<compile_context>
chip_gen: v7x
topology: tpu7x:2x2x1
jax: 0.10.0
libtpu: 0.0.40
codegen_flags: <defaults>
</compile_context>

<pallas_src>
import functools
import numpy as np
import jax
import jax.numpy as jnp
from jax import lax
from jax.experimental import pallas as pl
from jax.experimental.pallas import tpu as pltpu

BN_EPS = 1e-5          # nn.BatchNorm1d default eps
LRELU_SLOPE = 0.01     # nn.LeakyReLU default negative_slope


# ----------------------------- small helpers -----------------------------

def encoder_lengths(input_dim):
    Ls = [input_dim]
    for _ in range(3):
        Ls.append((Ls[-1] + 1) // 2)
    return Ls  # [L0, L1, L2, L3]; L3 == encoded_dim


def adaptive_pool_matrix_np(Lin, Lout):
    """AdaptiveAvgPool1d(Lout) as a (Lin, Lout) averaging matrix (PyTorch bin rule)."""
    P = np.zeros((Lin, Lout), np.float32)
    for o in range(Lout):
        start = (o * Lin) // Lout
        end = -((-(o + 1) * Lin) // Lout)   # ceil((o+1)*Lin/Lout)
        P[start:end, o] = 1.0 / (end - start)
    return P


# ----------------------------- in-kernel building blocks -----------------------------

def _mm(a, b):
    return jnp.dot(a, b, preferred_element_type=jnp.float32)


def _conv_taps(sel_ref, w_ref, x):
    """y[(b,o), co] = sum_t (S_t @ x @ W_t).  sel_ref: (k, R, C) ref, w_ref: (k, Cin, Cout) ref,
    x: (C, Cin) value.  Matmul order chosen to minimize work; Cin==1 avoids a K=1 matmul."""
    k, cin, cout = w_ref.shape
    acc = None
    for t in range(k):
        if cin == 1:
            yt = _mm(sel_ref[t], x * w_ref[t])             # (R,C)@(C,Cout)
        elif cout <= cin:
            yt = _mm(sel_ref[t], _mm(x, w_ref[t]))
        else:
            yt = _mm(_mm(sel_ref[t], x), w_ref[t])
        acc = yt if acc is None else acc + yt
    return acc


def _bn_lrelu(y, g_ref, b_ref):
    """BatchNorm1d (training-mode batch stats, biased var) + LeakyReLU, per channel (axis=1)."""
    mean = jnp.mean(y, axis=0, keepdims=True)
    var = jnp.mean(jnp.square(y - mean), axis=0, keepdims=True)
    yhat = (y - mean) * lax.rsqrt(var + BN_EPS) * g_ref[...] + b_ref[...]
    return jnp.where(yhat >= 0, yhat, LRELU_SLOPE * yhat)


# ----------------------------- the fused kernel -----------------------------

def _vae_fused_kernel(enc_dim, latent_dim,
                      # inputs
                      x_ref, eps_ref,
                      ew1, ew2, ew3, eg1, eb1, eg2, eb2, eg3, eb3,
                      wml, bml, wdl, bdl,
                      dw1, dw2, dw3, dg1, db1, dg2, db2, dg3, db3,
                      ow, ob,
                      se1, se2, se3, sd1, sd2, sd3, so,
                      gat, sct, sb, pbig,
                      # outputs
                      recon_ref, mu_ref, logvar_ref):
    B = eps_ref.shape[0]

    # ---- encoder: 3 x (Conv1d k3 s2 p1, no bias -> BN -> LeakyReLU) ----
    h = x_ref[...]                                         # (B*L0, 1)
    h = _bn_lrelu(_conv_taps(se1, ew1, h), eg1, eb1)       # (B*L1, 32)
    h = _bn_lrelu(_conv_taps(se2, ew2, h), eg2, eb2)       # (B*L2, 64)
    h = _bn_lrelu(_conv_taps(se3, ew3, h), eg3, eb3)       # (B*L3, 128)

    # ---- fc_mu | fc_logvar (flatten folded via per-position gathers) ----
    ml = bml[...]                                          # (1, 2*latent), broadcasts
    for l in range(enc_dim):
        ml = ml + _mm(_mm(gat[l], h), wml[l])              # (B, 2*latent)
    mu = ml[:, :latent_dim]
    logvar = ml[:, latent_dim:]
    mu_ref[...] = mu.astype(mu_ref.dtype)
    logvar_ref[...] = logvar.astype(logvar_ref.dtype)

    # ---- reparameterize: z = mu + eps * exp(0.5 * logvar) ----
    z = mu + eps_ref[...] * jnp.exp(0.5 * logvar)

    # ---- decoder Linear(latent -> 128*enc) + Unflatten (per-position scatter) ----
    c3 = wdl.shape[2]                                      # 128
    d = jnp.zeros((B * enc_dim, c3), jnp.float32)
    for l in range(enc_dim):
        dl = _mm(z, wdl[l]) + bdl[l]                       # (B, 128)
        d = d + _mm(sct[l], dl)                            # row b*enc + l <- dl[b]

    # ---- decoder: 3 x (ConvTranspose1d k3 s2 p1 op1, no bias -> BN -> LeakyReLU) ----
    d = _bn_lrelu(_conv_taps(sd1, dw1, d), dg1, db1)       # (B*2*enc, 64)
    d = _bn_lrelu(_conv_taps(sd2, dw2, d), dg2, db2)       # (B*4*enc, 32)
    d = _bn_lrelu(_conv_taps(sd3, dw3, d), dg3, db3)       # (B*8*enc, 32)

    # ---- final Conv1d(32 -> 1, k3 p1, bias) + AdaptiveAvgPool1d(input_dim) ----
    yconv = None
    for t in range(ow.shape[0]):
        st = _mm(so[t], d)                                             # (B*Lf, 32)
        contrib = jnp.sum(st * ow[t], axis=1, keepdims=True)           # (B*Lf, 1)
        yconv = contrib if yconv is None else yconv + contrib
    yconv = yconv + ob[...]                                # pooling preserves the bias
    recon_ref[...] = _mm(sb[...], yconv * pbig[...]).astype(recon_ref.dtype)


# ----------------------------- host-side precompute -----------------------------

def prepare_operands(params, *, batch, input_dim, latent_dim):
    """Precompute (once) every weight permutation, selection matrix and the pooling matrix."""
    f32 = np.float32
    L0, L1, L2, L3 = encoder_lengths(input_dim)
    enc = L3
    c3 = int(params['enc_w3'].shape[0])    # 128

    def conv_taps(w):        # torch Conv1d weight (Cout, Cin, k) -> (k, Cin, Cout)
        return np.transpose(np.asarray(w, f32), (2, 1, 0)).copy()

    def convT_taps(wt):      # torch ConvTranspose1d weight (Cin, Cout, k) -> equiv conv taps
        return np.transpose(np.asarray(wt, f32)[:, :, ::-1], (2, 0, 1)).copy()

    def row(v):
        return np.asarray(v, f32).reshape(1, -1)

    def conv_sel(Lin, Lout, stride, pad, k=3):
        S = np.zeros((k, batch * Lout, batch * Lin), f32)
        for t in range(k):
            for b in range(batch):
                for o in range(Lout):
                    i = stride * o + t - pad
                    if 0 <= i < Lin:
                        S[t, b * Lout + o, b * Lin + i] = 1.0
        return S

    def convT_sel(Lin, stride=2, pad=1, out_pad=1, k=3):
        Lup = (Lin - 1) * stride + 1 + out_pad
        padc = k - 1 - pad
        Lout = Lup + 2 * padc - k + 1
        S = np.zeros((k, batch * Lout, batch * Lin), f32)
        for t in range(k):
            for b in range(batch):
                for o in range(Lout):
                    j = o + t - padc
                    if 0 <= j < Lup and j % stride == 0 and (j // stride) < Lin:
                        S[t, b * Lout + o, b * Lin + (j // stride)] = 1.0
        return S, Lout

    # encoder conv weights + BN params
    ew1 = conv_taps(params['enc_w1'])
    ew2 = conv_taps(params['enc_w2'])
    ew3 = conv_taps(params['enc_w3'])
    eg1, eb1 = row(params['enc_g1']), row(params['enc_b1'])
    eg2, eb2 = row(params['enc_g2']), row(params['enc_b2'])
    eg3, eb3 = row(params['enc_g3']), row(params['enc_b3'])

    # fc_mu | fc_logvar folded for the 2D (rows=(b,l), cols=c) layout.
    # torch flatten order: feature index = c*enc + l.
    def fc_fold(w):          # (out, c3*enc) -> (enc, c3, out)
        out_dim = w.shape[0]
        w3 = np.asarray(w, f32).reshape(out_dim, c3, enc)
        return np.transpose(w3, (2, 1, 0)).copy()

    wml = np.concatenate([fc_fold(params['mu_w']), fc_fold(params['lv_w'])], axis=2)
    bml = np.concatenate([np.asarray(params['mu_b'], f32),
                          np.asarray(params['lv_b'], f32)]).reshape(1, -1)

    # decoder Linear (latent -> c3*enc), output feature index = c*enc + l
    wd3 = np.asarray(params['dec_w'], f32).reshape(c3, enc, latent_dim)   # [c, l, k]
    wdl = np.transpose(wd3, (1, 2, 0)).copy()                             # (enc, latent, c3)
    bdl = np.asarray(params['dec_b'], f32).reshape(c3, enc).T.reshape(enc, 1, c3).copy()

    # decoder ConvTranspose1d weights as equivalent forward-conv taps
    dw1 = convT_taps(params['dct_w1'])
    dw2 = convT_taps(params['dct_w2'])
    dw3 = convT_taps(params['dct_w3'])
    dg1, db1 = row(params['dec_g1']), row(params['dec_b1'])
    dg2, db2 = row(params['dec_g2']), row(params['dec_b2'])
    dg3, db3 = row(params['dec_g3']), row(params['dec_b3'])

    # final Conv1d(32 -> 1): taps stored as (k, 1, Cin) so the kernel uses a
    # broadcast-multiply + lane reduction instead of an N=1 matmul.
    ow = np.transpose(np.asarray(params['out_w'], f32), (2, 0, 1)).copy()   # (3, 1, 32)
    ob = np.asarray(params['out_b'], f32).reshape(1, 1)

    # conv selection matrices (block-diagonal over batch)
    se1 = conv_sel(L0, L1, 2, 1)
    se2 = conv_sel(L1, L2, 2, 1)
    se3 = conv_sel(L2, L3, 2, 1)
    sd1, Ld1 = convT_sel(enc)
    sd2, Ld2 = convT_sel(Ld1)
    sd3, Lf = convT_sel(Ld2)
    so = conv_sel(Lf, Lf, 1, 1)

    # flatten / unflatten gather-scatter matrices
    gat = np.zeros((enc, batch, batch * enc), f32)
    sct = np.zeros((enc, batch * enc, batch), f32)
    for l in range(enc):
        for b in range(batch):
            gat[l, b, b * enc + l] = 1.0
            sct[l, b * enc + l, b] = 1.0

    # AdaptiveAvgPool1d(Lf -> input_dim), folded with a per-batch row-sum selection
    P = adaptive_pool_matrix_np(Lf, input_dim)                         # (Lf, input_dim)
    pbig = np.tile(P, (batch, 1))                                      # (batch*Lf, input_dim)
    sb = np.kron(np.eye(batch, dtype=f32), np.ones((1, Lf), f32))      # (batch, batch*Lf)

    ops = [ew1, ew2, ew3, eg1, eb1, eg2, eb2, eg3, eb3,
           wml, bml, wdl, bdl,
           dw1, dw2, dw3, dg1, db1, dg2, db2, dg3, db3,
           ow, ob,
           se1, se2, se3, sd1, sd2, sd3, so,
           gat, sct, sb, pbig]
    return [jnp.asarray(o, jnp.float32) for o in ops]


def make_fused_forward(params, *, batch, input_dim, latent_dim):
    enc = encoder_lengths(input_dim)[3]
    ops = prepare_operands(params, batch=batch, input_dim=input_dim,
                           latent_dim=latent_dim)

    vmem = pl.BlockSpec(memory_space=pltpu.MemorySpace.VMEM)
    call = pl.pallas_call(
        functools.partial(_vae_fused_kernel, enc, latent_dim),
        out_shape=(jax.ShapeDtypeStruct((batch, input_dim), jnp.float32),
                   jax.ShapeDtypeStruct((batch, latent_dim), jnp.float32),
                   jax.ShapeDtypeStruct((batch, latent_dim), jnp.float32)),
        in_specs=[vmem] * (2 + len(ops)),
        out_specs=(vmem, vmem, vmem),
    )

    @jax.jit
    def fwd(x, eps):
        x2d = x.astype(jnp.float32).reshape(batch * input_dim, 1)   # rows = (b, position)
        return call(x2d, eps.astype(jnp.float32), *ops)

    return fwd


# ----------------------------- parameters (torch-style init) -----------------------------

def init_params(key, input_dim, latent_dim):
    enc_dim = encoder_lengths(input_dim)[3]
    feat = 128 * enc_dim
    ks = jax.random.split(key, 16)

    def u(k, shape, fan_in):
        s = 1.0 / np.sqrt(fan_in)
        return jax.random.uniform(k, shape, jnp.float32, -s, s)

    p = {}
    p['enc_w1'] = u(ks[0], (32, 1, 3), 1 * 3)
    p['enc_w2'] = u(ks[1], (64, 32, 3), 32 * 3)
    p['enc_w3'] = u(ks[2], (128, 64, 3), 64 * 3)
    p['enc_g1'], p['enc_b1'] = jnp.ones(32, jnp.float32), jnp.zeros(32, jnp.float32)
    p['enc_g2'], p['enc_b2'] = jnp.ones(64, jnp.float32), jnp.zeros(64, jnp.float32)
    p['enc_g3'], p['enc_b3'] = jnp.ones(128, jnp.float32), jnp.zeros(128, jnp.float32)
    p['mu_w'], p['mu_b'] = u(ks[3], (latent_dim, feat), feat), u(ks[4], (latent_dim,), feat)
    p['lv_w'], p['lv_b'] = u(ks[5], (latent_dim, feat), feat), u(ks[6], (latent_dim,), feat)
    p['dec_w'], p['dec_b'] = u(ks[7], (feat, latent_dim), latent_dim), u(ks[8], (feat,), latent_dim)
    p['dct_w1'] = u(ks[9], (128, 64, 3), 64 * 3)
    p['dct_w2'] = u(ks[10], (64, 32, 3), 32 * 3)
    p['dct_w3'] = u(ks[11], (32, 32, 3), 32 * 3)
    p['dec_g1'], p['dec_b1'] = jnp.ones(64, jnp.float32), jnp.zeros(64, jnp.float32)
    p['dec_g2'], p['dec_b2'] = jnp.ones(32, jnp.float32), jnp.zeros(32, jnp.float32)
    p['dec_g3'], p['dec_b3'] = jnp.ones(32, jnp.float32), jnp.zeros(32, jnp.float32)
    p['out_w'], p['out_b'] = u(ks[12], (1, 32, 3), 32 * 3), u(ks[13], (1,), 32 * 3)
    return p, enc_dim


# ----------------------------- pure-JAX reference (correctness check) -----------------------------

def _ref_im2col(x_ncl, k, stride, pad):
    B, C, L = x_ncl.shape
    Lout = (L + 2 * pad - k) // stride + 1
    xp = jnp.pad(x_ncl, ((0, 0), (0, 0), (pad, pad)))
    idx = stride * np.arange(Lout)[:, None] + np.arange(k)[None, :]
    patches = xp[:, :, idx]                                          # (B, C, Lout, k)
    patches = jnp.transpose(patches, (0, 2, 1, 3)).reshape(B, Lout, C * k)
    return patches, Lout


def _ref_conv2d_mat(x_ncl, w, stride, pad):
    B = x_ncl.shape[0]
    patches, Lout = _ref_im2col(x_ncl, w.shape[2], stride, pad)
    y = patches.reshape(B * Lout, -1) @ w.reshape(w.shape[0], -1).T
    return y, Lout


def _ref_bn_lrelu(y2d, gamma, beta):
    mean = jnp.mean(y2d, axis=0, keepdims=True)
    var = jnp.mean(jnp.square(y2d - mean), axis=0, keepdims=True)
    yhat = (y2d - mean) * lax.rsqrt(var + BN_EPS) * gamma[None, :] + beta[None, :]
    return jnp.where(yhat >= 0, yhat, LRELU_SLOPE * yhat)


def reference_forward(params, x, eps, *, input_dim, latent_dim, enc_dim):
    B = x.shape[0]

    def conv_block(x_ncl, w, g, b, stride):
        y, Lout = _ref_conv2d_mat(x_ncl, w, stride, 1)
        y = _ref_bn_lrelu(y, g, b)
        return jnp.transpose(y.reshape(B, Lout, w.shape[0]), (0, 2, 1))

    def convT_block(x_ncl, w_t, g, b):
        B_, C, L = x_ncl.shape
        Lup = (L - 1) * 2 + 1 + 1
        xu = jnp.zeros((B_, C, Lup), x_ncl.dtype).at[:, :, ::2].set(x_ncl)
        w_conv = jnp.transpose(w_t[:, :, ::-1], (1, 0, 2))
        y, Lout = _ref_conv2d_mat(xu, w_conv, 1, 1)
        y = _ref_bn_lrelu(y, g, b)
        return jnp.transpose(y.reshape(B_, Lout, w_t.shape[1]), (0, 2, 1))

    h = x[:, None, :]
    h = conv_block(h, params['enc_w1'], params['enc_g1'], params['enc_b1'], 2)
    h = conv_block(h, params['enc_w2'], params['enc_g2'], params['enc_b2'], 2)
    h = conv_block(h, params['enc_w3'], params['enc_g3'], params['enc_b3'], 2)
    h_flat = h.reshape(B, -1)
    mu = h_flat @ params['mu_w'].T + params['mu_b']
    logvar = h_flat @ params['lv_w'].T + params['lv_b']
    z = mu + eps * jnp.exp(0.5 * logvar)
    d = (z @ params['dec_w'].T + params['dec_b']).reshape(B, 128, enc_dim)
    d = convT_block(d, params['dct_w1'], params['dec_g1'], params['dec_b1'])
    d = convT_block(d, params['dct_w2'], params['dec_g2'], params['dec_b2'])
    d = convT_block(d, params['dct_w3'], params['dec_g3'], params['dec_b3'])
    y, Lf = _ref_conv2d_mat(d, params['out_w'], 1, 1)
    y = (y + params['out_b'][None, :]).reshape(B, Lf)
    P = jnp.asarray(adaptive_pool_matrix_np(Lf, input_dim))
    return y @ P, mu, logvar


# ----------------------------- main -----------------------------

if __name__ == "__main__":
    INPUT_DIM = 60      # stand-in for data.shape[1] (non-power-of-2 to exercise pooling)
    LATENT_DIM = 16
    BATCH = 4

    key = jax.random.PRNGKey(0)
    kp, kx, ke = jax.random.split(key, 3)

    params, enc_dim = init_params(kp, INPUT_DIM, LATENT_DIM)
    x = jax.random.normal(kx, (BATCH, INPUT_DIM), jnp.float32)
    # TODO(synk): torch.randn_like draws noise inside forward(); here eps is sampled once
    # in glue JAX and passed in (pltpu.prng_* could generate it in-kernel instead).
    eps = jax.random.normal(ke, (BATCH, LATENT_DIM), jnp.float32)

    fwd = make_fused_forward(params, batch=BATCH, input_dim=INPUT_DIM,
                             latent_dim=LATENT_DIM)
    recon, mu, logvar = fwd(x, eps)
    jax.block_until_ready((recon, mu, logvar))

    assert recon.shape == (BATCH, INPUT_DIM)
    assert mu.shape == (BATCH, LATENT_DIM)
    assert logvar.shape == (BATCH, LATENT_DIM)
    assert all(bool(jnp.all(jnp.isfinite(a))) for a in (recon, mu, logvar))

    # correctness: compare against a pure-JAX/XLA reference of the same math
    with jax.default_matmul_precision("highest"):
        ref_fn = jax.jit(functools.partial(reference_forward, input_dim=INPUT_DIM,
                                           latent_dim=LATENT_DIM, enc_dim=enc_dim))
        recon_r, mu_r, logvar_r = ref_fn(params, x, eps)
        jax.block_until_ready((recon_r, mu_r, logvar_r))

    def close(a, b, tol=5e-2):
        return bool(jnp.all(jnp.abs(a - b) <= tol + tol * jnp.abs(b)))

    assert close(mu, mu_r), "mu mismatch vs reference"
    assert close(logvar, logvar_r), "logvar mismatch vs reference"
    assert close(recon, recon_r), "recon mismatch vs reference"

    print("KERNEL_OK")
</pallas_src>

<mosaic_0001>
module attributes {stable_mosaic.version = 11 : i64} {
  func.func @_vae_fused_kernel(%arg0: memref<240x1xf32, #tpu.memory_space<vmem>>, %arg1: memref<4x16xf32, #tpu.memory_space<vmem>>, %arg2: memref<3x1x32xf32, #tpu.memory_space<vmem>>, %arg3: memref<3x32x64xf32, #tpu.memory_space<vmem>>, %arg4: memref<3x64x128xf32, #tpu.memory_space<vmem>>, %arg5: memref<1x32xf32, #tpu.memory_space<vmem>>, %arg6: memref<1x32xf32, #tpu.memory_space<vmem>>, %arg7: memref<1x64xf32, #tpu.memory_space<vmem>>, %arg8: memref<1x64xf32, #tpu.memory_space<vmem>>, %arg9: memref<1x128xf32, #tpu.memory_space<vmem>>, %arg10: memref<1x128xf32, #tpu.memory_space<vmem>>, %arg11: memref<8x128x32xf32, #tpu.memory_space<vmem>>, %arg12: memref<1x32xf32, #tpu.memory_space<vmem>>, %arg13: memref<8x16x128xf32, #tpu.memory_space<vmem>>, %arg14: memref<8x1x128xf32, #tpu.memory_space<vmem>>, %arg15: memref<3x128x64xf32, #tpu.memory_space<vmem>>, %arg16: memref<3x64x32xf32, #tpu.memory_space<vmem>>, %arg17: memref<3x32x32xf32, #tpu.memory_space<vmem>>, %arg18: memref<1x64xf32, #tpu.memory_space<vmem>>, %arg19: memref<1x64xf32, #tpu.memory_space<vmem>>, %arg20: memref<1x32xf32, #tpu.memory_space<vmem>>, %arg21: memref<1x32xf32, #tpu.memory_space<vmem>>, %arg22: memref<1x32xf32, #tpu.memory_space<vmem>>, %arg23: memref<1x32xf32, #tpu.memory_space<vmem>>, %arg24: memref<3x1x32xf32, #tpu.memory_space<vmem>>, %arg25: memref<1x1xf32, #tpu.memory_space<vmem>>, %arg26: memref<3x120x240xf32, #tpu.memory_space<vmem>>, %arg27: memref<3x60x120xf32, #tpu.memory_space<vmem>>, %arg28: memref<3x32x60xf32, #tpu.memory_space<vmem>>, %arg29: memref<3x64x32xf32, #tpu.memory_space<vmem>>, %arg30: memref<3x128x64xf32, #tpu.memory_space<vmem>>, %arg31: memref<3x256x128xf32, #tpu.memory_space<vmem>>, %arg32: memref<3x256x256xf32, #tpu.memory_space<vmem>>, %arg33: memref<8x4x32xf32, #tpu.memory_space<vmem>>, %arg34: memref<8x32x4xf32, #tpu.memory_space<vmem>>, %arg35: memref<4x256xf32, #tpu.memory_space<vmem>>, %arg36: memref<256x60xf32, #tpu.memory_space<vmem>>, %arg37: memref<4x60xf32, #tpu.memory_space<vmem>>, %arg38: memref<4x16xf32, #tpu.memory_space<vmem>>, %arg39: memref<4x16xf32, #tpu.memory_space<vmem>>) attributes {dimension_semantics = [], scalar_prefetch = 0 : i64, scratch_operands = 0 : i64, tpu.core_type = #tpu.core_type<tc>} {
    %c0 = arith.constant 0 : index
    %c0_0 = arith.constant 0 : index
    %0 = vector.load %arg0[%c0, %c0_0] : memref<240x1xf32, #tpu.memory_space<vmem>>, vector<240x1xf32>
    %c0_1 = arith.constant 0 : index
    %c0_2 = arith.constant 0 : index
    %c0_3 = arith.constant 0 : index
    %1 = vector.load %arg26[%c0_1, %c0_2, %c0_3] : memref<3x120x240xf32, #tpu.memory_space<vmem>>, vector<1x120x240xf32>
    %2 = vector.shape_cast %1 : vector<1x120x240xf32> to vector<120x240xf32>
    %c0_4 = arith.constant 0 : index
    %c0_5 = arith.constant 0 : index
    %c0_6 = arith.constant 0 : index
    %3 = vector.load %arg2[%c0_4, %c0_5, %c0_6] : memref<3x1x32xf32, #tpu.memory_space<vmem>>, vector<1x1x32xf32>
    %4 = vector.shape_cast %3 : vector<1x1x32xf32> to vector<1x32xf32>
    %5 = vector.broadcast %0 : vector<240x1xf32> to vector<240x32xf32>
    %6 = vector.broadcast %4 : vector<1x32xf32> to vector<240x32xf32>
    %7 = arith.mulf %5, %6 : vector<240x32xf32>
    %cst = arith.constant dense<0.000000e+00> : vector<120x32xf32>
    %8 = tpu.matmul %2, %7, %cst {dimension_numbers = #tpu.dot_dimension_numbers<[1], [0], [0], [1], [0, 0, 1, 1], [], []>} : vector<120x240xf32>, vector<240x32xf32>, vector<120x32xf32> -> vector<120x32xf32>
    %c1 = arith.constant 1 : index
    %c0_7 = arith.constant 0 : index
    %c0_8 = arith.constant 0 : index
    %9 = vector.load %arg26[%c1, %c0_7, %c0_8] : memref<3x120x240xf32, #tpu.memory_space<vmem>>, vector<1x120x240xf32>
    %10 = vector.shape_cast %9 : vector<1x120x240xf32> to vector<120x240xf32>
    %c1_9 = arith.constant 1 : index
    %c0_10 = arith.constant 0 : index
    %c0_11 = arith.constant 0 : index
    %11 = vector.load %arg2[%c1_9, %c0_10, %c0_11] : memref<3x1x32xf32, #tpu.memory_space<vmem>>, vector<1x1x32xf32>
    %12 = vector.shape_cast %11 : vector<1x1x32xf32> to vector<1x32xf32>
    %13 = vector.broadcast %0 : vector<240x1xf32> to vector<240x32xf32>
    %14 = vector.broadcast %12 : vector<1x32xf32> to vector<240x32xf32>
    %15 = arith.mulf %13, %14 : vector<240x32xf32>
    %cst_12 = arith.constant dense<0.000000e+00> : vector<120x32xf32>
    %16 = tpu.matmul %10, %15, %cst_12 {dimension_numbers = #tpu.dot_dimension_numbers<[1], [0], [0], [1], [0, 0, 1, 1], [], []>} : vector<120x240xf32>, vector<240x32xf32>, vector<120x32xf32> -> vector<120x32xf32>
    %17 = arith.addf %8, %16 : vector<120x32xf32>
    %c2 = arith.constant 2 : index
    %c0_13 = arith.constant 0 : index
    %c0_14 = arith.constant 0 : index
    %18 = vector.load %arg26[%c2, %c0_13, %c0_14] : memref<3x120x240xf32, #tpu.memory_space<vmem>>, vector<1x120x240xf32>
    %19 = vector.shape_cast %18 : vector<1x120x240xf32> to vector<120x240xf32>
    %c2_15 = arith.constant 2 : index
    %c0_16 = arith.constant 0 : index
    %c0_17 = arith.constant 0 : index
    %20 = vector.load %arg2[%c2_15, %c0_16, %c0_17] : memref<3x1x32xf32, #tpu.memory_space<vmem>>, vector<1x1x32xf32>
    %21 = vector.shape_cast %20 : vector<1x1x32xf32> to vector<1x32xf32>
    %22 = vector.broadcast %0 : vector<240x1xf32> to vector<240x32xf32>
    %23 = vector.broadcast %21 : vector<1x32xf32> to vector<240x32xf32>
    %24 = arith.mulf %22, %23 : vector<240x32xf32>
    %cst_18 = arith.constant dense<0.000000e+00> : vector<120x32xf32>
    %25 = tpu.matmul %19, %24, %cst_18 {dimension_numbers = #tpu.dot_dimension_numbers<[1], [0], [0], [1], [0, 0, 1, 1], [], []>} : vector<120x240xf32>, vector<240x32xf32>, vector<120x32xf32> -> vector<120x32xf32>
    %26 = arith.addf %17, %25 : vector<120x32xf32>
    %cst_19 = arith.constant dense<0.000000e+00> : vector<32xf32>
    %27 = vector.multi_reduction <add>, %26, %cst_19 [0] : vector<120x32xf32> to vector<32xf32>
    %28 = vector.shape_cast %27 : vector<32xf32> to vector<1x32xf32>
    %cst_20 = arith.constant 1.200000e+02 : f32
    %29 = vector.broadcast %cst_20 : f32 to vector<1x32xf32>
    %30 = arith.divf %28, %29 : vector<1x32xf32>
    %31 = vector.broadcast %30 : vector<1x32xf32> to vector<120x32xf32>
    %32 = arith.subf %26, %31 : vector<120x32xf32>
    %33 = arith.mulf %32, %32 : vector<120x32xf32>
    %cst_21 = arith.constant dense<0.000000e+00> : vector<32xf32>
    %34 = vector.multi_reduction <add>, %33, %cst_21 [0] : vector<120x32xf32> to vector<32xf32>
    %35 = vector.shape_cast %34 : vector<32xf32> to vector<1x32xf32>
    %cst_22 = arith.constant 1.200000e+02 : f32
    %36 = vector.broadcast %cst_22 : f32 to vector<1x32xf32>
    %37 = arith.divf %35, %36 : vector<1x32xf32>
    %38 = vector.broadcast %30 : vector<1x32xf32> to vector<120x32xf32>
    %39 = arith.subf %26, %38 : vector<120x32xf32>
    %cst_23 = arith.constant 9.99999974E-6 : f32
    %40 = vector.broadcast %cst_23 : f32 to vector<1x32xf32>
    %41 = arith.addf %37, %40 : vector<1x32xf32>
    %42 = math.rsqrt %41 : vector<1x32xf32>
    %43 = vector.broadcast %42 : vector<1x32xf32> to vector<120x32xf32>
    %44 = arith.mulf %39, %43 : vector<120x32xf32>
    %c0_24 = arith.constant 0 : index
    %c0_25 = arith.constant 0 : index
    %45 = vector.load %arg5[%c0_24, %c0_25] : memref<1x32xf32, #tpu.memory_space<vmem>>, vector<1x32xf32>
    %46 = vector.broadcast %45 : vector<1x32xf32> to vector<120x32xf32>
    %47 = arith.mulf %44, %46 : vector<120x32xf32>
    %c0_26 = arith.constant 0 : index
    %c0_27 = arith.constant 0 : index
    %48 = vector.load %arg6[%c0_26, %c0_27] : memref<1x32xf32, #tpu.memory_space<vmem>>, vector<1x32xf32>
    %49 = vector.broadcast %48 : vector<1x32xf32> to vector<120x32xf32>
    %50 = arith.addf %47, %49 : vector<120x32xf32>
    %cst_28 = arith.constant 0.000000e+00 : f32
    %51 = vector.broadcast %cst_28 : f32 to vector<120x32xf32>
    %52 = arith.cmpf oge, %50, %51 : vector<120x32xf32>
    %cst_29 = arith.constant 0.00999999977 : f32
    %53 = vector.broadcast %cst_29 : f32 to vector<120x32xf32>
    %54 = arith.mulf %53, %50 : vector<120x32xf32>
    %55 = arith.select %52, %50, %54 : vector<120x32xi1>, vector<120x32xf32>
    %c0_30 = arith.constant 0 : index
    %c0_31 = arith.constant 0 : index
    %c0_32 = arith.constant 0 : index
    %56 = vector.load %arg27[%c0_30, %c0_31, %c0_32] : memref<3x60x120xf32, #tpu.memory_space<vmem>>, vector<1x60x120xf32>
    %57 = vector.shape_cast %56 : vector<1x60x120xf32> to vector<60x120xf32>
    %cst_33 = arith.constant dense<0.000000e+00> : vector<60x32xf32>
    %58 = tpu.matmul %57, %55, %cst_33 {dimension_numbers = #tpu.dot_dimension_numbers<[1], [0], [0], [1], [0, 0, 1, 1], [], []>} : vector<60x120xf32>, vector<120x32xf32>, vector<60x32xf32> -> vector<60x32xf32>
    %c0_34 = arith.constant 0 : index
    %c0_35 = arith.constant 0 : index
    %c0_36 = arith.constant 0 : index
    %59 = vector.load %arg3[%c0_34, %c0_35, %c0_36] : memref<3x32x64xf32, #tpu.memory_space<vmem>>, vector<1x32x64xf32>
    %60 = vector.shape_cast %59 : vector<1x32x64xf32> to vector<32x64xf32>
    %cst_37 = arith.constant dense<0.000000e+00> : vector<60x64xf32>
    %61 = tpu.matmul %58, %60, %cst_37 {dimension_numbers = #tpu.dot_dimension_numbers<[1], [0], [0], [1], [0, 0, 1, 1], [], []>} : vector<60x32xf32>, vector<32x64xf32>, vector<60x64xf32> -> vector<60x64xf32>
    %c1_38 = arith.constant 1 : index
    %c0_39 = arith.constant 0 : index
    %c0_40 = arith.constant 0 : index
    %62 = vector.load %arg27[%c1_38, %c0_39, %c0_40] : memref<3x60x120xf32, #tpu.memory_space<vmem>>, vector<1x60x120xf32>
    %63 = vector.shape_cast %62 : vector<1x60x120xf32> to vector<60x120xf32>
    %cst_41 = arith.constant dense<0.000000e+00> : vector<60x32xf32>
    %64 = tpu.matmul %63, %55, %cst_41 {dimension_numbers = #tpu.dot_dimension_numbers<[1], [0], [0], [1], [0, 0, 1, 1], [], []>} : vector<60x120xf32>, vector<120x32xf32>, vector<60x32xf32> -> vector<60x32xf32>
    %c1_42 = arith.constant 1 : index
    %c0_43 = arith.constant 0 : index
    %c0_44 = arith.constant 0 : index
    %65 = vector.load %arg3[%c1_42, %c0_43, %c0_44] : memref<3x32x64xf32, #tpu.memory_space<vmem>>, vector<1x32x64xf32>
    %66 = vector.shape_cast %65 : vector<1x32x64xf32> to vector<32x64xf32>
    %cst_45 = arith.constant dense<0.000000e+00> : vector<60x64xf32>
    %67 = tpu.matmul %64, %66, %cst_45 {dimension_numbers = #tpu.dot_dimension_numbers<[1], [0], [0], [1], [0, 0, 1, 1], [], []>} : vector<60x32xf32>, vector<32x64xf32>, vector<60x64xf32> -> vector<60x64xf32>
    %68 = arith.addf %61, %67 : vector<60x64xf32>
    %c2_46 = arith.constant 2 : index
    %c0_47 = arith.constant 0 : index
    %c0_48 = arith.constant 0 : index
    %69 = vector.load %arg27[%c2_46, %c0_47, %c0_48] : memref<3x60x120xf32, #tpu.memory_space<vmem>>, vector<1x60x120xf32>
    %70 = vector.shape_cast %69 : vector<1x60x120xf32> to vector<60x120xf32>
    %cst_49 = arith.constant dense<0.000000e+00> : vector<60x32xf32>
    %71 = tpu.matmul %70, %55, %cst_49 {dimension_numbers = #tpu.dot_dimension_numbers<[1], [0], [0], [1], [0, 0, 1, 1], [], []>} : vector<60x120xf32>, vector<120x32xf32>, vector<60x32xf32> -> vector<60x32xf32>
    %c2_50 = arith.constant 2 : index
    %c0_51 = arith.constant 0 : index
    %c0_52 = arith.constant 0 : index
    %72 = vector.load %arg3[%c2_50, %c0_51, %c0_52] : memref<3x32x64xf32, #tpu.memory_space<vmem>>, vector<1x32x64xf32>
    %73 = vector.shape_cast %72 : vector<1x32x64xf32> to vector<32x64xf32>
    %cst_53 = arith.constant dense<0.000000e+00> : vector<60x64xf32>
    %74 = tpu.matmul %71, %73, %cst_53 {dimension_numbers = #tpu.dot_dimension_numbers<[1], [0], [0], [1], [0, 0, 1, 1], [], []>} : vector<60x32xf32>, vector<32x64xf32>, vector<60x64xf32> -> vector<60x64xf32>
    %75 = arith.addf %68, %74 : vector<60x64xf32>
    %cst_54 = arith.constant dense<0.000000e+00> : vector<64xf32>
    %76 = vector.multi_reduction <add>, %75, %cst_54 [0] : vector<60x64xf32> to vector<64xf32>
    %77 = vector.shape_cast %76 : vector<64xf32> to vector<1x64xf32>
    %cst_55 = arith.constant 6.000000e+01 : f32
    %78 = vector.broadcast %cst_55 : f32 to vector<1x64xf32>
    %79 = arith.divf %77, %78 : vector<1x64xf32>
    %80 = vector.broadcast %79 : vector<1x64xf32> to vector<60x64xf32>
    %81 = arith.subf %75, %80 : vector<60x64xf32>
    %82 = arith.mulf %81, %81 : vector<60x64xf32>
    %cst_56 = arith.constant dense<0.000000e+00> : vector<64xf32>
    %83 = vector.multi_reduction <add>, %82, %cst_56 [0] : vector<60x64xf32> to vector<64xf32>
    %84 = vector.shape_cast %83 : vector<64xf32> to vector<1x64xf32>
    %cst_57 = arith.constant 6.000000e+01 : f32
    %85 = vector.broadcast %cst_57 : f32 to vector<1x64xf32>
    %86 = arith.divf %84, %85 : vector<1x64xf32>
    %87 = vector.broadcast %79 : vector<1x64xf32> to vector<60x64xf32>
    %88 = arith.subf %75, %87 : vector<60x64xf32>
    %cst_58 = arith.constant 9.99999974E-6 : f32
    %89 = vector.broadcast %cst_58 : f32 to vector<1x64xf32>
    %90 = arith.addf %86, %89 : vector<1x64xf32>
    %91 = math.rsqrt %90 : vector<1x64xf32>
    %92 = vector.broadcast %91 : vector<1x64xf32> to vector<60x64xf32>
    %93 = arith.mulf %88, %92 : vector<60x64xf32>
    %c0_59 = arith.constant 0 : index
    %c0_60 = arith.constant 0 : index
    %94 = vector.load %arg7[%c0_59, %c0_60] : memref<1x64xf32, #tpu.memory_space<vmem>>, vector<1x64xf32>
    %95 = vector.broadcast %94 : vector<1x64xf32> to vector<60x64xf32>
    %96 = arith.mulf %93, %95 : vector<60x64xf32>
    %c0_61 = arith.constant 0 : index
    %c0_62 = arith.constant 0 : index
    %97 = vector.load %arg8[%c0_61, %c0_62] : memref<1x64xf32, #tpu.memory_space<vmem>>, vector<1x64xf32>
    %98 = vector.broadcast %97 : vector<1x64xf32> to vector<60x64xf32>
    %99 = arith.addf %96, %98 : vector<60x64xf32>
    %cst_63 = arith.constant 0.000000e+00 : f32
    %100 = vector.broadcast %cst_63 : f32 to vector<60x64xf32>
    %101 = arith.cmpf oge, %99, %100 : vector<60x64xf32>
    %cst_64 = arith.constant 0.00999999977 : f32
    %102 = vector.broadcast %cst_64 : f32 to vector<60x64xf32>
    %103 = arith.mulf %102, %99 : vector<60x64xf32>
    %104 = arith.select %101, %99, %103 : vector<60x64xi1>, vector<60x64xf32>
    %c0_65 = arith.constant 0 : index
    %c0_66 = arith.constant 0 : index
    %c0_67 = arith.constant 0 : index
    %105 = vector.load %arg28[%c0_65, %c0_66, %c0_67] : memref<3x32x60xf32, #tpu.memory_space<vmem>>, vector<1x32x60xf32>
    %106 = vector.shape_cast %105 : vector<1x32x60xf32> to vector<32x60xf32>
    %cst_68 = arith.constant dense<0.000000e+00> : vector<32x64xf32>
    %107 = tpu.matmul %106, %104, %cst_68 {dimension_numbers = #tpu.dot_dimension_numbers<[1], [0], [0], [1], [0, 0, 1, 1], [], []>} : vector<32x60xf32>, vector<60x64xf32>, vector<32x64xf32> -> vector<32x64xf32>
    %c0_69 = arith.constant 0 : index
    %c0_70 = arith.constant 0 : index
    %c0_71 = arith.constant 0 : index
    %108 = vector.load %arg4[%c0_69, %c0_70, %c0_71] : memref<3x64x128xf32, #tpu.memory_space<vmem>>, vector<1x64x128xf32>
    %109 = vector.shape_cast %108 : vector<1x64x128xf32> to vector<64x128xf32>
    %cst_72 = arith.constant dense<0.000000e+00> : vector<32x128xf32>
    %110 = tpu.matmul %107, %109, %cst_72 {dimension_numbers = #tpu.dot_dimension_numbers<[1], [0], [0], [1], [0, 0, 1, 1], [], []>} : vector<32x64xf32>, vector<64x128xf32>, vector<32x128xf32> -> vector<32x128xf32>
    %c1_73 = arith.constant 1 : index
    %c0_74 = arith.constant 0 : index
    %c0_75 = arith.constant 0 : index
    %111 = vector.load %arg28[%c1_73, %c0_74, %c0_75] : memref<3x32x60xf32, #tpu.memory_space<vmem>>, vector<1x32x60xf32>
    %112 = vector.shape_cast %111 : vector<1x32x60xf32> to vector<32x60xf32>
    %cst_76 = arith.constant dense<0.000000e+00> : vector<32x64xf32>
    %113 = tpu.matmul %112, %104, %cst_76 {dimension_numbers = #tpu.dot_dimension_numbers<[1], [0], [0], [1], [0, 0, 1, 1], [], []>} : vector<32x60xf32>, vector<60x64xf32>, vector<32x64xf32> -> vector<32x64xf32>
    %c1_77 = arith.constant 1 : index
    %c0_78 = arith.constant 0 : index
    %c0_79 = arith.constant 0 : index
    %114 = vector.load %arg4[%c1_77, %c0_78, %c0_79] : memref<3x64x128xf32, #tpu.memory_space<vmem>>, vector<1x64x128xf32>
    %115 = vector.shape_cast %114 : vector<1x64x128xf32> to vector<64x128xf32>
    %cst_80 = arith.constant dense<0.000000e+00> : vector<32x128xf32>
    %116 = tpu.matmul %113, %115, %cst_80 {dimension_numbers = #tpu.dot_dimension_numbers<[1], [0], [0], [1], [0, 0, 1, 1], [], []>} : vector<32x64xf32>, vector<64x128xf32>, vector<32x128xf32> -> vector<32x128xf32>
    %117 = arith.addf %110, %116 : vector<32x128xf32>
    %c2_81 = arith.constant 2 : index
    %c0_82 = arith.constant 0 : index
    %c0_83 = arith.constant 0 : index
    %118 = vector.load %arg28[%c2_81, %c0_82, %c0_83] : memref<3x32x60xf32, #tpu.memory_space<vmem>>, vector<1x32x60xf32>
    %119 = vector.shape_cast %118 : vector<1x32x60xf32> to vector<32x60xf32>
    %cst_84 = arith.constant dense<0.000000e+00> : vector<32x64xf32>
    %120 = tpu.matmul %119, %104, %cst_84 {dimension_numbers = #tpu.dot_dimension_numbers<[1], [0], [0], [1], [0, 0, 1, 1], [], []>} : vector<32x60xf32>, vector<60x64xf32>, vector<32x64xf32> -> vector<32x64xf32>
    %c2_85 = arith.constant 2 : index
    %c0_86 = arith.constant 0 : index
    %c0_87 = arith.constant 0 : index
    %121 = vector.load %arg4[%c2_85, %c0_86, %c0_87] : memref<3x64x128xf32, #tpu.memory_space<vmem>>, vector<1x64x128xf32>
    %122 = vector.shape_cast %121 : vector<1x64x128xf32> to vector<64x128xf32>
    %cst_88 = arith.constant dense<0.000000e+00> : vector<32x128xf32>
    %123 = tpu.matmul %120, %122, %cst_88 {dimension_numbers = #tpu.dot_dimension_numbers<[1], [0], [0], [1], [0, 0, 1, 1], [], []>} : vector<32x64xf32>, vector<64x128xf32>, vector<32x128xf32> -> vector<32x128xf32>
    %124 = arith.addf %117, %123 : vector<32x128xf32>
    %cst_89 = arith.constant dense<0.000000e+00> : vector<128xf32>
    %125 = vector.multi_reduction <add>, %124, %cst_89 [0] : vector<32x128xf32> to vector<128xf32>
    %126 = vector.shape_cast %125 : vector<128xf32> to vector<1x128xf32>
    %cst_90 = arith.constant 3.200000e+01 : f32
    %127 = vector.broadcast %cst_90 : f32 to vector<1x128xf32>
    %128 = arith.divf %126, %127 : vector<1x128xf32>
    %129 = vector.broadcast %128 : vector<1x128xf32> to vector<32x128xf32>
    %130 = arith.subf %124, %129 : vector<32x128xf32>
    %131 = arith.mulf %130, %130 : vector<32x128xf32>
    %cst_91 = arith.constant dense<0.000000e+00> : vector<128xf32>
    %132 = vector.multi_reduction <add>, %131, %cst_91 [0] : vector<32x128xf32> to vector<128xf32>
    %133 = vector.shape_cast %132 : vector<128xf32> to vector<1x128xf32>
    %cst_92 = arith.constant 3.200000e+01 : f32
    %134 = vector.broadcast %cst_92 : f32 to vector<1x128xf32>
    %135 = arith.divf %133, %134 : vector<1x128xf32>
    %136 = vector.broadcast %128 : vector<1x128xf32> to vector<32x128xf32>
    %137 = arith.subf %124, %136 : vector<32x128xf32>
    %cst_93 = arith.constant 9.99999974E-6 : f32
    %138 = vector.broadcast %cst_93 : f32 to vector<1x128xf32>
    %139 = arith.addf %135, %138 : vector<1x128xf32>
    %140 = math.rsqrt %139 : vector<1x128xf32>
    %141 = vector.broadcast %140 : vector<1x128xf32> to vector<32x128xf32>
    %142 = arith.mulf %137, %141 : vector<32x128xf32>
    %c0_94 = arith.constant 0 : index
    %c0_95 = arith.constant 0 : index
    %143 = vector.load %arg9[%c0_94, %c0_95] : memref<1x128xf32, #tpu.memory_space<vmem>>, vector<1x128xf32>
    %144 = vector.broadcast %143 : vector<1x128xf32> to vector<32x128xf32>
    %145 = arith.mulf %142, %144 : vector<32x128xf32>
    %c0_96 = arith.constant 0 : index
    %c0_97 = arith.constant 0 : index
    %146 = vector.load %arg10[%c0_96, %c0_97] : memref<1x128xf32, #tpu.memory_space<vmem>>, vector<1x128xf32>
    %147 = vector.broadcast %146 : vector<1x128xf32> to vector<32x128xf32>
    %148 = arith.addf %145, %147 : vector<32x128xf32>
    %cst_98 = arith.constant 0.000000e+00 : f32
    %149 = vector.broadcast %cst_98 : f32 to vector<32x128xf32>
    %150 = arith.cmpf oge, %148, %149 : vector<32x128xf32>
    %cst_99 = arith.constant 0.00999999977 : f32
    %151 = vector.broadcast %cst_99 : f32 to vector<32x128xf32>
    %152 = arith.mulf %151, %148 : vector<32x128xf32>
    %153 = arith.select %150, %148, %152 : vector<32x128xi1>, vector<32x128xf32>
    %c0_100 = arith.constant 0 : index
    %c0_101 = arith.constant 0 : index
    %154 = vector.load %arg12[%c0_100, %c0_101] : memref<1x32xf32, #tpu.memory_space<vmem>>, vector<1x32xf32>
    %c0_102 = arith.constant 0 : index
    %c0_103 = arith.constant 0 : index
    %c0_104 = arith.constant 0 : index
    %155 = vector.load %arg33[%c0_102, %c0_103, %c0_104] : memref<8x4x32xf32, #tpu.memory_space<vmem>>, vector<1x4x32xf32>
    %156 = vector.shape_cast %155 : vector<1x4x32xf32> to vector<4x32xf32>
    %cst_105 = arith.constant dense<0.000000e+00> : vector<4x128xf32>
    %157 = tpu.matmul %156, %153, %cst_105 {dimension_numbers = #tpu.dot_dimension_numbers<[1], [0], [0], [1], [0, 0, 1, 1], [], []>} : vector<4x32xf32>, vector<32x128xf32>, vector<4x128xf32> -> vector<4x128xf32>
    %c0_106 = arith.constant 0 : index
    %c0_107 = arith.constant 0 : index
    %c0_108 = arith.constant 0 : index
    %158 = vector.load %arg11[%c0_106, %c0_107, %c0_108] : memref<8x128x32xf32, #tpu.memory_space<vmem>>, vector<1x128x32xf32>
    %159 = vector.shape_cast %158 : vector<1x128x32xf32> to vector<128x32xf32>
    %cst_109 = arith.constant dense<0.000000e+00> : vector<4x32xf32>
    %160 = tpu.matmul %157, %159, %cst_109 {dimension_numbers = #tpu.dot_dimension_numbers<[1], [0], [0], [1], [0, 0, 1, 1], [], []>} : vector<4x128xf32>, vector<128x32xf32>, vector<4x32xf32> -> vector<4x32xf32>
    %161 = vector.broadcast %154 : vector<1x32xf32> to vector<4x32xf32>
    %162 = arith.addf %161, %160 : vector<4x32xf32>
    %c1_110 = arith.constant 1 : index
    %c0_111 = arith.constant 0 : index
    %c0_112 = arith.constant 0 : index
    %163 = vector.load %arg33[%c1_110, %c0_111, %c0_112] : memref<8x4x32xf32, #tpu.memory_space<vmem>>, vector<1x4x32xf32>
    %164 = vector.shape_cast %163 : vector<1x4x32xf32> to vector<4x32xf32>
    %cst_113 = arith.constant dense<0.000000e+00> : vector<4x128xf32>
    %165 = tpu.matmul %164, %153, %cst_113 {dimension_numbers = #tpu.dot_dimension_numbers<[1], [0], [0], [1], [0, 0, 1, 1], [], []>} : vector<4x32xf32>, vector<32x128xf32>, vector<4x128xf32> -> vector<4x128xf32>
    %c1_114 = arith.constant 1 : index
    %c0_115 = arith.constant 0 : index
    %c0_116 = arith.constant 0 : index
    %166 = vector.load %arg11[%c1_114, %c0_115, %c0_116] : memref<8x128x32xf32, #tpu.memory_space<vmem>>, vector<1x128x32xf32>
    %167 = vector.shape_cast %166 : vector<1x128x32xf32> to vector<128x32xf32>
    %cst_117 = arith.constant dense<0.000000e+00> : vector<4x32xf32>
    %168 = tpu.matmul %165, %167, %cst_117 {dimension_numbers = #tpu.dot_dimension_numbers<[1], [0], [0], [1], [0, 0, 1, 1], [], []>} : vector<4x128xf32>, vector<128x32xf32>, vector<4x32xf32> -> vector<4x32xf32>
    %169 = arith.addf %162, %168 : vector<4x32xf32>
    %c2_118 = arith.constant 2 : index
    %c0_119 = arith.constant 0 : index
    %c0_120 = arith.constant 0 : index
    %170 = vector.load %arg33[%c2_118, %c0_119, %c0_120] : memref<8x4x32xf32, #tpu.memory_space<vmem>>, vector<1x4x32xf32>
    %171 = vector.shape_cast %170 : vector<1x4x32xf32> to vector<4x32xf32>
    %cst_121 = arith.constant dense<0.000000e+00> : vector<4x128xf32>
    %172 = tpu.matmul %171, %153, %cst_121 {dimension_numbers = #tpu.dot_dimension_numbers<[1], [0], [0], [1], [0, 0, 1, 1], [], []>} : vector<4x32xf32>, vector<32x128xf32>, vector<4x128xf32> -> vector<4x128xf32>
    %c2_122 = arith.constant 2 : index
    %c0_123 = arith.constant 0 : index
    %c0_124 = arith.constant 0 : index
    %173 = vector.load %arg11[%c2_122, %c0_123, %c0_124] : memref<8x128x32xf32, #tpu.memory_space<vmem>>, vector<1x128x32xf32>
    %174 = vector.shape_cast %173 : vector<1x128x32xf32> to vector<128x32xf32>
    %cst_125 = arith.constant dense<0.000000e+00> : vector<4x32xf32>
    %175 = tpu.matmul %172, %174, %cst_125 {dimension_numbers = #tpu.dot_dimension_numbers<[1], [0], [0], [1], [0, 0, 1, 1], [], []>} : vector<4x128xf32>, vector<128x32xf32>, vector<4x32xf32> -> vector<4x32xf32>
    %176 = arith.addf %169, %175 : vector<4x32xf32>
    %c3 = arith.constant 3 : index
    %c0_126 = arith.constant 0 : index
    %c0_127 = arith.constant 0 : index
    %177 = vector.load %arg33[%c3, %c0_126, %c0_127] : memref<8x4x32xf32, #tpu.memory_space<vmem>>, vector<1x4x32xf32>
    %178 = vector.shape_cast %177 : vector<1x4x32xf32> to vector<4x32xf32>
    %cst_128 = arith.constant dense<0.000000e+00> : vector<4x128xf32>
    %179 = tpu.matmul %178, %153, %cst_128 {dimension_numbers = #tpu.dot_dimension_numbers<[1], [0], [0], [1], [0, 0, 1, 1], [], []>} : vector<4x32xf32>, vector<32x128xf32>, vector<4x128xf32> -> vector<4x128xf32>
    %c3_129 = arith.constant 3 : index
    %c0_130 = arith.constant 0 : index
    %c0_131 = arith.constant 0 : index
    %180 = vector.load %arg11[%c3_129, %c0_130, %c0_131] : memref<8x128x32xf32, #tpu.memory_space<vmem>>, vector<1x128x32xf32>
    %181 = vector.shape_cast %180 : vector<1x128x32xf32> to vector<128x32xf32>
    %cst_132 = arith.constant dense<0.000000e+00> : vector<4x32xf32>
    %182 = tpu.matmul %179, %181, %cst_132 {dimension_numbers = #tpu.dot_dimension_numbers<[1], [0], [0], [1], [0, 0, 1, 1], [], []>} : vector<4x128xf32>, vector<128x32xf32>, vector<4x32xf32> -> vector<4x32xf32>
    %183 = arith.addf %176, %182 : vector<4x32xf32>
    %c4 = arith.constant 4 : index
    %c0_133 = arith.constant 0 : index
    %c0_134 = arith.constant 0 : index
    %184 = vector.load %arg33[%c4, %c0_133, %c0_134] : memref<8x4x32xf32, #tpu.memory_space<vmem>>, vector<1x4x32xf32>
    %185 = vector.shape_cast %184 : vector<1x4x32xf32> to vector<4x32xf32>
    %cst_135 = arith.constant dense<0.000000e+00> : vector<4x128xf32>
    %186 = tpu.matmul %185, %153, %cst_135 {dimension_numbers = #tpu.dot_dimension_numbers<[1], [0], [0], [1], [0, 0, 1, 1], [], []>} : vector<4x32xf32>, vector<32x128xf32>, vector<4x128xf32> -> vector<4x128xf32>
    %c4_136 = arith.constant 4 : index
    %c0_137 = arith.constant 0 : index
    %c0_138 = arith.constant 0 : index
    %187 = vector.load %arg11[%c4_136, %c0_137, %c0_138] : memref<8x128x32xf32, #tpu.memory_space<vmem>>, vector<1x128x32xf32>
    %188 = vector.shape_cast %187 : vector<1x128x32xf32> to vector<128x32xf32>
    %cst_139 = arith.constant dense<0.000000e+00> : vector<4x32xf32>
    %189 = tpu.matmul %186, %188, %cst_139 {dimension_numbers = #tpu.dot_dimension_numbers<[1], [0], [0], [1], [0, 0, 1, 1], [], []>} : vector<4x128xf32>, vector<128x32xf32>, vector<4x32xf32> -> vector<4x32xf32>
    %190 = arith.addf %183, %189 : vector<4x32xf32>
    %c5 = arith.constant 5 : index
    %c0_140 = arith.constant 0 : index
    %c0_141 = arith.constant 0 : index
    %191 = vector.load %arg33[%c5, %c0_140, %c0_141] : memref<8x4x32xf32, #tpu.memory_space<vmem>>, vector<1x4x32xf32>
    %192 = vector.shape_cast %191 : vector<1x4x32xf32> to vector<4x32xf32>
    %cst_142 = arith.constant dense<0.000000e+00> : vector<4x128xf32>
    %193 = tpu.matmul %192, %153, %cst_142 {dimension_numbers = #tpu.dot_dimension_numbers<[1], [0], [0], [1], [0, 0, 1, 1], [], []>} : vector<4x32xf32>, vector<32x128xf32>, vector<4x128xf32> -> vector<4x128xf32>
    %c5_143 = arith.constant 5 : index
    %c0_144 = arith.constant 0 : index
    %c0_145 = arith.constant 0 : index
    %194 = vector.load %arg11[%c5_143, %c0_144, %c0_145] : memref<8x128x32xf32, #tpu.memory_space<vmem>>, vector<1x128x32xf32>
    %195 = vector.shape_cast %194 : vector<1x128x32xf32> to vector<128x32xf32>
    %cst_146 = arith.constant dense<0.000000e+00> : vector<4x32xf32>
    %196 = tpu.matmul %193, %195, %cst_146 {dimension_numbers = #tpu.dot_dimension_numbers<[1], [0], [0], [1], [0, 0, 1, 1], [], []>} : vector<4x128xf32>, vector<128x32xf32>, vector<4x32xf32> -> vector<4x32xf32>
    %197 = arith.addf %190, %196 : vector<4x32xf32>
    %c6 = arith.constant 6 : index
    %c0_147 = arith.constant 0 : index
    %c0_148 = arith.constant 0 : index
    %198 = vector.load %arg33[%c6, %c0_147, %c0_148] : memref<8x4x32xf32, #tpu.memory_space<vmem>>, vector<1x4x32xf32>
    %199 = vector.shape_cast %198 : vector<1x4x32xf32> to vector<4x32xf32>
    %cst_149 = arith.constant dense<0.000000e+00> : vector<4x128xf32>
    %200 = tpu.matmul %199, %153, %cst_149 {dimension_numbers = #tpu.dot_dimension_numbers<[1], [0], [0], [1], [0, 0, 1, 1], [], []>} : vector<4x32xf32>, vector<32x128xf32>, vector<4x128xf32> -> vector<4x128xf32>
    %c6_150 = arith.constant 6 : index
    %c0_151 = arith.constant 0 : index
    %c0_152 = arith.constant 0 : index
    %201 = vector.load %arg11[%c6_150, %c0_151, %c0_152] : memref<8x128x32xf32, #tpu.memory_space<vmem>>, vector<1x128x32xf32>
    %202 = vector.shape_cast %201 : vector<1x128x32xf32> to vector<128x32xf32>
    %cst_153 = arith.constant dense<0.000000e+00> : vector<4x32xf32>
    %203 = tpu.matmul %200, %202, %cst_153 {dimension_numbers = #tpu.dot_dimension_numbers<[1], [0], [0], [1], [0, 0, 1, 1], [], []>} : vector<4x128xf32>, vector<128x32xf32>, vector<4x32xf32> -> vector<4x32xf32>
    %204 = arith.addf %197, %203 : vector<4x32xf32>
    %c7 = arith.constant 7 : index
    %c0_154 = arith.constant 0 : index
    %c0_155 = arith.constant 0 : index
    %205 = vector.load %arg33[%c7, %c0_154, %c0_155] : memref<8x4x32xf32, #tpu.memory_space<vmem>>, vector<1x4x32xf32>
    %206 = vector.shape_cast %205 : vector<1x4x32xf32> to vector<4x32xf32>
    %cst_156 = arith.constant dense<0.000000e+00> : vector<4x128xf32>
    %207 = tpu.matmul %206, %153, %cst_156 {dimension_numbers = #tpu.dot_dimension_numbers<[1], [0], [0], [1], [0, 0, 1, 1], [], []>} : vector<4x32xf32>, vector<32x128xf32>, vector<4x128xf32> -> vector<4x128xf32>
    %c7_157 = arith.constant 7 : index
    %c0_158 = arith.constant 0 : index
    %c0_159 = arith.constant 0 : index
    %208 = vector.load %arg11[%c7_157, %c0_158, %c0_159] : memref<8x128x32xf32, #tpu.memory_space<vmem>>, vector<1x128x32xf32>
    %209 = vector.shape_cast %208 : vector<1x128x32xf32> to vector<128x32xf32>
    %cst_160 = arith.constant dense<0.000000e+00> : vector<4x32xf32>
    %210 = tpu.matmul %207, %209, %cst_160 {dimension_numbers = #tpu.dot_dimension_numbers<[1], [0], [0], [1], [0, 0, 1, 1], [], []>} : vector<4x128xf32>, vector<128x32xf32>, vector<4x32xf32> -> vector<4x32xf32>
    %211 = arith.addf %204, %210 : vector<4x32xf32>
    %212 = vector.extract_strided_slice %211 {offsets = [0, 0], sizes = [4, 16], strides = [1, 1]} : vector<4x32xf32> to vector<4x16xf32>
    %213 = vector.extract_strided_slice %211 {offsets = [0, 16], sizes = [4, 16], strides = [1, 1]} : vector<4x32xf32> to vector<4x16xf32>
    %c0_161 = arith.constant 0 : index
    %c0_162 = arith.constant 0 : index
    %214 = vector.load %arg38[%c0_161, %c0_162] : memref<4x16xf32, #tpu.memory_space<vmem>>, vector<4x16xf32>
    tpu.vector_store %arg38[%c0_161, %c0_162], %212 {strides = array<i32>} : memref<4x16xf32, #tpu.memory_space<vmem>>, vector<4x16xf32>,
    %c0_163 = arith.constant 0 : index
    %c0_164 = arith.constant 0 : index
    %215 = vector.load %arg39[%c0_163, %c0_164] : memref<4x16xf32, #tpu.memory_space<vmem>>, vector<4x16xf32>
    tpu.vector_store %arg39[%c0_163, %c0_164], %213 {strides = array<i32>} : memref<4x16xf32, #tpu.memory_space<vmem>>, vector<4x16xf32>,
    %c0_165 = arith.constant 0 : index
    %c0_166 = arith.constant 0 : index
    %216 = vector.load %arg1[%c0_165, %c0_166] : memref<4x16xf32, #tpu.memory_space<vmem>>, vector<4x16xf32>
    %cst_167 = arith.constant 5.000000e-01 : f32
    %217 = vector.broadcast %cst_167 : f32 to vector<4x16xf32>
    %218 = arith.mulf %217, %213 : vector<4x16xf32>
    %219 = math.exp %218 : vector<4x16xf32>
    %220 = arith.mulf %216, %219 : vector<4x16xf32>
    %221 = arith.addf %212, %220 : vector<4x16xf32>
    %cst_168 = arith.constant 0.000000e+00 : f32
    %222 = vector.broadcast %cst_168 : f32 to vector<32x128xf32>
    %c0_169 = arith.constant 0 : index
    %c0_170 = arith.constant 0 : index
    %c0_171 = arith.constant 0 : index
    %223 = vector.load %arg13[%c0_169, %c0_170, %c0_171] : memref<8x16x128xf32, #tpu.memory_space<vmem>>, vector<1x16x128xf32>
    %224 = vector.shape_cast %223 : vector<1x16x128xf32> to vector<16x128xf32>
    %cst_172 = arith.constant dense<0.000000e+00> : vector<4x128xf32>
    %225 = tpu.matmul %221, %224, %cst_172 {dimension_numbers = #tpu.dot_dimension_numbers<[1], [0], [0], [1], [0, 0, 1, 1], [], []>} : vector<4x16xf32>, vector<16x128xf32>, vector<4x128xf32> -> vector<4x128xf32>
    %c0_173 = arith.constant 0 : index
    %c0_174 = arith.constant 0 : index
    %c0_175 = arith.constant 0 : index
    %226 = vector.load %arg14[%c0_173, %c0_174, %c0_175] : memref<8x1x128xf32, #tpu.memory_space<vmem>>, vector<1x1x128xf32>
    %227 = vector.shape_cast %226 : vector<1x1x128xf32> to vector<1x128xf32>
    %228 = vector.broadcast %227 : vector<1x128xf32> to vector<4x128xf32>
    %229 = arith.addf %225, %228 : vector<4x128xf32>
    %c0_176 = arith.constant 0 : index
    %c0_177 = arith.constant 0 : index
    %c0_178 = arith.constant 0 : index
    %230 = vector.load %arg34[%c0_176, %c0_177, %c0_178] : memref<8x32x4xf32, #tpu.memory_space<vmem>>, vector<1x32x4xf32>
    %231 = vector.shape_cast %230 : vector<1x32x4xf32> to vector<32x4xf32>
    %cst_179 = arith.constant dense<0.000000e+00> : vector<32x128xf32>
    %232 = tpu.matmul %231, %229, %cst_179 {dimension_numbers = #tpu.dot_dimension_numbers<[1], [0], [0], [1], [0, 0, 1, 1], [], []>} : vector<32x4xf32>, vector<4x128xf32>, vector<32x128xf32> -> vector<32x128xf32>
    %233 = arith.addf %222, %232 : vector<32x128xf32>
    %c1_180 = arith.constant 1 : index
    %c0_181 = arith.constant 0 : index
    %c0_182 = arith.constant 0 : index
    %234 = vector.load %arg13[%c1_180, %c0_181, %c0_182] : memref<8x16x128xf32, #tpu.memory_space<vmem>>, vector<1x16x128xf32>
    %235 = vector.shape_cast %234 : vector<1x16x128xf32> to vector<16x128xf32>
    %cst_183 = arith.constant dense<0.000000e+00> : vector<4x128xf32>
    %236 = tpu.matmul %221, %235, %cst_183 {dimension_numbers = #tpu.dot_dimension_numbers<[1], [0], [0], [1], [0, 0, 1, 1], [], []>} : vector<4x16xf32>, vector<16x128xf32>, vector<4x128xf32> -> vector<4x128xf32>
    %c1_184 = arith.constant 1 : index
    %c0_185 = arith.constant 0 : index
    %c0_186 = arith.constant 0 : index
    %237 = vector.load %arg14[%c1_184, %c0_185, %c0_186] : memref<8x1x128xf32, #tpu.memory_space<vmem>>, vector<1x1x128xf32>
    %238 = vector.shape_cast %237 : vector<1x1x128xf32> to vector<1x128xf32>
    %239 = vector.broadcast %238 : vector<1x128xf32> to vector<4x128xf32>
    %240 = arith.addf %236, %239 : vector<4x128xf32>
    %c1_187 = arith.constant 1 : index
    %c0_188 = arith.constant 0 : index
    %c0_189 = arith.constant 0 : index
    %241 = vector.load %arg34[%c1_187, %c0_188, %c0_189] : memref<8x32x4xf32, #tpu.memory_space<vmem>>, vector<1x32x4xf32>
    %242 = vector.shape_cast %241 : vector<1x32x4xf32> to vector<32x4xf32>
    %cst_190 = arith.constant dense<0.000000e+00> : vector<32x128xf32>
    %243 = tpu.matmul %242, %240, %cst_190 {dimension_numbers = #tpu.dot_dimension_numbers<[1], [0], [0], [1], [0, 0, 1, 1], [], []>} : vector<32x4xf32>, vector<4x128xf32>, vector<32x128xf32> -> vector<32x128xf32>
    %244 = arith.addf %233, %243 : vector<32x128xf32>
    %c2_191 = arith.constant 2 : index
    %c0_192 = arith.constant 0 : index
    %c0_193 = arith.constant 0 : index
    %245 = vector.load %arg13[%c2_191, %c0_192, %c0_193] : memref<8x16x128xf32, #tpu.memory_space<vmem>>, vector<1x16x128xf32>
    %246 = vector.shape_cast %245 : vector<1x16x128xf32> to vector<16x128xf32>
    %cst_194 = arith.constant dense<0.000000e+00> : vector<4x128xf32>
    %247 = tpu.matmul %221, %246, %cst_194 {dimension_numbers = #tpu.dot_dimension_numbers<[1], [0], [0], [1], [0, 0, 1, 1], [], []>} : vector<4x16xf32>, vector<16x128xf32>, vector<4x128xf32> -> vector<4x128xf32>
    %c2_195 = arith.constant 2 : index
    %c0_196 = arith.constant 0 : index
    %c0_197 = arith.constant 0 : index
    %248 = vector.load %arg14[%c2_195, %c0_196, %c0_197] : memref<8x1x128xf32, #tpu.memory_space<vmem>>, vector<1x1x128xf32>
    %249 = vector.shape_cast %248 : vector<1x1x128xf32> to vector<1x128xf32>
    %250 = vector.broadcast %249 : vector<1x128xf32> to vector<4x128xf32>
    %251 = arith.addf %247, %250 : vector<4x128xf32>
    %c2_198 = arith.constant 2 : index
    %c0_199 = arith.constant 0 : index
    %c0_200 = arith.constant 0 : index
    %252 = vector.load %arg34[%c2_198, %c0_199, %c0_200] : memref<8x32x4xf32, #tpu.memory_space<vmem>>, vector<1x32x4xf32>
    %253 = vector.shape_cast %252 : vector<1x32x4xf32> to vector<32x4xf32>
    %cst_201 = arith.constant dense<0.000000e+00> : vector<32x128xf32>
    %254 = tpu.matmul %253, %251, %cst_201 {dimension_numbers = #tpu.dot_dimension_numbers<[1], [0], [0], [1], [0, 0, 1, 1], [], []>} : vector<32x4xf32>, vector<4x128xf32>, vector<32x128xf32> -> vector<32x128xf32>
    %255 = arith.addf %244, %254 : vector<32x128xf32>
    %c3_202 = arith.constant 3 : index
    %c0_203 = arith.constant 0 : index
    %c0_204 = arith.constant 0 : index
    %256 = vector.load %arg13[%c3_202, %c0_203, %c0_204] : memref<8x16x128xf32, #tpu.memory_space<vmem>>, vector<1x16x128xf32>
    %257 = vector.shape_cast %256 : vector<1x16x128xf32> to vector<16x128xf32>
    %cst_205 = arith.constant dense<0.000000e+00> : vector<4x128xf32>
    %258 = tpu.matmul %221, %257, %cst_205 {dimension_numbers = #tpu.dot_dimension_numbers<[1], [0], [0], [1], [0, 0, 1, 1], [], []>} : vector<4x16xf32>, vector<16x128xf32>, vector<4x128xf32> -> vector<4x128xf32>
    %c3_206 = arith.constant 3 : index
    %c0_207 = arith.constant 0 : index
    %c0_208 = arith.constant 0 : index
    %259 = vector.load %arg14[%c3_206, %c0_207, %c0_208] : memref<8x1x128xf32, #tpu.memory_space<vmem>>, vector<1x1x128xf32>
    %260 = vector.shape_cast %259 : vector<1x1x128xf32> to vector<1x128xf32>
    %261 = vector.broadcast %260 : vector<1x128xf32> to vector<4x128xf32>
    %262 = arith.addf %258, %261 : vector<4x128xf32>
    %c3_209 = arith.constant 3 : index
    %c0_210 = arith.constant 0 : index
    %c0_211 = arith.constant 0 : index
    %263 = vector.load %arg34[%c3_209, %c0_210, %c0_211] : memref<8x32x4xf32, #tpu.memory_space<vmem>>, vector<1x32x4xf32>
    %264 = vector.shape_cast %263 : vector<1x32x4xf32> to vector<32x4xf32>
    %cst_212 = arith.constant dense<0.000000e+00> : vector<32x128xf32>
    %265 = tpu.matmul %264, %262, %cst_212 {dimension_numbers = #tpu.dot_dimension_numbers<[1], [0], [0], [1], [0, 0, 1, 1], [], []>} : vector<32x4xf32>, vector<4x128xf32>, vector<32x128xf32> -> vector<32x128xf32>
    %266 = arith.addf %255, %265 : vector<32x128xf32>
    %c4_213 = arith.constant 4 : index
    %c0_214 = arith.constant 0 : index
    %c0_215 = arith.constant 0 : index
    %267 = vector.load %arg13[%c4_213, %c0_214, %c0_215] : memref<8x16x128xf32, #tpu.memory_space<vmem>>, vector<1x16x128xf32>
    %268 = vector.shape_cast %267 : vector<1x16x128xf32> to vector<16x128xf32>
    %cst_216 = arith.constant dense<0.000000e+00> : vector<4x128xf32>
    %269 = tpu.matmul %221, %268, %cst_216 {dimension_numbers = #tpu.dot_dimension_numbers<[1], [0], [0], [1], [0, 0, 1, 1], [], []>} : vector<4x16xf32>, vector<16x128xf32>, vector<4x128xf32> -> vector<4x128xf32>
    %c4_217 = arith.constant 4 : index
    %c0_218 = arith.constant 0 : index
    %c0_219 = arith.constant 0 : index
    %270 = vector.load %arg14[%c4_217, %c0_218, %c0_219] : memref<8x1x128xf32, #tpu.memory_space<vmem>>, vector<1x1x128xf32>
    %271 = vector.shape_cast %270 : vector<1x1x128xf32> to vector<1x128xf32>
    %272 = vector.broadcast %271 : vector<1x128xf32> to vector<4x128xf32>
    %273 = arith.addf %269, %272 : vector<4x128xf32>
    %c4_220 = arith.constant 4 : index
    %c0_221 = arith.constant 0 : index
    %c0_222 = arith.constant 0 : index
    %274 = vector.load %arg34[%c4_220, %c0_221, %c0_222] : memref<8x32x4xf32, #tpu.memory_space<vmem>>, vector<1x32x4xf32>
    %275 = vector.shape_cast %274 : vector<1x32x4xf32> to vector<32x4xf32>
    %cst_223 = arith.constant dense<0.000000e+00> : vector<32x128xf32>
    %276 = tpu.matmul %275, %273, %cst_223 {dimension_numbers = #tpu.dot_dimension_numbers<[1], [0], [0], [1], [0, 0, 1, 1], [], []>} : vector<32x4xf32>, vector<4x128xf32>, vector<32x128xf32> -> vector<32x128xf32>
    %277 = arith.addf %266, %276 : vector<32x128xf32>
    %c5_224 = arith.constant 5 : index
    %c0_225 = arith.constant 0 : index
    %c0_226 = arith.constant 0 : index
    %278 = vector.load %arg13[%c5_224, %c0_225, %c0_226] : memref<8x16x128xf32, #tpu.memory_space<vmem>>, vector<1x16x128xf32>
    %279 = vector.shape_cast %278 : vector<1x16x128xf32> to vector<16x128xf32>
    %cst_227 = arith.constant dense<0.000000e+00> : vector<4x128xf32>
    %280 = tpu.matmul %221, %279, %cst_227 {dimension_numbers = #tpu.dot_dimension_numbers<[1], [0], [0], [1], [0, 0, 1, 1], [], []>} : vector<4x16xf32>, vector<16x128xf32>, vector<4x128xf32> -> vector<4x128xf32>
    %c5_228 = arith.constant 5 : index
    %c0_229 = arith.constant 0 : index
    %c0_230 = arith.constant 0 : index
    %281 = vector.load %arg14[%c5_228, %c0_229, %c0_230] : memref<8x1x128xf32, #tpu.memory_space<vmem>>, vector<1x1x128xf32>
    %282 = vector.shape_cast %281 : vector<1x1x128xf32> to vector<1x128xf32>
    %283 = vector.broadcast %282 : vector<1x128xf32> to vector<4x128xf32>
    %284 = arith.addf %280, %283 : vector<4x128xf32>
    %c5_231 = arith.constant 5 : index
    %c0_232 = arith.constant 0 : index
    %c0_233 = arith.constant 0 : index
    %285 = vector.load %arg34[%c5_231, %c0_232, %c0_233] : memref<8x32x4xf32, #tpu.memory_space<vmem>>, vector<1x32x4xf32>
    %286 = vector.shape_cast %285 : vector<1x32x4xf32> to vector<32x4xf32>
    %cst_234 = arith.constant dense<0.000000e+00> : vector<32x128xf32>
    %287 = tpu.matmul %286, %284, %cst_234 {dimension_numbers = #tpu.dot_dimension_numbers<[1], [0], [0], [1], [0, 0, 1, 1], [], []>} : vector<32x4xf32>, vector<4x128xf32>, vector<32x128xf32> -> vector<32x128xf32>
    %288 = arith.addf %277, %287 : vector<32x128xf32>
    %c6_235 = arith.constant 6 : index
    %c0_236 = arith.constant 0 : index
    %c0_237 = arith.constant 0 : index
    %289 = vector.load %arg13[%c6_235, %c0_236, %c0_237] : memref<8x16x128xf32, #tpu.memory_space<vmem>>, vector<1x16x128xf32>
    %290 = vector.shape_cast %289 : vector<1x16x128xf32> to vector<16x128xf32>
    %cst_238 = arith.constant dense<0.000000e+00> : vector<4x128xf32>
    %291 = tpu.matmul %221, %290, %cst_238 {dimension_numbers = #tpu.dot_dimension_numbers<[1], [0], [0], [1], [0, 0, 1, 1], [], []>} : vector<4x16xf32>, vector<16x128xf32>, vector<4x128xf32> -> vector<4x128xf32>
    %c6_239 = arith.constant 6 : index
    %c0_240 = arith.constant 0 : index
    %c0_241 = arith.constant 0 : index
    %292 = vector.load %arg14[%c6_239, %c0_240, %c0_241] : memref<8x1x128xf32, #tpu.memory_space<vmem>>, vector<1x1x128xf32>
    %293 = vector.shape_cast %292 : vector<1x1x128xf32> to vector<1x128xf32>
    %294 = vector.broadcast %293 : vector<1x128xf32> to vector<4x128xf32>
    %295 = arith.addf %291, %294 : vector<4x128xf32>
    %c6_242 = arith.constant 6 : index
    %c0_243 = arith.constant 0 : index
    %c0_244 = arith.constant 0 : index
    %296 = vector.load %arg34[%c6_242, %c0_243, %c0_244] : memref<8x32x4xf32, #tpu.memory_space<vmem>>, vector<1x32x4xf32>
    %297 = vector.shape_cast %296 : vector<1x32x4xf32> to vector<32x4xf32>
    %cst_245 = arith.constant dense<0.000000e+00> : vector<32x128xf32>
    %298 = tpu.matmul %297, %295, %cst_245 {dimension_numbers = #tpu.dot_dimension_numbers<[1], [0], [0], [1], [0, 0, 1, 1], [], []>} : vector<32x4xf32>, vector<4x128xf32>, vector<32x128xf32> -> vector<32x128xf32>
    %299 = arith.addf %288, %298 : vector<32x128xf32>
    %c7_246 = arith.constant 7 : index
    %c0_247 = arith.constant 0 : index
    %c0_248 = arith.constant 0 : index
    %300 = vector.load %arg13[%c7_246, %c0_247, %c0_248] : memref<8x16x128xf32, #tpu.memory_space<vmem>>, vector<1x16x128xf32>
    %301 = vector.shape_cast %300 : vector<1x16x128xf32> to vector<16x128xf32>
    %cst_249 = arith.constant dense<0.000000e+00> : vector<4x128xf32>
    %302 = tpu.matmul %221, %301, %cst_249 {dimension_numbers = #tpu.dot_dimension_numbers<[1], [0], [0], [1], [0, 0, 1, 1], [], []>} : vector<4x16xf32>, vector<16x128xf32>, vector<4x128xf32> -> vector<4x128xf32>
    %c7_250 = arith.constant 7 : index
    %c0_251 = arith.constant 0 : index
    %c0_252 = arith.constant 0 : index
    %303 = vector.load %arg14[%c7_250, %c0_251, %c0_252] : memref<8x1x128xf32, #tpu.memory_space<vmem>>, vector<1x1x128xf32>
    %304 = vector.shape_cast %303 : vector<1x1x128xf32> to vector<1x128xf32>
    %305 = vector.broadcast %304 : vector<1x128xf32> to vector<4x128xf32>
    %306 = arith.addf %302, %305 : vector<4x128xf32>
    %c7_253 = arith.constant 7 : index
    %c0_254 = arith.constant 0 : index
    %c0_255 = arith.constant 0 : index
    %307 = vector.load %arg34[%c7_253, %c0_254, %c0_255] : memref<8x32x4xf32, #tpu.memory_space<vmem>>, vector<1x32x4xf32>
    %308 = vector.shape_cast %307 : vector<1x32x4xf32> to vector<32x4xf32>
    %cst_256 = arith.constant dense<0.000000e+00> : vector<32x128xf32>
    %309 = tpu.matmul %308, %306, %cst_256 {dimension_numbers = #tpu.dot_dimension_numbers<[1], [0], [0], [1], [0, 0, 1, 1], [], []>} : vector<32x4xf32>, vector<4x128xf32>, vector<32x128xf32> -> vector<32x128xf32>
    %310 = arith.addf %299, %309 : vector<32x128xf32>
    %c0_257 = arith.constant 0 : index
    %c0_258 = arith.constant 0 : index
    %c0_259 = arith.constant 0 : index
    %311 = vector.load %arg29[%c0_257, %c0_258, %c0_259] : memref<3x64x32xf32, #tpu.memory_space<vmem>>, vector<1x64x32xf32>
    %312 = vector.shape_cast %311 : vector<1x64x32xf32> to vector<64x32xf32>
    %c0_260 = arith.constant 0 : index
    %c0_261 = arith.constant 0 : index
    %c0_262 = arith.constant 0 : index
    %313 = vector.load %arg15[%c0_260, %c0_261, %c0_262] : memref<3x128x64xf32, #tpu.memory_space<vmem>>, vector<1x128x64xf32>
    %314 = vector.shape_cast %313 : vector<1x128x64xf32> to vector<128x64xf32>
    %cst_263 = arith.constant dense<0.000000e+00> : vector<32x64xf32>
    %315 = tpu.matmul %310, %314, %cst_263 {dimension_numbers = #tpu.dot_dimension_numbers<[1], [0], [0], [1], [0, 0, 1, 1], [], []>} : vector<32x128xf32>, vector<128x64xf32>, vector<32x64xf32> -> vector<32x64xf32>
    %cst_264 = arith.constant dense<0.000000e+00> : vector<64x64xf32>
    %316 = tpu.matmul %312, %315, %cst_264 {dimension_numbers = #tpu.dot_dimension_numbers<[1], [0], [0], [1], [0, 0, 1, 1], [], []>} : vector<64x32xf32>, vector<32x64xf32>, vector<64x64xf32> -> vector<64x64xf32>
    %c1_265 = arith.constant 1 : index
    %c0_266 = arith.constant 0 : index
    %c0_267 = arith.constant 0 : index
    %317 = vector.load %arg29[%c1_265, %c0_266, %c0_267] : memref<3x64x32xf32, #tpu.memory_space<vmem>>, vector<1x64x32xf32>
    %318 = vector.shape_cast %317 : vector<1x64x32xf32> to vector<64x32xf32>
    %c1_268 = arith.constant 1 : index
    %c0_269 = arith.constant 0 : index
    %c0_270 = arith.constant 0 : index
    %319 = vector.load %arg15[%c1_268, %c0_269, %c0_270] : memref<3x128x64xf32, #tpu.memory_space<vmem>>, vector<1x128x64xf32>
    %320 = vector.shape_cast %319 : vector<1x128x64xf32> to vector<128x64xf32>
    %cst_271 = arith.constant dense<0.000000e+00> : vector<32x64xf32>
    %321 = tpu.matmul %310, %320, %cst_271 {dimension_numbers = #tpu.dot_dimension_numbers<[1], [0], [0], [1], [0, 0, 1, 1], [], []>} : vector<32x128xf32>, vector<128x64xf32>, vector<32x64xf32> -> vector<32x64xf32>
    %cst_272 = arith.constant dense<0.000000e+00> : vector<64x64xf32>
    %322 = tpu.matmul %318, %321, %cst_272 {dimension_numbers = #tpu.dot_dimension_numbers<[1], [0], [0], [1], [0, 0, 1, 1], [], []>} : vector<64x32xf32>, vector<32x64xf32>, vector<64x64xf32> -> vector<64x64xf32>
    %323 = arith.addf %316, %322 : vector<64x64xf32>
    %c2_273 = arith.constant 2 : index
    %c0_274 = arith.constant 0 : index
    %c0_275 = arith.constant 0 : index
    %324 = vector.load %arg29[%c2_273, %c0_274, %c0_275] : memref<3x64x32xf32, #tpu.memory_space<vmem>>, vector<1x64x32xf32>
    %325 = vector.shape_cast %324 : vector<1x64x32xf32> to vector<64x32xf32>
    %c2_276 = arith.constant 2 : index
    %c0_277 = arith.constant 0 : index
    %c0_278 = arith.constant 0 : index
    %326 = vector.load %arg15[%c2_276, %c0_277, %c0_278] : memref<3x128x64xf32, #tpu.memory_space<vmem>>, vector<1x128x64xf32>
    %327 = vector.shape_cast %326 : vector<1x128x64xf32> to vector<128x64xf32>
    %cst_279 = arith.constant dense<0.000000e+00> : vector<32x64xf32>
    %328 = tpu.matmul %310, %327, %cst_279 {dimension_numbers = #tpu.dot_dimension_numbers<[1], [0], [0], [1], [0, 0, 1, 1], [], []>} : vector<32x128xf32>, vector<128x64xf32>, vector<32x64xf32> -> vector<32x64xf32>
    %cst_280 = arith.constant dense<0.000000e+00> : vector<64x64xf32>
    %329 = tpu.matmul %325, %328, %cst_280 {dimension_numbers = #tpu.dot_dimension_numbers<[1], [0], [0], [1], [0, 0, 1, 1], [], []>} : vector<64x32xf32>, vector<32x64xf32>, vector<64x64xf32> -> vector<64x64xf32>
    %330 = arith.addf %323, %329 : vector<64x64xf32>
    %cst_281 = arith.constant dense<0.000000e+00> : vector<64xf32>
    %331 = vector.multi_reduction <add>, %330, %cst_281 [0] : vector<64x64xf32> to vector<64xf32>
    %332 = vector.shape_cast %331 : vector<64xf32> to vector<1x64xf32>
    %cst_282 = arith.constant 6.400000e+01 : f32
    %333 = vector.broadcast %cst_282 : f32 to vector<1x64xf32>
    %334 = arith.divf %332, %333 : vector<1x64xf32>
    %335 = vector.broadcast %334 : vector<1x64xf32> to vector<64x64xf32>
    %336 = arith.subf %330, %335 : vector<64x64xf32>
    %337 = arith.mulf %336, %336 : vector<64x64xf32>
    %cst_283 = arith.constant dense<0.000000e+00> : vector<64xf32>
    %338 = vector.multi_reduction <add>, %337, %cst_283 [0] : vector<64x64xf32> to vector<64xf32>
    %339 = vector.shape_cast %338 : vector<64xf32> to vector<1x64xf32>
    %cst_284 = arith.constant 6.400000e+01 : f32
    %340 = vector.broadcast %cst_284 : f32 to vector<1x64xf32>
    %341 = arith.divf %339, %340 : vector<1x64xf32>
    %342 = vector.broadcast %334 : vector<1x64xf32> to vector<64x64xf32>
    %343 = arith.subf %330, %342 : vector<64x64xf32>
    %cst_285 = arith.constant 9.99999974E-6 : f32
    %344 = vector.broadcast %cst_285 : f32 to vector<1x64xf32>
    %345 = arith.addf %341, %344 : vector<1x64xf32>
    %346 = math.rsqrt %345 : vector<1x64xf32>
    %347 = vector.broadcast %346 : vector<1x64xf32> to vector<64x64xf32>
    %348 = arith.mulf %343, %347 : vector<64x64xf32>
    %c0_286 = arith.constant 0 : index
    %c0_287 = arith.constant 0 : index
    %349 = vector.load %arg18[%c0_286, %c0_287] : memref<1x64xf32, #tpu.memory_space<vmem>>, vector<1x64xf32>
    %350 = vector.broadcast %349 : vector<1x64xf32> to vector<64x64xf32>
    %351 = arith.mulf %348, %350 : vector<64x64xf32>
    %c0_288 = arith.constant 0 : index
    %c0_289 = arith.constant 0 : index
    %352 = vector.load %arg19[%c0_288, %c0_289] : memref<1x64xf32, #tpu.memory_space<vmem>>, vector<1x64xf32>
    %353 = vector.broadcast %352 : vector<1x64xf32> to vector<64x64xf32>
    %354 = arith.addf %351, %353 : vector<64x64xf32>
    %cst_290 = arith.constant 0.000000e+00 : f32
    %355 = vector.broadcast %cst_290 : f32 to vector<64x64xf32>
    %356 = arith.cmpf oge, %354, %355 : vector<64x64xf32>
    %cst_291 = arith.constant 0.00999999977 : f32
    %357 = vector.broadcast %cst_291 : f32 to vector<64x64xf32>
    %358 = arith.mulf %357, %354 : vector<64x64xf32>
    %359 = arith.select %356, %354, %358 : vector<64x64xi1>, vector<64x64xf32>
    %c0_292 = arith.constant 0 : index
    %c0_293 = arith.constant 0 : index
    %c0_294 = arith.constant 0 : index
    %360 = vector.load %arg30[%c0_292, %c0_293, %c0_294] : memref<3x128x64xf32, #tpu.memory_space<vmem>>, vector<1x128x64xf32>
    %361 = vector.shape_cast %360 : vector<1x128x64xf32> to vector<128x64xf32>
    %c0_295 = arith.constant 0 : index
    %c0_296 = arith.constant 0 : index
    %c0_297 = arith.constant 0 : index
    %362 = vector.load %arg16[%c0_295, %c0_296, %c0_297] : memref<3x64x32xf32, #tpu.memory_space<vmem>>, vector<1x64x32xf32>
    %363 = vector.shape_cast %362 : vector<1x64x32xf32> to vector<64x32xf32>
    %cst_298 = arith.constant dense<0.000000e+00> : vector<64x32xf32>
    %364 = tpu.matmul %359, %363, %cst_298 {dimension_numbers = #tpu.dot_dimension_numbers<[1], [0], [0], [1], [0, 0, 1, 1], [], []>} : vector<64x64xf32>, vector<64x32xf32>, vector<64x32xf32> -> vector<64x32xf32>
    %cst_299 = arith.constant dense<0.000000e+00> : vector<128x32xf32>
    %365 = tpu.matmul %361, %364, %cst_299 {dimension_numbers = #tpu.dot_dimension_numbers<[1], [0], [0], [1], [0, 0, 1, 1], [], []>} : vector<128x64xf32>, vector<64x32xf32>, vector<128x32xf32> -> vector<128x32xf32>
    %c1_300 = arith.constant 1 : index
    %c0_301 = arith.constant 0 : index
    %c0_302 = arith.constant 0 : index
    %366 = vector.load %arg30[%c1_300, %c0_301, %c0_302] : memref<3x128x64xf32, #tpu.memory_space<vmem>>, vector<1x128x64xf32>
    %367 = vector.shape_cast %366 : vector<1x128x64xf32> to vector<128x64xf32>
    %c1_303 = arith.constant 1 : index
    %c0_304 = arith.constant 0 : index
    %c0_305 = arith.constant 0 : index
    %368 = vector.load %arg16[%c1_303, %c0_304, %c0_305] : memref<3x64x32xf32, #tpu.memory_space<vmem>>, vector<1x64x32xf32>
    %369 = vector.shape_cast %368 : vector<1x64x32xf32> to vector<64x32xf32>
    %cst_306 = arith.constant dense<0.000000e+00> : vector<64x32xf32>
    %370 = tpu.matmul %359, %369, %cst_306 {dimension_numbers = #tpu.dot_dimension_numbers<[1], [0], [0], [1], [0, 0, 1, 1], [], []>} : vector<64x64xf32>, vector<64x32xf32>, vector<64x32xf32> -> vector<64x32xf32>
    %cst_307 = arith.constant dense<0.000000e+00> : vector<128x32xf32>
    %371 = tpu.matmul %367, %370, %cst_307 {dimension_numbers = #tpu.dot_dimension_numbers<[1], [0], [0], [1], [0, 0, 1, 1], [], []>} : vector<128x64xf32>, vector<64x32xf32>, vector<128x32xf32> -> vector<128x32xf32>
    %372 = arith.addf %365, %371 : vector<128x32xf32>
    %c2_308 = arith.constant 2 : index
    %c0_309 = arith.constant 0 : index
    %c0_310 = arith.constant 0 : index
    %373 = vector.load %arg30[%c2_308, %c0_309, %c0_310] : memref<3x128x64xf32, #tpu.memory_space<vmem>>, vector<1x128x64xf32>
    %374 = vector.shape_cast %373 : vector<1x128x64xf32> to vector<128x64xf32>
    %c2_311 = arith.constant 2 : index
    %c0_312 = arith.constant 0 : index
    %c0_313 = arith.constant 0 : index
    %375 = vector.load %arg16[%c2_311, %c0_312, %c0_313] : memref<3x64x32xf32, #tpu.memory_space<vmem>>, vector<1x64x32xf32>
    %376 = vector.shape_cast %375 : vector<1x64x32xf32> to vector<64x32xf32>
    %cst_314 = arith.constant dense<0.000000e+00> : vector<64x32xf32>
    %377 = tpu.matmul %359, %376, %cst_314 {dimension_numbers = #tpu.dot_dimension_numbers<[1], [0], [0], [1], [0, 0, 1, 1], [], []>} : vector<64x64xf32>, vector<64x32xf32>, vector<64x32xf32> -> vector<64x32xf32>
    %cst_315 = arith.constant dense<0.000000e+00> : vector<128x32xf32>
    %378 = tpu.matmul %374, %377, %cst_315 {dimension_numbers = #tpu.dot_dimension_numbers<[1], [0], [0], [1], [0, 0, 1, 1], [], []>} : vector<128x64xf32>, vector<64x32xf32>, vector<128x32xf32> -> vector<128x32xf32>
    %379 = arith.addf %372, %378 : vector<128x32xf32>
    %cst_316 = arith.constant dense<0.000000e+00> : vector<32xf32>
    %380 = vector.multi_reduction <add>, %379, %cst_316 [0] : vector<128x32xf32> to vector<32xf32>
    %381 = vector.shape_cast %380 : vector<32xf32> to vector<1x32xf32>
    %cst_317 = arith.constant 1.280000e+02 : f32
    %382 = vector.broadcast %cst_317 : f32 to vector<1x32xf32>
    %383 = arith.divf %381, %382 : vector<1x32xf32>
    %384 = vector.broadcast %383 : vector<1x32xf32> to vector<128x32xf32>
    %385 = arith.subf %379, %384 : vector<128x32xf32>
    %386 = arith.mulf %385, %385 : vector<128x32xf32>
    %cst_318 = arith.constant dense<0.000000e+00> : vector<32xf32>
    %387 = vector.multi_reduction <add>, %386, %cst_318 [0] : vector<128x32xf32> to vector<32xf32>
    %388 = vector.shape_cast %387 : vector<32xf32> to vector<1x32xf32>
    %cst_319 = arith.constant 1.280000e+02 : f32
    %389 = vector.broadcast %cst_319 : f32 to vector<1x32xf32>
    %390 = arith.divf %388, %389 : vector<1x32xf32>
    %391 = vector.broadcast %383 : vector<1x32xf32> to vector<128x32xf32>
    %392 = arith.subf %379, %391 : vector<128x32xf32>
    %cst_320 = arith.constant 9.99999974E-6 : f32
    %393 = vector.broadcast %cst_320 : f32 to vector<1x32xf32>
    %394 = arith.addf %390, %393 : vector<1x32xf32>
    %395 = math.rsqrt %394 : vector<1x32xf32>
    %396 = vector.broadcast %395 : vector<1x32xf32> to vector<128x32xf32>
    %397 = arith.mulf %392, %396 : vector<128x32xf32>
    %c0_321 = arith.constant 0 : index
    %c0_322 = arith.constant 0 : index
    %398 = vector.load %arg20[%c0_321, %c0_322] : memref<1x32xf32, #tpu.memory_space<vmem>>, vector<1x32xf32>
    %399 = vector.broadcast %398 : vector<1x32xf32> to vector<128x32xf32>
    %400 = arith.mulf %397, %399 : vector<128x32xf32>
    %c0_323 = arith.constant 0 : index
    %c0_324 = arith.constant 0 : index
    %401 = vector.load %arg21[%c0_323, %c0_324] : memref<1x32xf32, #tpu.memory_space<vmem>>, vector<1x32xf32>
    %402 = vector.broadcast %401 : vector<1x32xf32> to vector<128x32xf32>
    %403 = arith.addf %400, %402 : vector<128x32xf32>
    %cst_325 = arith.constant 0.000000e+00 : f32
    %404 = vector.broadcast %cst_325 : f32 to vector<128x32xf32>
    %405 = arith.cmpf oge, %403, %404 : vector<128x32xf32>
    %cst_326 = arith.constant 0.00999999977 : f32
    %406 = vector.broadcast %cst_326 : f32 to vector<128x32xf32>
    %407 = arith.mulf %406, %403 : vector<128x32xf32>
    %408 = arith.select %405, %403, %407 : vector<128x32xi1>, vector<128x32xf32>
    %c0_327 = arith.constant 0 : index
    %c0_328 = arith.constant 0 : index
    %c0_329 = arith.constant 0 : index
    %409 = vector.load %arg31[%c0_327, %c0_328, %c0_329] : memref<3x256x128xf32, #tpu.memory_space<vmem>>, vector<1x256x128xf32>
    %410 = vector.shape_cast %409 : vector<1x256x128xf32> to vector<256x128xf32>
    %c0_330 = arith.constant 0 : index
    %c0_331 = arith.constant 0 : index
    %c0_332 = arith.constant 0 : index
    %411 = vector.load %arg17[%c0_330, %c0_331, %c0_332] : memref<3x32x32xf32, #tpu.memory_space<vmem>>, vector<1x32x32xf32>
    %412 = vector.shape_cast %411 : vector<1x32x32xf32> to vector<32x32xf32>
    %cst_333 = arith.constant dense<0.000000e+00> : vector<128x32xf32>
    %413 = tpu.matmul %408, %412, %cst_333 {dimension_numbers = #tpu.dot_dimension_numbers<[1], [0], [0], [1], [0, 0, 1, 1], [], []>} : vector<128x32xf32>, vector<32x32xf32>, vector<128x32xf32> -> vector<128x32xf32>
    %cst_334 = arith.constant dense<0.000000e+00> : vector<256x32xf32>
    %414 = tpu.matmul %410, %413, %cst_334 {dimension_numbers = #tpu.dot_dimension_numbers<[1], [0], [0], [1], [0, 0, 1, 1], [], []>} : vector<256x128xf32>, vector<128x32xf32>, vector<256x32xf32> -> vector<256x32xf32>
    %c1_335 = arith.constant 1 : index
    %c0_336 = arith.constant 0 : index
    %c0_337 = arith.constant 0 : index
    %415 = vector.load %arg31[%c1_335, %c0_336, %c0_337] : memref<3x256x128xf32, #tpu.memory_space<vmem>>, vector<1x256x128xf32>
    %416 = vector.shape_cast %415 : vector<1x256x128xf32> to vector<256x128xf32>
    %c1_338 = arith.constant 1 : index
    %c0_339 = arith.constant 0 : index
    %c0_340 = arith.constant 0 : index
    %417 = vector.load %arg17[%c1_338, %c0_339, %c0_340] : memref<3x32x32xf32, #tpu.memory_space<vmem>>, vector<1x32x32xf32>
    %418 = vector.shape_cast %417 : vector<1x32x32xf32> to vector<32x32xf32>
    %cst_341 = arith.constant dense<0.000000e+00> : vector<128x32xf32>
    %419 = tpu.matmul %408, %418, %cst_341 {dimension_numbers = #tpu.dot_dimension_numbers<[1], [0], [0], [1], [0, 0, 1, 1], [], []>} : vector<128x32xf32>, vector<32x32xf32>, vector<128x32xf32> -> vector<128x32xf32>
    %cst_342 = arith.constant dense<0.000000e+00> : vector<256x32xf32>
    %420 = tpu.matmul %416, %419, %cst_342 {dimension_numbers = #tpu.dot_dimension_numbers<[1], [0], [0], [1], [0, 0, 1, 1], [], []>} : vector<256x128xf32>, vector<128x32xf32>, vector<256x32xf32> -> vector<256x32xf32>
    %421 = arith.addf %414, %420 : vector<256x32xf32>
    %c2_343 = arith.constant 2 : index
    %c0_344 = arith.constant 0 : index
    %c0_345 = arith.constant 0 : index
    %422 = vector.load %arg31[%c2_343, %c0_344, %c0_345] : memref<3x256x128xf32, #tpu.memory_space<vmem>>, vector<1x256x128xf32>
    %423 = vector.shape_cast %422 : vector<1x256x128xf32> to vector<256x128xf32>
    %c2_346 = arith.constant 2 : index
    %c0_347 = arith.constant 0 : index
    %c0_348 = arith.constant 0 : index
    %424 = vector.load %arg17[%c2_346, %c0_347, %c0_348] : memref<3x32x32xf32, #tpu.memory_space<vmem>>, vector<1x32x32xf32>
    %425 = vector.shape_cast %424 : vector<1x32x32xf32> to vector<32x32xf32>
    %cst_349 = arith.constant dense<0.000000e+00> : vector<128x32xf32>
    %426 = tpu.matmul %408, %425, %cst_349 {dimension_numbers = #tpu.dot_dimension_numbers<[1], [0], [0], [1], [0, 0, 1, 1], [], []>} : vector<128x32xf32>, vector<32x32xf32>, vector<128x32xf32> -> vector<128x32xf32>
    %cst_350 = arith.constant dense<0.000000e+00> : vector<256x32xf32>
    %427 = tpu.matmul %423, %426, %cst_350 {dimension_numbers = #tpu.dot_dimension_numbers<[1], [0], [0], [1], [0, 0, 1, 1], [], []>} : vector<256x128xf32>, vector<128x32xf32>, vector<256x32xf32> -> vector<256x32xf32>
    %428 = arith.addf %421, %427 : vector<256x32xf32>
    %cst_351 = arith.constant dense<0.000000e+00> : vector<32xf32>
    %429 = vector.multi_reduction <add>, %428, %cst_351 [0] : vector<256x32xf32> to vector<32xf32>
    %430 = vector.shape_cast %429 : vector<32xf32> to vector<1x32xf32>
    %cst_352 = arith.constant 2.560000e+02 : f32
    %431 = vector.broadcast %cst_352 : f32 to vector<1x32xf32>
    %432 = arith.divf %430, %431 : vector<1x32xf32>
    %433 = vector.broadcast %432 : vector<1x32xf32> to vector<256x32xf32>
    %434 = arith.subf %428, %433 : vector<256x32xf32>
    %435 = arith.mulf %434, %434 : vector<256x32xf32>
    %cst_353 = arith.constant dense<0.000000e+00> : vector<32xf32>
    %436 = vector.multi_reduction <add>, %435, %cst_353 [0] : vector<256x32xf32> to vector<32xf32>
    %437 = vector.shape_cast %436 : vector<32xf32> to vector<1x32xf32>
    %cst_354 = arith.constant 2.560000e+02 : f32
    %438 = vector.broadcast %cst_354 : f32 to vector<1x32xf32>
    %439 = arith.divf %437, %438 : vector<1x32xf32>
    %440 = vector.broadcast %432 : vector<1x32xf32> to vector<256x32xf32>
    %441 = arith.subf %428, %440 : vector<256x32xf32>
    %cst_355 = arith.constant 9.99999974E-6 : f32
    %442 = vector.broadcast %cst_355 : f32 to vector<1x32xf32>
    %443 = arith.addf %439, %442 : vector<1x32xf32>
    %444 = math.rsqrt %443 : vector<1x32xf32>
    %445 = vector.broadcast %444 : vector<1x32xf32> to vector<256x32xf32>
    %446 = arith.mulf %441, %445 : vector<256x32xf32>
    %c0_356 = arith.constant 0 : index
    %c0_357 = arith.constant 0 : index
    %447 = vector.load %arg22[%c0_356, %c0_357] : memref<1x32xf32, #tpu.memory_space<vmem>>, vector<1x32xf32>
    %448 = vector.broadcast %447 : vector<1x32xf32> to vector<256x32xf32>
    %449 = arith.mulf %446, %448 : vector<256x32xf32>
    %c0_358 = arith.constant 0 : index
    %c0_359 = arith.constant 0 : index
    %450 = vector.load %arg23[%c0_358, %c0_359] : memref<1x32xf32, #tpu.memory_space<vmem>>, vector<1x32xf32>
    %451 = vector.broadcast %450 : vector<1x32xf32> to vector<256x32xf32>
    %452 = arith.addf %449, %451 : vector<256x32xf32>
    %cst_360 = arith.constant 0.000000e+00 : f32
    %453 = vector.broadcast %cst_360 : f32 to vector<256x32xf32>
    %454 = arith.cmpf oge, %452, %453 : vector<256x32xf32>
    %cst_361 = arith.constant 0.00999999977 : f32
    %455 = vector.broadcast %cst_361 : f32 to vector<256x32xf32>
    %456 = arith.mulf %455, %452 : vector<256x32xf32>
    %457 = arith.select %454, %452, %456 : vector<256x32xi1>, vector<256x32xf32>
    %c0_362 = arith.constant 0 : index
    %c0_363 = arith.constant 0 : index
    %c0_364 = arith.constant 0 : index
    %458 = vector.load %arg32[%c0_362, %c0_363, %c0_364] : memref<3x256x256xf32, #tpu.memory_space<vmem>>, vector<1x256x256xf32>
    %459 = vector.shape_cast %458 : vector<1x256x256xf32> to vector<256x256xf32>
    %cst_365 = arith.constant dense<0.000000e+00> : vector<256x32xf32>
    %460 = tpu.matmul %459, %457, %cst_365 {dimension_numbers = #tpu.dot_dimension_numbers<[1], [0], [0], [1], [0, 0, 1, 1], [], []>} : vector<256x256xf32>, vector<256x32xf32>, vector<256x32xf32> -> vector<256x32xf32>
    %c0_366 = arith.constant 0 : index
    %c0_367 = arith.constant 0 : index
    %c0_368 = arith.constant 0 : index
    %461 = vector.load %arg24[%c0_366, %c0_367, %c0_368] : memref<3x1x32xf32, #tpu.memory_space<vmem>>, vector<1x1x32xf32>
    %462 = vector.shape_cast %461 : vector<1x1x32xf32> to vector<1x32xf32>
    %463 = vector.broadcast %462 : vector<1x32xf32> to vector<256x32xf32>
    %464 = arith.mulf %460, %463 : vector<256x32xf32>
    %cst_369 = arith.constant dense<0.000000e+00> : vector<256xf32>
    %465 = vector.multi_reduction <add>, %464, %cst_369 [1] : vector<256x32xf32> to vector<256xf32>
    %466 = vector.shape_cast %465 : vector<256xf32> to vector<256x1xf32>
    %c1_370 = arith.constant 1 : index
    %c0_371 = arith.constant 0 : index
    %c0_372 = arith.constant 0 : index
    %467 = vector.load %arg32[%c1_370, %c0_371, %c0_372] : memref<3x256x256xf32, #tpu.memory_space<vmem>>, vector<1x256x256xf32>
    %468 = vector.shape_cast %467 : vector<1x256x256xf32> to vector<256x256xf32>
    %cst_373 = arith.constant dense<0.000000e+00> : vector<256x32xf32>
    %469 = tpu.matmul %468, %457, %cst_373 {dimension_numbers = #tpu.dot_dimension_numbers<[1], [0], [0], [1], [0, 0, 1, 1], [], []>} : vector<256x256xf32>, vector<256x32xf32>, vector<256x32xf32> -> vector<256x32xf32>
    %c1_374 = arith.constant 1 : index
    %c0_375 = arith.constant 0 : index
    %c0_376 = arith.constant 0 : index
    %470 = vector.load %arg24[%c1_374, %c0_375, %c0_376] : memref<3x1x32xf32, #tpu.memory_space<vmem>>, vector<1x1x32xf32>
    %471 = vector.shape_cast %470 : vector<1x1x32xf32> to vector<1x32xf32>
    %472 = vector.broadcast %471 : vector<1x32xf32> to vector<256x32xf32>
    %473 = arith.mulf %469, %472 : vector<256x32xf32>
    %cst_377 = arith.constant dense<0.000000e+00> : vector<256xf32>
    %474 = vector.multi_reduction <add>, %473, %cst_377 [1] : vector<256x32xf32> to vector<256xf32>
    %475 = vector.shape_cast %474 : vector<256xf32> to vector<256x1xf32>
    %476 = arith.addf %466, %475 : vector<256x1xf32>
    %c2_378 = arith.constant 2 : index
    %c0_379 = arith.constant 0 : index
    %c0_380 = arith.constant 0 : index
    %477 = vector.load %arg32[%c2_378, %c0_379, %c0_380] : memref<3x256x256xf32, #tpu.memory_space<vmem>>, vector<1x256x256xf32>
    %478 = vector.shape_cast %477 : vector<1x256x256xf32> to vector<256x256xf32>
    %cst_381 = arith.constant dense<0.000000e+00> : vector<256x32xf32>
    %479 = tpu.matmul %478, %457, %cst_381 {dimension_numbers = #tpu.dot_dimension_numbers<[1], [0], [0], [1], [0, 0, 1, 1], [], []>} : vector<256x256xf32>, vector<256x32xf32>, vector<256x32xf32> -> vector<256x32xf32>
    %c2_382 = arith.constant 2 : index
    %c0_383 = arith.constant 0 : index
    %c0_384 = arith.constant 0 : index
    %480 = vector.load %arg24[%c2_382, %c0_383, %c0_384] : memref<3x1x32xf32, #tpu.memory_space<vmem>>, vector<1x1x32xf32>
    %481 = vector.shape_cast %480 : vector<1x1x32xf32> to vector<1x32xf32>
    %482 = vector.broadcast %481 : vector<1x32xf32> to vector<256x32xf32>
    %483 = arith.mulf %479, %482 : vector<256x32xf32>
    %cst_385 = arith.constant dense<0.000000e+00> : vector<256xf32>
    %484 = vector.multi_reduction <add>, %483, %cst_385 [1] : vector<256x32xf32> to vector<256xf32>
    %485 = vector.shape_cast %484 : vector<256xf32> to vector<256x1xf32>
    %486 = arith.addf %476, %485 : vector<256x1xf32>
    %c0_386 = arith.constant 0 : index
    %c0_387 = arith.constant 0 : index
    %487 = vector.load %arg25[%c0_386, %c0_387] : memref<1x1xf32, #tpu.memory_space<vmem>>, vector<1x1xf32>
    %488 = vector.broadcast %487 : vector<1x1xf32> to vector<256x1xf32>
    %489 = arith.addf %486, %488 : vector<256x1xf32>
    %c0_388 = arith.constant 0 : index
    %c0_389 = arith.constant 0 : index
    %490 = vector.load %arg35[%c0_388, %c0_389] : memref<4x256xf32, #tpu.memory_space<vmem>>, vector<4x256xf32>
    %c0_390 = arith.constant 0 : index
    %c0_391 = arith.constant 0 : index
    %491 = vector.load %arg36[%c0_390, %c0_391] : memref<256x60xf32, #tpu.memory_space<vmem>>, vector<256x60xf32>
    %492 = vector.broadcast %489 : vector<256x1xf32> to vector<256x60xf32>
    %493 = arith.mulf %492, %491 : vector<256x60xf32>
    %cst_392 = arith.constant dense<0.000000e+00> : vector<4x60xf32>
    %494 = tpu.matmul %490, %493, %cst_392 {dimension_numbers = #tpu.dot_dimension_numbers<[1], [0], [0], [1], [0, 0, 1, 1], [], []>} : vector<4x256xf32>, vector<256x60xf32>, vector<4x60xf32> -> vector<4x60xf32>
    %c0_393 = arith.constant 0 : index
    %c0_394 = arith.constant 0 : index
    %495 = vector.load %arg37[%c0_393, %c0_394] : memref<4x60xf32, #tpu.memory_space<vmem>>, vector<4x60xf32>
    tpu.vector_store %arg37[%c0_393, %c0_394], %494 {strides = array<i32>} : memref<4x60xf32, #tpu.memory_space<vmem>>, vector<4x60xf32>,
    return
  }
}

</mosaic_0001>

<bundles_post_ra>
// kernel: fwd.1
= control target key start
LH: loop header
LB: loop body
LE: loop exit
PB: predicated region body
PF: predicated region fallthrough
CT: control target
= control target key end

     0   :  { %s16347_s6 = smov 1   ;;  %s16348_s10 = smov 2   ;;  %s19208_s0 = inlined_call_operand.smem [shape: u32[40], index: -1, kind: input, shape index: {}] }
   0x1   :  { %s16429_s5 = sld [smem:[%s19208_s0]]   ;;  %s16349_s14 = smov 3  }
   0x2   :  { %s16434_s9 = sld [smem:[%s19208_s0 + %s16347_s6]]   ;;  %s16350_s18 = smov 4  }
   0x3   :  { %s16439_s13 = sld [smem:[%s19208_s0 + %s16348_s10]]   ;;  %s16351_s22 = smov 5  }
   0x4   :  { %s16444_s17 = sld [smem:[%s19208_s0 + %s16349_s14]]   ;;  %s16352_s26 = smov 6  }
   0x5   :  { %s16449_s21 = sld [smem:[%s19208_s0 + %s16350_s18]]   ;;  %s16353_s30 = smov 7  }
   0x6   :  { %s16454_s25 = sld [smem:[%s19208_s0 + %s16351_s22]]   ;;  %s16354_s4 = smov 8  }
   0x7   :  { %19216 = sst [smem:[#allocation49_spill]] %s16429_s5  ;;  %s16355_s10 = smov 9  }
   0x8   :  { %s16459_s29 = sld [smem:[%s19208_s0 + %s16352_s26]]   ;;  %s16356_s15 = smov 10  }
   0x9   :  { %s16464_s3 = sld [smem:[%s19208_s0 + %s16353_s30]]   ;;  %s16357_s20 = smov 11  }
   0xa   :  { %s16469_s8 = sld [smem:[%s19208_s0 + %s16354_s4]]   ;;  %s16358_s26 = smov 12  }
   0xb   :  { %s16474_s14 = sld [smem:[%s19208_s0 + %s16355_s10]]   ;;  %s16359_s1 = smov 13  }
   0xc   :  { %19217 = sst [smem:[#allocation50_spill]] %s16454_s25  ;;  %s16360_s7 = smov 14  }
   0xd   :  { %s16479_s19 = sld [smem:[%s19208_s0 + %s16356_s15]]   ;;  %s16361_s15 = smov 15  }
   0xe   :  { %19218 = sst [smem:[#allocation51_spill]] %s16459_s29  ;;  %s16362_s22 = smov 16  }
   0xf   :  { %19219 = sst [smem:[#allocation52_spill]] %s16464_s3  ;;  %s16363_s28 = smov 17  }
  0x10   :  { %19220 = sst [smem:[#allocation53_spill]] %s16469_s8  ;;  %s16372_s10 = smov 26  }
  0x11   :  { %19221 = sst [smem:[#allocation54_spill]] %s16474_s14  ;;  %s16373_s16 = smov 27  }
  0x12   :  { %s16484_s24 = sld [smem:[%s19208_s0 + %s16357_s20]]   ;;  %s16374_s23 = smov 28  }
  0x13   :  { %19222 = sst [smem:[#allocation55_spill]] %s16479_s19 }
  0x14   :  { %s16489_s30 = sld [smem:[%s19208_s0 + %s16358_s26]]  }
  0x15   :  { %s16494_s6 = sld [smem:[%s19208_s0 + %s16359_s1]]   ;;  %s16375_s1 = smov 29  }
  0x16   :  { %s16499_s12 = sld [smem:[%s19208_s0 + %s16360_s7]]   ;;  %s16364_s7 = smov 18  }
  0x17   :  { %s16504_s20 = sld [smem:[%s19208_s0 + %s16361_s15]]   ;;  %s16365_s15 = smov 19  }
  0x18   :  { %s16509_s27 = sld [smem:[%s19208_s0 + %s16362_s22]]   ;;  %s16366_s22 = smov 20  }
  0x19   :  { %s16514_s4 = sld [smem:[%s19208_s0 + %s16363_s28]]   ;;  %s16367_s28 = smov 21  }
  0x1a   :  { %19223 = sst [smem:[#allocation56_spill]] %s16489_s30 }
  0x1b   :  { %s16519_s30 = sld [smem:[%s19208_s0 + %s16364_s7]]   ;;  %s16368_s7 = smov 22  }
  0x1c   :  { %s16524_s19 = sld [smem:[%s19208_s0 + %s16365_s15]]   ;;  %s16369_s15 = smov 23  }
  0x1d   :  { %s16529_s14 = sld [smem:[%s19208_s0 + %s16366_s22]]   ;;  %s16370_s22 = smov 24  }
  0x1e   :  { %s16534_s8 = sld [smem:[%s19208_s0 + %s16367_s28]]   ;;  %s16371_s28 = smov 25  }
  0x1f   :  { %s16567_s3 = sld [smem:[%s19208_s0 + %s16374_s23]]   ;;  %s16378_s23 = smov 32  }
  0x20   :  { %s16572_s29 = sld [smem:[%s19208_s0 + %s16375_s1]]   ;;  %s16379_s1 = smov 33  }
  0x21   :  { %19224 = sst [smem:[#allocation57_spill]] %s16519_s30 }
  0x22   :  { %19225 = sst [smem:[#allocation58_spill]] %s16524_s19 }
  0x23   :  { %19226 = sst [smem:[#allocation59_spill]] %s16529_s14 }
  0x24   :  { %19227 = sst [smem:[#allocation60_spill]] %s16534_s8 }
  0x25   :  { %s16539_s30 = sld [smem:[%s19208_s0 + %s16368_s7]]   ;;  %s16380_s7 = smov 34  }
  0x26   :  { %s16544_s19 = sld [smem:[%s19208_s0 + %s16369_s15]]  }
  0x27   :  { %s16549_s14 = sld [smem:[%s19208_s0 + %s16370_s22]]  }
  0x28   :  { %s11625_s8 = sld [smem:[%s19208_s0 + %s16371_s28]]  }
  0x29   :  { %19232 = sst [smem:[#allocation65_spill]] %s16567_s3  ;;  %s16383_s3 = smov 37  }
  0x2a   :  { %s16587_s28 = sld [smem:[%s19208_s0 + %s16378_s23]]   ;;  %s16382_s23 = smov 36  }
  0x2b   :  { %19228 = sst [smem:[#allocation61_spill]] %s16539_s30 }
  0x2c   :  { %19229 = sst [smem:[#allocation62_spill]] %s16544_s19 }
  0x2d   :  { %19230 = sst [smem:[#allocation63_spill]] %s16549_s14 }
  0x2e   :  { %s16557_s30 = sld [smem:[%s19208_s0 + %s16372_s10]]   ;;  %s16376_s10 = smov 30   ;;  %v85_v0 = vstv %s11625_s8 }
  0x2f   :  { %s16562_s19 = sld [smem:[%s19208_s0 + %s16373_s16]]   ;;  %s16377_s16 = smov 31   ;;  %86 = vst [vmem:[#allocation2] sm:$0x1] %v85_v0 }
  0x30   :  { %s16577_s25 = sld [smem:[%s19208_s0 + %s16376_s10]]   ;;  %s16381_s8 = smov 35  }
  0x31   :  { %s16582_s5 = sld [smem:[%s19208_s0 + %s16377_s16]]  }
  0x32   :  { %19234 = sst [smem:[#allocation67_spill]] %s16587_s28 }
  0x33   :  { %s16592_s10 = sld [smem:[%s19208_s0 + %s16379_s1]]  }
  0x34   :  { %s16597_s16 = sld [smem:[%s19208_s0 + %s16380_s7]]  }
  0x35   :  { %19231 = sst [smem:[#allocation64_spill]] %s16562_s19 }
  0x36   :  { %19233 = sst [smem:[#allocation66_spill]] %s16577_s25  ;;  %s16384_s25 = smov 38  }
  0x37   :  { %s16602_s22 = sld [smem:[%s19208_s0 + %s16381_s8]]   ;;  %s16385_s8 = smov 39  }
  0x38   :  { %s16607_s19 = sld [smem:[%s19208_s0 + %s16382_s23]]  }
  0x39   :  { %s16612_s14 = sld [smem:[%s19208_s0 + %s16383_s3]]  }
  0x3a   :  { %19235 = sst [smem:[#allocation68_spill]] %s16597_s16 }
  0x3b   :  { %s16617_s16 = sld [smem:[%s19208_s0 + %s16384_s25]]  }
  0x3d   :  { %19236 = sst [smem:[#allocation69_spill]] %s16602_s22 }
  0x3e   :  { %s16622_s22 = sld [smem:[%s19208_s0 + %s16385_s8]]  }
  0x3f   :  { %87 = vsyncpa [#allocation4], 0 }
  0x40   :  { %88 = vsyncpa [#allocation7], 0 }
  0x41   :  { %89 = vsyncpa [#allocation10], 0 }
  0x42   :  { %90 = vsyncpa [#allocation13], 0 }
  0x43   :  { %91 = vsyncpa [#allocation16], 0 }
  0x44   :  { %92 = vsyncpa [#allocation19], 0 }
  0x45   :  { %93 = vsyncpa [#allocation22], 0 }
  0x46   :  { %94 = vsyncpa [#allocation25], 0 }
  0x47   :  { %95 = vsyncpa [#allocation28], 0 }
  0x48   :  { %96 = vsyncpa [#allocation31], 0 }
  0x49   :  { %97 = vsyncpa [#allocation5], 0 }
  0x4a   :  { %98 = vsyncpa [#allocation35], 0  ;;  %s16386_s28 = smov [#allocation6]   ;;  %s15839_s0 = scalar_lea.hbm %s16439_s13, 48 }
  0x4b   :  { %s116_s23 = sshll.u32 %s16386_s28, 4  ;;  %p15840_p0 = scmp.ne.s32.totalorder %s16439_s13, %s15839_s0  ;;  %s117_s23 = int_to_ptr.vmem [resolvable:$true] %s116_s23 }
  0x4c   :  { %p15843_p1 = scmp.lt.u32.totalorder %s15839_s0, %s16439_s13 }
  0x4e   :  { %p15845_p2 = pnand %p15843_p1, %p15840_p0 }
  0x50   :  { %15848 = shalt.err (!%p15845_p2)
}
  0x51   :  { %s15849_s26 = scalar_lea.vmem %s117_s23, 48  ;;  %s15853_s3 = scalar_lea.vmem %s117_s23, 64 }
  0x52   :  { %p15850_p3 = scmp.ne.s32.totalorder %s117_s23, %s15849_s26  ;;  %p15854_p4 = scmp.lt.s32.totalorder %s117_s23, %s117_s23 }
  0x53   :  { %p15855_p5 = scmp.lt.s32.totalorder %s15853_s3, %s15849_s26 }
  0x55   :  { %p15856_p6 = por %p15855_p5, %p15854_p4 }
  0x57   :  { %p15857_p7 = pnand %p15856_p6, %p15850_p3 }
  0x59   :  { %15860 = shalt.err (!%p15857_p7)
}
  0x5a   :  { %s16387_s1 = smov 16   ;;  %s16388_s2 = smov 1  }
  0x5b   :  { %122 = dma.hbm_to_vmem [thread:$0]  %s16439_s13, 48, %s117_s23, [#allocation7], %s16387_s1, %s16387_s1, %s16388_s2  }
  0x5c   :  { %s16389_s25 = smov [#allocation9]   ;;  %s16390_s11 = smov [#allocation12]  }
  0x5d   :  { %s140_s7 = sshll.u32 %s16389_s25, 4  ;;  %s178_s8 = sshll.u32 %s16390_s11, 4  ;;  %s141_s7 = int_to_ptr.vmem [resolvable:$true] %s140_s7  ;;  %s179_s8 = int_to_ptr.vmem [resolvable:$true] %s178_s8 }
  0x5e   :  { %s15861_s15 = scalar_lea.hbm %s16449_s21, 3072 }
  0x5f   :  { %p15862_p8 = scmp.ne.s32.totalorder %s16449_s21, %s15861_s15  ;;  %p15865_p9 = scmp.lt.u32.totalorder %s15861_s15, %s16449_s21 }
  0x61   :  { %p15867_p10 = pnand %p15865_p9, %p15862_p8 }
  0x63   :  { %15870 = shalt.err (!%p15867_p10)
}
  0x64   :  { %s15871_s18 = scalar_lea.vmem %s141_s7, 3072  ;;  %p15876_p12 = scmp.lt.s32.totalorder %s141_s7, %s141_s7 }
  0x65   :  { %p15872_p11 = scmp.ne.s32.totalorder %s141_s7, %s15871_s18  ;;  %p15877_p13 = scmp.lt.s32.totalorder %s15871_s18, %s15871_s18 }
  0x67   :  { %p15878_p0 = por %p15877_p13, %p15876_p12 }
  0x69   :  { %p15879_p1 = pnand %p15878_p0, %p15872_p11 }
  0x6b   :  { %15882 = shalt.err (!%p15879_p1)
}
  0x6c   :  { %s16391_s28 = smov 128   ;;  %s16392_s13 = smov 8  }
  0x6d   :  { %146 = dma.hbm_to_vmem [thread:$0]  %s16449_s21, 3072, %s141_s7, [#allocation10], %s16391_s28, %s16391_s28, %s16392_s13  }
  0x6e   :  { %s15883_s23 = scalar_lea.hbm %s16494_s6, 2048 }
  0x6f   :  { %p15884_p2 = scmp.ne.s32.totalorder %s16494_s6, %s15883_s23  ;;  %p15887_p3 = scmp.lt.u32.totalorder %s15883_s23, %s16494_s6 }
  0x71   :  { %p15889_p4 = pnand %p15887_p3, %p15884_p2 }
  0x73   :  { %15892 = shalt.err (!%p15889_p4)
}
  0x74   :  { %s15893_s0 = scalar_lea.vmem %s179_s8, 2048  ;;  %p15898_p6 = scmp.lt.s32.totalorder %s179_s8, %s179_s8 }
  0x75   :  { %p15894_p5 = scmp.ne.s32.totalorder %s179_s8, %s15893_s0  ;;  %p15899_p7 = scmp.lt.s32.totalorder %s15893_s0, %s15893_s0 }
  0x77   :  { %p15900_p8 = por %p15899_p7, %p15898_p6 }
  0x79   :  { %p15901_p9 = pnand %p15900_p8, %p15894_p5 }
  0x7b   :  { %15904 = shalt.err (!%p15901_p9)
}
  0x7c   :  { %184 = dma.hbm_to_vmem [thread:$0]  %s16494_s6, 2048, %s179_s8, [#allocation13], %s16391_s28, %s16391_s28, %s16392_s13  }
  0x7d   :  { %s16393_s21 = smov [#allocation15]   ;;  %s16394_s3 = smov [#allocation18]  }
  0x7e   :  { %s202_s26 = sshll.u32 %s16393_s21, 4  ;;  %s226_s25 = sshll.u32 %s16394_s3, 4  ;;  %s203_s26 = int_to_ptr.vmem [resolvable:$true] %s202_s26  ;;  %s227_s25 = int_to_ptr.vmem [resolvable:$true] %s226_s25 }
  0x7f   :  { %s15905_s7 = scalar_lea.hbm %s16504_s20, 6144 }
  0x80   :  { %p15906_p10 = scmp.ne.s32.totalorder %s16504_s20, %s15905_s7  ;;  %p15909_p11 = scmp.lt.u32.totalorder %s15905_s7, %s16504_s20 }
  0x82   :  { %p15911_p12 = pnand %p15909_p11, %p15906_p10 }
  0x84   :  { %15914 = shalt.err (!%p15911_p12)
}
  0x85   :  { %s15915_s11 = scalar_lea.vmem %s203_s26, 6144  ;;  %p15920_p0 = scmp.lt.s32.totalorder %s203_s26, %s203_s26 }
  0x86   :  { %p15916_p13 = scmp.ne.s32.totalorder %s203_s26, %s15915_s11  ;;  %p15921_p1 = scmp.lt.s32.totalorder %s15915_s11, %s15915_s11 }
  0x88   :  { %p15922_p2 = por %p15921_p1, %p15920_p0 }
  0x8a   :  { %p15923_p3 = pnand %p15922_p2, %p15916_p13 }
  0x8c   :  { %15926 = shalt.err (!%p15923_p3)
}
  0x8d   :  { %208 = dma.hbm_to_vmem [thread:$0]  %s16504_s20, 6144, %s203_s26, [#allocation16], %s16391_s28, %s16391_s28, %s16392_s13  }
  0x8e   :  { %s15927_s6 = scalar_lea.hbm %s16514_s4, 1536 }
  0x8f   :  { %p15928_p4 = scmp.ne.s32.totalorder %s16514_s4, %s15927_s6  ;;  %p15931_p5 = scmp.lt.u32.totalorder %s15927_s6, %s16514_s4 }
  0x91   :  { %p15933_p6 = pnand %p15931_p5, %p15928_p4 }
  0x93   :  { %15936 = shalt.err (!%p15933_p6)
}
  0x94   :  { %s15937_s8 = scalar_lea.vmem %s227_s25, 1536  ;;  %p15942_p8 = scmp.lt.s32.totalorder %s227_s25, %s227_s25 }
  0x95   :  { %p15938_p7 = scmp.ne.s32.totalorder %s227_s25, %s15937_s8  ;;  %p15943_p9 = scmp.lt.s32.totalorder %s15937_s8, %s15937_s8 }
  0x97   :  { %p15944_p10 = por %p15943_p9, %p15942_p8 }
  0x99   :  { %p15945_p11 = pnand %p15944_p10, %p15938_p7 }
  0x9b   :  { %15948 = shalt.err (!%p15945_p11)
}
  0x9c   :  { %232 = dma.hbm_to_vmem [thread:$0]  %s16514_s4, 1536, %s227_s25, [#allocation19], %s16391_s28, %s16391_s28, %s16392_s13  }
  0x9d   :  { %s16395_s20 = smov [#allocation21]   ;;  %s15949_s18 = scalar_lea.hbm %s16557_s30, 11520 }
  0x9e   :  { %s264_s15 = sshll.u32 %s16395_s20, 4  ;;  %p15950_p12 = scmp.ne.s32.totalorder %s16557_s30, %s15949_s18  ;;  %s265_s15 = int_to_ptr.vmem [resolvable:$true] %s264_s15 }
  0x9f   :  { %p15953_p13 = scmp.lt.u32.totalorder %s15949_s18, %s16557_s30 }
  0xa1   :  { %p15955_p0 = pnand %p15953_p13, %p15950_p12 }
  0xa3   :  { %15958 = shalt.err (!%p15955_p0)
}
  0xa4   :  { %s15959_s23 = scalar_lea.vmem %s265_s15, 11520  ;;  %p15964_p2 = scmp.lt.s32.totalorder %s265_s15, %s265_s15 }
  0xa5   :  { %p15960_p1 = scmp.ne.s32.totalorder %s265_s15, %s15959_s23  ;;  %p15965_p3 = scmp.lt.s32.totalorder %s15959_s23, %s15959_s23 }
  0xa7   :  { %p15966_p4 = por %p15965_p3, %p15964_p2 }
  0xa9   :  { %p15967_p5 = pnand %p15966_p4, %p15960_p1 }
  0xab   :  { %15970 = shalt.err (!%p15967_p5)
}
  0xac   :  { %s16396_s0 = smov 256   ;;  %s16397_s4 = smov [#allocation24]  }
  0xad   :  { %270 = dma.hbm_to_vmem [thread:$0]  %s16557_s30, 11520, %s265_s15, [#allocation22], %s16396_s0, %s16396_s0, %s16387_s1  }
  0xae   :  { %s290_s21 = sshll.u32 %s16397_s4, 4  ;;  %s16398_s26 = smov [#allocation27]   ;;  %s291_s21 = int_to_ptr.vmem [resolvable:$true] %s290_s21 }
  0xaf   :  { %s314_s3 = sshll.u32 %s16398_s26, 4  ;;  %s15971_s25 = scalar_lea.hbm %s16572_s29, 3072  ;;  %s315_s3 = int_to_ptr.vmem [resolvable:$true] %s314_s3 }
  0xb0   :  { %p15972_p6 = scmp.ne.s32.totalorder %s16572_s29, %s15971_s25  ;;  %p15975_p7 = scmp.lt.u32.totalorder %s15971_s25, %s16572_s29 }
  0xb2   :  { %p15977_p8 = pnand %p15975_p7, %p15972_p6 }
  0xb4   :  { %15980 = shalt.err (!%p15977_p8)
}
  0xb5   :  { %s15981_s7 = scalar_lea.vmem %s291_s21, 3072  ;;  %p15986_p10 = scmp.lt.s32.totalorder %s291_s21, %s291_s21 }
  0xb6   :  { %p15982_p9 = scmp.ne.s32.totalorder %s291_s21, %s15981_s7  ;;  %p15987_p11 = scmp.lt.s32.totalorder %s15981_s7, %s15981_s7 }
  0xb8   :  { %p15988_p12 = por %p15987_p11, %p15986_p10 }
  0xba   :  { %p15989_p13 = pnand %p15988_p12, %p15982_p9 }
  0xbc   :  { %15992 = shalt.err (!%p15989_p13)
}
  0xbd   :  { %296 = dma.hbm_to_vmem [thread:$0]  %s16572_s29, 3072, %s291_s21, [#allocation25], %s16391_s28, %s16391_s28, %s16392_s13  }
  0xbe   :  { %s15993_s30 = scalar_lea.hbm %s16582_s5, 12288 }
  0xbf   :  { %p15994_p0 = scmp.ne.s32.totalorder %s16582_s5, %s15993_s30  ;;  %p15997_p1 = scmp.lt.u32.totalorder %s15993_s30, %s16582_s5 }
  0xc1   :  { %p15999_p2 = pnand %p15997_p1, %p15994_p0 }
  0xc3   :  { %16002 = shalt.err (!%p15999_p2)
}
  0xc4   :  { %s16003_s11 = scalar_lea.vmem %s315_s3, 12288  ;;  %p16008_p4 = scmp.lt.s32.totalorder %s315_s3, %s315_s3 }
  0xc5   :  { %p16004_p3 = scmp.ne.s32.totalorder %s315_s3, %s16003_s11  ;;  %p16009_p5 = scmp.lt.s32.totalorder %s16003_s11, %s16003_s11 }
  0xc7   :  { %p16010_p6 = por %p16009_p5, %p16008_p4 }
  0xc9   :  { %p16011_p7 = pnand %p16010_p6, %p16004_p3 }
  0xcb   :  { %16014 = shalt.err (!%p16011_p7)
}
  0xcc   :  { %320 = dma.hbm_to_vmem [thread:$0]  %s16582_s5, 12288, %s315_s3, [#allocation28], %s16391_s28, %s16391_s28, %s16392_s13  }
  0xcd   :  { %s16399_s29 = smov [#allocation30]   ;;  %s16015_s8 = scalar_lea.hbm %s16592_s10, 512 }
  0xce   :  { %s338_s6 = sshll.u32 %s16399_s29, 4  ;;  %p16016_p8 = scmp.ne.s32.totalorder %s16592_s10, %s16015_s8  ;;  %s339_s6 = int_to_ptr.vmem [resolvable:$true] %s338_s6 }
  0xcf   :  { %p16019_p9 = scmp.lt.u32.totalorder %s16015_s8, %s16592_s10 }
  0xd1   :  { %p16021_p10 = pnand %p16019_p9, %p16016_p8 }
  0xd3   :  { %16024 = shalt.err (!%p16021_p10)
}
  0xd4   :  { %s16025_s20 = scalar_lea.vmem %s339_s6, 512  ;;  %p16030_p12 = scmp.lt.s32.totalorder %s339_s6, %s339_s6 }
  0xd5   :  { %p16026_p11 = scmp.ne.s32.totalorder %s339_s6, %s16025_s20  ;;  %p16031_p13 = scmp.lt.s32.totalorder %s16025_s20, %s16025_s20 }
  0xd7   :  { %p16032_p0 = por %p16031_p13, %p16030_p12 }
  0xd9   :  { %p16033_p1 = pnand %p16032_p0, %p16026_p11 }
  0xdb   :  { %16036 = shalt.err (!%p16033_p1)
}
  0xdc   :  { %s16400_s15 = smov 64   ;;  %s16401_s5 = smov 4  }
  0xdd   :  { %344 = dma.hbm_to_vmem [thread:$0]  %s16592_s10, 512, %s339_s6, [#allocation31], %s16400_s15, %s16400_s15, %s16401_s5  }
  0xde   :  { %s16402_s18 = smov [#allocation3]   ;;  %s16403_s4 = smov [#allocation8]  }
  0xdf   :  { %s107_s23 = sshll.u32 %s16402_s18, 4  ;;  %s128_s21 = sshll.u32 %s16403_s4, 4  ;;  %s108_s23 = int_to_ptr.vmem [resolvable:$true] %s107_s23  ;;  %s16684_s21 = int_to_ptr.vmem [resolvable:$true] %s128_s21 }
  0xe0   :  { %s16037_s26 = scalar_lea.hbm %s16434_s9, 64 }
  0xe1   :  { %p16038_p2 = scmp.ne.s32.totalorder %s16434_s9, %s16037_s26  ;;  %p16041_p3 = scmp.lt.u32.totalorder %s16037_s26, %s16434_s9 }
  0xe3   :  { %p16043_p4 = pnand %p16041_p3, %p16038_p2 }
  0xe5   :  { %16046 = shalt.err (!%p16043_p4)
}
  0xe6   :  { %s16047_s3 = scalar_lea.vmem %s108_s23, 64  ;;  %p16052_p6 = scmp.lt.s32.totalorder %s108_s23, %s108_s23 }
  0xe7   :  { %p16048_p5 = scmp.ne.s32.totalorder %s108_s23, %s16047_s3  ;;  %p16053_p7 = scmp.lt.s32.totalorder %s16047_s3, %s16047_s3 }
  0xe9   :  { %p16054_p8 = por %p16053_p7, %p16052_p6 }
  0xeb   :  { %p16055_p9 = pnand %p16054_p8, %p16048_p5 }
  0xed   :  { %16058 = shalt.err (!%p16055_p9)
}
  0xee   :  { %110 = dma.hbm_to_vmem [thread:$0]  %s16434_s9, 64, %s108_s23, [#allocation4]  }
  0xef   :  { %s16059_s10 = scalar_lea.hbm %s16444_s17, 1536 }
  0xf0   :  { %p16060_p10 = scmp.ne.s32.totalorder %s16444_s17, %s16059_s10  ;;  %p16063_p11 = scmp.lt.u32.totalorder %s16059_s10, %s16444_s17 }
  0xf2   :  { %p16065_p12 = pnand %p16063_p11, %p16060_p10 }
  0xf4   :  { %16068 = shalt.err (!%p16065_p12)
}
  0xf5   :  { %s16069_s25 = scalar_lea.vmem %s16684_s21, 1536  ;;  %p16074_p0 = scmp.lt.s32.totalorder %s16684_s21, %s16684_s21 }
  0xf6   :  { %p16070_p13 = scmp.ne.s32.totalorder %s16684_s21, %s16069_s25  ;;  %p16075_p1 = scmp.lt.s32.totalorder %s16069_s25, %s16069_s25 }
  0xf8   :  { %p16076_p2 = por %p16075_p1, %p16074_p0 }
  0xfa   :  { %p16077_p3 = pnand %p16076_p2, %p16070_p13 }
  0xfc   :  { %16080 = shalt.err (!%p16077_p3)
}
  0xfd   :  { %134 = dma.hbm_to_vmem [thread:$0]  %s16444_s17, 1536, %s16684_s21, [#allocation7], %s16391_s28, %s16391_s28, %s16392_s13  }
  0xfe   :  { %s16404_s9 = smov [#allocation11]   ;;  %s16405_s30 = smov [#allocation14]  }
  0xff   :  { %s164_s7 = sshll.u32 %s16404_s9, 4  ;;  %s190_s11 = sshll.u32 %s16405_s30, 4  ;;  %s165_s7 = int_to_ptr.vmem [resolvable:$true] %s164_s7  ;;  %s16702_s11 = int_to_ptr.vmem [resolvable:$true] %s190_s11 }
 0x100   :  { %s16081_s29 = scalar_lea.hbm %s16484_s24, 16384 }
 0x101   :  { %p16082_p4 = scmp.ne.s32.totalorder %s16484_s24, %s16081_s29  ;;  %p16085_p5 = scmp.lt.u32.totalorder %s16081_s29, %s16484_s24 }
 0x103   :  { %p16087_p6 = pnand %p16085_p5, %p16082_p4 }
 0x105   :  { %16090 = shalt.err (!%p16087_p6)
}
 0x106   :  { %s16091_s6 = scalar_lea.vmem %s165_s7, 16384  ;;  %p16096_p8 = scmp.lt.s32.totalorder %s165_s7, %s165_s7 }
 0x107   :  { %p16092_p7 = scmp.ne.s32.totalorder %s165_s7, %s16091_s6  ;;  %p16097_p9 = scmp.lt.s32.totalorder %s16091_s6, %s16091_s6 }
 0x109   :  { %p16098_p10 = por %p16097_p9, %p16096_p8 }
 0x10b   :  { %p16099_p11 = pnand %p16098_p10, %p16092_p7 }
 0x10d   :  { %16102 = shalt.err (!%p16099_p11)
}
 0x10e   :  { %170 = dma.hbm_to_vmem [thread:$0]  %s16484_s24, 16384, %s165_s7, [#allocation10], %s16391_s28, %s16391_s28, %s16392_s13  }
 0x10f   :  { %s16103_s17 = scalar_lea.hbm %s16499_s12, 128 }
 0x110   :  { %p16104_p12 = scmp.ne.s32.totalorder %s16499_s12, %s16103_s17  ;;  %p16107_p13 = scmp.lt.u32.totalorder %s16103_s17, %s16499_s12 }
 0x112   :  { %p16109_p0 = pnand %p16107_p13, %p16104_p12 }
 0x114   :  { %16112 = shalt.err (!%p16109_p0)
}
 0x115   :  { %s16113_s8 = scalar_lea.vmem %s16702_s11, 128  ;;  %p16118_p2 = scmp.lt.s32.totalorder %s16702_s11, %s16702_s11 }
 0x116   :  { %p16114_p1 = scmp.ne.s32.totalorder %s16702_s11, %s16113_s8  ;;  %p16119_p3 = scmp.lt.s32.totalorder %s16113_s8, %s16113_s8 }
 0x118   :  { %p16120_p4 = por %p16119_p3, %p16118_p2 }
 0x11a   :  { %p16121_p5 = pnand %p16120_p4, %p16114_p1 }
 0x11c   :  { %16124 = shalt.err (!%p16121_p5)
}
 0x11d   :  { %196 = dma.hbm_to_vmem [thread:$0]  %s16499_s12, 128, %s16702_s11, [#allocation13], %s16387_s1, %s16387_s1, %s16388_s2  }
 0x11e   :  { %s16406_s24 = smov [#allocation17]   ;;  %s16407_s15 = smov [#allocation20]  }
 0x11f   :  { %s214_s20 = sshll.u32 %s16406_s24, 4  ;;  %s250_s5 = sshll.u32 %s16407_s15, 4  ;;  %s215_s20 = int_to_ptr.vmem [resolvable:$true] %s214_s20  ;;  %s16723_s5 = int_to_ptr.vmem [resolvable:$true] %s250_s5 }
 0x120   :  { %s16125_s18 = scalar_lea.hbm %s16509_s27, 3072 }
 0x121   :  { %p16126_p6 = scmp.ne.s32.totalorder %s16509_s27, %s16125_s18  ;;  %p16129_p7 = scmp.lt.u32.totalorder %s16125_s18, %s16509_s27 }
 0x123   :  { %p16131_p8 = pnand %p16129_p7, %p16126_p6 }
 0x125   :  { %16134 = shalt.err (!%p16131_p8)
}
 0x126   :  { %s16135_s23 = scalar_lea.vmem %s215_s20, 3072  ;;  %p16140_p10 = scmp.lt.s32.totalorder %s215_s20, %s215_s20 }
 0x127   :  { %p16136_p9 = scmp.ne.s32.totalorder %s215_s20, %s16135_s23  ;;  %p16141_p11 = scmp.lt.s32.totalorder %s16135_s23, %s16135_s23 }
 0x129   :  { %p16142_p12 = por %p16141_p11, %p16140_p10 }
 0x12b   :  { %p16143_p13 = pnand %p16142_p12, %p16136_p9 }
 0x12d   :  { %16146 = shalt.err (!%p16143_p13)
}
 0x12e   :  { %s19237_s12 = sld [smem:[#allocation63_spill]] }
 0x12f   :  { %220 = dma.hbm_to_vmem [thread:$0]  %s16509_s27, 3072, %s215_s20, [#allocation16], %s16391_s28, %s16391_s28, %s16392_s13  }
 0x134   :  { %s16147_s4 = scalar_lea.hbm %s19237_s12, 48 }
 0x135   :  { %p16148_p0 = scmp.ne.s32.totalorder %s19237_s12, %s16147_s4  ;;  %p16151_p1 = scmp.lt.u32.totalorder %s16147_s4, %s19237_s12 }
 0x137   :  { %p16153_p2 = pnand %p16151_p1, %p16148_p0 }
 0x139   :  { %16156 = shalt.err (!%p16153_p2)
}
 0x13a   :  { %s16157_s21 = scalar_lea.vmem %s16723_s5, 48  ;;  %s16161_s26 = scalar_lea.vmem %s16723_s5, 64 }
 0x13b   :  { %p16158_p3 = scmp.ne.s32.totalorder %s16723_s5, %s16157_s21  ;;  %p16162_p4 = scmp.lt.s32.totalorder %s16723_s5, %s16723_s5 }
 0x13c   :  { %p16163_p5 = scmp.lt.s32.totalorder %s16161_s26, %s16157_s21 }
 0x13e   :  { %p16164_p6 = por %p16163_p5, %p16162_p4 }
 0x140   :  { %p16165_p7 = pnand %p16164_p6, %p16158_p3 }
 0x142   :  { %16168 = shalt.err (!%p16165_p7)
}
 0x143   :  { %s19238_s27 = sld [smem:[#allocation64_spill]]  ;;  %s16408_s3 = smov [#allocation23]  }
 0x144   :  { %256 = dma.hbm_to_vmem [thread:$0]  %s19237_s12, 48, %s16723_s5, [#allocation19], %s16387_s1, %s16387_s1, %s16388_s2  }
 0x145   :  { %s276_s10 = sshll.u32 %s16408_s3, 4  ;;  %s16409_s25 = smov [#allocation26]   ;;  %s277_s10 = int_to_ptr.vmem [resolvable:$true] %s276_s10 }
 0x146   :  { %s302_s9 = sshll.u32 %s16409_s25, 4  ;;  %s16745_s9 = int_to_ptr.vmem [resolvable:$true] %s302_s9 }
 0x149   :  { %s16169_s7 = scalar_lea.hbm %s19238_s27, 3072 }
 0x14a   :  { %p16170_p8 = scmp.ne.s32.totalorder %s19238_s27, %s16169_s7  ;;  %p16173_p9 = scmp.lt.u32.totalorder %s16169_s7, %s19238_s27 }
 0x14c   :  { %p16175_p10 = pnand %p16173_p9, %p16170_p8 }
 0x14e   :  { %16178 = shalt.err (!%p16175_p10)
}
 0x14f   :  { %s16179_s30 = scalar_lea.vmem %s277_s10, 3072  ;;  %p16184_p12 = scmp.lt.s32.totalorder %s277_s10, %s277_s10 }
 0x150   :  { %p16180_p11 = scmp.ne.s32.totalorder %s277_s10, %s16179_s30  ;;  %p16185_p13 = scmp.lt.s32.totalorder %s16179_s30, %s16179_s30 }
 0x152   :  { %p16186_p0 = por %p16185_p13, %p16184_p12 }
 0x154   :  { %p16187_p1 = pnand %p16186_p0, %p16180_p11 }
 0x156   :  { %16190 = shalt.err (!%p16187_p1)
}
 0x157   :  { %s19239_s2 = sld [smem:[#allocation66_spill]] }
 0x158   :  { %282 = dma.hbm_to_vmem [thread:$0]  %s19238_s27, 3072, %s277_s10, [#allocation22], %s16391_s28, %s16391_s28, %s16392_s13  }
 0x15d   :  { %s16191_s11 = scalar_lea.hbm %s19239_s2, 6144 }
 0x15e   :  { %p16192_p2 = scmp.ne.s32.totalorder %s19239_s2, %s16191_s11  ;;  %p16195_p3 = scmp.lt.u32.totalorder %s16191_s11, %s19239_s2 }
 0x160   :  { %p16197_p4 = pnand %p16195_p3, %p16192_p2 }
 0x162   :  { %16200 = shalt.err (!%p16197_p4)
}
 0x163   :  { %s16201_s29 = scalar_lea.vmem %s16745_s9, 6144  ;;  %p16206_p6 = scmp.lt.s32.totalorder %s16745_s9, %s16745_s9 }
 0x164   :  { %p16202_p5 = scmp.ne.s32.totalorder %s16745_s9, %s16201_s29  ;;  %p16207_p7 = scmp.lt.s32.totalorder %s16201_s29, %s16201_s29 }
 0x166   :  { %p16208_p8 = por %p16207_p7, %p16206_p6 }
 0x168   :  { %p16209_p9 = pnand %p16208_p8, %p16202_p5 }
 0x16a   :  { %16212 = shalt.err (!%p16209_p9)
}
 0x16b   :  { %s19240_s6 = sld [smem:[#allocation67_spill]]  ;;  %s16410_s17 = smov [#allocation29]  }
 0x16c   :  { %308 = dma.hbm_to_vmem [thread:$0]  %s19239_s2, 6144, %s16745_s9, [#allocation25], %s16391_s28, %s16391_s28, %s16392_s13  }
 0x16d   :  { %s326_s8 = sshll.u32 %s16410_s17, 4  ;;  %s16411_s24 = smov [#allocation32]   ;;  %s327_s8 = int_to_ptr.vmem [resolvable:$true] %s326_s8 }
 0x16e   :  { %s350_s20 = sshll.u32 %s16411_s24, 4  ;;  %s16766_s20 = int_to_ptr.vmem [resolvable:$true] %s350_s20 }
 0x171   :  { %s16213_s15 = scalar_lea.hbm %s19240_s6, 24576 }
 0x172   :  { %p16214_p10 = scmp.ne.s32.totalorder %s19240_s6, %s16213_s15  ;;  %p16217_p11 = scmp.lt.u32.totalorder %s16213_s15, %s19240_s6 }
 0x174   :  { %p16219_p12 = pnand %p16217_p11, %p16214_p10 }
 0x176   :  { %16222 = shalt.err (!%p16219_p12)
}
 0x177   :  { %s16223_s5 = scalar_lea.vmem %s327_s8, 24576  ;;  %p16228_p0 = scmp.lt.s32.totalorder %s327_s8, %s327_s8 }
 0x178   :  { %p16224_p13 = scmp.ne.s32.totalorder %s327_s8, %s16223_s5  ;;  %p16229_p1 = scmp.lt.s32.totalorder %s16223_s5, %s16223_s5 }
 0x17a   :  { %p16230_p2 = por %p16229_p1, %p16228_p0 }
 0x17c   :  { %p16231_p3 = pnand %p16230_p2, %p16224_p13 }
 0x17e   :  { %16234 = shalt.err (!%p16231_p3)
}
 0x17f   :  { %s19241_s18 = sld [smem:[#allocation68_spill]] }
 0x180   :  { %332 = dma.hbm_to_vmem [thread:$0]  %s19240_s6, 24576, %s327_s8, [#allocation28], %s16396_s0, %s16396_s0, %s16387_s1  }
 0x185   :  { %s16235_s23 = scalar_lea.hbm %s19241_s18, 4096 }
 0x186   :  { %p16236_p4 = scmp.ne.s32.totalorder %s19241_s18, %s16235_s23  ;;  %p16239_p5 = scmp.lt.u32.totalorder %s16235_s23, %s19241_s18 }
 0x188   :  { %p16241_p6 = pnand %p16239_p5, %p16236_p4 }
 0x18a   :  { %16244 = shalt.err (!%p16241_p6)
}
 0x18b   :  { %s16245_s12 = scalar_lea.vmem %s16766_s20, 4096  ;;  %p16250_p8 = scmp.lt.s32.totalorder %s16766_s20, %s16766_s20 }
 0x18c   :  { %p16246_p7 = scmp.ne.s32.totalorder %s16766_s20, %s16245_s12  ;;  %p16251_p9 = scmp.lt.s32.totalorder %s16245_s12, %s16245_s12 }
 0x18e   :  { %p16252_p10 = por %p16251_p9, %p16250_p8 }
 0x190   :  { %p16253_p11 = pnand %p16252_p10, %p16246_p7 }
 0x192   :  { %16256 = shalt.err (!%p16253_p11)
}
 0x193   :  { %356 = dma.hbm_to_vmem [thread:$0]  %s19241_s18, 4096, %s16766_s20, [#allocation31], %s16391_s28, %s16391_s28, %s16392_s13  }
 0x194   :  { %16323 = dma.done.wait [#allocation4], 64  }
 0x195   :  { %16324 = vsyncadd [#allocation4], 4294967232 }
 0x196   :  { %16325 = dma.done.wait [#allocation7], 1584  }
 0x197   :  { %16326 = vsyncadd [#allocation7], 4294965712 }
 0x198   :  { %16327 = dma.done.wait [#allocation10], 19456  }
 0x199   :  { %16328 = vsyncadd [#allocation10], 4294947840 }
 0x19a   :  { %16329 = dma.done.wait [#allocation13], 2176  }
 0x19b   :  { %16330 = vsyncadd [#allocation13], 4294965120 }
 0x19c   :  { %16331 = dma.done.wait [#allocation16], 9216  }
 0x19d   :  { %16332 = vsyncadd [#allocation16], 4294958080 }
 0x19e   :  { %16333 = dma.done.wait [#allocation19], 1584  }
 0x19f   :  { %16334 = vsyncadd [#allocation19], 4294965712 }
 0x1a0   :  { %16335 = dma.done.wait [#allocation22], 14592  }
 0x1a1   :  { %16336 = vsyncadd [#allocation22], 4294952704 }
 0x1a2   :  { %16337 = dma.done.wait [#allocation25], 9216  }
 0x1a3   :  { %16338 = vsyncadd [#allocation25], 4294958080 }
 0x1a4   :  { %16339 = dma.done.wait [#allocation28], 36864  }
 0x1a5   :  { %16340 = vsyncadd [#allocation28], 4294930432 }
 0x1a6   :  { %16341 = dma.done.wait [#allocation31], 4608  }
 0x1a7   :  { %16342 = vsyncadd [#allocation31], 4294962688  ;;  %s19242_s1 = sld [smem:[#allocation49_spill]]  ;;  %v16412_v1 = vmov 0   ;;  %v16413_v8 = vmov 0.0|0.0   ;;  %v667_v33 = vld [vmem:[#allocation21 + $0xf8] sm:$0xff] }
 0x1a8   :  { %15823 = vset.pattern.permute.xlu1 %v16412_v1  ;;  %15822 = vset.pattern.permute.xlu0 %v16412_v1  ;;  %vm734_vm0 = vcmask 916480   ;;  %v16823_v36 = vld [vmem:[#allocation6 + $0x1] ss:$0 sm:$0xff]  ;;  %vm1374_vm1 = vcmask 261120   ;;  %vm1592_vm2 = vcmask 982016   ;;  %s19243_s28 = sld [smem:[#allocation50_spill]] }
 0x1a9   :  { %14388 = vmatprep.subr.bf16.mxu0 %v16413_v8  ;;  %11642 = vmatprep.mubr.msk.f32.mxu0 %vm734_vm0, %v667_v33  ;;  %s19244_s13 = sld [smem:[#allocation51_spill]]  ;;  %s19245_s0 = sld [smem:[#allocation65_spill]] }
 0x1aa   :  { %s19246_s4 = sld [smem:[#allocation52_spill]]  ;;  %s19247_s21 = sld [smem:[#allocation53_spill]] }
 0x1ab   :  { %s19250_s26 = sld [smem:[#allocation54_spill]]  ;;  %s19251_s27 = sld [smem:[#allocation55_spill]] }
 0x1ac   :  { %s19252_s3 = sld [smem:[#allocation56_spill]]  ;;  %s16417_s10 = smov 112  }
 0x1ad   :  { %v420_v2 = vld [vmem:[%s19242_s1 + $0x10] sm:$0xff]  ;;  %v418_v3 = vld [vmem:[%s19242_s1] sm:$0xff]  ;;  %v421_v4 = vld [vmem:[%s19242_s1 + $0x18] sm:$0xff]  ;;  %s19253_s25 = sld [smem:[#allocation57_spill]]  ;;  %s19254_s9 = sld [smem:[#allocation58_spill]] }
 0x1ae   :  { %491 = vperm.xlu1 %15823, %v420_v2   ;;  %481 = vperm.xlu0 %15822, %v418_v3   ;;  %v419_v5 = vld [vmem:[%s19242_s1 + $0x8] sm:$0xff]  ;;  %v422_v7 = vld [vmem:[%s19242_s1 + $0x20] sm:$0xff]  ;;  %v425_v9 = vld [vmem:[%s19242_s1 + $0x38] sm:$0xff]  ;;  %s19255_s7 = sld [smem:[#allocation59_spill]]  ;;  %s19256_s30 = sld [smem:[#allocation60_spill]] }
 0x1af   :  { %v423_v6 = vld [vmem:[%s19242_s1 + $0x28] sm:$0xff]  ;;  %v424_v10 = vld [vmem:[%s19242_s1 + $0x30] sm:$0xff]  ;;  %v426_v12 = vld [vmem:[%s19242_s1 + $0x40] sm:$0xff]  ;;  %s19257_s2 = sld [smem:[#allocation61_spill]]  ;;  %s19258_s11 = sld [smem:[#allocation62_spill]] }
 0x1b0   :  { %v427_v11 = vld [vmem:[%s19242_s1 + $0x48] sm:$0xff]  ;;  %v429_v13 = vld [vmem:[%s19242_s1 + $0x58] sm:$0xff]  ;;  %v428_v14 = vld [vmem:[%s19242_s1 + $0x50] sm:$0xff]  ;;  %s19259_s29 = sld [smem:[#allocation69_spill]]  ;;  %s16418_s6 = smov [#allocation34]  }
 0x1b1   :  { %v431_v15 = vld [vmem:[%s19242_s1 + $0x68] sm:$0xff]  ;;  %v430_v16 = vld [vmem:[%s19242_s1 + $0x60] sm:$0xff]  ;;  %v433_v17 = vld [vmem:[%s19242_s1 + $0x78] sm:$0xff]  ;;  %s11566_s17 = sshll.u32 %s16418_s6, 4  ;;  %s11567_s17 = int_to_ptr.vmem [resolvable:$true] %s11566_s17 }
 0x1b2   :  { %496 = vperm.xlu1 %15823, %v421_v4   ;;  %486 = vperm.xlu0 %15822, %v419_v5   ;;  %v432_v18 = vld [vmem:[%s19242_s1 + $0x70] sm:$0xff]  ;;  %v435_v19 = vld [vmem:[%s19242_s1 + $0x88] sm:$0xff]  ;;  %v434_v20 = vld [vmem:[%s19242_s1 + $0x80] sm:$0xff]  ;;  %s16257_s8 = scalar_lea.vmem %s11567_s17, 64  ;;  %p16262_p13 = scmp.lt.s32.totalorder %s11567_s17, %s11567_s17 }
 0x1b3   :  { %v437_v21 = vld [vmem:[%s19242_s1 + $0x98] sm:$0xff]  ;;  %v436_v22 = vld [vmem:[%s19242_s1 + $0x90] sm:$0xff]  ;;  %v439_v23 = vld [vmem:[%s19242_s1 + $0xa8] sm:$0xff]  ;;  %p16258_p12 = scmp.ne.s32.totalorder %s11567_s17, %s16257_s8  ;;  %p16263_p0 = scmp.lt.s32.totalorder %s16257_s8, %s16257_s8 }
 0x1b4   :  { %v438_v24 = vld [vmem:[%s19242_s1 + $0xa0] sm:$0xff]  ;;  %v441_v25 = vld [vmem:[%s19242_s1 + $0xb8] sm:$0xff]  ;;  %v440_v26 = vld [vmem:[%s19242_s1 + $0xb0] sm:$0xff] }
 0x1b5   :  { %v443_v27 = vld [vmem:[%s19242_s1 + $0xc8] sm:$0xff]  ;;  %v442_v28 = vld [vmem:[%s19242_s1 + $0xc0] sm:$0xff]  ;;  %v445_v29 = vld [vmem:[%s19242_s1 + $0xd8] sm:$0xff]  ;;  %p16264_p1 = por %p16263_p0, %p16262_p13 }
 0x1b6   :  { %506 = vperm.xlu1 %15823, %v423_v6   ;;  %501 = vperm.xlu0 %15822, %v422_v7   ;;  %v444_v30 = vld [vmem:[%s19242_s1 + $0xd0] sm:$0xff]  ;;  %v447_v31 = vld [vmem:[%s19242_s1 + $0xe8] sm:$0xff]  ;;  %v446_v32 = vld [vmem:[%s19242_s1 + $0xe0] sm:$0xff] }
 0x1b7   :  { %p16265_p2 = pnand %p16264_p1, %p16258_p12 }
 0x1ba   :  { %516 = vperm.xlu1 %15823, %v425_v9   ;;  %511 = vperm.xlu0 %15822, %v424_v10  }
 0x1be   :  { %526 = vperm.xlu1 %15823, %v427_v11   ;;  %521 = vperm.xlu0 %15822, %v426_v12  }
 0x1c2   :  { %536 = vperm.xlu1 %15823, %v429_v13   ;;  %531 = vperm.xlu0 %15822, %v428_v14  }
 0x1c6   :  { %546 = vperm.xlu1 %15823, %v431_v15   ;;  %541 = vperm.xlu0 %15822, %v430_v16  }
 0x1ca   :  { %556 = vperm.xlu1 %15823, %v433_v17   ;;  %551 = vperm.xlu0 %15822, %v432_v18  }
 0x1ce   :  { %566 = vperm.xlu1 %15823, %v435_v19   ;;  %561 = vperm.xlu0 %15822, %v434_v20  }
 0x1d2   :  { %576 = vperm.xlu1 %15823, %v437_v21   ;;  %571 = vperm.xlu0 %15822, %v436_v22  }
 0x1d6   :  { %586 = vperm.xlu1 %15823, %v439_v23   ;;  %581 = vperm.xlu0 %15822, %v438_v24  }
 0x1da   :  { %596 = vperm.xlu1 %15823, %v441_v25   ;;  %591 = vperm.xlu0 %15822, %v440_v26  }
 0x1de   :  { %606 = vperm.xlu1 %15823, %v443_v27   ;;  %601 = vperm.xlu0 %15822, %v442_v28  }
 0x1e2   :  { %616 = vperm.xlu1 %15823, %v445_v29   ;;  %611 = vperm.xlu0 %15822, %v444_v30  }
 0x1e6   :  { %626 = vperm.xlu1 %15823, %v447_v31   ;;  %621 = vperm.xlu0 %15822, %v446_v32  }
 0x22d   :  { %v16819_v34 = vpop.permute.xlu1 %491  ;;  %v16821_v35 = vpop.permute.xlu0 %481 }
 0x22e   :  { %v704_v39 = vmul.f32 %v16823_v36, %v16821_v35  ;;  %v706_v41 = vmul.f32 %v16823_v36, %v16819_v34 }
 0x231   :  { %v16825_v37 = vpop.permute.xlu1 %496  ;;  %v16827_v38 = vpop.permute.xlu0 %486 }
 0x232   :  { %v705_v40 = vmul.f32 %v16823_v36, %v16827_v38  ;;  %v707_v42 = vmul.f32 %v16823_v36, %v16825_v37 }
 0x234   :  { %v14389_v45 = vpack.c.bf16 %v705_v40, %v704_v39  ;;  %v14392_v50 = vpack.c.bf16 %v707_v42, %v706_v41 }
 0x235   :  { %v16837_v43 = vpop.permute.xlu1 %506  ;;  %v16839_v44 = vpop.permute.xlu0 %501 }
 0x236   :  { %14390 = vmatpush1.bf16.msra.mxu0 %v14389_v45  ;;  %v709_v46 = vmul.f32 %v16823_v36, %v16837_v43  ;;  %v708_v47 = vmul.f32 %v16823_v36, %v16839_v44 }
 0x237   :  { %14391 = vmatprep.subr.bf16.mxu0 %v16413_v8 }
 0x238   :  { %v14395_v55 = vpack.c.bf16 %v709_v46, %v708_v47 }
 0x239   :  { %v16846_v48 = vpop.permute.xlu1 %516  ;;  %v16848_v49 = vpop.permute.xlu0 %511 }
 0x23a   :  { %14393 = vmatpush1.bf16.msra.mxu0 %v14392_v50  ;;  %v711_v51 = vmul.f32 %v16823_v36, %v16846_v48  ;;  %v710_v52 = vmul.f32 %v16823_v36, %v16848_v49 }
 0x23b   :  { %14394 = vmatprep.subr.bf16.mxu0 %v16413_v8 }
 0x23c   :  { %v14398_v60 = vpack.c.bf16 %v711_v51, %v710_v52 }
 0x23d   :  { %v16855_v53 = vpop.permute.xlu1 %526  ;;  %v16857_v54 = vpop.permute.xlu0 %521 }
 0x23e   :  { %14396 = vmatpush1.bf16.msra.mxu0 %v14395_v55  ;;  %v713_v56 = vmul.f32 %v16823_v36, %v16855_v53  ;;  %v712_v57 = vmul.f32 %v16823_v36, %v16857_v54 }
 0x23f   :  { %14397 = vmatprep.subr.bf16.mxu0 %v16413_v8 }
 0x240   :  { %v14401_v1 = vpack.c.bf16 %v713_v56, %v712_v57  ;;  %v16954_v57 = vld [vmem:[#allocation6] ss:$0 sm:$0xff] }
 0x241   :  { %v16864_v58 = vpop.permute.xlu1 %536  ;;  %v16866_v59 = vpop.permute.xlu0 %531 }
 0x242   :  { %14399 = vmatpush1.bf16.msra.mxu0 %v14398_v60  ;;  %v715_v61 = vmul.f32 %v16823_v36, %v16864_v58  ;;  %v714_v62 = vmul.f32 %v16823_v36, %v16866_v59  ;;  %v636_v60 = vmul.f32 %v16954_v57, %v16827_v38 }
 0x243   :  { %14400 = vmatprep.subr.bf16.mxu0 %v16413_v8 }
 0x244   :  { %v14404_v6 = vpack.c.bf16 %v715_v61, %v714_v62  ;;  %v635_v62 = vmul.f32 %v16954_v57, %v16821_v35 }
 0x245   :  { %v16873_v63 = vpop.permute.xlu1 %546  ;;  %v16875_v0 = vpop.permute.xlu0 %541 }
 0x246   :  { %14402 = vmatpush1.bf16.msra.mxu0 %v14401_v1  ;;  %v717_v2 = vmul.f32 %v16823_v36, %v16873_v63  ;;  %v716_v3 = vmul.f32 %v16823_v36, %v16875_v0  ;;  %v666_v1 = vld [vmem:[#allocation21 + $0xf0] sm:$0xff] }
 0x247   :  { %14403 = vmatprep.subr.bf16.mxu0 %v16413_v8 }
 0x248   :  { %v14407_v12 = vpack.c.bf16 %v717_v2, %v716_v3  ;;  %v669_v2 = vld [vmem:[#allocation21 + $0x108] sm:$0xff]  ;;  %v638_v3 = vmul.f32 %v16954_v57, %v16825_v37 }
 0x249   :  { %v16882_v4 = vpop.permute.xlu1 %556  ;;  %v16884_v5 = vpop.permute.xlu0 %551 }
 0x24a   :  { %14405 = vmatpush1.bf16.msra.mxu0 %v14404_v6  ;;  %v719_v7 = vmul.f32 %v16823_v36, %v16882_v4  ;;  %v718_v9 = vmul.f32 %v16823_v36, %v16884_v5  ;;  %v14434_v6 = vpack.c.bf16 %v636_v60, %v635_v62  ;;  %v681_v62 = vld [vmem:[#allocation21 + $0x168] sm:$0xff] }
 0x24b   :  { %14406 = vmatprep.subr.bf16.mxu0 %v16413_v8 }
 0x24c   :  { %v14410_v17 = vpack.c.bf16 %v719_v7, %v718_v9  ;;  %v668_v7 = vld [vmem:[#allocation21 + $0x100] sm:$0xff]  ;;  %v671_v9 = vld [vmem:[#allocation21 + $0x118] sm:$0xff] }
 0x24d   :  { %v16891_v10 = vpop.permute.xlu1 %566  ;;  %v16893_v11 = vpop.permute.xlu0 %561 }
 0x24e   :  { %14408 = vmatpush1.bf16.msra.mxu0 %v14407_v12  ;;  %v721_v13 = vmul.f32 %v16823_v36, %v16891_v10  ;;  %v720_v14 = vmul.f32 %v16823_v36, %v16893_v11  ;;  %v640_v12 = vmul.f32 %v16954_v57, %v16837_v43 }
 0x24f   :  { %14409 = vmatprep.subr.bf16.mxu0 %v16413_v8 }
 0x250   :  { %v14413_v22 = vpack.c.bf16 %v721_v13, %v720_v14  ;;  %v639_v13 = vmul.f32 %v16954_v57, %v16839_v44 }
 0x251   :  { %v16900_v15 = vpop.permute.xlu1 %576  ;;  %v16902_v16 = vpop.permute.xlu0 %571 }
 0x252   :  { %14411 = vmatpush1.bf16.msra.mxu0 %v14410_v17  ;;  %v723_v18 = vmul.f32 %v16823_v36, %v16900_v15  ;;  %v722_v19 = vmul.f32 %v16823_v36, %v16902_v16  ;;  %v670_v17 = vld [vmem:[#allocation21 + $0x110] sm:$0xff] }
 0x253   :  { %14412 = vmatprep.subr.bf16.mxu0 %v16413_v8 }
 0x254   :  { %v14416_v27 = vpack.c.bf16 %v723_v18, %v722_v19  ;;  %v673_v18 = vld [vmem:[#allocation21 + $0x128] sm:$0xff]  ;;  %v642_v19 = vmul.f32 %v16954_v57, %v16846_v48 }
 0x255   :  { %v16909_v20 = vpop.permute.xlu1 %586  ;;  %v16911_v21 = vpop.permute.xlu0 %581 }
 0x256   :  { %14414 = vmatpush1.bf16.msra.mxu0 %v14413_v22  ;;  %v725_v23 = vmul.f32 %v16823_v36, %v16909_v20  ;;  %v724_v24 = vmul.f32 %v16823_v36, %v16911_v21  ;;  %v641_v22 = vmul.f32 %v16954_v57, %v16848_v49 }
 0x257   :  { %14415 = vmatprep.subr.bf16.mxu0 %v16413_v8 }
 0x258   :  { %v14419_v32 = vpack.c.bf16 %v725_v23, %v724_v24  ;;  %v14440_v23 = vpack.c.bf16 %v640_v12, %v639_v13  ;;  %v672_v24 = vld [vmem:[#allocation21 + $0x120] sm:$0xff]  ;;  %v682_v13 = vld [vmem:[#allocation21 + $0x170] sm:$0xff] }
 0x259   :  { %v16918_v25 = vpop.permute.xlu1 %596  ;;  %v16920_v26 = vpop.permute.xlu0 %591 }
 0x25a   :  { %14417 = vmatpush1.bf16.msra.mxu0 %v14416_v27  ;;  %v727_v28 = vmul.f32 %v16823_v36, %v16918_v25  ;;  %v726_v29 = vmul.f32 %v16823_v36, %v16920_v26  ;;  %v675_v27 = vld [vmem:[#allocation21 + $0x138] sm:$0xff] }
 0x25b   :  { %14418 = vmatprep.subr.bf16.mxu0 %v16413_v8 }
 0x25c   :  { %v14422_v42 = vpack.c.bf16 %v727_v28, %v726_v29  ;;  %v644_v28 = vmul.f32 %v16954_v57, %v16855_v53  ;;  %v643_v29 = vmul.f32 %v16954_v57, %v16857_v54 }
 0x25d   :  { %v16927_v30 = vpop.permute.xlu1 %606  ;;  %v16929_v31 = vpop.permute.xlu0 %601 }
 0x25e   :  { %14420 = vmatpush1.bf16.msra.mxu0 %v14419_v32  ;;  %v729_v33 = vmul.f32 %v16823_v36, %v16927_v30  ;;  %v728_v39 = vmul.f32 %v16823_v36, %v16929_v31  ;;  %v14443_v32 = vpack.c.bf16 %v642_v19, %v641_v22  ;;  %v684_v22 = vld [vmem:[#allocation21 + $0x180] sm:$0xff] }
 0x25f   :  { %14421 = vmatprep.subr.bf16.mxu0 %v16413_v8 }
 0x260   :  { %v14425_v47 = vpack.c.bf16 %v729_v33, %v728_v39  ;;  %v674_v33 = vld [vmem:[#allocation21 + $0x130] sm:$0xff]  ;;  %v677_v39 = vld [vmem:[#allocation21 + $0x148] sm:$0xff] }
 0x261   :  { %v16936_v40 = vpop.permute.xlu1 %616  ;;  %v16938_v41 = vpop.permute.xlu0 %611 }
 0x262   :  { %14423 = vmatpush1.bf16.msra.mxu0 %v14422_v42  ;;  %v731_v45 = vmul.f32 %v16823_v36, %v16936_v40  ;;  %v730_v46 = vmul.f32 %v16823_v36, %v16938_v41  ;;  %v646_v42 = vmul.f32 %v16954_v57, %v16864_v58 }
 0x263   :  { %14424 = vmatprep.subr.bf16.mxu0 %v16413_v8 }
 0x264   :  { %v14428_v56 = vpack.c.bf16 %v731_v45, %v730_v46  ;;  %v645_v45 = vmul.f32 %v16954_v57, %v16866_v59  ;;  %v14446_v46 = vpack.c.bf16 %v644_v28, %v643_v29  ;;  %v686_v29 = vld [vmem:[#allocation21 + $0x190] sm:$0xff] }
 0x265   :  { %v16945_v50 = vpop.permute.xlu1 %626  ;;  %v16947_v51 = vpop.permute.xlu0 %621 }
 0x266   :  { %14426 = vmatpush1.bf16.msra.mxu0 %v14425_v47  ;;  %v733_v52 = vmul.f32 %v16823_v36, %v16945_v50  ;;  %v732_v55 = vmul.f32 %v16823_v36, %v16947_v51  ;;  %v637_v36 = vmul.f32 %v16954_v57, %v16819_v34  ;;  %v676_v47 = vld [vmem:[#allocation21 + $0x140] sm:$0xff]  ;;  %v14449_v60 = vpack.c.bf16 %v646_v42, %v645_v45 }
 0x267   :  { %14427 = vmatprep.subr.bf16.mxu0 %v16413_v8  ;;  %v688_v45 = vld [vmem:[#allocation21 + $0x1a0] sm:$0xff] }
 0x268   :  { %v14431_v61 = vpack.c.bf16 %v733_v52, %v732_v55  ;;  %v14437_v14 = vpack.c.bf16 %v638_v3, %v637_v36  ;;  %v679_v52 = vld [vmem:[#allocation21 + $0x158] sm:$0xff]  ;;  %v648_v55 = vmul.f32 %v16954_v57, %v16873_v63  ;;  %v680_v3 = vld [vmem:[#allocation21 + $0x160] sm:$0xff] }
 0x26a   :  { %14429 = vmatpush1.bf16.msra.mxu0 %v14428_v56  ;;  %v647_v56 = vmul.f32 %v16954_v57, %v16875_v0 }
 0x26b   :  { %14430 = vmatprep.subr.bf16.mxu0 %v16413_v8 }
 0x26c   :  { %v14452_v36 = vpack.c.bf16 %v648_v55, %v647_v56  ;;  %v690_v56 = vld [vmem:[#allocation21 + $0x1b0] sm:$0xff] }
 0x26e   :  { %14432 = vmatpush1.bf16.msra.mxu0 %v14431_v61  ;;  %v678_v61 = vld [vmem:[#allocation21 + $0x150] sm:$0xff] }
 0x26f   :  { %14433 = vmatprep.subr.bf16.mxu0 %v16413_v8 }
 0x271   :  { %845 = vmatmul.mubr.f32.vlgmr.msra.gmra.mrb[0].mxu0 %v666_v1  ;;  %v650_v1 = vmul.f32 %v16954_v57, %v16882_v4 }
 0x272   :  { %14435 = vmatpush1.bf16.msra.mxu0 %v14434_v6  ;;  %11643 = vmatprep.mubr.msk.f32.mxu0 %vm734_vm0, %v669_v2  ;;  %v649_v2 = vmul.f32 %v16954_v57, %v16884_v5  ;;  %v683_v6 = vld [vmem:[#allocation21 + $0x178] sm:$0xff] }
 0x273   :  { %14436 = vmatprep.subr.bf16.mxu0 %v16413_v8 }
 0x274   :  { %v14455_v12 = vpack.c.bf16 %v650_v1, %v649_v2  ;;  %v692_v2 = vld [vmem:[#allocation21 + $0x1c0] sm:$0xff] }
 0x275   :  { %850 = vmatmul.mubr.f32.gmra.mrb[2].mxu0 %v668_v7  ;;  %v652_v7 = vmul.f32 %v16954_v57, %v16891_v10 }
 0x276   :  { %14438 = vmatpush1.bf16.msra.mxu0 %v14437_v14  ;;  %11644 = vmatprep.mubr.msk.f32.mxu0 %vm734_vm0, %v671_v9  ;;  %v651_v9 = vmul.f32 %v16954_v57, %v16893_v11  ;;  %v685_v14 = vld [vmem:[#allocation21 + $0x188] sm:$0xff] }
 0x277   :  { %14439 = vmatprep.subr.bf16.mxu0 %v16413_v8 }
 0x278   :  { %v14458_v19 = vpack.c.bf16 %v652_v7, %v651_v9  ;;  %v694_v9 = vld [vmem:[#allocation21 + $0x1d0] sm:$0xff] }
 0x279   :  { %855 = vmatmul.mubr.f32.gmra.mrb[4].mxu0 %v670_v17  ;;  %v654_v17 = vmul.f32 %v16954_v57, %v16900_v15 }
 0x27a   :  { %14441 = vmatpush1.bf16.msra.mxu0 %v14440_v23  ;;  %11645 = vmatprep.mubr.msk.f32.mxu0 %vm734_vm0, %v673_v18  ;;  %v653_v18 = vmul.f32 %v16954_v57, %v16902_v16  ;;  %v687_v23 = vld [vmem:[#allocation21 + $0x198] sm:$0xff] }
 0x27b   :  { %14442 = vmatprep.subr.bf16.mxu0 %v16413_v8 }
 0x27c   :  { %v14461_v28 = vpack.c.bf16 %v654_v17, %v653_v18 }
 0x27d   :  { %860 = vmatmul.mubr.f32.gmra.mrb[6].mxu0 %v672_v24  ;;  %v656_v24 = vmul.f32 %v16954_v57, %v16909_v20 }
 0x27e   :  { %14444 = vmatpush1.bf16.msra.mxu0 %v14443_v32  ;;  %11646 = vmatprep.mubr.msk.f32.mxu0 %vm734_vm0, %v675_v27  ;;  %v655_v27 = vmul.f32 %v16954_v57, %v16911_v21  ;;  %v689_v32 = vld [vmem:[#allocation21 + $0x1a8] sm:$0xff] }
 0x27f   :  { %14445 = vmatprep.subr.bf16.mxu0 %v16413_v8 }
 0x280   :  { %v14464_v42 = vpack.c.bf16 %v656_v24, %v655_v27 }
 0x281   :  { %865 = vmatmul.mubr.f32.gmra.mrb[8].mxu0 %v674_v33  ;;  %v658_v33 = vmul.f32 %v16954_v57, %v16918_v25 }
 0x282   :  { %14447 = vmatpush1.bf16.msra.mxu0 %v14446_v46  ;;  %11647 = vmatprep.mubr.msk.f32.mxu0 %vm734_vm0, %v677_v39  ;;  %v657_v39 = vmul.f32 %v16954_v57, %v16920_v26  ;;  %v691_v46 = vld [vmem:[#allocation21 + $0x1b8] sm:$0xff] }
 0x283   :  { %14448 = vmatprep.subr.bf16.mxu0 %v16413_v8 }
 0x284   :  { %v14467_v55 = vpack.c.bf16 %v658_v33, %v657_v39 }
 0x285   :  { %870 = vmatmul.mubr.f32.gmra.mrb[10].mxu0 %v676_v47  ;;  %v660_v47 = vmul.f32 %v16954_v57, %v16927_v30 }
 0x286   :  { %14450 = vmatpush1.bf16.msra.mxu0 %v14449_v60  ;;  %11648 = vmatprep.mubr.msk.f32.mxu0 %vm734_vm0, %v679_v52  ;;  %v659_v52 = vmul.f32 %v16954_v57, %v16929_v31  ;;  %v693_v60 = vld [vmem:[#allocation21 + $0x1c8] sm:$0xff] }
 0x287   :  { %14451 = vmatprep.subr.bf16.mxu0 %v16413_v8 }
 0x288   :  { %v14470_v1 = vpack.c.bf16 %v660_v47, %v659_v52 }
 0x289   :  { %875 = vmatmul.mubr.f32.gmra.mrb[12].mxu0 %v678_v61  ;;  %v662_v61 = vmul.f32 %v16954_v57, %v16936_v40 }
 0x28a   :  { %14453 = vmatpush1.bf16.msra.mxu0 %v14452_v36  ;;  %11649 = vmatprep.mubr.msk.f32.mxu0 %vm734_vm0, %v681_v62  ;;  %v661_v62 = vmul.f32 %v16954_v57, %v16938_v41  ;;  %v695_v36 = vld [vmem:[#allocation21 + $0x1d8] sm:$0xff] }
 0x28b   :  { %14454 = vmatprep.subr.bf16.mxu0 %v16413_v8 }
 0x28c   :  { %v14473_v7 = vpack.c.bf16 %v662_v61, %v661_v62 }
 0x28d   :  { %880 = vmatmul.mubr.f32.gmra.mrb[14].mxu0 %v680_v3  ;;  %v664_v3 = vmul.f32 %v16954_v57, %v16945_v50 }
 0x28e   :  { %14456 = vmatpush1.bf16.msra.mxu0 %v14455_v12  ;;  %11650 = vmatprep.mubr.msk.f32.mxu0 %vm734_vm0, %v683_v6  ;;  %v663_v6 = vmul.f32 %v16954_v57, %v16947_v51  ;;  %v17045_v12 = vld [vmem:[#allocation6 + $0x2] ss:$0 sm:$0xff]  ;;  %v448_v57 = vld [vmem:[#allocation21] sm:$0xff] }
 0x28f   :  { %14457 = vmatprep.subr.bf16.mxu0 %v16413_v8  ;;  %v1144_v18 = vmul.f32 %v17045_v12, %v16821_v35  ;;  %v453_v35 = vld [vmem:[#allocation21 + $0x28] sm:$0xff]  ;;  %v1149_v27 = vmul.f32 %v17045_v12, %v16837_v43  ;;  %v1150_v33 = vmul.f32 %v17045_v12, %v16848_v49  ;;  %v454_v43 = vld [vmem:[#allocation21 + $0x30] sm:$0xff]  ;;  %v459_v49 = vld [vmem:[#allocation21 + $0x58] sm:$0xff]  ;;  %v1155_v47 = vmul.f32 %v17045_v12, %v16864_v58 }
 0x290   :  { %v14476_v17 = vpack.c.bf16 %v664_v3, %v663_v6  ;;  %v1154_v52 = vmul.f32 %v17045_v12, %v16866_v59  ;;  %v460_v58 = vld [vmem:[#allocation21 + $0x60] sm:$0xff]  ;;  %v463_v59 = vld [vmem:[#allocation21 + $0x78] sm:$0xff]  ;;  %v1159_v62 = vmul.f32 %v17045_v12, %v16882_v4  ;;  %v1160_v3 = vmul.f32 %v17045_v12, %v16893_v11  ;;  %v469_v11 = vld [vmem:[#allocation21 + $0xa8] sm:$0xff] }
 0x291   :  { %885 = vmatmul.mubr.f32.gmra.mrb[16].mxu0 %v682_v13  ;;  %v449_v13 = vld [vmem:[#allocation21 + $0x8] sm:$0xff]  ;;  %v464_v4 = vld [vmem:[#allocation21 + $0x80] sm:$0xff] }
 0x292   :  { %14459 = vmatpush1.bf16.msra.mxu0 %v14458_v19  ;;  %11651 = vmatprep.mubr.msk.f32.mxu0 %vm734_vm0, %v685_v14  ;;  %v1145_v14 = vmul.f32 %v17045_v12, %v16827_v38  ;;  %v451_v19 = vld [vmem:[#allocation21 + $0x18] sm:$0xff]  ;;  %v450_v38 = vld [vmem:[#allocation21 + $0x10] sm:$0xff]  ;;  %v14494_v61 = vpack.c.bf16 %v1155_v47, %v1154_v52  ;;  %v1118_v47 = vld [vmem:[#allocation21 + $0x240] sm:$0xff] }
 0x293   :  { %14460 = vmatprep.subr.bf16.mxu0 %v16413_v8  ;;  %v1121_v52 = vld [vmem:[#allocation21 + $0x258] sm:$0xff] }
 0x294   :  { %v14479_v24 = vpack.c.bf16 %v1145_v14, %v1144_v18  ;;  %v1165_v14 = vmul.f32 %v17045_v12, %v16909_v20  ;;  %v470_v20 = vld [vmem:[#allocation21 + $0xb0] sm:$0xff] }
 0x295   :  { %890 = vmatmul.mubr.f32.gmra.mrb[18].mxu0 %v684_v22  ;;  %v1146_v22 = vmul.f32 %v17045_v12, %v16819_v34  ;;  %v452_v34 = vld [vmem:[#allocation21 + $0x20] sm:$0xff] }
 0x296   :  { %14462 = vmatpush1.bf16.msra.mxu0 %v14461_v28  ;;  %11652 = vmatprep.mubr.msk.f32.mxu0 %vm734_vm0, %v687_v23  ;;  %v1147_v23 = vmul.f32 %v17045_v12, %v16825_v37  ;;  %v1148_v28 = vmul.f32 %v17045_v12, %v16839_v44  ;;  %v455_v37 = vld [vmem:[#allocation21 + $0x38] sm:$0xff]  ;;  %v457_v44 = vld [vmem:[#allocation21 + $0x48] sm:$0xff] }
 0x297   :  { %14463 = vmatprep.subr.bf16.mxu0 %v16413_v8 }
 0x298   :  { %v14485_v39 = vpack.c.bf16 %v1149_v27, %v1148_v28  ;;  %v1170_v27 = vmul.f32 %v17045_v12, %v16938_v41  ;;  %v1107_v41 = vld [vmem:[#allocation21 + $0x1e8] sm:$0xff] }
 0x299   :  { %895 = vmatmul.mubr.f32.gmra.mrb[20].mxu0 %v686_v29  ;;  %v14482_v29 = vpack.c.bf16 %v1147_v23, %v1146_v22  ;;  %v1169_v23 = vmul.f32 %v17045_v12, %v16927_v30  ;;  %v474_v30 = vld [vmem:[#allocation21 + $0xd0] sm:$0xff] }
 0x29a   :  { %14465 = vmatpush1.bf16.msra.mxu0 %v14464_v42  ;;  %11653 = vmatprep.mubr.msk.f32.mxu0 %vm734_vm0, %v689_v32  ;;  %v1151_v32 = vmul.f32 %v17045_v12, %v16846_v48  ;;  %v1153_v42 = vmul.f32 %v17045_v12, %v16855_v53  ;;  %v456_v48 = vld [vmem:[#allocation21 + $0x40] sm:$0xff]  ;;  %v458_v53 = vld [vmem:[#allocation21 + $0x50] sm:$0xff] }
 0x29b   :  { %14466 = vmatprep.subr.bf16.mxu0 %v16413_v8 }
 0x29d   :  { %900 = vmatmul.mubr.f32.gmra.mrb[22].mxu0 %v688_v45  ;;  %v1152_v45 = vmul.f32 %v17045_v12, %v16857_v54  ;;  %v461_v54 = vld [vmem:[#allocation21 + $0x68] sm:$0xff] }
 0x29e   :  { %14468 = vmatpush1.bf16.msra.mxu0 %v14467_v55  ;;  %11654 = vmatprep.mubr.msk.f32.mxu0 %vm734_vm0, %v691_v46  ;;  %v14488_v46 = vpack.c.bf16 %v1151_v32, %v1150_v33  ;;  %v1106_v33 = vld [vmem:[#allocation21 + $0x1e0] sm:$0xff] }
 0x29f   :  { %14469 = vmatprep.subr.bf16.mxu0 %v16413_v8  ;;  %v14491_v55 = vpack.c.bf16 %v1153_v42, %v1152_v45  ;;  %v1115_v42 = vld [vmem:[#allocation21 + $0x228] sm:$0xff]  ;;  %v1114_v45 = vld [vmem:[#allocation21 + $0x220] sm:$0xff] }
 0x2a1   :  { %905 = vmatmul.mubr.f32.gmra.mrb[24].mxu0 %v690_v56  ;;  %v1157_v56 = vmul.f32 %v17045_v12, %v16873_v63  ;;  %v462_v63 = vld [vmem:[#allocation21 + $0x70] sm:$0xff] }
 0x2a2   :  { %14471 = vmatpush1.bf16.msra.mxu0 %v14470_v1  ;;  %11655 = vmatprep.mubr.msk.f32.mxu0 %vm734_vm0, %v693_v60  ;;  %v1156_v60 = vmul.f32 %v17045_v12, %v16875_v0  ;;  %v1158_v1 = vmul.f32 %v17045_v12, %v16884_v5  ;;  %v465_v0 = vld [vmem:[#allocation21 + $0x88] sm:$0xff]  ;;  %v467_v5 = vld [vmem:[#allocation21 + $0x98] sm:$0xff] }
 0x2a3   :  { %14472 = vmatprep.subr.bf16.mxu0 %v16413_v8 }
 0x2a4   :  { %v14500_v6 = vpack.c.bf16 %v1159_v62, %v1158_v1  ;;  %v1128_v62 = vld [vmem:[#allocation21 + $0x290] sm:$0xff]  ;;  %v1131_v1 = vld [vmem:[#allocation21 + $0x2a8] sm:$0xff] }
 0x2a5   :  { %910 = vmatmul.mubr.f32.gmra.mrb[26].mxu0 %v692_v2  ;;  %v14497_v2 = vpack.c.bf16 %v1157_v56, %v1156_v60  ;;  %v1125_v56 = vld [vmem:[#allocation21 + $0x278] sm:$0xff]  ;;  %v1124_v60 = vld [vmem:[#allocation21 + $0x270] sm:$0xff] }
 0x2a6   :  { %14474 = vmatpush1.bf16.msra.mxu0 %v14473_v7  ;;  %11656 = vmatprep.mubr.msk.f32.mxu0 %vm734_vm0, %v695_v36  ;;  %v1161_v36 = vmul.f32 %v17045_v12, %v16891_v10  ;;  %v1163_v7 = vmul.f32 %v17045_v12, %v16900_v15  ;;  %v466_v10 = vld [vmem:[#allocation21 + $0x90] sm:$0xff]  ;;  %v468_v15 = vld [vmem:[#allocation21 + $0xa0] sm:$0xff] }
 0x2a7   :  { %14475 = vmatprep.subr.bf16.mxu0 %v16413_v8 }
 0x2a9   :  { %915 = vmatmul.mubr.f32.gmra.mrb[28].mxu0 %v694_v9  ;;  %v1162_v9 = vmul.f32 %v17045_v12, %v16902_v16  ;;  %v471_v16 = vld [vmem:[#allocation21 + $0xb8] sm:$0xff] }
 0x2aa   :  { %14477 = vmatpush1.bf16.msra.mxu0 %v14476_v17  ;;  %11657 = vmatprep.mubr.msk.f32.mxu0 %vm734_vm0, %v449_v13  ;;  %v14503_v13 = vpack.c.bf16 %v1161_v36, %v1160_v3  ;;  %v1164_v17 = vmul.f32 %v17045_v12, %v16911_v21  ;;  %v473_v21 = vld [vmem:[#allocation21 + $0xc8] sm:$0xff]  ;;  %v1134_v3 = vld [vmem:[#allocation21 + $0x2c0] sm:$0xff] }
 0x2ab   :  { %14478 = vmatprep.subr.bf16.mxu0 %v16413_v8  ;;  %v14506_v18 = vpack.c.bf16 %v1163_v7, %v1162_v9  ;;  %v1135_v36 = vld [vmem:[#allocation21 + $0x2c8] sm:$0xff] }
 0x2ac   :  { %v14509_v22 = vpack.c.bf16 %v1165_v14, %v1164_v17 }
 0x2ad   :  { %1030 = vmatmul.mubr.f32.vlgmr.msra.gmra.mrb[0].mxu0 %v448_v57  ;;  %v1167_v57 = vmul.f32 %v17045_v12, %v16918_v25  ;;  %v472_v25 = vld [vmem:[#allocation21 + $0xc0] sm:$0xff] }
 0x2ae   :  { %14480 = vmatpush1.bf16.msra.mxu0 %v14479_v24  ;;  %11658 = vmatprep.mubr.msk.f32.mxu0 %vm734_vm0, %v451_v19  ;;  %v1166_v19 = vmul.f32 %v17045_v12, %v16920_v26  ;;  %v1168_v24 = vmul.f32 %v17045_v12, %v16929_v31  ;;  %v475_v26 = vld [vmem:[#allocation21 + $0xd8] sm:$0xff]  ;;  %v477_v31 = vld [vmem:[#allocation21 + $0xe8] sm:$0xff] }
 0x2af   :  { %14481 = vmatprep.subr.bf16.mxu0 %v16413_v8 }
 0x2b0   :  { %v14515_v28 = vpack.c.bf16 %v1169_v23, %v1168_v24 }
 0x2b1   :  { %1035 = vmatmul.mubr.f32.gmra.mrb[2].mxu0 %v450_v38  ;;  %v14512_v38 = vpack.c.bf16 %v1167_v57, %v1166_v19 }
 0x2b2   :  { %14483 = vmatpush1.bf16.msra.mxu0 %v14482_v29  ;;  %11659 = vmatprep.mubr.msk.f32.mxu0 %vm734_vm0, %v453_v35  ;;  %v1171_v35 = vmul.f32 %v17045_v12, %v16936_v40  ;;  %v1173_v29 = vmul.f32 %v17045_v12, %v16945_v50  ;;  %v476_v40 = vld [vmem:[#allocation21 + $0xe0] sm:$0xff]  ;;  %v1108_v50 = vld [vmem:[#allocation21 + $0x1f0] sm:$0xff] }
 0x2b3   :  { %14484 = vmatprep.subr.bf16.mxu0 %v16413_v8 }
 0x2b5   :  { %1040 = vmatmul.mubr.f32.gmra.mrb[4].mxu0 %v452_v34  ;;  %v1172_v34 = vmul.f32 %v17045_v12, %v16947_v51  ;;  %v1111_v51 = vld [vmem:[#allocation21 + $0x208] sm:$0xff]  ;;  %v1110_v12 = vld [vmem:[#allocation21 + $0x200] sm:$0xff] }
 0x2b6   :  { %14486 = vmatpush1.bf16.msra.mxu0 %v14485_v39  ;;  %11660 = vmatprep.mubr.msk.f32.mxu0 %vm734_vm0, %v455_v37  ;;  %v14518_v37 = vpack.c.bf16 %v1171_v35, %v1170_v27  ;;  %v1109_v39 = vld [vmem:[#allocation21 + $0x1f8] sm:$0xff] }
 0x2b7   :  { %14487 = vmatprep.subr.bf16.mxu0 %v16413_v8  ;;  %v14521_v32 = vpack.c.bf16 %v1173_v29, %v1172_v34 }
 0x2b9   :  { %1045 = vmatmul.mubr.f32.gmra.mrb[6].mxu0 %v454_v43  ;;  %v1113_v43 = vld [vmem:[#allocation21 + $0x218] sm:$0xff] }
 0x2ba   :  { %14489 = vmatpush1.bf16.msra.mxu0 %v14488_v46  ;;  %11661 = vmatprep.mubr.msk.f32.mxu0 %vm734_vm0, %v457_v44  ;;  %v1112_v44 = vld [vmem:[#allocation21 + $0x210] sm:$0xff]  ;;  %v1117_v46 = vld [vmem:[#allocation21 + $0x238] sm:$0xff] }
 0x2bb   :  { %14490 = vmatprep.subr.bf16.mxu0 %v16413_v8 }
 0x2bd   :  { %1050 = vmatmul.mubr.f32.gmra.mrb[8].mxu0 %v456_v48  ;;  %v1116_v48 = vld [vmem:[#allocation21 + $0x230] sm:$0xff] }
 0x2be   :  { %14492 = vmatpush1.bf16.msra.mxu0 %v14491_v55  ;;  %11662 = vmatprep.mubr.msk.f32.mxu0 %vm734_vm0, %v459_v49  ;;  %v1119_v49 = vld [vmem:[#allocation21 + $0x248] sm:$0xff]  ;;  %v1120_v55 = vld [vmem:[#allocation21 + $0x250] sm:$0xff] }
 0x2bf   :  { %14493 = vmatprep.subr.bf16.mxu0 %v16413_v8 }
 0x2c1   :  { %1055 = vmatmul.mubr.f32.gmra.mrb[10].mxu0 %v458_v53  ;;  %v1123_v53 = vld [vmem:[#allocation21 + $0x268] sm:$0xff] }
 0x2c2   :  { %14495 = vmatpush1.bf16.msra.mxu0 %v14494_v61  ;;  %11663 = vmatprep.mubr.msk.f32.mxu0 %vm734_vm0, %v461_v54  ;;  %v1122_v54 = vld [vmem:[#allocation21 + $0x260] sm:$0xff]  ;;  %v1127_v61 = vld [vmem:[#allocation21 + $0x288] sm:$0xff] }
 0x2c3   :  { %14496 = vmatprep.subr.bf16.mxu0 %v16413_v8 }
 0x2c5   :  { %1060 = vmatmul.mubr.f32.gmra.mrb[12].mxu0 %v460_v58  ;;  %v1126_v58 = vld [vmem:[#allocation21 + $0x280] sm:$0xff] }
 0x2c6   :  { %14498 = vmatpush1.bf16.msra.mxu0 %v14497_v2  ;;  %11664 = vmatprep.mubr.msk.f32.mxu0 %vm734_vm0, %v463_v59  ;;  %v1129_v59 = vld [vmem:[#allocation21 + $0x298] sm:$0xff]  ;;  %v1130_v2 = vld [vmem:[#allocation21 + $0x2a0] sm:$0xff] }
 0x2c7   :  { %14499 = vmatprep.subr.bf16.mxu0 %v16413_v8 }
 0x2c9   :  { %1065 = vmatmul.mubr.f32.gmra.mrb[14].mxu0 %v462_v63  ;;  %v1133_v63 = vld [vmem:[#allocation21 + $0x2b8] sm:$0xff] }
 0x2ca   :  { %14501 = vmatpush1.bf16.msra.mxu0 %v14500_v6  ;;  %11665 = vmatprep.mubr.msk.f32.mxu0 %vm734_vm0, %v465_v0  ;;  %v1132_v0 = vld [vmem:[#allocation21 + $0x2b0] sm:$0xff] }
 0x2cb   :  { %14502 = vmatprep.subr.bf16.mxu0 %v16413_v8 }
 0x2cd   :  { %1070 = vmatmul.mubr.f32.gmra.mrb[16].mxu0 %v464_v4 }
 0x2ce   :  { %14504 = vmatpush1.bf16.msra.mxu0 %v14503_v13  ;;  %11666 = vmatprep.mubr.msk.f32.mxu0 %vm734_vm0, %v467_v5 }
 0x2cf   :  { %14505 = vmatprep.subr.bf16.mxu0 %v16413_v8 }
 0x2d1   :  { %1075 = vmatmul.mubr.f32.gmra.mrb[18].mxu0 %v466_v10 }
 0x2d2   :  { %14507 = vmatpush1.bf16.msra.mxu0 %v14506_v18  ;;  %11667 = vmatprep.mubr.msk.f32.mxu0 %vm734_vm0, %v469_v11 }
 0x2d3   :  { %14508 = vmatprep.subr.bf16.mxu0 %v16413_v8 }
 0x2d5   :  { %1080 = vmatmul.mubr.f32.gmra.mrb[20].mxu0 %v468_v15 }
 0x2d6   :  { %14510 = vmatpush1.bf16.msra.mxu0 %v14509_v22  ;;  %11668 = vmatprep.mubr.msk.f32.mxu0 %vm734_vm0, %v471_v16 }
 0x2d7   :  { %14511 = vmatprep.subr.bf16.mxu0 %v16413_v8 }
 0x2d9   :  { %1085 = vmatmul.mubr.f32.gmra.mrb[22].mxu0 %v470_v20 }
 0x2da   :  { %14513 = vmatpush1.bf16.msra.mxu0 %v14512_v38  ;;  %11669 = vmatprep.mubr.msk.f32.mxu0 %vm734_vm0, %v473_v21 }
 0x2db   :  { %14514 = vmatprep.subr.bf16.mxu0 %v16413_v8 }
 0x2dd   :  { %1090 = vmatmul.mubr.f32.gmra.mrb[24].mxu0 %v472_v25 }
 0x2de   :  { %14516 = vmatpush1.bf16.msra.mxu0 %v14515_v28  ;;  %11670 = vmatprep.mubr.msk.f32.mxu0 %vm734_vm0, %v475_v26 }
 0x2df   :  { %14517 = vmatprep.subr.bf16.mxu0 %v16413_v8 }
 0x2e1   :  { %1095 = vmatmul.mubr.f32.gmra.mrb[26].mxu0 %v474_v30 }
 0x2e2   :  { %14519 = vmatpush1.bf16.msra.mxu0 %v14518_v37  ;;  %11671 = vmatprep.mubr.msk.f32.mxu0 %vm734_vm0, %v477_v31 }
 0x2e3   :  { %14520 = vmatprep.subr.bf16.mxu0 %v16413_v8 }
 0x2e5   :  { %1100 = vmatmul.mubr.f32.gmra.mrb[28].mxu0 %v476_v40 }
 0x2e6   :  { %14522 = vmatpush1.bf16.msra.mxu0 %v14521_v32  ;;  %11673 = vmatprep.mubr.msk.f32.mxu0 %vm734_vm0, %v1107_v41 }
 0x2e7   :  { %14733 = vmatprep.subr.bf16.mxu0 %v16413_v8 }
 0x2e9   :  { %1284 = vmatmul.mubr.f32.vlgmr.msra.gmra.mrb[0].mxu0 %v1106_v33 }
 0x2ea   :  { %11674 = vmatprep.mubr.msk.f32.mxu0 %vm734_vm0, %v1109_v39 }
 0x2ed   :  { %1289 = vmatmul.mubr.f32.gmra.mrb[2].mxu0 %v1108_v50 }
 0x2ee   :  { %11675 = vmatprep.mubr.msk.f32.mxu0 %vm734_vm0, %v1111_v51 }
 0x2f1   :  { %1294 = vmatmul.mubr.f32.gmra.mrb[4].mxu0 %v1110_v12 }
 0x2f2   :  { %11676 = vmatprep.mubr.msk.f32.mxu0 %vm734_vm0, %v1113_v43 }
 0x2f5   :  { %1299 = vmatmul.mubr.f32.gmra.mrb[6].mxu0 %v1112_v44 }
 0x2f6   :  { %11677 = vmatprep.mubr.msk.f32.mxu0 %vm734_vm0, %v1115_v42 }
 0x2f9   :  { %1304 = vmatmul.mubr.f32.gmra.mrb[8].mxu0 %v1114_v45 }
 0x2fa   :  { %11678 = vmatprep.mubr.msk.f32.mxu0 %vm734_vm0, %v1117_v46 }
 0x2fd   :  { %1309 = vmatmul.mubr.f32.gmra.mrb[10].mxu0 %v1116_v48 }
 0x2fe   :  { %11679 = vmatprep.mubr.msk.f32.mxu0 %vm734_vm0, %v1119_v49 }
 0x301   :  { %1314 = vmatmul.mubr.f32.gmra.mrb[12].mxu0 %v1118_v47 }
 0x302   :  { %11680 = vmatprep.mubr.msk.f32.mxu0 %vm734_vm0, %v1121_v52 }
 0x305   :  { %1319 = vmatmul.mubr.f32.gmra.mrb[14].mxu0 %v1120_v55 }
 0x306   :  { %11681 = vmatprep.mubr.msk.f32.mxu0 %vm734_vm0, %v1123_v53 }
 0x309   :  { %1324 = vmatmul.mubr.f32.gmra.mrb[16].mxu0 %v1122_v54 }
 0x30a   :  { %11682 = vmatprep.mubr.msk.f32.mxu0 %vm734_vm0, %v1125_v56  ;;  %v1584_v56 = vld [vmem:[#allocation23] sm:$0xff] }
 0x30b   :  { %12898 = vmatprep.mubr.msk.f32.mxu1 %vm1592_vm2, %v1584_v56 }
 0x30d   :  { %1329 = vmatmul.mubr.f32.gmra.mrb[18].mxu0 %v1124_v60 }
 0x30e   :  { %11683 = vmatprep.mubr.msk.f32.mxu0 %vm734_vm0, %v1127_v61 }
 0x311   :  { %1334 = vmatmul.mubr.f32.gmra.mrb[20].mxu0 %v1126_v58 }
 0x312   :  { %11684 = vmatprep.mubr.msk.f32.mxu0 %vm734_vm0, %v1129_v59 }
 0x315   :  { %1339 = vmatmul.mubr.f32.gmra.mrb[22].mxu0 %v1128_v62 }
 0x316   :  { %11685 = vmatprep.mubr.msk.f32.mxu0 %vm734_vm0, %v1131_v1 }
 0x319   :  { %1344 = vmatmul.mubr.f32.gmra.mrb[24].mxu0 %v1130_v2 }
 0x31a   :  { %11686 = vmatprep.mubr.msk.f32.mxu0 %vm734_vm0, %v1133_v63 }
 0x31d   :  { %1349 = vmatmul.mubr.f32.gmra.mrb[26].mxu0 %v1132_v0 }
 0x31e   :  { %11687 = vmatprep.mubr.msk.f32.mxu0 %vm734_vm0, %v1135_v36 }
 0x321   :  { %1354 = vmatmul.mubr.f32.gmra.mrb[28].mxu0 %v1134_v3 }
 0x3bc   :  { %v17154_v6 = vpop.f32.mrb[0].mxu0 }
 0x3bd   :  { %v1287_v4 = vpop.f32.mrb[1].mxu0  ;;  %v1375_v7 = vsel %vm1374_vm1, %v17154_v6, 0.0 }
 0x3c0   :  { %v17156_v5 = vpop.f32.mrb[2].mxu0 }
 0x3c1   :  { %v1376_v9 = vsel %vm1374_vm1, %v17156_v5, 0.0  ;;  %v1292_v13 = vpop.f32.mrb[3].mxu0 }
 0x3c2   :  { %v1377_v10 = vadd.f32 %v1376_v9, %v1375_v7 }
 0x3c4   :  { %v17162_v11 = vpop.f32.mrb[4].mxu0 }
 0x3c5   :  { %v1378_v14 = vsel %vm1374_vm1, %v17162_v11, 0.0  ;;  %v1297_v17 = vpop.f32.mrb[5].mxu0 }
 0x3c6   :  { %v1379_v18 = vadd.f32 %v1378_v14, %v1377_v10 }
 0x3c8   :  { %v1300_v15 = vpop.f32.mrb[6].mxu0 }
 0x3c9   :  { %v1380_v16 = vsel %vm1374_vm1, %v1300_v15, 0.0  ;;  %v1302_v57 = vpop.f32.mrb[7].mxu0 }
 0x3ca   :  { %v1381_v19 = vadd.f32 %v1380_v16, %v1379_v18 }
 0x3cc   :  { %v1305_v22 = vpop.f32.mrb[8].mxu0 }
 0x3cd   :  { %v1382_v20 = vsel %vm1374_vm1, %v1305_v22, 0.0  ;;  %v1307_v21 = vpop.f32.mrb[9].mxu0 }
 0x3ce   :  { %v1383_v23 = vadd.f32 %v1382_v20, %v1381_v19 }
 0x3d0   :  { %v1310_v24 = vpop.f32.mrb[10].mxu0 }
 0x3d1   :  { %v1384_v38 = vsel %vm1374_vm1, %v1310_v24, 0.0  ;;  %v1312_v25 = vpop.f32.mrb[11].mxu0 }
 0x3d2   :  { %v1385_v26 = vadd.f32 %v1384_v38, %v1383_v23 }
 0x3d4   :  { %v1315_v35 = vpop.f32.mrb[12].mxu0 }
 0x3d5   :  { %v1386_v27 = vsel %vm1374_vm1, %v1315_v35, 0.0  ;;  %v1317_v28 = vpop.f32.mrb[13].mxu0 }
 0x3d6   :  { %v1387_v30 = vadd.f32 %v1386_v27, %v1385_v26 }
 0x3d8   :  { %v1320_v31 = vpop.f32.mrb[14].mxu0 }
 0x3d9   :  { %v1388_v29 = vsel %vm1374_vm1, %v1320_v31, 0.0  ;;  %v1322_v34 = vpop.f32.mrb[15].mxu0 }
 0x3da   :  { %v1389_v37 = vadd.f32 %v1388_v29, %v1387_v30 }
 0x3dc   :  { %v1325_v40 = vpop.f32.mrb[16].mxu0 }
 0x3dd   :  { %v1390_v41 = vsel %vm1374_vm1, %v1325_v40, 0.0  ;;  %v1327_v32 = vpop.f32.mrb[17].mxu0 }
 0x3de   :  { %v1391_v33 = vadd.f32 %v1390_v41, %v1389_v37 }
 0x3e0   :  { %v1330_v39 = vpop.f32.mrb[18].mxu0 }
 0x3e1   :  { %v1392_v50 = vsel %vm1374_vm1, %v1330_v39, 0.0  ;;  %v1332_v51 = vpop.f32.mrb[19].mxu0 }
 0x3e2   :  { %v1393_v12 = vadd.f32 %v1392_v50, %v1391_v33 }
 0x3e4   :  { %v1335_v43 = vpop.f32.mrb[20].mxu0 }
 0x3e5   :  { %v1394_v44 = vsel %vm1374_vm1, %v1335_v43, 0.0  ;;  %v1337_v42 = vpop.f32.mrb[21].mxu0 }
 0x3e6   :  { %v1395_v45 = vadd.f32 %v1394_v44, %v1393_v12 }
 0x3e8   :  { %v1340_v46 = vpop.f32.mrb[22].mxu0 }
 0x3e9   :  { %v1396_v48 = vsel %vm1374_vm1, %v1340_v46, 0.0  ;;  %v1342_v49 = vpop.f32.mrb[23].mxu0 }
 0x3ea   :  { %v1397_v47 = vadd.f32 %v1396_v48, %v1395_v45 }
 0x3ec   :  { %v1345_v52 = vpop.f32.mrb[24].mxu0 }
 0x3ed   :  { %v1398_v55 = vsel %vm1374_vm1, %v1345_v52, 0.0  ;;  %v1347_v53 = vpop.f32.mrb[25].mxu0 }
 0x3ee   :  { %v1399_v54 = vadd.f32 %v1398_v55, %v1397_v47 }
 0x3f0   :  { %v1350_v60 = vpop.f32.mrb[26].mxu0 }
 0x3f1   :  { %v1400_v61 = vsel %vm1374_vm1, %v1350_v60, 0.0  ;;  %v1352_v58 = vpop.f32.mrb[27].mxu0 }
 0x3f2   :  { %v1401_v59 = vadd.f32 %v1400_v61, %v1399_v54 }
 0x3f4   :  { %v1355_v62 = vpop.f32.mrb[28].mxu0 }
 0x3f5   :  { %v1402_v1 = vsel %vm1374_vm1, %v1355_v62, 0.0  ;;  %v1357_v2 = vpop.f32.mrb[29].mxu0 }
 0x3f6   :  { %v1403_v63 = vadd.f32 %v1402_v1, %v1401_v59 }
 0x3f8   :  { %v1404_v0 = vrot.slane %v1403_v63, 4 }
 0x3fa   :  { %v1405_v36 = vadd.f32 %v1404_v0, %v1403_v63 }
 0x3fc   :  { %v1406_v3 = vrot.slane %v1405_v36, 2 }
 0x3fe   :  { %v1407_v4 = vadd.f32 %v1406_v3, %v1405_v36 }
 0x400   :  { %v1408_v7 = vrot.slane %v1407_v4, 1 }
 0x402   :  { %v1409_v9 = vadd.f32 %v1408_v7, %v1407_v4 }
 0x404   :  { %v1411_v13 = vmul.f32 0.008333334, %v1409_v9 }
 0x406   :  { %v17180_v10 = vsub.f32 %v17154_v6, %v1411_v13  ;;  %v17183_v14 = vsub.f32 %v17156_v5, %v1411_v13  ;;  %v17186_v17 = vsub.f32 %v17162_v11, %v1411_v13  ;;  %v17188_v18 = vsub.f32 %v1300_v15, %v1411_v13 }
 0x407   :  { %v17190_v16 = vsub.f32 %v1305_v22, %v1411_v13  ;;  %v17192_v57 = vsub.f32 %v1310_v24, %v1411_v13  ;;  %v17194_v19 = vsub.f32 %v1315_v35, %v1411_v13  ;;  %v17196_v20 = vsub.f32 %v1320_v31, %v1411_v13 }
 0x408   :  { %v1420_v21 = vsub.f32 %v1325_v40, %v1411_v13  ;;  %v1421_v23 = vsub.f32 %v1330_v39, %v1411_v13  ;;  %v1422_v6 = vsub.f32 %v1335_v43, %v1411_v13  ;;  %v1423_v38 = vsub.f32 %v1340_v46, %v1411_v13 }
 0x409   :  { %v1424_v25 = vsub.f32 %v1345_v52, %v1411_v13  ;;  %v1425_v5 = vsub.f32 %v1350_v60, %v1411_v13  ;;  %v1426_v26 = vsub.f32 %v1355_v62, %v1411_v13  ;;  %v1427_v11 = vmul.f32 %v17180_v10, %v17180_v10 }
 0x40a   :  { %v1428_v15 = vmul.f32 %v17183_v14, %v17183_v14  ;;  %v1429_v22 = vmul.f32 %v17186_v17, %v17186_v17  ;;  %v1430_v24 = vmul.f32 %v17188_v18, %v17188_v18  ;;  %v1431_v30 = vmul.f32 %v17190_v16, %v17190_v16 }
 0x40b   :  { %v1442_v35 = vsel %vm1374_vm1, %v1427_v11, 0.0  ;;  %v1432_v34 = vmul.f32 %v17192_v57, %v17192_v57  ;;  %v1433_v41 = vmul.f32 %v17194_v19, %v17194_v19  ;;  %v1434_v39 = vmul.f32 %v17196_v20, %v17196_v20 }
 0x40c   :  { %v1443_v27 = vsel %vm1374_vm1, %v1428_v15, 0.0  ;;  %v1445_v31 = vsel %vm1374_vm1, %v1429_v22, 0.0  ;;  %v1447_v37 = vsel %vm1374_vm1, %v1430_v24, 0.0  ;;  %v1449_v32 = vsel %vm1374_vm1, %v1431_v30, 0.0 }
 0x40d   :  { %v1444_v28 = vadd.f32 %v1443_v27, %v1442_v35  ;;  %v1451_v50 = vsel %vm1374_vm1, %v1432_v34, 0.0  ;;  %v1435_v12 = vmul.f32 %v1420_v21, %v1420_v21  ;;  %v1453_v43 = vsel %vm1374_vm1, %v1433_v41, 0.0 }
 0x40e   :  { %v1436_v42 = vmul.f32 %v1421_v23, %v1421_v23  ;;  %v1455_v45 = vsel %vm1374_vm1, %v1434_v39, 0.0  ;;  %v1437_v48 = vmul.f32 %v1422_v6, %v1422_v6  ;;  %v1438_v52 = vmul.f32 %v1423_v38, %v1423_v38 }
 0x40f   :  { %v1446_v29 = vadd.f32 %v1445_v31, %v1444_v28  ;;  %v1457_v49 = vsel %vm1374_vm1, %v1435_v12, 0.0  ;;  %v1439_v54 = vmul.f32 %v1424_v25, %v1424_v25  ;;  %v1440_v61 = vmul.f32 %v1425_v5, %v1425_v5 }
 0x410   :  { %v1459_v55 = vsel %vm1374_vm1, %v1436_v42, 0.0  ;;  %v1461_v56 = vsel %vm1374_vm1, %v1437_v48, 0.0  ;;  %v1463_v58 = vsel %vm1374_vm1, %v1438_v52, 0.0  ;;  %v1441_v62 = vmul.f32 %v1426_v26, %v1426_v26 }
 0x411   :  { %v1448_v40 = vadd.f32 %v1447_v37, %v1446_v29  ;;  %v1465_v1 = vsel %vm1374_vm1, %v1439_v54, 0.0  ;;  %v1467_v63 = vsel %vm1374_vm1, %v1440_v61, 0.0  ;;  %v17230_v29 = vld [vmem:[%s19243_s28] ss:$0 sm:$0xff] }
 0x412   :  { %v1469_v36 = vsel %vm1374_vm1, %v1441_v62, 0.0 }
 0x413   :  { %v1450_v33 = vadd.f32 %v1449_v32, %v1448_v40  ;;  %v17236_v32 = vld [vmem:[%s19244_s13] ss:$0 sm:$0xff] }
 0x415   :  { %v1452_v51 = vadd.f32 %v1451_v50, %v1450_v33 }
 0x417   :  { %v1454_v44 = vadd.f32 %v1453_v43, %v1452_v51 }
 0x419   :  { %v1456_v46 = vadd.f32 %v1455_v45, %v1454_v44 }
 0x41b   :  { %v1458_v47 = vadd.f32 %v1457_v49, %v1456_v46 }
 0x41d   :  { %v1460_v53 = vadd.f32 %v1459_v55, %v1458_v47 }
 0x41f   :  { %v1462_v60 = vadd.f32 %v1461_v56, %v1460_v53 }
 0x421   :  { %v1464_v59 = vadd.f32 %v1463_v58, %v1462_v60 }
 0x423   :  { %v1466_v2 = vadd.f32 %v1465_v1, %v1464_v59 }
 0x425   :  { %v1468_v0 = vadd.f32 %v1467_v63, %v1466_v2 }
 0x427   :  { %v1470_v3 = vadd.f32 %v1469_v36, %v1468_v0 }
 0x429   :  { %v1471_v4 = vrot.slane %v1470_v3, 4 }
 0x42b   :  { %v1472_v7 = vadd.f32 %v1471_v4, %v1470_v3 }
 0x42d   :  { %v1473_v9 = vrot.slane %v1472_v7, 2 }
 0x42f   :  { %v1474_v13 = vadd.f32 %v1473_v9, %v1472_v7 }
 0x431   :  { %v1475_v11 = vrot.slane %v1474_v13, 1 }
 0x433   :  { %v1476_v15 = vadd.f32 %v1475_v11, %v1474_v13 }
 0x435   :  { %v1477_v22 = vmul.f32 0.008333334, %v1476_v15 }
 0x437   :  { %v1478_v24 = vadd.f32 1e-05, %v1477_v22 }
 0x439   :  { %15825 = vrsqrt.f32 %v1478_v24 }
 0x443   :  { %v15826_v35 = vpop.eup %15825 }
 0x444   :  { %v1488_v27 = vmul.f32 %v15826_v35, %v1420_v21  ;;  %v1489_v28 = vmul.f32 %v15826_v35, %v1421_v23  ;;  %v1490_v30 = vmul.f32 %v15826_v35, %v1422_v6  ;;  %v1491_v31 = vmul.f32 %v15826_v35, %v1423_v38 }
 0x445   :  { %v1492_v34 = vmul.f32 %v15826_v35, %v1424_v25  ;;  %v1493_v37 = vmul.f32 %v15826_v35, %v1425_v5  ;;  %v17232_v40 = vmul.f32 %v15826_v35, %v1426_v26  ;;  %v1480_v41 = vmul.f32 %v15826_v35, %v17180_v10 }
 0x446   :  { %v1481_v33 = vmul.f32 %v15826_v35, %v17183_v14  ;;  %v1482_v39 = vmul.f32 %v15826_v35, %v17186_v17  ;;  %v1483_v38 = vmul.f32 %v15826_v35, %v17188_v18  ;;  %v1484_v10 = vmul.f32 %v15826_v35, %v17190_v16 }
 0x447   :  { %v1514_v50 = vmul.f32 %v17230_v29, %v1492_v34  ;;  %v1515_v21 = vmul.f32 %v17230_v29, %v1493_v37  ;;  %v1502_v23 = vmul.f32 %v17230_v29, %v1480_v41  ;;  %v1512_v5 = vmul.f32 %v17230_v29, %v1490_v30 }
 0x448   :  { %v1503_v6 = vmul.f32 %v17230_v29, %v1481_v33  ;;  %v1504_v25 = vmul.f32 %v17230_v29, %v1482_v39  ;;  %v1513_v14 = vmul.f32 %v17230_v29, %v1491_v31  ;;  %v1505_v12 = vmul.f32 %v17230_v29, %v1483_v38 }
 0x449   :  { %v17250_v17 = vadd.f32 %v17236_v32, %v1514_v50  ;;  %v1524_v26 = vadd.f32 %v17236_v32, %v1502_v23  ;;  %v1485_v18 = vmul.f32 %v15826_v35, %v17192_v57  ;;  %v17258_v44 = vadd.f32 %v17236_v32, %v1515_v21 }
 0x44a   :  { %v1525_v51 = vadd.f32 %v17236_v32, %v1503_v6  ;;  %v1526_v43 = vadd.f32 %v17236_v32, %v1504_v25  ;;  %v1506_v42 = vmul.f32 %v17230_v29, %v1484_v10  ;;  %v1527_v46 = vadd.f32 %v17236_v32, %v1505_v12  ;;  %v1588_v12 = vld [vmem:[#allocation23 + $0x20] sm:$0xff] }
 0x44b   :  { %vm1539_vm3 = vcmp.ge.f32.partialorder %v1524_v26, 0.0  ;;  %v1554_v16 = vmul.f32 0.01, %v1524_v26  ;;  %v1507_v47 = vmul.f32 %v17230_v29, %v1485_v18  ;;  %v1486_v53 = vmul.f32 %v15826_v35, %v17194_v19  ;;  %v1590_v18 = vld [vmem:[#allocation23 + $0x30] sm:$0xff] }
 0x44c   :  { %vm1540_vm4 = vcmp.ge.f32.partialorder %v1525_v51, 0.0  ;;  %v1555_v45 = vmul.f32 0.01, %v1525_v51  ;;  %vm1541_vm5 = vcmp.ge.f32.partialorder %v1526_v43, 0.0  ;;  %v1556_v49 = vmul.f32 0.01, %v1526_v43 }
 0x44d   :  { %v1569_v48 = vsel %vm1539_vm3, %v1524_v26, %v1554_v16  ;;  %v1528_v52 = vadd.f32 %v17236_v32, %v1506_v42  ;;  %vm1542_vm6 = vcmp.ge.f32.partialorder %v1527_v46, 0.0  ;;  %v1557_v57 = vmul.f32 0.01, %v1527_v46  ;;  %v1727_v16 = vld [vmem:[#allocation23 + $0x40] sm:$0xff]  ;;  %v1728_v42 = vld [vmem:[#allocation23 + $0x48] sm:$0xff] }
 0x44e   :  { %v1570_v55 = vsel %vm1540_vm4, %v1525_v51, %v1555_v45  ;;  %v1571_v56 = vsel %vm1541_vm5, %v1526_v43, %v1556_v49  ;;  %v1529_v60 = vadd.f32 %v17236_v32, %v1507_v47  ;;  %v1487_v59 = vmul.f32 %v15826_v35, %v17196_v20  ;;  %v1589_v43 = vld [vmem:[#allocation23 + $0x28] sm:$0xff]  ;;  %v1729_v45 = vld [vmem:[#allocation23 + $0x50] sm:$0xff] }
 0x44f   :  { %v17265_v54 = vpack.c.bf16 %v1570_v55, %v1569_v48  ;;  %vm1543_vm7 = vcmp.ge.f32.partialorder %v1528_v52, 0.0  ;;  %v1572_v61 = vsel %vm1542_vm6, %v1527_v46, %v1557_v57  ;;  %v1558_v58 = vmul.f32 0.01, %v1528_v52  ;;  %v1730_v46 = vld [vmem:[#allocation23 + $0x58] sm:$0xff]  ;;  %v1731_v48 = vld [vmem:[#allocation23 + $0x60] sm:$0xff]  ;;  %v1732_v49 = vld [vmem:[#allocation23 + $0x68] sm:$0xff] }
 0x450   :  { %v1508_v62 = vmul.f32 %v17230_v29, %v1486_v53  ;;  %v17271_v1 = vpack.c.bf16 %v1572_v61, %v1571_v56  ;;  %vm1544_vm8 = vcmp.ge.f32.partialorder %v1529_v60, 0.0  ;;  %v1559_v2 = vmul.f32 0.01, %v1529_v60  ;;  %v1733_v47 = vld [vmem:[#allocation23 + $0x70] sm:$0xff]  ;;  %v1865_v55 = vld [vmem:[#allocation8 + $0x20] sm:$0xff] }
 0x451   :  { %14524 = vmatprep.subr.bf16.mxu1 %v17265_v54  ;;  %v1510_v19 = vmul.f32 %v17230_v29, %v1488_v27  ;;  %v1573_v63 = vsel %vm1543_vm7, %v1528_v52, %v1558_v58  ;;  %v1509_v0 = vmul.f32 %v17230_v29, %v1487_v59  ;;  %v1511_v3 = vmul.f32 %v17230_v29, %v1489_v28  ;;  %v1734_v52 = vld [vmem:[#allocation23 + $0x78] sm:$0xf]  ;;  %v1866_v57 = vld [vmem:[#allocation8 + $0x28] sm:$0xff]  ;;  %v1722_v58 = vld [vmem:[#allocation8] sm:$0xff] }
 0x452   :  { %14526 = vmatpush3.bf16.msra.mxu1 %v17265_v54  ;;  %v1530_v36 = vadd.f32 %v17236_v32, %v1508_v62  ;;  %v1574_v20 = vsel %vm1544_vm8, %v1529_v60, %v1559_v2  ;;  %v1534_v7 = vadd.f32 %v17236_v32, %v1512_v5  ;;  %v1535_v9 = vadd.f32 %v17236_v32, %v1513_v14  ;;  %v1867_v56 = vld [vmem:[#allocation8 + $0x30] sm:$0xff]  ;;  %v1868_v60 = vld [vmem:[#allocation8 + $0x38] sm:$0xff]  ;;  %v1723_v59 = vld [vmem:[#allocation8 + $0x8] sm:$0xff] }
 0x453   :  { %14528 = vmatprep.subr.bf16.mxu1 %v17271_v1  ;;  %v1532_v4 = vadd.f32 %v17236_v32, %v1510_v19  ;;  %v17282_v13 = vpack.c.bf16 %v1574_v20, %v1573_v63  ;;  %v1531_v11 = vadd.f32 %v17236_v32, %v1509_v0  ;;  %v1533_v22 = vadd.f32 %v17236_v32, %v1511_v3 }
 0x454   :  { %vm1545_vm9 = vcmp.ge.f32.partialorder %v1530_v36, 0.0  ;;  %v1560_v15 = vmul.f32 0.01, %v1530_v36  ;;  %vm1549_vm11 = vcmp.ge.f32.partialorder %v1534_v7, 0.0  ;;  %vm1550_vm13 = vcmp.ge.f32.partialorder %v1535_v9, 0.0 }
 0x455   :  { %vm1547_vm10 = vcmp.ge.f32.partialorder %v1532_v4, 0.0  ;;  %v1562_v24 = vmul.f32 0.01, %v1532_v4  ;;  %vm1546_vm12 = vcmp.ge.f32.partialorder %v1531_v11, 0.0  ;;  %v1561_v35 = vmul.f32 0.01, %v1531_v11 }
 0x456   :  { %14530 = vmatpush3.bf16.msra.mxu1 %v17271_v1  ;;  %v1575_v27 = vsel %vm1545_vm9, %v1530_v36, %v1560_v15  ;;  %vm1548_vm14 = vcmp.ge.f32.partialorder %v1533_v22, 0.0  ;;  %v1563_v28 = vmul.f32 0.01, %v1533_v22  ;;  %v1564_v31 = vmul.f32 0.01, %v1534_v7 }
 0x457   :  { %14532 = vmatprep.subr.bf16.mxu1 %v17282_v13  ;;  %v1577_v30 = vsel %vm1547_vm10, %v1532_v4, %v1562_v24  ;;  %v1576_v34 = vsel %vm1546_vm12, %v1531_v11, %v1561_v35  ;;  %v1565_v37 = vmul.f32 0.01, %v1535_v9  ;;  %vm1551_vm15 = vcmp.ge.f32.partialorder %v17250_v17, 0.0 }
 0x458   :  { %vm1552_vm0 = vcmp.ge.f32.partialorder %v17258_v44, 0.0  ;;  %v17290_v41 = vpack.c.bf16 %v1576_v34, %v1575_v27  ;;  %v1578_v33 = vsel %vm1548_vm14, %v1533_v22, %v1563_v28  ;;  %v1579_v39 = vsel %vm1549_vm11, %v1534_v7, %v1564_v31  ;;  %v1724_v7 = vld [vmem:[#allocation8 + $0x10] sm:$0xff] }
 0x459   :  { %v1566_v50 = vmul.f32 0.01, %v17250_v17  ;;  %v17295_v21 = vpack.c.bf16 %v1578_v33, %v1577_v30  ;;  %v1580_v23 = vsel %vm1550_vm13, %v1535_v9, %v1565_v37  ;;  %v1567_v6 = vmul.f32 0.01, %v17258_v44  ;;  %v1725_v9 = vld [vmem:[#allocation8 + $0x18] sm:$0xff]  ;;  %v2268_v34 = vld [vmem:[#allocation8 + $0x50] sm:$0xff] }
 0x45a   :  { %14534 = vmatpush3.bf16.msra.mxu1 %v17282_v13  ;;  %v17300_v38 = vpack.c.bf16 %v1580_v23, %v1579_v39  ;;  %v1516_v14 = vmul.f32 %v17230_v29, %v17232_v40  ;;  %v1585_v29 = vld [vmem:[#allocation23 + $0x8] sm:$0xff]  ;;  %v1586_v40 = vld [vmem:[#allocation23 + $0x10] sm:$0xff]  ;;  %v14579_v53 = vpack.c.bf16 %v1866_v57, %v1865_v55  ;;  %v14583_v61 = vpack.c.bf16 %v1868_v60, %v1867_v56  ;;  %v2269_v37 = vld [vmem:[#allocation8 + $0x58] sm:$0xff] }
 0x45b   :  { %14536 = vmatprep.subr.bf16.mxu1 %v17290_v41  ;;  %v1581_v25 = vsel %vm1551_vm15, %v17250_v17, %v1566_v50  ;;  %v1582_v10 = vsel %vm1552_vm0, %v17258_v44, %v1567_v6  ;;  %v1591_v44 = vld [vmem:[#allocation23 + $0x38] sm:$0xf]  ;;  %v14587_v62 = vpack.c.bf16 %v1723_v59, %v1722_v58  ;;  %v14591_v22 = vpack.c.bf16 %v1725_v9, %v1724_v7  ;;  %v2129_v33 = vld [vmem:[#allocation23 + $0x88] sm:$0xff]  ;;  %v2130_v39 = vld [vmem:[#allocation23 + $0x90] sm:$0xff] }
 0x45c   :  { %v17304_v5 = vpack.c.bf16 %v1582_v10, %v1581_v25  ;;  %v1538_v26 = vadd.f32 %v17236_v32, %v1516_v14  ;;  %v1587_v32 = vld [vmem:[#allocation23 + $0x18] sm:$0xff]  ;;  %v14627_v50 = vpack.c.bf16 %v2269_v37, %v2268_v34  ;;  %v2132_v23 = vld [vmem:[#allocation23 + $0xa0] sm:$0xff]  ;;  %v2133_v6 = vld [vmem:[#allocation23 + $0xa8] sm:$0xff]  ;;  %vm2407_vm4 = vcmask 523264  }
 0x45d   :  { %v2135_v25 = vld [vmem:[#allocation23 + $0xb8] sm:$0xf]  ;;  %vm2421_vm5 = vcmask 519168   ;;  %vm2551_vm14 = vcmask 1043456   ;;  %vm16414_vm15 = vmmov 1  }
 0x45e   :  { %14538 = vmatpush3.bf16.msra.mxu1 %v17290_v41  ;;  %v1568_v51 = vmul.f32 0.01, %v1538_v26  ;;  %vm1553_vm3 = vcmp.ge.f32.partialorder %v1538_v26, 0.0  ;;  %vm17433_vm0 = vmpackc.low %vm2551_vm14, %vm16414_vm15 }
 0x45f   :  { %14540 = vmatprep.subr.bf16.mxu1 %v17295_v21 }
 0x460   :  { %v17316_v17 = vsel %vm1553_vm3, %v1538_v26, %v1568_v51  ;;  %vm16415_vm3 = vmmov 0  }
 0x462   :  { %14542 = vmatpush3.bf16.msra.mxu1 %v17295_v21 }
 0x463   :  { %14544 = vmatprep.subr.bf16.mxu1 %v17300_v38 }
 0x466   :  { %14546 = vmatpush3.bf16.msra.mxu1 %v17300_v38 }
 0x467   :  { %14548 = vmatprep.subr.bf16.mxu1 %v17304_v5 }
 0x46a   :  { %14550 = vmatpush3.bf16.msra.mxu1 %v17304_v5 }
 0x46b   :  { %12896 = vmatprep.subr.mxu1 %v17316_v17 }
 0x46e   :  { %12897 = vmatpush3.msra.mxu1 %v17316_v17 }
 0x46f   :  { %12899 = vmatmul.mubr.msk.f32.vlgmr.msra.gmra.mrb[0].mxu1 %vm1592_vm2, %v1585_v29  ;;  %14552 = vmatprep.subr.bf16.mxu1 %v17265_v54 }
 0x470   :  { %14554 = vmatpush3.bf16.msra.mxu1 %v17265_v54  ;;  %12901 = vmatprep.mubr.msk.f32.mxu1 %vm1592_vm2, %v1586_v40 }
 0x471   :  { %14556 = vmatprep.subr.bf16.mxu1 %v17271_v1 }
 0x473   :  { %12902 = vmatmul.mubr.msk.f32.gmra.mrb[2].mxu1 %vm1592_vm2, %v1587_v32  ;;  %v2534_v32 = vld [vmem:[%s19245_s0] sm:$0xff] }
 0x474   :  { %14558 = vmatpush3.bf16.msra.mxu1 %v17271_v1  ;;  %12904 = vmatprep.mubr.msk.f32.mxu1 %vm1592_vm2, %v1588_v12 }
 0x475   :  { %14560 = vmatprep.subr.bf16.mxu1 %v17282_v13 }
 0x477   :  { %12905 = vmatmul.mubr.msk.f32.gmra.mrb[4].mxu1 %vm1592_vm2, %v1589_v43 }
 0x478   :  { %14562 = vmatpush3.bf16.msra.mxu1 %v17282_v13  ;;  %12907 = vmatprep.mubr.msk.f32.mxu1 %vm1592_vm2, %v1590_v18 }
 0x479   :  { %14564 = vmatprep.subr.bf16.mxu1 %v17290_v41 }
 0x47b   :  { %12908 = vmatmul.mubr.msk.f32.gmra.mrb[6].mxu1 %vm1592_vm2, %v1591_v44 }
 0x47c   :  { %14566 = vmatpush3.bf16.msra.mxu1 %v17290_v41  ;;  %12940 = vmatprep.mubr.msk.f32.mxu1 %vm1592_vm2, %v1727_v16 }
 0x47d   :  { %14568 = vmatprep.subr.bf16.mxu1 %v17295_v21 }
 0x480   :  { %14570 = vmatpush3.bf16.msra.mxu1 %v17295_v21 }
 0x481   :  { %14572 = vmatprep.subr.bf16.mxu1 %v17300_v38 }
 0x484   :  { %14574 = vmatpush3.bf16.msra.mxu1 %v17300_v38 }
 0x485   :  { %14576 = vmatprep.subr.bf16.mxu1 %v17304_v5 }
 0x488   :  { %14578 = vmatpush3.bf16.msra.mxu1 %v17304_v5 }
 0x489   :  { %12938 = vmatprep.subr.mxu1 %v17316_v17 }
 0x48c   :  { %12939 = vmatpush3.msra.mxu1 %v17316_v17 }
 0x48d   :  { %12941 = vmatmul.mubr.msk.f32.vlgmr.msra.gmra.mrb[8].mxu1 %vm1592_vm2, %v1728_v42  ;;  %14580 = vmatprep.subr.bf16.mxu1 %v14579_v53 }
 0x48e   :  { %12943 = vmatprep.mubr.msk.f32.mxu1 %vm1592_vm2, %v1729_v45  ;;  %14582 = vmatpush3.bf16.msra.mxu1 %v14579_v53 }
 0x48f   :  { %14584 = vmatprep.subr.bf16.mxu1 %v14583_v61 }
 0x491   :  { %12944 = vmatmul.mubr.msk.f32.gmra.mrb[10].mxu1 %vm1592_vm2, %v1730_v46 }
 0x492   :  { %12946 = vmatprep.mubr.msk.f32.mxu1 %vm1592_vm2, %v1731_v48  ;;  %14586 = vmatpush3.bf16.msra.mxu1 %v14583_v61 }
 0x493   :  { %14588 = vmatprep.subr.bf16.mxu1 %v14587_v62 }
 0x495   :  { %12947 = vmatmul.mubr.msk.f32.gmra.mrb[12].mxu1 %vm1592_vm2, %v1732_v49 }
 0x496   :  { %12949 = vmatprep.mubr.msk.f32.mxu1 %vm1592_vm2, %v1733_v47 }
 0x499   :  { %12950 = vmatmul.mubr.msk.f32.gmra.mrb[14].mxu1 %vm1592_vm2, %v1734_v52 }
 0x542   :  { %v12900_v2 = vpop.f32.mrb[0].mxu1 }
 0x543   :  { %v1683_v19 = vpop.f32.mrb[1].mxu1 }
 0x546   :  { %v12903_v63 = vpop.f32.mrb[2].mxu1 }
 0x547   :  { %v1693_v0 = vpop.f32.mrb[3].mxu1 }
 0x54a   :  { %v12906_v36 = vpop.f32.mrb[4].mxu1 }
 0x54b   :  { %v1703_v3 = vpop.f32.mrb[5].mxu1 }
 0x54e   :  { %v12909_v20 = vpop.f32.mrb[6].mxu1 }
 0x54f   :  { %v1713_v4 = vpop.f32.mrb[7].mxu1 }
 0x560   :  { %v12942_v11 = vpop.f32.mrb[8].mxu1 }
 0x561   :  { %v1825_v15 = vpop.f32.mrb[9].mxu1 }
 0x562   :  { %12960 = vmatprep.mubr.msk.f32.mxu1 %vm1374_vm1, %v1825_v15 }
 0x563   :  { %12961 = vmatmul.mubr.msk.f32.vlgmr.msra.gmra.mrb[16].mxu1 %vm1374_vm1, %v12942_v11 }
 0x564   :  { %14590 = vmatpush3.bf16.msra.mxu1 %v14587_v62  ;;  %v12945_v24 = vpop.f32.mrb[10].mxu1 }
 0x565   :  { %v1835_v35 = vpop.f32.mrb[11].mxu1  ;;  %14592 = vmatprep.subr.bf16.mxu1 %v14591_v22 }
 0x566   :  { %12963 = vmatprep.mubr.msk.f32.mxu1 %vm1374_vm1, %v1835_v35 }
 0x567   :  { %12964 = vmatmul.mubr.msk.f32.gmra.mrb[18].mxu1 %vm1374_vm1, %v12945_v24 }
 0x568   :  { %14594 = vmatpush3.bf16.msra.mxu1 %v14591_v22  ;;  %v12948_v27 = vpop.f32.mrb[12].mxu1 }
 0x569   :  { %14596 = vmatprep.subr.bf16.mxu1 %v17265_v54  ;;  %v1845_v28 = vpop.f32.mrb[13].mxu1 }
 0x56a   :  { %12966 = vmatprep.mubr.msk.f32.mxu1 %vm1374_vm1, %v1845_v28 }
 0x56b   :  { %12967 = vmatmul.mubr.msk.f32.gmra.mrb[20].mxu1 %vm1374_vm1, %v12948_v27 }
 0x56c   :  { %v12951_v30 = vpop.f32.mrb[14].mxu1 }
 0x56d   :  { %v1855_v31 = vpop.f32.mrb[15].mxu1 }
 0x56e   :  { %12969 = vmatprep.mubr.msk.f32.mxu1 %vm1374_vm1, %v1855_v31 }
 0x56f   :  { %12970 = vmatmul.mubr.msk.f32.gmra.mrb[22].mxu1 %vm1374_vm1, %v12951_v30 }
 0x570   :  { %12980 = vmatprep.mubr.msk.f32.mxu1 %vm1374_vm1, %v1683_v19 }
 0x573   :  { %12981 = vmatmul.mubr.msk.f32.vlgmr.msra.gmra.mrb[16].mxu1 %vm1374_vm1, %v12900_v2 }
 0x574   :  { %14598 = vmatpush3.bf16.msra.mxu1 %v17265_v54  ;;  %12983 = vmatprep.mubr.msk.f32.mxu1 %vm1374_vm1, %v1693_v0  ;;  %v2128_v54 = vld [vmem:[#allocation23 + $0x80] sm:$0xff] }
 0x575   :  { %14600 = vmatprep.subr.bf16.mxu1 %v17271_v1 }
 0x577   :  { %12984 = vmatmul.mubr.msk.f32.gmra.mrb[18].mxu1 %vm1374_vm1, %v12903_v63 }
 0x578   :  { %14602 = vmatpush3.bf16.msra.mxu1 %v17271_v1  ;;  %12986 = vmatprep.mubr.msk.f32.mxu1 %vm1374_vm1, %v1703_v3  ;;  %v2266_v1 = vld [vmem:[#allocation8 + $0x40] sm:$0xff] }
 0x579   :  { %14604 = vmatprep.subr.bf16.mxu1 %v17282_v13 }
 0x57b   :  { %12987 = vmatmul.mubr.msk.f32.gmra.mrb[20].mxu1 %vm1374_vm1, %v12906_v36 }
 0x57c   :  { %14606 = vmatpush3.bf16.msra.mxu1 %v17282_v13  ;;  %12989 = vmatprep.mubr.msk.f32.mxu1 %vm1374_vm1, %v1713_v4  ;;  %v2267_v13 = vld [vmem:[#allocation8 + $0x48] sm:$0xff] }
 0x57d   :  { %14608 = vmatprep.subr.bf16.mxu1 %v17290_v41 }
 0x57f   :  { %12990 = vmatmul.mubr.msk.f32.gmra.mrb[22].mxu1 %vm1374_vm1, %v12909_v20 }
 0x580   :  { %14610 = vmatpush3.bf16.msra.mxu1 %v17290_v41  ;;  %13022 = vmatprep.mubr.msk.f32.mxu1 %vm1592_vm2, %v2128_v54  ;;  %v14623_v41 = vpack.c.bf16 %v2267_v13, %v2266_v1 }
 0x581   :  { %14612 = vmatprep.subr.bf16.mxu1 %v17295_v21 }
 0x584   :  { %14614 = vmatpush3.bf16.msra.mxu1 %v17295_v21  ;;  %v2131_v21 = vld [vmem:[#allocation23 + $0x98] sm:$0xff] }
 0x585   :  { %14616 = vmatprep.subr.bf16.mxu1 %v17300_v38 }
 0x588   :  { %14618 = vmatpush3.bf16.msra.mxu1 %v17300_v38  ;;  %v2134_v38 = vld [vmem:[#allocation23 + $0xb0] sm:$0xff] }
 0x589   :  { %14620 = vmatprep.subr.bf16.mxu1 %v17304_v5 }
 0x58c   :  { %14622 = vmatpush3.bf16.msra.mxu1 %v17304_v5 }
 0x58d   :  { %13020 = vmatprep.subr.mxu1 %v17316_v17 }
 0x590   :  { %13021 = vmatpush3.msra.mxu1 %v17316_v17 }
 0x591   :  { %13023 = vmatmul.mubr.msk.f32.vlgmr.msra.gmra.mrb[24].mxu1 %vm1592_vm2, %v2129_v33  ;;  %14624 = vmatprep.subr.bf16.mxu1 %v14623_v41 }
 0x592   :  { %13025 = vmatprep.mubr.msk.f32.mxu1 %vm1592_vm2, %v2130_v39  ;;  %14626 = vmatpush3.bf16.msra.mxu1 %v14623_v41 }
 0x593   :  { %14628 = vmatprep.subr.bf16.mxu1 %v14627_v50 }
 0x595   :  { %13026 = vmatmul.mubr.msk.f32.gmra.mrb[26].mxu1 %vm1592_vm2, %v2131_v21 }
 0x596   :  { %13028 = vmatprep.mubr.msk.f32.mxu1 %vm1592_vm2, %v2132_v23  ;;  %14630 = vmatpush3.bf16.msra.mxu1 %v14627_v50 }
 0x599   :  { %13029 = vmatmul.mubr.msk.f32.gmra.mrb[28].mxu1 %vm1592_vm2, %v2133_v6 }
 0x59a   :  { %13031 = vmatprep.mubr.msk.f32.mxu1 %vm1592_vm2, %v2134_v38 }
 0x59d   :  { %13032 = vmatmul.mubr.msk.f32.gmra.mrb[30].mxu1 %vm1592_vm2, %v2135_v25  ;;  %vm2538_vm2 = vcmask 490496  }
 0x664   :  { %v13024_v10 = vpop.f32.mrb[24].mxu1 }
 0x665   :  { %v2226_v5 = vpop.f32.mrb[25].mxu1 }
 0x666   :  { %13042 = vmatprep.mubr.msk.f32.mxu1 %vm1374_vm1, %v2226_v5 }
 0x667   :  { %13043 = vmatmul.mubr.msk.f32.vlgmr.msra.gmra.mrb[16].mxu1 %vm1374_vm1, %v13024_v10 }
 0x668   :  { %v13027_v14 = vpop.f32.mrb[26].mxu1 }
 0x669   :  { %v2236_v26 = vpop.f32.mrb[27].mxu1 }
 0x66a   :  { %13045 = vmatprep.mubr.msk.f32.mxu1 %vm1374_vm1, %v2236_v26 }
 0x66b   :  { %13046 = vmatmul.mubr.msk.f32.gmra.mrb[18].mxu1 %vm1374_vm1, %v13027_v14 }
 0x66c   :  { %v13030_v51 = vpop.f32.mrb[28].mxu1 }
 0x66d   :  { %v2246_v17 = vpop.f32.mrb[29].mxu1 }
 0x66e   :  { %13048 = vmatprep.mubr.msk.f32.mxu1 %vm1374_vm1, %v2246_v17 }
 0x66f   :  { %13049 = vmatmul.mubr.msk.f32.gmra.mrb[20].mxu1 %vm1374_vm1, %v13030_v51 }
 0x670   :  { %v13033_v29 = vpop.f32.mrb[30].mxu1 }
 0x671   :  { %v2256_v40 = vpop.f32.mrb[31].mxu1 }
 0x672   :  { %13051 = vmatprep.mubr.msk.f32.mxu1 %vm1374_vm1, %v2256_v40 }
 0x673   :  { %13052 = vmatmul.mubr.msk.f32.gmra.mrb[22].mxu1 %vm1374_vm1, %v13033_v29 }
 0x674   :  { %13070 = vmatprep.mubr.msk.f32.mxu1 %vm2538_vm2, %v2534_v32 }
 0x73a   :  { %v13044_v12 = vpop.f32.mrb[16].mxu1 }
 0x73b   :  { %v2409_v43 = vsel %vm2407_vm4, %v13044_v12, 0.0  ;;  %v2360_v18 = vpop.f32.mrb[17].mxu1 }
 0x73c   :  { %v2408_v44 = vsel %vm2407_vm4, %v2360_v18, 0.0 }
 0x73d   :  { %v2410_v16 = vadd.f32 %v2409_v43, %v2408_v44 }
 0x73e   :  { %v13047_v42 = vpop.f32.mrb[18].mxu1 }
 0x73f   :  { %v2370_v45 = vpop.f32.mrb[19].mxu1  ;;  %v2413_v49 = vsel %vm2407_vm4, %v13047_v42, 0.0 }
 0x740   :  { %v2411_v46 = vsel %vm2407_vm4, %v2370_v45, 0.0 }
 0x741   :  { %v2412_v48 = vadd.f32 %v2411_v46, %v2410_v16  ;;  %v11738_v46 = vld [vmem:[%s19246_s4] ss:$0 sm:$0xff] }
 0x742   :  { %v13050_v47 = vpop.f32.mrb[20].mxu1 }
 0x743   :  { %v2380_v52 = vpop.f32.mrb[21].mxu1  ;;  %v2414_v55 = vadd.f32 %v2413_v49, %v2412_v48  ;;  %v2417_v56 = vsel %vm2407_vm4, %v13050_v47, 0.0 }
 0x744   :  { %v2415_v57 = vsel %vm2407_vm4, %v2380_v52, 0.0 }
 0x745   :  { %v2416_v53 = vadd.f32 %v2415_v57, %v2414_v55 }
 0x746   :  { %v13053_v60 = vpop.f32.mrb[22].mxu1 }
 0x747   :  { %v2390_v61 = vpop.f32.mrb[23].mxu1  ;;  %v2418_v58 = vadd.f32 %v2417_v56, %v2416_v53  ;;  %v2422_v2 = vsel %vm2421_vm5, %v13053_v60, 0.0 }
 0x748   :  { %v2419_v59 = vsel %vm2407_vm4, %v2390_v61, 0.0 }
 0x749   :  { %v2420_v62 = vadd.f32 %v2419_v59, %v2418_v58 }
 0x74b   :  { %v2423_v19 = vadd.f32 %v2422_v2, %v2420_v62 }
 0x74d   :  { %v2424_v63 = vrot.slane %v2423_v19, 4 }
 0x74f   :  { %v2425_v0 = vadd.f32 %v2424_v63, %v2423_v19 }
 0x751   :  { %v2426_v36 = vrot.slane %v2425_v0, 2 }
 0x753   :  { %v2427_v3 = vadd.f32 %v2426_v36, %v2425_v0 }
 0x755   :  { %v2428_v20 = vrot.slane %v2427_v3, 1 }
 0x757   :  { %v2429_v4 = vadd.f32 %v2428_v20, %v2427_v3 }
 0x759   :  { %v2431_v7 = vmul.f32 0.016666668, %v2429_v4 }
 0x75b   :  { %v2432_v9 = vsub.f32 %v2360_v18, %v2431_v7  ;;  %v2433_v11 = vsub.f32 %v13044_v12, %v2431_v7  ;;  %v2434_v15 = vsub.f32 %v2370_v45, %v2431_v7  ;;  %v2435_v22 = vsub.f32 %v13047_v42, %v2431_v7 }
 0x75c   :  { %v2436_v24 = vsub.f32 %v2380_v52, %v2431_v7  ;;  %v2437_v35 = vsub.f32 %v13050_v47, %v2431_v7  ;;  %v2438_v27 = vsub.f32 %v2390_v61, %v2431_v7  ;;  %v2439_v28 = vsub.f32 %v13053_v60, %v2431_v7  ;;  %v11739_v60 = vld [vmem:[%s19247_s21] ss:$0 sm:$0xff] }
 0x75d   :  { %v2440_v30 = vmul.f32 %v2432_v9, %v2432_v9  ;;  %v2441_v31 = vmul.f32 %v2433_v11, %v2433_v11  ;;  %v2442_v54 = vmul.f32 %v2434_v15, %v2434_v15  ;;  %v2443_v1 = vmul.f32 %v2435_v22, %v2435_v22 }
 0x75e   :  { %v2444_v41 = vmul.f32 %v2436_v24, %v2436_v24  ;;  %v2445_v50 = vmul.f32 %v2437_v35, %v2437_v35  ;;  %v2446_v6 = vmul.f32 %v2438_v27, %v2438_v27  ;;  %v2447_v10 = vmul.f32 %v2439_v28, %v2439_v28 }
 0x75f   :  { %v2448_v13 = vsel %vm2407_vm4, %v2440_v30, 0.0  ;;  %v2449_v34 = vsel %vm2407_vm4, %v2441_v31, 0.0  ;;  %v2451_v33 = vsel %vm2407_vm4, %v2442_v54, 0.0  ;;  %v2453_v21 = vsel %vm2407_vm4, %v2443_v1, 0.0 }
 0x760   :  { %v2450_v37 = vadd.f32 %v2449_v34, %v2448_v13  ;;  %v2455_v38 = vsel %vm2407_vm4, %v2444_v41, 0.0  ;;  %v2457_v5 = vsel %vm2407_vm4, %v2445_v50, 0.0  ;;  %v2459_v26 = vsel %vm2407_vm4, %v2446_v6, 0.0 }
 0x761   :  { %v2461_v17 = vsel %vm2421_vm5, %v2447_v10, 0.0  ;;  %v2535_v10 = vld [vmem:[%s19245_s0 + $0x8] sm:$0xff] }
 0x762   :  { %v2452_v39 = vadd.f32 %v2451_v33, %v2450_v37 }
 0x764   :  { %v2454_v23 = vadd.f32 %v2453_v21, %v2452_v39 }
 0x766   :  { %v2456_v25 = vadd.f32 %v2455_v38, %v2454_v23 }
 0x768   :  { %v2458_v14 = vadd.f32 %v2457_v5, %v2456_v25  ;;  %v2536_v5 = vld [vmem:[%s19245_s0 + $0x10] sm:$0xff] }
 0x76a   :  { %v2460_v51 = vadd.f32 %v2459_v26, %v2458_v14  ;;  %v2537_v14 = vld [vmem:[%s19245_s0 + $0x18] sm:$0xff]  ;;  %v11745_v26 = vld [vmem:[%s19245_s0 + $0x20] sm:$0xff] }
 0x76c   :  { %v2462_v29 = vadd.f32 %v2461_v17, %v2460_v51  ;;  %v11746_v51 = vld [vmem:[%s19245_s0 + $0x28] sm:$0xff]  ;;  %v11747_v17 = vld [vmem:[%s19245_s0 + $0x30] sm:$0xff] }
 0x76e   :  { %v2463_v40 = vrot.slane %v2462_v29, 4 }
 0x770   :  { %v2464_v32 = vadd.f32 %v2463_v40, %v2462_v29  ;;  %v11748_v29 = vld [vmem:[%s19245_s0 + $0x38] sm:$0xff]  ;;  %v2751_v40 = vld [vmem:[#allocation9 + $0x40] sm:$0xff] }
 0x772   :  { %v2465_v12 = vrot.slane %v2464_v32, 2 }
 0x774   :  { %v2466_v43 = vadd.f32 %v2465_v12, %v2464_v32  ;;  %v2752_v32 = vld [vmem:[#allocation9 + $0x48] sm:$0xff]  ;;  %v2753_v12 = vld [vmem:[#allocation9 + $0x50] sm:$0xff] }
 0x776   :  { %v2467_v18 = vrot.slane %v2466_v43, 1 }
 0x778   :  { %v2468_v44 = vadd.f32 %v2467_v18, %v2466_v43  ;;  %v14667_v43 = vpack.c.bf16 %v2752_v32, %v2751_v40  ;;  %v2754_v18 = vld [vmem:[#allocation9 + $0x58] sm:$0xff] }
 0x779   :  { %v3312_v40 = vld [vmem:[#allocation11 + $0x18] sm:$0xff] }
 0x77a   :  { %v2469_v16 = vmul.f32 0.016666668, %v2468_v44  ;;  %v14671_v44 = vpack.c.bf16 %v2754_v18, %v2753_v12  ;;  %v3314_v18 = vld [vmem:[#allocation11 + $0x28] sm:$0xff] }
 0x77c   :  { %v2470_v42 = vadd.f32 1e-05, %v2469_v16  ;;  %v2755_v16 = vld [vmem:[#allocation9 + $0x60] sm:$0xff] }
 0x77e   :  { %15827 = vrsqrt.f32 %v2470_v42  ;;  %v2756_v42 = vld [vmem:[#allocation9 + $0x68] sm:$0xff] }
 0x788   :  { %v15828_v45 = vpop.eup %15827 }
 0x789   :  { %v2472_v48 = vmul.f32 %v15828_v45, %v2432_v9  ;;  %v2473_v49 = vmul.f32 %v15828_v45, %v2433_v11  ;;  %v2474_v47 = vmul.f32 %v15828_v45, %v2434_v15  ;;  %v2475_v52 = vmul.f32 %v15828_v45, %v2435_v22 }
 0x78a   :  { %v2476_v55 = vmul.f32 %v15828_v45, %v2436_v24  ;;  %v2477_v57 = vmul.f32 %v15828_v45, %v2437_v35  ;;  %v2478_v53 = vmul.f32 %v15828_v45, %v2438_v27  ;;  %v2479_v56 = vmul.f32 %v15828_v45, %v2439_v28 }
 0x78b   :  { %v2489_v61 = vmul.f32 %v11738_v46, %v2474_v47  ;;  %v2490_v58 = vmul.f32 %v11738_v46, %v2475_v52  ;;  %v2487_v59 = vmul.f32 %v11738_v46, %v2472_v48  ;;  %v2488_v62 = vmul.f32 %v11738_v46, %v2473_v49  ;;  %v2758_v48 = vld [vmem:[#allocation9 + $0x78] sm:$0xff]  ;;  %v2640_v47 = vld [vmem:[#allocation9] sm:$0xff]  ;;  %v2641_v52 = vld [vmem:[#allocation9 + $0x8] sm:$0xff] }
 0x78c   :  { %v2491_v2 = vmul.f32 %v11738_v46, %v2476_v55  ;;  %v2492_v19 = vmul.f32 %v11738_v46, %v2477_v57  ;;  %v2493_v63 = vmul.f32 %v11738_v46, %v2478_v53  ;;  %v2494_v0 = vmul.f32 %v11738_v46, %v2479_v56  ;;  %v2757_v46 = vld [vmem:[#allocation9 + $0x70] sm:$0xff] }
 0x78d   :  { %v2502_v36 = vadd.f32 %v11739_v60, %v2487_v59  ;;  %v2503_v3 = vadd.f32 %v11739_v60, %v2488_v62  ;;  %v2504_v20 = vadd.f32 %v11739_v60, %v2489_v61  ;;  %v2505_v4 = vadd.f32 %v11739_v60, %v2490_v58  ;;  %v2642_v61 = vld [vmem:[#allocation9 + $0x10] sm:$0xff]  ;;  %v2643_v58 = vld [vmem:[#allocation9 + $0x18] sm:$0xff] }
 0x78e   :  { %v2506_v7 = vadd.f32 %v11739_v60, %v2491_v2  ;;  %v2507_v9 = vadd.f32 %v11739_v60, %v2492_v19  ;;  %v2508_v11 = vadd.f32 %v11739_v60, %v2493_v63  ;;  %v2509_v15 = vadd.f32 %v11739_v60, %v2494_v0  ;;  %v2644_v19 = vld [vmem:[#allocation9 + $0x20] sm:$0xff]  ;;  %v2645_v63 = vld [vmem:[#allocation9 + $0x28] sm:$0xff] }
 0x78f   :  { %vm2510_vm6 = vcmp.ge.f32.partialorder %v2502_v36, 0.0  ;;  %vm2511_vm7 = vcmp.ge.f32.partialorder %v2503_v3, 0.0  ;;  %v2518_v22 = vmul.f32 0.01, %v2502_v36  ;;  %v2519_v24 = vmul.f32 0.01, %v2503_v3 }
 0x790   :  { %vm2516_vm8 = vcmp.ge.f32.partialorder %v2508_v11, 0.0  ;;  %vm2517_vm9 = vcmp.ge.f32.partialorder %v2509_v15, 0.0  ;;  %v2524_v35 = vmul.f32 0.01, %v2508_v11  ;;  %v2525_v27 = vmul.f32 0.01, %v2509_v15 }
 0x791   :  { %v2526_v28 = vsel %vm2510_vm6, %v2502_v36, %v2518_v22  ;;  %v2527_v30 = vsel %vm2511_vm7, %v2503_v3, %v2519_v24  ;;  %vm2512_vm10 = vcmp.ge.f32.partialorder %v2504_v20, 0.0  ;;  %vm2513_vm11 = vcmp.ge.f32.partialorder %v2505_v4, 0.0  ;;  %v3058_v24 = vld [vmem:[#allocation9 + $0x90] sm:$0xff] }
 0x792   :  { %v2532_v31 = vsel %vm2516_vm8, %v2508_v11, %v2524_v35  ;;  %v2533_v54 = vsel %vm2517_vm9, %v2509_v15, %v2525_v27  ;;  %v17419_v1 = vpack.c.bf16 %v2527_v30, %v2526_v28  ;;  %v2520_v13 = vmul.f32 0.01, %v2504_v20  ;;  %v3056_v11 = vld [vmem:[#allocation9 + $0x80] sm:$0xff]  ;;  %v3057_v15 = vld [vmem:[#allocation9 + $0x88] sm:$0xff]  ;;  %v3059_v35 = vld [vmem:[#allocation9 + $0x98] sm:$0xff] }
 0x793   :  { %v17421_v34 = vpack.c.bf16 %v2533_v54, %v2532_v31  ;;  %v2521_v37 = vmul.f32 0.01, %v2505_v4  ;;  %vm2514_vm12 = vcmp.ge.f32.partialorder %v2506_v7, 0.0  ;;  %vm2515_vm13 = vcmp.ge.f32.partialorder %v2507_v9, 0.0  ;;  %v11763_v27 = vld [vmem:[%s19245_s0 + $0x48] sm:$0xff]  ;;  %v11764_v28 = vld [vmem:[%s19245_s0 + $0x50] sm:$0xff] }
 0x794   :  { %14632 = vmatprep.subr.bf16.mxu1 %v17419_v1  ;;  %v2528_v41 = vsel %vm2512_vm10, %v2504_v20, %v2520_v13  ;;  %v2522_v33 = vmul.f32 0.01, %v2506_v7  ;;  %v2523_v39 = vmul.f32 0.01, %v2507_v9  ;;  %v14675_v45 = vpack.c.bf16 %v2756_v42, %v2755_v16  ;;  %v2646_v20 = vld [vmem:[#allocation9 + $0x30] sm:$0xff]  ;;  %v3060_v31 = vld [vmem:[#allocation9 + $0xa0] sm:$0xff] }
 0x795   :  { %14634 = vmatpush3.bf16.msra.mxu1 %v17419_v1  ;;  %v2529_v50 = vsel %vm2513_vm11, %v2505_v4, %v2521_v37  ;;  %v14679_v49 = vpack.c.bf16 %v2758_v48, %v2757_v46  ;;  %v14683_v55 = vpack.c.bf16 %v2641_v52, %v2640_v47  ;;  %v14687_v2 = vpack.c.bf16 %v2643_v58, %v2642_v61  ;;  %v2647_v4 = vld [vmem:[#allocation9 + $0x38] sm:$0xff]  ;;  %v3061_v54 = vld [vmem:[#allocation9 + $0xa8] sm:$0xff]  ;;  %v3062_v37 = vld [vmem:[#allocation9 + $0xb0] sm:$0xff] }
 0x796   :  { %v17425_v21 = vpack.c.bf16 %v2529_v50, %v2528_v41  ;;  %v2530_v23 = vsel %vm2514_vm12, %v2506_v7, %v2522_v33  ;;  %v2531_v6 = vsel %vm2515_vm13, %v2507_v9, %v2523_v39  ;;  %v14691_v3 = vpack.c.bf16 %v2645_v63, %v2644_v19  ;;  %v11762_v9 = vld [vmem:[%s19245_s0 + $0x40] sm:$0xff]  ;;  %v3317_v52 = vld [vmem:[#allocation11 + $0x40] sm:$0xff] }
 0x797   :  { %v17427_v38 = vpack.c.bf16 %v2531_v6, %v2530_v23  ;;  %v14695_v7 = vpack.c.bf16 %v2647_v4, %v2646_v20  ;;  %v14717_v22 = vpack.c.bf16 %v3057_v15, %v3056_v11  ;;  %v14721_v30 = vpack.c.bf16 %v3059_v35, %v3058_v24  ;;  %v3063_v41 = vld [vmem:[#allocation9 + $0xb8] sm:$0xff]  ;;  %v3323_v11 = vld [vmem:[#allocation11 + $0x70] sm:$0xff] }
 0x798   :  { %14636 = vmatprep.subr.bf16.mxu1 %v17425_v21  ;;  %v14725_v13 = vpack.c.bf16 %v3061_v54, %v3060_v31  ;;  %v16416_v23 = vmov 0.0   ;;  %v3316_v46 = vld [vmem:[#allocation11 + $0x38] sm:$0xff]  ;;  %vm4543_vm8 = vcmask 125952   ;;  %vm4569_vm9 = vcmask 130048  }
 0x799   :  { %14638 = vmatpush3.bf16.msra.mxu1 %v17425_v21  ;;  %13194 = vmatprep.mubr.msk.f32.mxu0 %vm16415_vm3, %v16416_v23  ;;  %v3320_v61 = vld [vmem:[#allocation11 + $0x58] sm:$0xff]  ;;  %vm4733_vm10 = vcmask 31744  }
 0x79a   :  { %14640 = vmatprep.subr.bf16.mxu1 %v17427_v38  ;;  %v3324_v15 = vld [vmem:[#allocation11 + $0x78] sm:$0xff] }
 0x79d   :  { %14642 = vmatpush3.bf16.msra.mxu1 %v17427_v38 }
 0x79e   :  { %14645 = vmatprep.subr.msk.bf16.mxu1 %vm17433_vm0, %v17421_v34 }
 0x7a1   :  { %14648 = vmatpush3.bf16.msk.msra.mxu1 %vm17433_vm0, %v17421_v34 }
 0x7a2   :  { %14650 = vmatprep.subr.bf16.mxu1 %v17419_v1 }
 0x7a4   :  { %13071 = vmatmul.mubr.msk.f32.vlgmr.msra.gmra.mrb[32].mxu1 %vm2538_vm2, %v2535_v10 }
 0x7a5   :  { %14652 = vmatpush3.bf16.msra.mxu1 %v17419_v1  ;;  %13073 = vmatprep.mubr.msk.f32.mxu1 %vm2538_vm2, %v2536_v5 }
 0x7a6   :  { %14654 = vmatprep.subr.bf16.mxu1 %v17425_v21 }
 0x7a8   :  { %13074 = vmatmul.mubr.msk.f32.gmra.mrb[34].mxu1 %vm2538_vm2, %v2537_v14  ;;  %v3309_v14 = vld [vmem:[#allocation11] sm:$0xff] }
 0x7a9   :  { %14656 = vmatpush3.bf16.msra.mxu1 %v17425_v21  ;;  %13092 = vmatprep.mubr.msk.f32.mxu1 %vm2538_vm2, %v11745_v26  ;;  %v3310_v26 = vld [vmem:[#allocation11 + $0x8] sm:$0xff] }
 0x7aa   :  { %14658 = vmatprep.subr.bf16.mxu1 %v17427_v38 }
 0x7ad   :  { %14660 = vmatpush3.bf16.msra.mxu1 %v17427_v38 }
 0x7ae   :  { %14663 = vmatprep.subr.msk.bf16.mxu1 %vm17433_vm0, %v17421_v34 }
 0x7b1   :  { %14666 = vmatpush3.bf16.msk.msra.mxu1 %vm17433_vm0, %v17421_v34 }
 0x7b2   :  { %14668 = vmatprep.subr.bf16.mxu1 %v14667_v43 }
 0x7b4   :  { %13093 = vmatmul.mubr.msk.f32.vlgmr.msra.gmra.mrb[36].mxu1 %vm2538_vm2, %v11746_v51  ;;  %v3311_v51 = vld [vmem:[#allocation11 + $0x10] sm:$0xff] }
 0x7b5   :  { %13095 = vmatprep.mubr.msk.f32.mxu1 %vm2538_vm2, %v11747_v17  ;;  %14670 = vmatpush3.bf16.msra.mxu1 %v14667_v43  ;;  %v14743_v12 = vpack.c.bf16 %v3312_v40, %v3311_v51  ;;  %v3313_v43 = vld [vmem:[#allocation11 + $0x20] sm:$0xff] }
 0x7b6   :  { %14672 = vmatprep.subr.bf16.mxu1 %v14671_v44  ;;  %v14746_v42 = vpack.c.bf16 %v3314_v18, %v3313_v43 }
 0x7b8   :  { %13096 = vmatmul.mubr.msk.f32.gmra.mrb[38].mxu1 %vm2538_vm2, %v11748_v29  ;;  %v14740_v29 = vpack.c.bf16 %v3310_v26, %v3309_v14 }
 0x7b9   :  { %14674 = vmatpush3.bf16.msra.mxu1 %v14671_v44 }
 0x7ba   :  { %14676 = vmatprep.subr.bf16.mxu1 %v14675_v45 }
 0x7bd   :  { %14678 = vmatpush3.bf16.msra.mxu1 %v14675_v45  ;;  %v3315_v45 = vld [vmem:[#allocation11 + $0x30] sm:$0xff] }
 0x7be   :  { %14680 = vmatprep.subr.bf16.mxu1 %v14679_v49  ;;  %v14749_v47 = vpack.c.bf16 %v3316_v46, %v3315_v45 }
 0x7c1   :  { %14682 = vmatpush3.bf16.msra.mxu1 %v14679_v49 }
 0x7c2   :  { %14684 = vmatprep.subr.bf16.mxu1 %v14683_v55 }
 0x877   :  { %v13072_v57 = vpop.f32.mrb[32].mxu1 }
 0x878   :  { %v2621_v53 = vpop.f32.mrb[33].mxu1 }
 0x87b   :  { %v13075_v56 = vpop.f32.mrb[34].mxu1 }
 0x87c   :  { %v2631_v60 = vpop.f32.mrb[35].mxu1 }
 0x887   :  { %v13094_v59 = vpop.f32.mrb[36].mxu1 }
 0x888   :  { %v2731_v62 = vpop.f32.mrb[37].mxu1 }
 0x889   :  { %13114 = vmatprep.mubr.msk.f32.mxu1 %vm2407_vm4, %v2731_v62 }
 0x88a   :  { %13115 = vmatmul.mubr.msk.f32.vlgmr.msra.gmra.mrb[40].mxu1 %vm2407_vm4, %v13094_v59 }
 0x88b   :  { %14686 = vmatpush3.bf16.msra.mxu1 %v14683_v55  ;;  %v13097_v0 = vpop.f32.mrb[38].mxu1  ;;  %v3318_v55 = vld [vmem:[#allocation11 + $0x48] sm:$0xff] }
 0x88c   :  { %v2741_v36 = vpop.f32.mrb[39].mxu1  ;;  %14688 = vmatprep.subr.bf16.mxu1 %v14687_v2 }
 0x88d   :  { %13117 = vmatprep.mubr.msk.f32.mxu1 %vm2407_vm4, %v2741_v36  ;;  %v3322_v36 = vld [vmem:[#allocation11 + $0x68] sm:$0xff] }
 0x88e   :  { %13118 = vmatmul.mubr.msk.f32.gmra.mrb[42].mxu1 %vm2407_vm4, %v13097_v0  ;;  %v3321_v0 = vld [vmem:[#allocation11 + $0x60] sm:$0xff] }
 0x88f   :  { %14690 = vmatpush3.bf16.msra.mxu1 %v14687_v2  ;;  %13136 = vmatprep.mubr.msk.f32.mxu1 %vm2407_vm4, %v2621_v53 }
 0x890   :  { %14692 = vmatprep.subr.bf16.mxu1 %v14691_v3 }
 0x893   :  { %14694 = vmatpush3.bf16.msra.mxu1 %v14691_v3 }
 0x894   :  { %14696 = vmatprep.subr.bf16.mxu1 %v14695_v7 }
 0x897   :  { %14698 = vmatpush3.bf16.msra.mxu1 %v14695_v7 }
 0x898   :  { %14700 = vmatprep.subr.bf16.mxu1 %v17419_v1 }
 0x89a   :  { %13137 = vmatmul.mubr.msk.f32.vlgmr.msra.gmra.mrb[40].mxu1 %vm2407_vm4, %v13072_v57 }
 0x89b   :  { %13139 = vmatprep.mubr.msk.f32.mxu1 %vm2407_vm4, %v2631_v60  ;;  %14702 = vmatpush3.bf16.msra.mxu1 %v17419_v1  ;;  %v11765_v1 = vld [vmem:[%s19245_s0 + $0x58] sm:$0xff] }
 0x89c   :  { %14704 = vmatprep.subr.bf16.mxu1 %v17425_v21  ;;  %v3319_v60 = vld [vmem:[#allocation11 + $0x50] sm:$0xff] }
 0x89d   :  { %v14755_v59 = vpack.c.bf16 %v3320_v61, %v3319_v60  ;;  %v3478_v60 = vld [vmem:[#allocation11 + $0x80] sm:$0xff]  ;;  %v3479_v61 = vld [vmem:[#allocation11 + $0x88] sm:$0xff] }
 0x89e   :  { %13140 = vmatmul.mubr.msk.f32.gmra.mrb[42].mxu1 %vm2407_vm4, %v13075_v56  ;;  %v14752_v56 = vpack.c.bf16 %v3318_v55, %v3317_v52  ;;  %v3729_v52 = vld [vmem:[#allocation30 + $0xc] sm:$0xf]  ;;  %v3892_v55 = vld [vmem:[#allocation30 + $0x10] sm:$0xf] }
 0x89f   :  { %14706 = vmatpush3.bf16.msra.mxu1 %v17425_v21  ;;  %13158 = vmatprep.mubr.msk.f32.mxu1 %vm2538_vm2, %v11762_v9  ;;  %v14758_v9 = vpack.c.bf16 %v3322_v36, %v3321_v0  ;;  %v3482_v0 = vld [vmem:[#allocation11 + $0xa0] sm:$0xff]  ;;  %v3483_v36 = vld [vmem:[#allocation11 + $0xa8] sm:$0xff] }
 0x8a0   :  { %14708 = vmatprep.subr.bf16.mxu1 %v17427_v38 }
 0x8a3   :  { %14710 = vmatpush3.bf16.msra.mxu1 %v17427_v38 }
 0x8a4   :  { %14713 = vmatprep.subr.msk.bf16.mxu1 %vm17433_vm0, %v17421_v34 }
 0x8a7   :  { %14716 = vmatpush3.bf16.msk.msra.mxu1 %vm17433_vm0, %v17421_v34  ;;  %v14729_v34 = vpack.c.bf16 %v3063_v41, %v3062_v37 }
 0x8a8   :  { %14718 = vmatprep.subr.bf16.mxu1 %v14717_v22 }
 0x8aa   :  { %13159 = vmatmul.mubr.msk.f32.vlgmr.msra.gmra.mrb[44].mxu1 %vm2538_vm2, %v11763_v27  ;;  %v14761_v27 = vpack.c.bf16 %v3324_v15, %v3323_v11  ;;  %v3486_v15 = vld [vmem:[#allocation11 + $0xc0] sm:$0xff] }
 0x8ab   :  { %13161 = vmatprep.mubr.msk.f32.mxu1 %vm2538_vm2, %v11764_v28  ;;  %14720 = vmatpush3.bf16.msra.mxu1 %v14717_v22 }
 0x8ac   :  { %14722 = vmatprep.subr.bf16.mxu1 %v14721_v30 }
 0x8ae   :  { %13162 = vmatmul.mubr.msk.f32.gmra.mrb[46].mxu1 %vm2538_vm2, %v11765_v1 }
 0x8af   :  { %14724 = vmatpush3.bf16.msra.mxu1 %v14721_v30 }
 0x8b0   :  { %14726 = vmatprep.subr.bf16.mxu1 %v14725_v13 }
 0x8b3   :  { %14728 = vmatpush3.bf16.msra.mxu1 %v14725_v13 }
 0x8b4   :  { %14730 = vmatprep.subr.bf16.mxu1 %v14729_v34 }
 0x8b7   :  { %14732 = vmatpush3.bf16.msra.mxu1 %v14729_v34 }
 0x8b8   :  { %14739 = vmatprep.subr.bf16.mxu1 %v16413_v8 }
 0x97d   :  { %v13160_v33 = vpop.f32.mrb[44].mxu1 }
 0x97e   :  { %v3036_v39 = vpop.f32.mrb[45].mxu1 }
 0x97f   :  { %13180 = vmatprep.mubr.msk.f32.mxu1 %vm2407_vm4, %v3036_v39 }
 0x980   :  { %13181 = vmatmul.mubr.msk.f32.vlgmr.msra.gmra.mrb[40].mxu1 %vm2407_vm4, %v13160_v33  ;;  %v11775_v33 = vld [vmem:[%s19250_s26] ss:$0 sm:$0xff] }
 0x981   :  { %v13163_v50 = vpop.f32.mrb[46].mxu1  ;;  %14741 = vmatpush3.bf16.msra.mxu1 %v14740_v29 }
 0x982   :  { %v3046_v21 = vpop.f32.mrb[47].mxu1  ;;  %14742 = vmatprep.subr.bf16.mxu1 %v16413_v8 }
 0x983   :  { %13183 = vmatprep.mubr.msk.f32.mxu1 %vm2407_vm4, %v3046_v21 }
 0x984   :  { %13184 = vmatmul.mubr.msk.f32.gmra.mrb[42].mxu1 %vm2407_vm4, %v13163_v50 }
 0x985   :  { %13229 = vmatprep.mubr.msk.f32.mxu1 %vm16415_vm3, %v16416_v23  ;;  %14744 = vmatpush3.bf16.msra.mxu1 %v14743_v12 }
 0x986   :  { %14745 = vmatprep.subr.bf16.mxu1 %v16413_v8 }
 0x989   :  { %14747 = vmatpush3.bf16.msra.mxu1 %v14746_v42 }
 0x98a   :  { %14748 = vmatprep.subr.bf16.mxu1 %v16413_v8 }
 0x98d   :  { %14750 = vmatpush3.bf16.msra.mxu1 %v14749_v47  ;;  %v3566_v47 = vld [vmem:[#allocation30 + $0x8] sm:$0xf] }
 0x98e   :  { %14751 = vmatprep.subr.bf16.mxu1 %v16413_v8 }
 0x991   :  { %14753 = vmatpush3.bf16.msra.mxu1 %v14752_v56  ;;  %v4381_v56 = vld [vmem:[#allocation30 + $0x1c] sm:$0xf] }
 0x992   :  { %14754 = vmatprep.subr.bf16.mxu1 %v16413_v8 }
 0x995   :  { %14756 = vmatpush3.bf16.msra.mxu1 %v14755_v59  ;;  %v3480_v59 = vld [vmem:[#allocation11 + $0x90] sm:$0xff] }
 0x996   :  { %14757 = vmatprep.subr.bf16.mxu1 %v16413_v8 }
 0x999   :  { %14759 = vmatpush3.bf16.msra.mxu1 %v14758_v9 }
 0x99a   :  { %14760 = vmatprep.subr.bf16.mxu1 %v16413_v8 }
 0x99d   :  { %14762 = vmatpush3.bf16.msra.mxu1 %v14761_v27  ;;  %v3489_v27 = vld [vmem:[#allocation11 + $0xd8] sm:$0xff] }
 0x99e   :  { %14769 = vmatprep.subr.bf16.mxu1 %v16413_v8 }
 0xa53   :  { %v13182_v6 = vpop.f32.mrb[40].mxu1 }
 0xa54   :  { %v3142_v38 = vpop.f32.mrb[41].mxu1 }
 0xa55   :  { %v3165_v25 = vadd.f32 %v13182_v6, %v3142_v38 }
 0xa57   :  { %v13185_v10 = vpop.f32.mrb[42].mxu1 }
 0xa58   :  { %v3152_v5 = vpop.f32.mrb[43].mxu1 }
 0xa59   :  { %v3166_v17 = vadd.f32 %v3165_v25, %v3152_v5 }
 0xa5b   :  { %v3167_v32 = vadd.f32 %v13185_v10, %v3166_v17 }
 0xa5d   :  { %v3168_v44 = vrot.slane %v3167_v32, 4 }
 0xa5f   :  { %v3169_v16 = vadd.f32 %v3168_v44, %v3167_v32 }
 0xa61   :  { %v3170_v48 = vrot.slane %v3169_v16, 2 }
 0xa63   :  { %v3171_v49 = vadd.f32 %v3170_v48, %v3169_v16  ;;  %v3235_v48 = vld [vmem:[#allocation30] sm:$0xf] }
 0xa65   :  { %v3172_v57 = vrot.slane %v3171_v49, 1 }
 0xa67   :  { %v3173_v53 = vadd.f32 %v3172_v57, %v3171_v49  ;;  %v3403_v49 = vld [vmem:[#allocation30 + $0x4] sm:$0xf]  ;;  %v4055_v57 = vld [vmem:[#allocation30 + $0x14] sm:$0xf] }
 0xa69   :  { %v3175_v58 = vmul.f32 0.03125, %v3173_v53  ;;  %v4218_v53 = vld [vmem:[#allocation30 + $0x18] sm:$0xf] }
 0xa6b   :  { %v3176_v62 = vsub.f32 %v3142_v38, %v3175_v58  ;;  %v3177_v2 = vsub.f32 %v13182_v6, %v3175_v58  ;;  %v3178_v19 = vsub.f32 %v3152_v5, %v3175_v58  ;;  %v3179_v63 = vsub.f32 %v13185_v10, %v3175_v58  ;;  %v11776_v38 = vld [vmem:[%s19251_s27] ss:$0 sm:$0xff] }
 0xa6c   :  { %v14770_v58 = vpack.c.bf16 %v3479_v61, %v3478_v60 }
 0xa6d   :  { %v3180_v3 = vmul.f32 %v3176_v62, %v3176_v62  ;;  %v3181_v20 = vmul.f32 %v3177_v2, %v3177_v2  ;;  %v3182_v4 = vmul.f32 %v3178_v19, %v3178_v19  ;;  %v3183_v22 = vmul.f32 %v3179_v63, %v3179_v63 }
 0xa6f   :  { %v3184_v7 = vadd.f32 %v3181_v20, %v3180_v3  ;;  %v14776_v3 = vpack.c.bf16 %v3483_v36, %v3482_v0  ;;  %v3484_v20 = vld [vmem:[#allocation11 + $0xb0] sm:$0xff] }
 0xa70   :  { %v3810_v36 = vld [vmem:[#allocation11 + $0x1b0] sm:$0xff] }
 0xa71   :  { %v3185_v24 = vadd.f32 %v3184_v7, %v3182_v4  ;;  %v3485_v4 = vld [vmem:[#allocation11 + $0xb8] sm:$0xff] }
 0xa72   :  { %v14779_v11 = vpack.c.bf16 %v3485_v4, %v3484_v20  ;;  %v3812_v4 = vld [vmem:[#allocation11 + $0x1c0] sm:$0xff] }
 0xa73   :  { %v3186_v35 = vadd.f32 %v3185_v24, %v3183_v22  ;;  %v3487_v22 = vld [vmem:[#allocation11 + $0xc8] sm:$0xff] }
 0xa74   :  { %v14782_v24 = vpack.c.bf16 %v3487_v22, %v3486_v15  ;;  %v3815_v15 = vld [vmem:[#allocation11 + $0x1d8] sm:$0xff] }
 0xa75   :  { %v3187_v28 = vrot.slane %v3186_v35, 4 }
 0xa77   :  { %v3188_v30 = vadd.f32 %v3187_v28, %v3186_v35  ;;  %v3488_v35 = vld [vmem:[#allocation11 + $0xd0] sm:$0xff] }
 0xa79   :  { %v3189_v31 = vrot.slane %v3188_v30, 2 }
 0xa7b   :  { %v3190_v54 = vadd.f32 %v3189_v31, %v3188_v30  ;;  %v14785_v31 = vpack.c.bf16 %v3489_v27, %v3488_v35  ;;  %v3817_v35 = vld [vmem:[#allocation11 + $0x1e8] sm:$0xff] }
 0xa7d   :  { %v3191_v1 = vrot.slane %v3190_v54, 1 }
 0xa7f   :  { %v3192_v13 = vadd.f32 %v3191_v1, %v3190_v54  ;;  %v3490_v54 = vld [vmem:[#allocation11 + $0xe0] sm:$0xff]  ;;  %v3491_v1 = vld [vmem:[#allocation11 + $0xe8] sm:$0xff] }
 0xa81   :  { %v3193_v37 = vmul.f32 0.03125, %v3192_v13  ;;  %v14788_v13 = vpack.c.bf16 %v3491_v1, %v3490_v54  ;;  %v3967_v54 = vld [vmem:[#allocation11 + $0x200] sm:$0xff]  ;;  %v3968_v1 = vld [vmem:[#allocation11 + $0x208] sm:$0xff] }
 0xa83   :  { %v3194_v41 = vadd.f32 1e-05, %v3193_v37  ;;  %v3492_v37 = vld [vmem:[#allocation11 + $0xf0] sm:$0xff] }
 0xa85   :  { %15829 = vrsqrt.f32 %v3194_v41  ;;  %v3493_v41 = vld [vmem:[#allocation11 + $0xf8] sm:$0xff] }
 0xa8f   :  { %v15830_v34 = vpop.eup %15829 }
 0xa90   :  { %v3196_v39 = vmul.f32 %v15830_v34, %v3176_v62  ;;  %v3197_v50 = vmul.f32 %v15830_v34, %v3177_v2  ;;  %v3198_v21 = vmul.f32 %v15830_v34, %v3178_v19  ;;  %v3199_v6 = vmul.f32 %v15830_v34, %v3179_v63  ;;  %v3481_v62 = vld [vmem:[#allocation11 + $0x98] sm:$0xff] }
 0xa91   :  { %v14773_v63 = vpack.c.bf16 %v3481_v62, %v3480_v59  ;;  %v3807_v59 = vld [vmem:[#allocation11 + $0x198] sm:$0xff] }
 0xa92   :  { %v3207_v25 = vmul.f32 %v11775_v33, %v3196_v39  ;;  %v3208_v10 = vmul.f32 %v11775_v33, %v3197_v50  ;;  %v3209_v5 = vmul.f32 %v11775_v33, %v3198_v21  ;;  %v3210_v14 = vmul.f32 %v11775_v33, %v3199_v6  ;;  %v3641_v50 = vld [vmem:[#allocation11 + $0x100] sm:$0xff]  ;;  %v3642_v21 = vld [vmem:[#allocation11 + $0x108] sm:$0xff] }
 0xa93   :  { %v14791_v39 = vpack.c.bf16 %v3493_v41, %v3492_v37  ;;  %v14800_v6 = vpack.c.bf16 %v3642_v21, %v3641_v50  ;;  %v3969_v41 = vld [vmem:[#allocation11 + $0x210] sm:$0xff]  ;;  %v3971_v21 = vld [vmem:[#allocation11 + $0x220] sm:$0xff] }
 0xa94   :  { %v3218_v26 = vadd.f32 %v11776_v38, %v3207_v25  ;;  %v3219_v51 = vadd.f32 %v11776_v38, %v3208_v10  ;;  %v3220_v17 = vadd.f32 %v11776_v38, %v3209_v5  ;;  %v3221_v29 = vadd.f32 %v11776_v38, %v3210_v14  ;;  %v3643_v38 = vld [vmem:[#allocation11 + $0x110] sm:$0xff]  ;;  %v3644_v25 = vld [vmem:[#allocation11 + $0x118] sm:$0xff] }
 0xa95   :  { %v14803_v14 = vpack.c.bf16 %v3644_v25, %v3643_v38  ;;  %v3973_v25 = vld [vmem:[#allocation11 + $0x230] sm:$0xff] }
 0xa96   :  { %vm3222_vm2 = vcmp.ge.f32.partialorder %v3218_v26, 0.0  ;;  %vm3223_vm5 = vcmp.ge.f32.partialorder %v3219_v51, 0.0  ;;  %vm3224_vm6 = vcmp.ge.f32.partialorder %v3220_v17, 0.0  ;;  %vm3225_vm7 = vcmp.ge.f32.partialorder %v3221_v29, 0.0 }
 0xa97   :  { %v3226_v40 = vmul.f32 0.01, %v3218_v26  ;;  %v3227_v32 = vmul.f32 0.01, %v3219_v51  ;;  %v3228_v12 = vmul.f32 0.01, %v3220_v17 }
 0xa98   :  { %v3229_v43 = vmul.f32 0.01, %v3221_v29 }
 0xa99   :  { %v3230_v18 = vsel %vm3222_vm2, %v3218_v26, %v3226_v40  ;;  %v3231_v44 = vsel %vm3223_vm5, %v3219_v51, %v3227_v32  ;;  %v3232_v16 = vsel %vm3224_vm6, %v3220_v17, %v3228_v12  ;;  %v3645_v26 = vld [vmem:[#allocation11 + $0x120] sm:$0xff]  ;;  %v3646_v51 = vld [vmem:[#allocation11 + $0x128] sm:$0xff]  ;;  %v3648_v40 = vld [vmem:[#allocation11 + $0x138] sm:$0xff] }
 0xa9a   :  { %v3233_v42 = vsel %vm3225_vm7, %v3221_v29, %v3229_v43  ;;  %v14734_v45 = vpack.c.bf16 %v3231_v44, %v3230_v18  ;;  %v14806_v17 = vpack.c.bf16 %v3646_v51, %v3645_v26  ;;  %v3647_v29 = vld [vmem:[#allocation11 + $0x130] sm:$0xff]  ;;  %v3649_v18 = vld [vmem:[#allocation11 + $0x140] sm:$0xff]  ;;  %v3650_v44 = vld [vmem:[#allocation11 + $0x148] sm:$0xff] }
 0xa9b   :  { %v14737_v46 = vpack.c.bf16 %v3233_v42, %v3232_v16  ;;  %v14809_v43 = vpack.c.bf16 %v3648_v40, %v3647_v29  ;;  %v14812_v16 = vpack.c.bf16 %v3650_v44, %v3649_v18  ;;  %v3651_v42 = vld [vmem:[#allocation11 + $0x150] sm:$0xff]  ;;  %v3976_v26 = vld [vmem:[#allocation11 + $0x248] sm:$0xff]  ;;  %v3978_v29 = vld [vmem:[#allocation11 + $0x258] sm:$0xff] }
 0xa9c   :  { %14735 = vmatpush3.bf16.msra.mxu0 %v14734_v45  ;;  %v3981_v44 = vld [vmem:[#allocation11 + $0x270] sm:$0xff] }
 0xa9d   :  { %14736 = vmatprep.subr.bf16.mxu0 %v16413_v8 }
 0xaa0   :  { %14738 = vmatpush3.bf16.msra.mxu0 %v14737_v46 }
 0xaa1   :  { %14763 = vmatprep.subr.bf16.mxu0 %v16413_v8 }
 0xaa3   :  { %13195 = vmatmul.mubr.msk.f32.vlgmr.msra.gmra.mrb[30].mxu0 %vm1374_vm1, %v3235_v48  ;;  %v3653_v48 = vld [vmem:[#allocation11 + $0x160] sm:$0xff] }
 0xaa4   :  { %14765 = vmatpush3.bf16.msra.mxu0 %v14734_v45  ;;  %13240 = vmatprep.mubr.msk.f32.mxu0 %vm16415_vm3, %v16416_v23 }
 0xaa5   :  { %14766 = vmatprep.subr.bf16.mxu0 %v16413_v8 }
 0xaa8   :  { %14768 = vmatpush3.bf16.msra.mxu0 %v14737_v46 }
 0xaa9   :  { %14793 = vmatprep.subr.bf16.mxu0 %v16413_v8 }
 0xaab   :  { %13241 = vmatmul.mubr.msk.f32.vlgmr.msra.gmra.mrb[32].mxu0 %vm1374_vm1, %v3403_v49  ;;  %v3654_v49 = vld [vmem:[#allocation11 + $0x168] sm:$0xff] }
 0xaac   :  { %14795 = vmatpush3.bf16.msra.mxu0 %v14734_v45  ;;  %13286 = vmatprep.mubr.msk.f32.mxu0 %vm16415_vm3, %v16416_v23 }
 0xaad   :  { %14796 = vmatprep.subr.bf16.mxu0 %v16413_v8 }
 0xab0   :  { %14798 = vmatpush3.bf16.msra.mxu0 %v14737_v46 }
 0xab1   :  { %14823 = vmatprep.subr.bf16.mxu0 %v16413_v8 }
 0xab3   :  { %13287 = vmatmul.mubr.msk.f32.vlgmr.msra.gmra.mrb[34].mxu0 %vm1374_vm1, %v3566_v47  ;;  %v14818_v47 = vpack.c.bf16 %v3654_v49, %v3653_v48  ;;  %v4132_v49 = vld [vmem:[#allocation11 + $0x290] sm:$0xff] }
 0xab4   :  { %14825 = vmatpush3.bf16.msra.mxu0 %v14734_v45  ;;  %13332 = vmatprep.mubr.msk.f32.mxu0 %vm16415_vm3, %v16416_v23 }
 0xab5   :  { %14826 = vmatprep.subr.bf16.mxu0 %v16413_v8 }
 0xab8   :  { %14828 = vmatpush3.bf16.msra.mxu0 %v14737_v46 }
 0xab9   :  { %14853 = vmatprep.subr.bf16.mxu0 %v16413_v8 }
 0xabb   :  { %13333 = vmatmul.mubr.msk.f32.vlgmr.msra.gmra.mrb[36].mxu0 %vm1374_vm1, %v3729_v52  ;;  %v3655_v52 = vld [vmem:[#allocation11 + $0x170] sm:$0xff] }
 0xabc   :  { %14855 = vmatpush3.bf16.msra.mxu0 %v14734_v45  ;;  %13378 = vmatprep.mubr.msk.f32.mxu0 %vm16415_vm3, %v16416_v23 }
 0xabd   :  { %14856 = vmatprep.subr.bf16.mxu0 %v16413_v8 }
 0xac0   :  { %14858 = vmatpush3.bf16.msra.mxu0 %v14737_v46 }
 0xac1   :  { %14883 = vmatprep.subr.bf16.mxu0 %v16413_v8 }
 0xac3   :  { %13379 = vmatmul.mubr.msk.f32.vlgmr.msra.gmra.mrb[38].mxu0 %vm1374_vm1, %v3892_v55  ;;  %v3656_v55 = vld [vmem:[#allocation11 + $0x178] sm:$0xff] }
 0xac4   :  { %14885 = vmatpush3.bf16.msra.mxu0 %v14734_v45  ;;  %13424 = vmatprep.mubr.msk.f32.mxu0 %vm16415_vm3, %v16416_v23 }
 0xac5   :  { %14886 = vmatprep.subr.bf16.mxu0 %v16413_v8 }
 0xac8   :  { %14888 = vmatpush3.bf16.msra.mxu0 %v14737_v46 }
 0xac9   :  { %14913 = vmatprep.subr.bf16.mxu0 %v16413_v8 }
 0xacb   :  { %13425 = vmatmul.mubr.msk.f32.vlgmr.msra.gmra.mrb[40].mxu0 %vm1374_vm1, %v4055_v57  ;;  %v14821_v57 = vpack.c.bf16 %v3656_v55, %v3655_v52  ;;  %v4134_v55 = vld [vmem:[#allocation11 + $0x2a0] sm:$0xff] }
 0xacc   :  { %14915 = vmatpush3.bf16.msra.mxu0 %v14734_v45  ;;  %13470 = vmatprep.mubr.msk.f32.mxu0 %vm16415_vm3, %v16416_v23 }
 0xacd   :  { %14916 = vmatprep.subr.bf16.mxu0 %v16413_v8 }
 0xad0   :  { %14918 = vmatpush3.bf16.msra.mxu0 %v14737_v46 }
 0xad1   :  { %14943 = vmatprep.subr.bf16.mxu0 %v16413_v8 }
 0xad3   :  { %13471 = vmatmul.mubr.msk.f32.vlgmr.msra.gmra.mrb[42].mxu0 %vm1374_vm1, %v4218_v53  ;;  %v3804_v53 = vld [vmem:[#allocation11 + $0x180] sm:$0xff] }
 0xad4   :  { %14945 = vmatpush3.bf16.msra.mxu0 %v14734_v45  ;;  %13516 = vmatprep.mubr.msk.f32.mxu0 %vm16415_vm3, %v16416_v23  ;;  %v3652_v45 = vld [vmem:[#allocation11 + $0x158] sm:$0xff] }
 0xad5   :  { %14946 = vmatprep.subr.bf16.mxu0 %v16413_v8 }
 0xad8   :  { %14948 = vmatpush3.bf16.msra.mxu0 %v14737_v46  ;;  %v14815_v46 = vpack.c.bf16 %v3652_v45, %v3651_v42  ;;  %v4130_v45 = vld [vmem:[#allocation11 + $0x280] sm:$0xff] }
 0xad9   :  { %14976 = vmatprep.subr.bf16.mxu0 %v16413_v8 }
 0xadb   :  { %13517 = vmatmul.mubr.msk.f32.vlgmr.msra.gmra.mrb[44].mxu0 %vm1374_vm1, %v4381_v56  ;;  %v3805_v56 = vld [vmem:[#allocation11 + $0x188] sm:$0xff] }
 0xadc   :  { %13565 = vmatprep.mubr.msk.f32.mxu0 %vm16415_vm3, %v16416_v23  ;;  %v14830_v60 = vpack.c.bf16 %v3805_v56, %v3804_v53  ;;  %v4136_v56 = vld [vmem:[#allocation11 + $0x2b0] sm:$0xff] }
 0xb76   :  { %v3305_v2 = vpop.f32.mrb[30].mxu0 }
 0xb77   :  { %v13196_v19 = vpop.f32.mrb[31].mxu0  ;;  %13230 = vmatmul.mubr.f32.vlgmr.msra.gmra.mrb[48].mxu1 %v3305_v2 }
 0xb78   :  { %14771 = vmatpush3.bf16.msra.mxu1 %v14770_v58  ;;  %13275 = vmatprep.mubr.msk.f32.mxu1 %vm16415_vm3, %v16416_v23  ;;  %v3806_v58 = vld [vmem:[#allocation11 + $0x190] sm:$0xff]  ;;  %v3808_v19 = vld [vmem:[#allocation11 + $0x1a0] sm:$0xff] }
 0xb79   :  { %14772 = vmatprep.subr.bf16.mxu1 %v16413_v8  ;;  %v14833_v2 = vpack.c.bf16 %v3807_v59, %v3806_v58  ;;  %v4139_v59 = vld [vmem:[#allocation11 + $0x2c8] sm:$0xff] }
 0xb7c   :  { %14774 = vmatpush3.bf16.msra.mxu1 %v14773_v63  ;;  %v3809_v63 = vld [vmem:[#allocation11 + $0x1a8] sm:$0xff] }
 0xb7d   :  { %14775 = vmatprep.subr.bf16.mxu1 %v16413_v8  ;;  %v14836_v0 = vpack.c.bf16 %v3809_v63, %v3808_v19  ;;  %v4141_v19 = vld [vmem:[#allocation11 + $0x2d8] sm:$0xff] }
 0xb7e   :  { %v3473_v7 = vpop.f32.mrb[32].mxu0 }
 0xb7f   :  { %v13242_v9 = vpop.f32.mrb[33].mxu0 }
 0xb80   :  { %14777 = vmatpush3.bf16.msra.mxu1 %v14776_v3  ;;  %v3811_v3 = vld [vmem:[#allocation11 + $0x1b8] sm:$0xff] }
 0xb81   :  { %14778 = vmatprep.subr.bf16.mxu1 %v16413_v8  ;;  %v14839_v20 = vpack.c.bf16 %v3811_v3, %v3810_v36  ;;  %v4143_v36 = vld [vmem:[#allocation11 + $0x2e8] sm:$0xff] }
 0xb84   :  { %14780 = vmatpush3.bf16.msra.mxu1 %v14779_v11  ;;  %v3814_v11 = vld [vmem:[#allocation11 + $0x1d0] sm:$0xff] }
 0xb85   :  { %14781 = vmatprep.subr.bf16.mxu1 %v16413_v8  ;;  %v14845_v22 = vpack.c.bf16 %v3815_v15, %v3814_v11  ;;  %v4294_v11 = vld [vmem:[#allocation11 + $0x308] sm:$0xff] }
 0xb86   :  { %v17563_v28 = vpop.f32.mrb[34].mxu0 }
 0xb87   :  { %v13288_v30 = vpop.f32.mrb[35].mxu0 }
 0xb88   :  { %14783 = vmatpush3.bf16.msra.mxu1 %v14782_v24  ;;  %v3816_v24 = vld [vmem:[#allocation11 + $0x1e0] sm:$0xff]  ;;  %v3819_v30 = vld [vmem:[#allocation11 + $0x1f8] sm:$0xff] }
 0xb89   :  { %14784 = vmatprep.subr.bf16.mxu1 %v16413_v8  ;;  %v14848_v27 = vpack.c.bf16 %v3817_v35, %v3816_v24  ;;  %v4296_v24 = vld [vmem:[#allocation11 + $0x318] sm:$0xff] }
 0xb8c   :  { %14786 = vmatpush3.bf16.msra.mxu1 %v14785_v31 }
 0xb8d   :  { %14787 = vmatprep.subr.bf16.mxu1 %v16413_v8 }
 0xb8e   :  { %v17567_v34 = vpop.f32.mrb[36].mxu0 }
 0xb8f   :  { %v13334_v33 = vpop.f32.mrb[37].mxu0 }
 0xb90   :  { %14789 = vmatpush3.bf16.msra.mxu1 %v14788_v13  ;;  %v14860_v13 = vpack.c.bf16 %v3968_v1, %v3967_v54  ;;  %v3970_v33 = vld [vmem:[#allocation11 + $0x218] sm:$0xff] }
 0xb91   :  { %14790 = vmatprep.subr.bf16.mxu1 %v16413_v8  ;;  %v14863_v50 = vpack.c.bf16 %v3970_v33, %v3969_v41  ;;  %v4300_v54 = vld [vmem:[#allocation11 + $0x338] sm:$0xff]  ;;  %v4303_v33 = vld [vmem:[#allocation11 + $0x350] sm:$0xff] }
 0xb94   :  { %14792 = vmatpush3.bf16.msra.mxu1 %v14791_v39 }
 0xb95   :  { %14799 = vmatprep.subr.bf16.mxu1 %v16413_v8 }
 0xb96   :  { %v17571_v10 = vpop.f32.mrb[38].mxu0 }
 0xb97   :  { %13276 = vmatmul.mubr.f32.vlgmr.msra.gmra.mrb[48].mxu1 %v3473_v7  ;;  %v13380_v5 = vpop.f32.mrb[39].mxu0  ;;  %v3813_v7 = vld [vmem:[#allocation11 + $0x1c8] sm:$0xff] }
 0xb98   :  { %14801 = vmatpush3.bf16.msra.mxu1 %v14800_v6  ;;  %13321 = vmatprep.mubr.msk.f32.mxu1 %vm16415_vm3, %v16416_v23  ;;  %v14842_v9 = vpack.c.bf16 %v3813_v7, %v3812_v4  ;;  %v3972_v6 = vld [vmem:[#allocation11 + $0x228] sm:$0xff]  ;;  %v3974_v5 = vld [vmem:[#allocation11 + $0x238] sm:$0xff] }
 0xb99   :  { %14802 = vmatprep.subr.bf16.mxu1 %v16413_v8  ;;  %v14866_v38 = vpack.c.bf16 %v3972_v6, %v3971_v21  ;;  %v4145_v4 = vld [vmem:[#allocation11 + $0x2f8] sm:$0xff]  ;;  %v4305_v21 = vld [vmem:[#allocation11 + $0x360] sm:$0xff]  ;;  %v4306_v6 = vld [vmem:[#allocation11 + $0x368] sm:$0xff] }
 0xb9c   :  { %14804 = vmatpush3.bf16.msra.mxu1 %v14803_v14  ;;  %v14869_v14 = vpack.c.bf16 %v3974_v5, %v3973_v25  ;;  %v4307_v25 = vld [vmem:[#allocation11 + $0x370] sm:$0xff]  ;;  %v4308_v5 = vld [vmem:[#allocation11 + $0x378] sm:$0xff] }
 0xb9d   :  { %14805 = vmatprep.subr.bf16.mxu1 %v16413_v8 }
 0xb9e   :  { %v17577_v32 = vpop.f32.mrb[40].mxu0 }
 0xb9f   :  { %v13426_v12 = vpop.f32.mrb[41].mxu0 }
 0xba0   :  { %14807 = vmatpush3.bf16.msra.mxu1 %v14806_v17  ;;  %v3977_v17 = vld [vmem:[#allocation11 + $0x250] sm:$0xff]  ;;  %v3979_v12 = vld [vmem:[#allocation11 + $0x260] sm:$0xff] }
 0xba1   :  { %14808 = vmatprep.subr.bf16.mxu1 %v16413_v8  ;;  %v14875_v40 = vpack.c.bf16 %v3978_v29, %v3977_v17  ;;  %v4458_v17 = vld [vmem:[#allocation11 + $0x390] sm:$0xff]  ;;  %v4459_v29 = vld [vmem:[#allocation11 + $0x398] sm:$0xff] }
 0xba4   :  { %14810 = vmatpush3.bf16.msra.mxu1 %v14809_v43  ;;  %v3980_v43 = vld [vmem:[#allocation11 + $0x268] sm:$0xff] }
 0xba5   :  { %14811 = vmatprep.subr.bf16.mxu1 %v16413_v8  ;;  %v14878_v18 = vpack.c.bf16 %v3980_v43, %v3979_v12  ;;  %v4460_v12 = vld [vmem:[#allocation11 + $0x3a0] sm:$0xff]  ;;  %v4461_v43 = vld [vmem:[#allocation11 + $0x3a8] sm:$0xff] }
 0xba6   :  { %v17584_v61 = vpop.f32.mrb[42].mxu0 }
 0xba7   :  { %v13472_v62 = vpop.f32.mrb[43].mxu0 }
 0xba8   :  { %14813 = vmatpush3.bf16.msra.mxu1 %v14812_v16  ;;  %v3982_v16 = vld [vmem:[#allocation11 + $0x278] sm:$0xff] }
 0xba9   :  { %14814 = vmatprep.subr.bf16.mxu1 %v16413_v8  ;;  %v14881_v42 = vpack.c.bf16 %v3982_v16, %v3981_v44  ;;  %v4462_v44 = vld [vmem:[#allocation11 + $0x3b0] sm:$0xff]  ;;  %v4463_v16 = vld [vmem:[#allocation11 + $0x3b8] sm:$0xff] }
 0xbac   :  { %14816 = vmatpush3.bf16.msra.mxu1 %v14815_v46  ;;  %v4131_v46 = vld [vmem:[#allocation11 + $0x288] sm:$0xff] }
 0xbad   :  { %14817 = vmatprep.subr.bf16.mxu1 %v16413_v8  ;;  %v14890_v48 = vpack.c.bf16 %v4131_v46, %v4130_v45  ;;  %v4465_v45 = vld [vmem:[#allocation11 + $0x3c8] sm:$0xff] }
 0xbae   :  { %v17597_v37 = vpop.f32.mrb[44].mxu0 }
 0xbaf   :  { %v13518_v39 = vpop.f32.mrb[45].mxu0 }
 0xbb0   :  { %14819 = vmatpush3.bf16.msra.mxu1 %v14818_v47  ;;  %v4133_v47 = vld [vmem:[#allocation11 + $0x298] sm:$0xff] }
 0xbb1   :  { %14820 = vmatprep.subr.bf16.mxu1 %v16413_v8  ;;  %v14893_v52 = vpack.c.bf16 %v4133_v47, %v4132_v49  ;;  %v4304_v39 = vld [vmem:[#allocation11 + $0x358] sm:$0xff] }
 0xbb2   :  { %v4467_v49 = vld [vmem:[#allocation11 + $0x3d8] sm:$0xff] }
 0xbb4   :  { %14822 = vmatpush3.bf16.msra.mxu1 %v14821_v57  ;;  %v4135_v57 = vld [vmem:[#allocation11 + $0x2a8] sm:$0xff] }
 0xbb5   :  { %14829 = vmatprep.subr.bf16.mxu1 %v16413_v8  ;;  %v14896_v53 = vpack.c.bf16 %v4135_v57, %v4134_v55  ;;  %v4469_v55 = vld [vmem:[#allocation11 + $0x3e8] sm:$0xff] }
 0xbb7   :  { %13322 = vmatmul.mubr.f32.vlgmr.msra.gmra.mrb[48].mxu1 %v17563_v28  ;;  %v3818_v28 = vld [vmem:[#allocation11 + $0x1f0] sm:$0xff] }
 0xbb8   :  { %14831 = vmatpush3.bf16.msra.mxu1 %v14830_v60  ;;  %13367 = vmatprep.mubr.msk.f32.mxu1 %vm16415_vm3, %v16416_v23  ;;  %v14851_v31 = vpack.c.bf16 %v3819_v30, %v3818_v28  ;;  %v4137_v60 = vld [vmem:[#allocation11 + $0x2b8] sm:$0xff]  ;;  %v4298_v28 = vld [vmem:[#allocation11 + $0x328] sm:$0xff] }
 0xbb9   :  { %14832 = vmatprep.subr.bf16.mxu1 %v16413_v8  ;;  %v14899_v58 = vpack.c.bf16 %v4137_v60, %v4136_v56  ;;  %v4471_v56 = vld [vmem:[#allocation11 + $0x3f8] sm:$0xff] }
 0xbbc   :  { %14834 = vmatpush3.bf16.msra.mxu1 %v14833_v2  ;;  %v4140_v2 = vld [vmem:[#allocation11 + $0x2d0] sm:$0xff] }
 0xbbd   :  { %14835 = vmatprep.subr.bf16.mxu1 %v16413_v8  ;;  %v14905_v63 = vpack.c.bf16 %v4141_v19, %v4140_v2 }
 0xbc0   :  { %14837 = vmatpush3.bf16.msra.mxu1 %v14836_v0  ;;  %v4142_v0 = vld [vmem:[#allocation11 + $0x2e0] sm:$0xff] }
 0xbc1   :  { %14838 = vmatprep.subr.bf16.mxu1 %v16413_v8  ;;  %v14908_v3 = vpack.c.bf16 %v4143_v36, %v4142_v0  ;;  %v4561_v0 = vld [vmem:[#allocation12 + $0x8] sm:$0xff]  ;;  %v4648_v36 = vld [vmem:[#allocation12 + $0x10] sm:$0xff] }
 0xbc4   :  { %14840 = vmatpush3.bf16.msra.mxu1 %v14839_v20  ;;  %v4144_v20 = vld [vmem:[#allocation11 + $0x2f0] sm:$0xff] }
 0xbc5   :  { %14841 = vmatprep.subr.bf16.mxu1 %v16413_v8  ;;  %v14911_v7 = vpack.c.bf16 %v4145_v4, %v4144_v20 }
 0xbc8   :  { %14843 = vmatpush3.bf16.msra.mxu1 %v14842_v9  ;;  %v4293_v9 = vld [vmem:[#allocation11 + $0x300] sm:$0xff] }
 0xbc9   :  { %14844 = vmatprep.subr.bf16.mxu1 %v16413_v8  ;;  %v14920_v15 = vpack.c.bf16 %v4294_v11, %v4293_v9 }
 0xbcc   :  { %14846 = vmatpush3.bf16.msra.mxu1 %v14845_v22  ;;  %v4295_v22 = vld [vmem:[#allocation11 + $0x310] sm:$0xff] }
 0xbcd   :  { %14847 = vmatprep.subr.bf16.mxu1 %v16413_v8  ;;  %v14923_v35 = vpack.c.bf16 %v4296_v24, %v4295_v22  ;;  %v4729_v22 = vld [vmem:[#allocation32 + $0x20] sm:$0xff] }
 0xbce   :  { %v11788_v24 = vld [vmem:[#allocation14 + $0x1] ss:$0 sm:$0xff] }
 0xbd0   :  { %14849 = vmatpush3.bf16.msra.mxu1 %v14848_v27  ;;  %v4297_v27 = vld [vmem:[#allocation11 + $0x320] sm:$0xff] }
 0xbd1   :  { %14850 = vmatprep.subr.bf16.mxu1 %v16413_v8  ;;  %v14926_v30 = vpack.c.bf16 %v4298_v28, %v4297_v27 }
 0xbd4   :  { %14852 = vmatpush3.bf16.msra.mxu1 %v14851_v31  ;;  %v4299_v31 = vld [vmem:[#allocation11 + $0x330] sm:$0xff] }
 0xbd5   :  { %14859 = vmatprep.subr.bf16.mxu1 %v16413_v8  ;;  %v14929_v1 = vpack.c.bf16 %v4300_v54, %v4299_v31 }
 0xbd7   :  { %13368 = vmatmul.mubr.f32.vlgmr.msra.gmra.mrb[48].mxu1 %v17567_v34  ;;  %v3975_v34 = vld [vmem:[#allocation11 + $0x240] sm:$0xff] }
 0xbd8   :  { %14861 = vmatpush3.bf16.msra.mxu1 %v14860_v13  ;;  %13413 = vmatprep.mubr.msk.f32.mxu1 %vm16415_vm3, %v16416_v23  ;;  %v14872_v51 = vpack.c.bf16 %v3976_v26, %v3975_v34  ;;  %v4302_v13 = vld [vmem:[#allocation11 + $0x348] sm:$0xff]  ;;  %v4456_v34 = vld [vmem:[#allocation11 + $0x380] sm:$0xff] }
 0xbd9   :  { %14862 = vmatprep.subr.bf16.mxu1 %v16413_v8  ;;  %v4457_v26 = vld [vmem:[#allocation11 + $0x388] sm:$0xff] }
 0xbdc   :  { %14864 = vmatpush3.bf16.msra.mxu1 %v14863_v50  ;;  %v14935_v50 = vpack.c.bf16 %v4304_v39, %v4303_v33  ;;  %v4643_v33 = vld [vmem:[#allocation32] sm:$0xff] }
 0xbdd   :  { %14865 = vmatprep.subr.bf16.mxu1 %v16413_v8  ;;  %v4935_v39 = vld [vmem:[#allocation12 + $0x20] sm:$0xff] }
 0xbe0   :  { %14867 = vmatpush3.bf16.msra.mxu1 %v14866_v38  ;;  %v14938_v38 = vpack.c.bf16 %v4306_v6, %v4305_v21  ;;  %v4644_v21 = vld [vmem:[#allocation32 + $0x8] sm:$0xff] }
 0xbe1   :  { %14868 = vmatprep.subr.bf16.mxu1 %v16413_v8 }
 0xbe4   :  { %14870 = vmatpush3.bf16.msra.mxu1 %v14869_v14  ;;  %v14941_v14 = vpack.c.bf16 %v4308_v5, %v4307_v25  ;;  %v4646_v25 = vld [vmem:[#allocation32 + $0x18] sm:$0xff]  ;;  %v5016_v5 = vld [vmem:[#allocation32 + $0x40] sm:$0xff] }
 0xbe5   :  { %14871 = vmatprep.subr.bf16.mxu1 %v16413_v8 }
 0xbe8   :  { %14873 = vmatpush3.bf16.msra.mxu1 %v14872_v51  ;;  %v14950_v51 = vpack.c.bf16 %v4457_v26, %v4456_v34  ;;  %v5125_v34 = vld [vmem:[#allocation12 + $0x30] sm:$0xff]  ;;  %v5126_v26 = vld [vmem:[#allocation12 + $0x38] sm:$0xff] }
 0xbe9   :  { %14874 = vmatprep.subr.bf16.mxu1 %v16413_v8 }
 0xbec   :  { %14876 = vmatpush3.bf16.msra.mxu1 %v14875_v40  ;;  %v14953_v40 = vpack.c.bf16 %v4459_v29, %v4458_v17 }
 0xbed   :  { %14877 = vmatprep.subr.bf16.mxu1 %v16413_v8 }
 0xbf0   :  { %14879 = vmatpush3.bf16.msra.mxu1 %v14878_v18  ;;  %v14956_v18 = vpack.c.bf16 %v4461_v43, %v4460_v12  ;;  %v14983_v12 = vpack.c.bf16 %v5126_v26, %v5125_v34  ;;  %v5018_v43 = vld [vmem:[#allocation32 + $0x50] sm:$0xff] }
 0xbf1   :  { %14880 = vmatprep.subr.bf16.mxu1 %v16413_v8 }
 0xbf4   :  { %14882 = vmatpush3.bf16.msra.mxu1 %v14881_v42  ;;  %v14959_v42 = vpack.c.bf16 %v4463_v16, %v4462_v44  ;;  %v5206_v44 = vld [vmem:[#allocation32 + $0x60] sm:$0xff] }
 0xbf5   :  { %14889 = vmatprep.subr.bf16.mxu1 %v16413_v8  ;;  %v11807_v16 = vld [vmem:[#allocation14 + $0x3] ss:$0 sm:$0xff] }
 0xbf7   :  { %13414 = vmatmul.mubr.f32.vlgmr.msra.gmra.mrb[48].mxu1 %v17571_v10  ;;  %v4138_v10 = vld [vmem:[#allocation11 + $0x2c0] sm:$0xff] }
 0xbf8   :  { %14891 = vmatpush3.bf16.msra.mxu1 %v14890_v48  ;;  %13459 = vmatprep.mubr.msk.f32.mxu1 %vm16415_vm3, %v16416_v23  ;;  %v14902_v62 = vpack.c.bf16 %v4139_v59, %v4138_v10  ;;  %v4466_v48 = vld [vmem:[#allocation11 + $0x3d0] sm:$0xff] }
 0xbf9   :  { %14892 = vmatprep.subr.bf16.mxu1 %v16413_v8  ;;  %v14965_v47 = vpack.c.bf16 %v4467_v49, %v4466_v48  ;;  %v5207_v49 = vld [vmem:[#allocation32 + $0x68] sm:$0xff] }
 0xbfc   :  { %14894 = vmatpush3.bf16.msra.mxu1 %v14893_v52  ;;  %v4468_v52 = vld [vmem:[#allocation11 + $0x3e0] sm:$0xff] }
 0xbfd   :  { %14895 = vmatprep.subr.bf16.mxu1 %v16413_v8  ;;  %v14968_v57 = vpack.c.bf16 %v4469_v55, %v4468_v52  ;;  %v5208_v52 = vld [vmem:[#allocation32 + $0x70] sm:$0xff]  ;;  %v5209_v55 = vld [vmem:[#allocation32 + $0x78] sm:$0xff] }
 0xc00   :  { %14897 = vmatpush3.bf16.msra.mxu1 %v14896_v53  ;;  %v4470_v53 = vld [vmem:[#allocation11 + $0x3f0] sm:$0xff] }
 0xc01   :  { %14898 = vmatprep.subr.bf16.mxu1 %v16413_v8  ;;  %v14971_v60 = vpack.c.bf16 %v4471_v56, %v4470_v53  ;;  %v11814_v53 = vld [vmem:[#allocation14 + $0x4] ss:$0 sm:$0xff]  ;;  %v5505_v56 = vld [vmem:[#allocation12 + $0x50] sm:$0xff] }
 0xc04   :  { %14900 = vmatpush3.bf16.msra.mxu1 %v14899_v58  ;;  %v11778_v58 = vld [vmem:[%s19252_s3] ss:$0 sm:$0xff] }
 0xc05   :  { %14901 = vmatprep.subr.bf16.mxu1 %v16413_v8 }
 0xc08   :  { %14903 = vmatpush3.bf16.msra.mxu1 %v14902_v62 }
 0xc09   :  { %14904 = vmatprep.subr.bf16.mxu1 %v16413_v8 }
 0xc0c   :  { %14906 = vmatpush3.bf16.msra.mxu1 %v14905_v63  ;;  %v4560_v63 = vld [vmem:[#allocation12] sm:$0xff] }
 0xc0d   :  { %14907 = vmatprep.subr.bf16.mxu1 %v16413_v8 }
 0xc10   :  { %14909 = vmatpush3.bf16.msra.mxu1 %v14908_v3  ;;  %v4649_v3 = vld [vmem:[#allocation12 + $0x18] sm:$0xff] }
 0xc11   :  { %14910 = vmatprep.subr.bf16.mxu1 %v16413_v8  ;;  %v14977_v20 = vpack.c.bf16 %v4649_v3, %v4648_v36  ;;  %v5586_v36 = vld [vmem:[#allocation32 + $0xa0] sm:$0xff] }
 0xc12   :  { %v5695_v3 = vld [vmem:[#allocation12 + $0x60] sm:$0xff] }
 0xc13   :  { %14978 = vmatpush3.bf16.msra.mxu0 %v14977_v20  ;;  %v5696_v20 = vld [vmem:[#allocation12 + $0x68] sm:$0xff] }
 0xc14   :  { %14912 = vmatpush3.bf16.msra.mxu1 %v14911_v7  ;;  %v4550_v7 = vld [vmem:[#allocation3] sm:$0xf] }
 0xc15   :  { %14919 = vmatprep.subr.bf16.mxu1 %v16413_v8 }
 0xc17   :  { %13460 = vmatmul.mubr.f32.vlgmr.msra.gmra.mrb[48].mxu1 %v17577_v32  ;;  %v4301_v32 = vld [vmem:[#allocation11 + $0x340] sm:$0xff] }
 0xc18   :  { %14921 = vmatpush3.bf16.msra.mxu1 %v14920_v15  ;;  %13505 = vmatprep.mubr.msk.f32.mxu1 %vm16415_vm3, %v16416_v23  ;;  %v14932_v41 = vpack.c.bf16 %v4302_v13, %v4301_v32  ;;  %v4731_v13 = vld [vmem:[#allocation32 + $0x30] sm:$0xff] }
 0xc19   :  { %14922 = vmatprep.subr.bf16.mxu1 %v16413_v8 }
 0xc1c   :  { %14924 = vmatpush3.bf16.msra.mxu1 %v14923_v35  ;;  %v11786_v35 = vld [vmem:[#allocation14] ss:$0 sm:$0xff] }
 0xc1d   :  { %14925 = vmatprep.subr.bf16.mxu1 %v16413_v8 }
 0xc20   :  { %14927 = vmatpush3.bf16.msra.mxu1 %v14926_v30 }
 0xc21   :  { %14928 = vmatprep.subr.bf16.mxu1 %v16413_v8 }
 0xc24   :  { %14930 = vmatpush3.bf16.msra.mxu1 %v14929_v1  ;;  %v4730_v1 = vld [vmem:[#allocation32 + $0x28] sm:$0xff] }
 0xc25   :  { %14931 = vmatprep.subr.bf16.mxu1 %v16413_v8 }
 0xc28   :  { %14933 = vmatpush3.bf16.msra.mxu1 %v14932_v41  ;;  %v4732_v41 = vld [vmem:[#allocation32 + $0x38] sm:$0xff] }
 0xc29   :  { %14934 = vmatprep.subr.bf16.mxu1 %v16413_v8 }
 0xc2c   :  { %14936 = vmatpush3.bf16.msra.mxu1 %v14935_v50  ;;  %v4936_v50 = vld [vmem:[#allocation12 + $0x28] sm:$0xff] }
 0xc2d   :  { %14937 = vmatprep.subr.bf16.mxu1 %v16413_v8  ;;  %v14980_v6 = vpack.c.bf16 %v4936_v50, %v4935_v39  ;;  %v5779_v39 = vld [vmem:[#allocation32 + $0xd8] sm:$0xff]  ;;  %v5966_v50 = vld [vmem:[#allocation32 + $0xe0] sm:$0xff] }
 0xc30   :  { %14939 = vmatpush3.bf16.msra.mxu1 %v14938_v38  ;;  %v4645_v38 = vld [vmem:[#allocation32 + $0x10] sm:$0xff] }
 0xc31   :  { %14940 = vmatprep.subr.bf16.mxu1 %v16413_v8 }
 0xc34   :  { %14942 = vmatpush3.bf16.msra.mxu1 %v14941_v14  ;;  %v11800_v14 = vld [vmem:[#allocation14 + $0x2] ss:$0 sm:$0xff] }
 0xc35   :  { %14949 = vmatprep.subr.bf16.mxu1 %v16413_v8 }
 0xc37   :  { %13506 = vmatmul.mubr.f32.vlgmr.msra.gmra.mrb[48].mxu1 %v17584_v61  ;;  %v4464_v61 = vld [vmem:[#allocation11 + $0x3c0] sm:$0xff] }
 0xc38   :  { %14951 = vmatpush3.bf16.msra.mxu1 %v14950_v51  ;;  %13551 = vmatprep.mubr.msk.f32.mxu1 %vm16415_vm3, %v16416_v23  ;;  %v14962_v46 = vpack.c.bf16 %v4465_v45, %v4464_v61  ;;  %v5316_v61 = vld [vmem:[#allocation12 + $0x48] sm:$0xff] }
 0xc39   :  { %14952 = vmatprep.subr.bf16.mxu1 %v16413_v8 }
 0xc3c   :  { %14954 = vmatpush3.bf16.msra.mxu1 %v14953_v40  ;;  %v5017_v40 = vld [vmem:[#allocation32 + $0x48] sm:$0xff] }
 0xc3d   :  { %14955 = vmatprep.subr.bf16.mxu1 %v16413_v8 }
 0xc40   :  { %14957 = vmatpush3.bf16.msra.mxu1 %v14956_v18  ;;  %v5019_v18 = vld [vmem:[#allocation32 + $0x58] sm:$0xff] }
 0xc41   :  { %14958 = vmatprep.subr.bf16.mxu1 %v16413_v8 }
 0xc44   :  { %14960 = vmatpush3.bf16.msra.mxu1 %v14959_v42  ;;  %v5315_v42 = vld [vmem:[#allocation12 + $0x40] sm:$0xff] }
 0xc45   :  { %14961 = vmatprep.subr.bf16.mxu1 %v16413_v8 }
 0xc48   :  { %14963 = vmatpush3.bf16.msra.mxu1 %v14962_v46 }
 0xc49   :  { %14964 = vmatprep.subr.bf16.mxu1 %v16413_v8 }
 0xc4c   :  { %14966 = vmatpush3.bf16.msra.mxu1 %v14965_v47  ;;  %v14986_v47 = vpack.c.bf16 %v5316_v61, %v5315_v42  ;;  %v6090_v42 = vld [vmem:[#allocation15 + $0x40] sm:$0xff]  ;;  %v6091_v61 = vld [vmem:[#allocation15 + $0x48] sm:$0xff] }
 0xc4d   :  { %14967 = vmatprep.subr.bf16.mxu1 %v16413_v8 }
 0xc50   :  { %14969 = vmatpush3.bf16.msra.mxu1 %v14968_v57  ;;  %v5396_v57 = vld [vmem:[#allocation32 + $0x80] sm:$0xff] }
 0xc51   :  { %14970 = vmatprep.subr.bf16.mxu1 %v16413_v8 }
 0xc54   :  { %14972 = vmatpush3.bf16.msra.mxu1 %v14971_v60  ;;  %v5506_v60 = vld [vmem:[#allocation12 + $0x58] sm:$0xff] }
 0xc55   :  { %14973 = vmatprep.subr.bf16.mxu1 %v16413_v8 }
 0xc57   :  { %13552 = vmatmul.mubr.f32.vlgmr.msra.gmra.mrb[48].mxu1 %v17597_v37  ;;  %v14974_v37 = vpack.c.bf16 %v4561_v0, %v4560_v63  ;;  %v5398_v63 = vld [vmem:[#allocation32 + $0x90] sm:$0xff]  ;;  %v5399_v0 = vld [vmem:[#allocation32 + $0x98] sm:$0xff] }
 0xc58   :  { %13558 = vmatprep.mubr.msk.f32.mxu1 %vm16415_vm3, %v16416_v23 }
 0xc59   :  { %14975 = vmatpush3.bf16.msra.mxu1 %v14974_v37  ;;  %v11821_v37 = vld [vmem:[#allocation14 + $0x5] ss:$0 sm:$0xff] }
 0xd2a   :  { %v4538_v10 = vpop.f32.mrb[48].mxu1 }
 0xd2b   :  { %v17648_v59 = vadd.f32 %v11778_v58, %v4538_v10  ;;  %v13553_v62 = vpop.f32.mrb[49].mxu1 }
 0xd2d   :  { %v4551_v2 = vmul.f32 0.5, %v17648_v59  ;;  %4544 = vst.msk [vmem:[#allocation34] sm:$0xf] %vm4543_vm8, %v17648_v59 }
 0xd2f   :  { %v4552_v19 = vmul.f32 1.442695, %v4551_v2  ;;  %v5397_v2 = vld [vmem:[#allocation32 + $0x88] sm:$0xff] }
 0xd31   :  { %15831 = vpow2.f32 %v4552_v19  ;;  %v14989_v19 = vpack.c.bf16 %v5506_v60, %v5505_v56  ;;  %v6193_v60 = vld [vmem:[#allocation15 + $0x80] sm:$0xff] }
 0xd3b   :  { %v15832_v4 = vpop.eup %15831 }
 0xd3c   :  { %4555 = vrot.lane.b32.xlu0 %v15832_v4, %s16417_s10 }
 0xdae   :  { %v4556_v9 = vpop.permute.xlu0 %4555 }
 0xdaf   :  { %v4558_v11 = vmul.f32 %v4556_v9, %v4550_v7 }
 0xdb1   :  { %v17655_v15 = vadd.f32 %v17648_v59, %v4558_v11  ;;  %v5587_v11 = vld [vmem:[#allocation32 + $0xa8] sm:$0xff] }
 0xdb3   :  { %13559 = vmatmul.mubr.msk.f32.vlgmr.msra.gmra.mrb[50].mxu1 %vm4569_vm9, %v17655_v15  ;;  %13566 = vmatmul.mubr.msk.f32.vlgmr.msra.gmra.mrb[46].mxu0 %vm4569_vm9, %v17655_v15 }
 0xdb4   :  { %13570 = vmatprep.mubr.msk.f32.mxu0 %vm4733_vm10, %v4729_v22  ;;  %v14992_v22 = vpack.c.bf16 %v5696_v20, %v5695_v3 }
 0xe86   :  { %v4639_v27 = vpop.f32.mrb[50].mxu1  ;;  %v4724_v28 = vpop.f32.mrb[46].mxu0 }
 0xe87   :  { %v4725_v30 = vadd.f32 %v11788_v24, %v4724_v28  ;;  %v13560_v31 = vpop.f32.mrb[51].mxu1  ;;  %v13567_v54 = vpop.f32.mrb[47].mxu0  ;;  %v4640_v32 = vadd.f32 %v11786_v35, %v4639_v27  ;;  %v5588_v24 = vld [vmem:[#allocation32 + $0xb0] sm:$0xff]  ;;  %v5589_v35 = vld [vmem:[#allocation32 + $0xb8] sm:$0xff]  ;;  %v5776_v27 = vld [vmem:[#allocation32 + $0xc0] sm:$0xff] }
 0xe88   :  { %v11828_v28 = vld [vmem:[#allocation14 + $0x6] ss:$0 sm:$0xff]  ;;  %v5886_v31 = vld [vmem:[#allocation12 + $0x78] sm:$0xff] }
 0xe89   :  { %13568 = vmatprep.subr.msk.mxu0 %vm2551_vm14, %v4725_v30 }
 0xe8a   :  { %13569 = vmatpush3.msk.msra.mxu0 %vm2551_vm14, %v4725_v30  ;;  %v5885_v30 = vld [vmem:[#allocation12 + $0x70] sm:$0xff] }
 0xe8b   :  { %13571 = vmatmul.mubr.msk.f32.vlgmr.msra.gmra.mrb[48].mxu0 %vm4733_vm10, %v4730_v1  ;;  %13576 = vmatprep.subr.msk.mxu0 %vm2551_vm14, %v4640_v32 }
 0xe8c   :  { %13577 = vmatpush3.msk.msra.mxu0 %vm2551_vm14, %v4640_v32  ;;  %13573 = vmatprep.mubr.msk.f32.mxu0 %vm4733_vm10, %v4731_v13  ;;  %v5777_v13 = vld [vmem:[#allocation32 + $0xc8] sm:$0xff] }
 0xe8d   :  { %14979 = vmatprep.subr.bf16.mxu0 %v16413_v8 }
 0xe8f   :  { %13574 = vmatmul.mubr.msk.f32.gmra.mrb[50].mxu0 %vm4733_vm10, %v4732_v41  ;;  %v14995_v41 = vpack.c.bf16 %v5886_v31, %v5885_v30  ;;  %v6205_v31 = vld [vmem:[#allocation15 + $0xe0] sm:$0xff] }
 0xe90   :  { %13578 = vmatprep.mubr.msk.f32.mxu0 %vm4733_vm10, %v4643_v33  ;;  %v5778_v33 = vld [vmem:[#allocation32 + $0xd0] sm:$0xff] }
 0xe93   :  { %13579 = vmatmul.mubr.msk.f32.vlgmr.msra.gmra.mrb[48].mxu0 %vm4733_vm10, %v4644_v21  ;;  %v11835_v21 = vld [vmem:[#allocation14 + $0x7] ss:$0 sm:$0xff] }
 0xe94   :  { %13581 = vmatprep.mubr.msk.f32.mxu0 %vm4733_vm10, %v4645_v38  ;;  %14981 = vmatpush3.bf16.msra.mxu0 %v14980_v6  ;;  %v6082_v6 = vld [vmem:[#allocation15] sm:$0xff]  ;;  %v6083_v38 = vld [vmem:[#allocation15 + $0x8] sm:$0xff] }
 0xe97   :  { %13582 = vmatmul.mubr.msk.f32.gmra.mrb[50].mxu0 %vm4733_vm10, %v4646_v25 }
 0xe98   :  { %13588 = vmatprep.mubr.msk.f32.mxu0 %vm16415_vm3, %v16416_v23 }
 0xe9b   :  { %13589 = vmatmul.mubr.msk.f32.vlgmr.msra.gmra.mrb[52].mxu0 %vm4569_vm9, %v17655_v15 }
 0xe9c   :  { %13593 = vmatprep.mubr.msk.f32.mxu0 %vm4733_vm10, %v5016_v5  ;;  %v6084_v5 = vld [vmem:[#allocation15 + $0x10] sm:$0xff] }
 0xf6e   :  { %v5011_v51 = vpop.f32.mrb[52].mxu0 }
 0xf6f   :  { %v5012_v17 = vadd.f32 %v11800_v14, %v5011_v51  ;;  %v13590_v29 = vpop.f32.mrb[53].mxu0  ;;  %v6085_v14 = vld [vmem:[#allocation15 + $0x18] sm:$0xff]  ;;  %v14997_v51 = vpack.c.bf16 %v6083_v38, %v6082_v6 }
 0xf70   :  { %v5968_v29 = vld [vmem:[#allocation32 + $0xf0] sm:$0xff] }
 0xf71   :  { %13591 = vmatprep.subr.msk.mxu0 %vm2551_vm14, %v5012_v17 }
 0xf72   :  { %13592 = vmatpush3.msk.msra.mxu0 %vm2551_vm14, %v5012_v17  ;;  %v5967_v17 = vld [vmem:[#allocation32 + $0xe8] sm:$0xff] }
 0xf73   :  { %13594 = vmatmul.mubr.msk.f32.vlgmr.msra.gmra.mrb[48].mxu0 %vm4733_vm10, %v5017_v40  ;;  %14982 = vmatprep.subr.bf16.mxu0 %v16413_v8  ;;  %v6087_v40 = vld [vmem:[#allocation15 + $0x28] sm:$0xff] }
 0xf74   :  { %13596 = vmatprep.mubr.msk.f32.mxu0 %vm4733_vm10, %v5018_v43  ;;  %14984 = vmatpush3.bf16.msra.mxu0 %v14983_v12  ;;  %v5969_v12 = vld [vmem:[#allocation32 + $0xf8] sm:$0xff] }
 0xf77   :  { %13597 = vmatmul.mubr.msk.f32.gmra.mrb[50].mxu0 %vm4733_vm10, %v5019_v18  ;;  %v6088_v18 = vld [vmem:[#allocation15 + $0x30] sm:$0xff] }
 0xf78   :  { %13603 = vmatprep.mubr.msk.f32.mxu0 %vm16415_vm3, %v16416_v23 }
 0xf7b   :  { %13604 = vmatmul.mubr.msk.f32.vlgmr.msra.gmra.mrb[54].mxu0 %vm4569_vm9, %v17655_v15 }
 0xf7c   :  { %13608 = vmatprep.mubr.msk.f32.mxu0 %vm4733_vm10, %v5206_v44  ;;  %v6089_v44 = vld [vmem:[#allocation15 + $0x38] sm:$0xff] }
0x104e   :  { %v5201_v45 = vpop.f32.mrb[54].mxu0 }
0x104f   :  { %v5202_v46 = vadd.f32 %v11807_v16, %v5201_v45  ;;  %v13605_v48 = vpop.f32.mrb[55].mxu0  ;;  %v15009_v16 = vpack.c.bf16 %v6089_v44, %v6088_v18  ;;  %v15013_v45 = vpack.c.bf16 %v6091_v61, %v6090_v42  ;;  %v6189_v44 = vld [vmem:[#allocation24 + $0x68] sm:$0xff]  ;;  %v6191_v42 = vld [vmem:[#allocation24 + $0x78] sm:$0xff]  ;;  %v6074_v61 = vld [vmem:[#allocation24] sm:$0xff] }
0x1050   :  { %v6093_v48 = vld [vmem:[#allocation15 + $0x58] sm:$0xff] }
0x1051   :  { %13606 = vmatprep.subr.msk.mxu0 %vm2551_vm14, %v5202_v46 }
0x1052   :  { %13607 = vmatpush3.msk.msra.mxu0 %vm2551_vm14, %v5202_v46  ;;  %v6092_v46 = vld [vmem:[#allocation15 + $0x50] sm:$0xff] }
0x1053   :  { %13609 = vmatmul.mubr.msk.f32.vlgmr.msra.gmra.mrb[48].mxu0 %vm4733_vm10, %v5207_v49  ;;  %14985 = vmatprep.subr.bf16.mxu0 %v16413_v8  ;;  %v15017_v49 = vpack.c.bf16 %v6093_v48, %v6092_v46  ;;  %v6565_v46 = vld [vmem:[#allocation15 + $0x118] sm:$0xff] }
0x1054   :  { %13611 = vmatprep.mubr.msk.f32.mxu0 %vm4733_vm10, %v5208_v52  ;;  %14987 = vmatpush3.bf16.msra.mxu0 %v14986_v47  ;;  %v6094_v47 = vld [vmem:[#allocation15 + $0x60] sm:$0xff]  ;;  %v6095_v52 = vld [vmem:[#allocation15 + $0x68] sm:$0xff] }
0x1055   :  { %v6075_v48 = vld [vmem:[#allocation24 + $0x8] sm:$0xff] }
0x1057   :  { %13612 = vmatmul.mubr.msk.f32.gmra.mrb[50].mxu0 %vm4733_vm10, %v5209_v55  ;;  %v15021_v55 = vpack.c.bf16 %v6095_v52, %v6094_v47  ;;  %v6566_v52 = vld [vmem:[#allocation15 + $0x120] sm:$0xff] }
0x1058   :  { %13618 = vmatprep.mubr.msk.f32.mxu0 %vm16415_vm3, %v16416_v23 }
0x105b   :  { %13619 = vmatmul.mubr.msk.f32.vlgmr.msra.gmra.mrb[56].mxu0 %vm4569_vm9, %v17655_v15 }
0x105c   :  { %13623 = vmatprep.mubr.msk.f32.mxu0 %vm4733_vm10, %v5396_v57  ;;  %v6096_v57 = vld [vmem:[#allocation15 + $0x70] sm:$0xff] }
0x112e   :  { %v5391_v58 = vpop.f32.mrb[56].mxu0 }
0x112f   :  { %v5392_v10 = vadd.f32 %v11814_v53, %v5391_v58  ;;  %v13620_v62 = vpop.f32.mrb[57].mxu0  ;;  %v6097_v53 = vld [vmem:[#allocation15 + $0x78] sm:$0xff]  ;;  %v6194_v58 = vld [vmem:[#allocation15 + $0x88] sm:$0xff] }
0x1130   :  { %v15025_v56 = vpack.c.bf16 %v6097_v53, %v6096_v57  ;;  %v6195_v62 = vld [vmem:[#allocation15 + $0x90] sm:$0xff] }
0x1131   :  { %13621 = vmatprep.subr.msk.mxu0 %vm2551_vm14, %v5392_v10  ;;  %v6077_v57 = vld [vmem:[#allocation24 + $0x18] sm:$0xff]  ;;  %v6078_v53 = vld [vmem:[#allocation24 + $0x20] sm:$0xff] }
0x1132   :  { %13622 = vmatpush3.msk.msra.mxu0 %vm2551_vm14, %v5392_v10  ;;  %v15029_v10 = vpack.c.bf16 %v6194_v58, %v6193_v60  ;;  %v6568_v60 = vld [vmem:[#allocation15 + $0x130] sm:$0xff]  ;;  %v6569_v58 = vld [vmem:[#allocation15 + $0x138] sm:$0xff] }
0x1133   :  { %13624 = vmatmul.mubr.msk.f32.vlgmr.msra.gmra.mrb[48].mxu0 %vm4733_vm10, %v5397_v2  ;;  %14988 = vmatprep.subr.bf16.mxu0 %v16413_v8  ;;  %v6196_v2 = vld [vmem:[#allocation15 + $0x98] sm:$0xff] }
0x1134   :  { %13626 = vmatprep.mubr.msk.f32.mxu0 %vm4733_vm10, %v5398_v63  ;;  %14990 = vmatpush3.bf16.msra.mxu0 %v14989_v19 }
0x1137   :  { %13627 = vmatmul.mubr.msk.f32.gmra.mrb[50].mxu0 %vm4733_vm10, %v5399_v0  ;;  %v15033_v0 = vpack.c.bf16 %v6196_v2, %v6195_v62  ;;  %v6080_v62 = vld [vmem:[#allocation24 + $0x30] sm:$0xff]  ;;  %v15089_v2 = vpack.c.bf16 %v6569_v58, %v6568_v60 }
0x1138   :  { %13633 = vmatprep.mubr.msk.f32.mxu0 %vm16415_vm3, %v16416_v23 }
0x113b   :  { %13634 = vmatmul.mubr.msk.f32.vlgmr.msra.gmra.mrb[58].mxu0 %vm4569_vm9, %v17655_v15 }
0x113c   :  { %13638 = vmatprep.mubr.msk.f32.mxu0 %vm4733_vm10, %v5586_v36  ;;  %v6197_v36 = vld [vmem:[#allocation15 + $0xa0] sm:$0xff] }
0x120e   :  { %v5581_v4 = vpop.f32.mrb[58].mxu0 }
0x120f   :  { %v5582_v7 = vadd.f32 %v11821_v37, %v5581_v4  ;;  %v13635_v9 = vpop.f32.mrb[59].mxu0  ;;  %v6198_v37 = vld [vmem:[#allocation15 + $0xa8] sm:$0xff] }
0x1210   :  { %v15037_v4 = vpack.c.bf16 %v6198_v37, %v6197_v36  ;;  %v6200_v9 = vld [vmem:[#allocation15 + $0xb8] sm:$0xff]  ;;  %v6571_v36 = vld [vmem:[#allocation15 + $0x148] sm:$0xff] }
0x1211   :  { %13636 = vmatprep.subr.msk.mxu0 %vm2551_vm14, %v5582_v7  ;;  %v6081_v37 = vld [vmem:[#allocation24 + $0x38] sm:$0xff] }
0x1212   :  { %13637 = vmatpush3.msk.msra.mxu0 %vm2551_vm14, %v5582_v7  ;;  %v6199_v7 = vld [vmem:[#allocation15 + $0xb0] sm:$0xff] }
0x1213   :  { %13639 = vmatmul.mubr.msk.f32.vlgmr.msra.gmra.mrb[48].mxu0 %vm4733_vm10, %v5587_v11  ;;  %14991 = vmatprep.subr.bf16.mxu0 %v16413_v8  ;;  %v15041_v11 = vpack.c.bf16 %v6200_v9, %v6199_v7  ;;  %v6572_v7 = vld [vmem:[#allocation15 + $0x150] sm:$0xff]  ;;  %v6573_v9 = vld [vmem:[#allocation15 + $0x158] sm:$0xff] }
0x1214   :  { %13641 = vmatprep.mubr.msk.f32.mxu0 %vm4733_vm10, %v5588_v24  ;;  %14993 = vmatpush3.bf16.msra.mxu0 %v14992_v22  ;;  %v6201_v22 = vld [vmem:[#allocation15 + $0xc0] sm:$0xff]  ;;  %v6202_v24 = vld [vmem:[#allocation15 + $0xc8] sm:$0xff] }
0x1217   :  { %13642 = vmatmul.mubr.msk.f32.gmra.mrb[50].mxu0 %vm4733_vm10, %v5589_v35  ;;  %v15045_v35 = vpack.c.bf16 %v6202_v24, %v6201_v22  ;;  %v6574_v22 = vld [vmem:[#allocation15 + $0x160] sm:$0xff]  ;;  %v6575_v24 = vld [vmem:[#allocation15 + $0x168] sm:$0xff] }
0x1218   :  { %13648 = vmatprep.mubr.msk.f32.mxu0 %vm16415_vm3, %v16416_v23 }
0x121b   :  { %13649 = vmatmul.mubr.msk.f32.vlgmr.msra.gmra.mrb[60].mxu0 %vm4569_vm9, %v17655_v15 }
0x121c   :  { %13653 = vmatprep.mubr.msk.f32.mxu0 %vm4733_vm10, %v5776_v27  ;;  %v6203_v27 = vld [vmem:[#allocation15 + $0xd0] sm:$0xff] }
0x12ee   :  { %v5771_v54 = vpop.f32.mrb[60].mxu0 }
0x12ef   :  { %v5772_v1 = vadd.f32 %v11828_v28, %v5771_v54  ;;  %v13650_v32 = vpop.f32.mrb[61].mxu0  ;;  %v6204_v28 = vld [vmem:[#allocation15 + $0xd8] sm:$0xff]  ;;  %v6206_v54 = vld [vmem:[#allocation15 + $0xe8] sm:$0xff] }
0x12f0   :  { %v15049_v30 = vpack.c.bf16 %v6204_v28, %v6203_v27  ;;  %v6207_v32 = vld [vmem:[#allocation15 + $0xf0] sm:$0xff]  ;;  %v6577_v28 = vld [vmem:[#allocation15 + $0x178] sm:$0xff] }
0x12f1   :  { %13651 = vmatprep.subr.msk.mxu0 %vm2551_vm14, %v5772_v1  ;;  %v6576_v27 = vld [vmem:[#allocation15 + $0x170] sm:$0xff] }
0x12f2   :  { %13652 = vmatpush3.msk.msra.mxu0 %vm2551_vm14, %v5772_v1  ;;  %v15053_v1 = vpack.c.bf16 %v6206_v54, %v6205_v31 }
0x12f3   :  { %13654 = vmatmul.mubr.msk.f32.vlgmr.msra.gmra.mrb[48].mxu0 %vm4733_vm10, %v5777_v13  ;;  %14994 = vmatprep.subr.bf16.mxu0 %v16413_v8  ;;  %v6208_v13 = vld [vmem:[#allocation15 + $0xf8] sm:$0xff] }
0x12f4   :  { %13656 = vmatprep.mubr.msk.f32.mxu0 %vm4733_vm10, %v5778_v33  ;;  %14996 = vmatpush3.bf16.msra.mxu0 %v14995_v41  ;;  %v15057_v41 = vpack.c.bf16 %v6208_v13, %v6207_v32  ;;  %v6184_v33 = vld [vmem:[#allocation24 + $0x40] sm:$0xff] }
0x12f7   :  { %13657 = vmatmul.mubr.msk.f32.gmra.mrb[50].mxu0 %vm4733_vm10, %v5779_v39 }
0x12f8   :  { %13663 = vmatprep.mubr.msk.f32.mxu0 %vm16415_vm3, %v16416_v23  ;;  %v15001_v23 = vpack.c.bf16 %v6085_v14, %v6084_v5 }
0x12fb   :  { %13664 = vmatmul.mubr.msk.f32.vlgmr.msra.gmra.mrb[62].mxu0 %vm4569_vm9, %v17655_v15  ;;  %v6086_v15 = vld [vmem:[#allocation15 + $0x20] sm:$0xff] }
0x12fc   :  { %13668 = vmatprep.mubr.msk.f32.mxu0 %vm4733_vm10, %v5966_v50  ;;  %v15005_v43 = vpack.c.bf16 %v6087_v40, %v6086_v15  ;;  %v6562_v15 = vld [vmem:[#allocation15 + $0x100] sm:$0xff]  ;;  %v6563_v40 = vld [vmem:[#allocation15 + $0x108] sm:$0xff] }
0x12fd   :  { %v15077_v18 = vpack.c.bf16 %v6563_v40, %v6562_v15  ;;  %v7096_v40 = vld [vmem:[#allocation17 + $0x40] sm:$0xff] }
0x13ce   :  { %v5961_v25 = vpop.f32.mrb[62].mxu0 }
0x13cf   :  { %v5962_v34 = vadd.f32 %v11835_v21, %v5961_v25  ;;  %v13665_v26 = vpop.f32.mrb[63].mxu0 }
0x13d1   :  { %13666 = vmatprep.subr.msk.mxu0 %vm2551_vm14, %v5962_v34 }
0x13d2   :  { %13667 = vmatpush3.msk.msra.mxu0 %vm2551_vm14, %v5962_v34 }
0x13d3   :  { %13669 = vmatmul.mubr.msk.f32.vlgmr.msra.gmra.mrb[48].mxu0 %vm4733_vm10, %v5967_v17  ;;  %14998 = vmatprep.subr.bf16.mxu0 %v14997_v51 }
0x13d4   :  { %13671 = vmatprep.mubr.msk.f32.mxu0 %vm4733_vm10, %v5968_v29  ;;  %15000 = vmatpush3.bf16.msra.mxu0 %v14997_v51  ;;  %v6185_v29 = vld [vmem:[#allocation24 + $0x48] sm:$0xff] }
0x13d5   :  { %15002 = vmatprep.subr.bf16.mxu0 %v15001_v23 }
0x13d7   :  { %13672 = vmatmul.mubr.msk.f32.gmra.mrb[50].mxu0 %vm4733_vm10, %v5969_v12  ;;  %v6187_v12 = vld [vmem:[#allocation24 + $0x58] sm:$0xff] }
0x13d8   :  { %15004 = vmatpush3.bf16.msra.mxu0 %v15001_v23  ;;  %v6186_v23 = vld [vmem:[#allocation24 + $0x50] sm:$0xff] }
0x13d9   :  { %15006 = vmatprep.subr.bf16.mxu0 %v15005_v43 }
0x13dc   :  { %15008 = vmatpush3.bf16.msra.mxu0 %v15005_v43  ;;  %v6188_v43 = vld [vmem:[#allocation24 + $0x60] sm:$0xff] }
0x13dd   :  { %15010 = vmatprep.subr.bf16.mxu0 %v15009_v16 }
0x13e0   :  { %15012 = vmatpush3.bf16.msra.mxu0 %v15009_v16  ;;  %v6190_v16 = vld [vmem:[#allocation24 + $0x70] sm:$0xff] }
0x13e1   :  { %15014 = vmatprep.subr.bf16.mxu0 %v15013_v45 }
0x13e4   :  { %15016 = vmatpush3.bf16.msra.mxu0 %v15013_v45  ;;  %v6564_v45 = vld [vmem:[#allocation15 + $0x110] sm:$0xff] }
0x13e5   :  { %15018 = vmatprep.subr.bf16.mxu0 %v15017_v49  ;;  %v15081_v47 = vpack.c.bf16 %v6565_v46, %v6564_v45 }
0x13e8   :  { %15020 = vmatpush3.bf16.msra.mxu0 %v15017_v49  ;;  %v6076_v49 = vld [vmem:[#allocation24 + $0x10] sm:$0xff] }
0x13e9   :  { %15022 = vmatprep.subr.bf16.mxu0 %v15021_v55 }
0x13ec   :  { %15024 = vmatpush3.bf16.msra.mxu0 %v15021_v55  ;;  %v6567_v55 = vld [vmem:[#allocation15 + $0x128] sm:$0xff] }
0x13ed   :  { %15026 = vmatprep.subr.bf16.mxu0 %v15025_v56 }
0x13f0   :  { %15028 = vmatpush3.bf16.msra.mxu0 %v15025_v56  ;;  %v15085_v56 = vpack.c.bf16 %v6567_v55, %v6566_v52 }
0x13f1   :  { %15030 = vmatprep.subr.bf16.mxu0 %v15029_v10 }
0x14a6   :  { %v17739_v19 = vpop.f32.mrb[48].mxu0 }
0x14a7   :  { %v17741_v63 = vpop.f32.mrb[49].mxu0 }
0x14a8   :  { %13706 = vmatprep.mubr.f32.mxu0 %v17741_v63 }
0x14a9   :  { %13707 = vmatmul.mubr.f32.vlgmr.msra.gmra.mrb[64].mxu0 %v17739_v19 }
0x14aa   :  { %15032 = vmatpush3.bf16.msra.mxu0 %v15029_v10  ;;  %v17745_v3 = vpop.f32.mrb[50].mxu0  ;;  %v6079_v10 = vld [vmem:[#allocation24 + $0x28] sm:$0xff] }
0x14ab   :  { %v17747_v20 = vpop.f32.mrb[51].mxu0  ;;  %15034 = vmatprep.subr.bf16.mxu0 %v15033_v0 }
0x14ac   :  { %13709 = vmatprep.mubr.f32.mxu0 %v17747_v20 }
0x14ad   :  { %13710 = vmatmul.mubr.f32.gmra.mrb[66].mxu0 %v17745_v3 }
0x14ae   :  { %15036 = vmatpush3.bf16.msra.mxu0 %v15033_v0  ;;  %13744 = vmatprep.mubr.f32.mxu0 %v17741_v63  ;;  %v6570_v0 = vld [vmem:[#allocation15 + $0x140] sm:$0xff] }
0x14af   :  { %15038 = vmatprep.subr.bf16.mxu0 %v15037_v4 }
0x14b2   :  { %15040 = vmatpush3.bf16.msra.mxu0 %v15037_v4  ;;  %v15093_v4 = vpack.c.bf16 %v6571_v36, %v6570_v0 }
0x14b3   :  { %15042 = vmatprep.subr.bf16.mxu0 %v15041_v11 }
0x14b6   :  { %15044 = vmatpush3.bf16.msra.mxu0 %v15041_v11  ;;  %v15097_v11 = vpack.c.bf16 %v6573_v9, %v6572_v7 }
0x14b7   :  { %15046 = vmatprep.subr.bf16.mxu0 %v15045_v35 }
0x14ba   :  { %15048 = vmatpush3.bf16.msra.mxu0 %v15045_v35  ;;  %v15101_v35 = vpack.c.bf16 %v6575_v24, %v6574_v22 }
0x14bb   :  { %15050 = vmatprep.subr.bf16.mxu0 %v15049_v30 }
0x14be   :  { %15052 = vmatpush3.bf16.msra.mxu0 %v15049_v30  ;;  %v15105_v30 = vpack.c.bf16 %v6577_v28, %v6576_v27 }
0x14bf   :  { %15054 = vmatprep.subr.bf16.mxu0 %v15053_v1 }
0x14c2   :  { %15056 = vmatpush3.bf16.msra.mxu0 %v15053_v1 }
0x14c3   :  { %15058 = vmatprep.subr.bf16.mxu0 %v15057_v41 }
0x14c6   :  { %15060 = vmatpush3.bf16.msra.mxu0 %v15057_v41 }
0x14c9   :  { %13745 = vmatmul.mubr.f32.vlgmr.msra.gmra.mrb[68].mxu0 %v17739_v19 }
0x14ca   :  { %13747 = vmatprep.mubr.f32.mxu0 %v17747_v20 }
0x14cd   :  { %13748 = vmatmul.mubr.f32.gmra.mrb[70].mxu0 %v17745_v3 }
0x14ce   :  { %13758 = vmatprep.mubr.msk.f32.mxu0 %vm1374_vm1, %v6184_v33  ;;  %v6554_v33 = vld [vmem:[#allocation24 + $0x88] sm:$0xff] }
0x157c   :  { %v13708_v39 = vpop.f32.mrb[64].mxu0 }
0x157d   :  { %v6164_v50 = vpop.f32.mrb[65].mxu0 }
0x157e   :  { %v15069_v21 = vpack.c.bf16 %v13708_v39, %v6164_v50  ;;  %v6555_v39 = vld [vmem:[#allocation24 + $0x90] sm:$0xff] }
0x157f   :  { %v6559_v50 = vld [vmem:[#allocation24 + $0xb0] sm:$0xff] }
0x1580   :  { %v13711_v6 = vpop.f32.mrb[66].mxu0 }
0x1581   :  { %v6174_v38 = vpop.f32.mrb[67].mxu0 }
0x1582   :  { %v15073_v25 = vpack.c.bf16 %v13711_v6, %v6174_v38  ;;  %v6941_v6 = vld [vmem:[#allocation17] sm:$0xff]  ;;  %v6942_v38 = vld [vmem:[#allocation17 + $0x8] sm:$0xff] }
0x159c   :  { %v13746_v5 = vpop.f32.mrb[68].mxu0 }
0x159d   :  { %v6275_v14 = vpop.f32.mrb[69].mxu0 }
0x159e   :  { %v15061_v34 = vpack.c.bf16 %v13746_v5, %v6275_v14  ;;  %v6943_v5 = vld [vmem:[#allocation17 + $0x10] sm:$0xff]  ;;  %v6944_v14 = vld [vmem:[#allocation17 + $0x18] sm:$0xff] }
0x15a0   :  { %v13749_v26 = vpop.f32.mrb[70].mxu0  ;;  %15062 = vmatprep.subr.bf16.mxu0 %v15061_v34 }
0x15a1   :  { %v6285_v51 = vpop.f32.mrb[71].mxu0  ;;  %15064 = vmatpush3.bf16.msra.mxu0 %v15061_v34  ;;  %v15121_v34 = vpack.c.bf16 %v6944_v14, %v6943_v5 }
0x15a2   :  { %v15065_v17 = vpack.c.bf16 %v13749_v26, %v6285_v51  ;;  %v6945_v26 = vld [vmem:[#allocation17 + $0x20] sm:$0xff]  ;;  %v6946_v51 = vld [vmem:[#allocation17 + $0x28] sm:$0xff] }
0x15a4   :  { %15066 = vmatprep.subr.bf16.mxu0 %v15065_v17 }
0x15a5   :  { %15068 = vmatpush3.bf16.msra.mxu0 %v15065_v17  ;;  %v15125_v17 = vpack.c.bf16 %v6946_v51, %v6945_v26 }
0x15a6   :  { %15070 = vmatprep.subr.bf16.mxu0 %v15069_v21 }
0x15a8   :  { %13759 = vmatmul.mubr.msk.f32.vlgmr.msra.gmra.mrb[72].mxu0 %vm1374_vm1, %v6185_v29  ;;  %v6947_v29 = vld [vmem:[#allocation17 + $0x30] sm:$0xff] }
0x15a9   :  { %15072 = vmatpush3.bf16.msra.mxu0 %v15069_v21  ;;  %13761 = vmatprep.mubr.msk.f32.mxu0 %vm1374_vm1, %v6186_v23  ;;  %v6560_v21 = vld [vmem:[#allocation24 + $0xb8] sm:$0xff]  ;;  %v6948_v23 = vld [vmem:[#allocation17 + $0x38] sm:$0xff] }
0x15aa   :  { %15074 = vmatprep.subr.bf16.mxu0 %v15073_v25  ;;  %v15129_v15 = vpack.c.bf16 %v6948_v23, %v6947_v29 }
0x15ac   :  { %13762 = vmatmul.mubr.msk.f32.gmra.mrb[74].mxu0 %vm1374_vm1, %v6187_v12  ;;  %v7097_v12 = vld [vmem:[#allocation17 + $0x48] sm:$0xff] }
0x15ad   :  { %15076 = vmatpush3.bf16.msra.mxu0 %v15073_v25  ;;  %13764 = vmatprep.mubr.msk.f32.mxu0 %vm1374_vm1, %v6188_v43  ;;  %v15117_v25 = vpack.c.bf16 %v6942_v38, %v6941_v6  ;;  %v17783_v43 = vpack.c.bf16 %v7097_v12, %v7096_v40 }
0x15ae   :  { %15078 = vmatprep.subr.bf16.mxu0 %v15077_v18 }
0x15af   :  { %15118 = vmatprep.subr.bf16.mxu1 %v15117_v25 }
0x15b0   :  { %13765 = vmatmul.mubr.msk.f32.gmra.mrb[76].mxu0 %vm1374_vm1, %v6189_v44  ;;  %15120 = vmatpush3.bf16.msra.mxu1 %v15117_v25 }
0x15b1   :  { %13767 = vmatprep.mubr.msk.f32.mxu0 %vm1374_vm1, %v6190_v16  ;;  %15122 = vmatprep.subr.bf16.mxu1 %v15121_v34 }
0x15b4   :  { %13768 = vmatmul.mubr.msk.f32.gmra.mrb[78].mxu0 %vm1374_vm1, %v6191_v42  ;;  %15124 = vmatpush3.bf16.msra.mxu1 %v15121_v34 }
0x15b5   :  { %13778 = vmatprep.mubr.msk.f32.mxu0 %vm1374_vm1, %v6074_v61  ;;  %15126 = vmatprep.subr.bf16.mxu1 %v15125_v17 }
0x15b8   :  { %13779 = vmatmul.mubr.msk.f32.vlgmr.msra.gmra.mrb[72].mxu0 %vm1374_vm1, %v6075_v48  ;;  %15128 = vmatpush3.bf16.msra.mxu1 %v15125_v17 }
0x15b9   :  { %15080 = vmatpush3.bf16.msra.mxu0 %v15077_v18  ;;  %13781 = vmatprep.mubr.msk.f32.mxu0 %vm1374_vm1, %v6076_v49 }
0x15ba   :  { %15082 = vmatprep.subr.bf16.mxu0 %v15081_v47  ;;  %15130 = vmatprep.subr.bf16.mxu1 %v15129_v15 }
0x15bc   :  { %13782 = vmatmul.mubr.msk.f32.gmra.mrb[74].mxu0 %vm1374_vm1, %v6077_v57  ;;  %15132 = vmatpush3.bf16.msra.mxu1 %v15129_v15 }
0x15bd   :  { %15084 = vmatpush3.bf16.msra.mxu0 %v15081_v47  ;;  %13784 = vmatprep.mubr.msk.f32.mxu0 %vm1374_vm1, %v6078_v53 }
0x15be   :  { %15086 = vmatprep.subr.bf16.mxu0 %v15085_v56  ;;  %15134 = vmatprep.subr.bf16.mxu1 %v17783_v43 }
0x15c0   :  { %13785 = vmatmul.mubr.msk.f32.gmra.mrb[76].mxu0 %vm1374_vm1, %v6079_v10 }
0x15c1   :  { %15088 = vmatpush3.bf16.msra.mxu0 %v15085_v56  ;;  %13787 = vmatprep.mubr.msk.f32.mxu0 %vm1374_vm1, %v6080_v62 }
0x15c2   :  { %15090 = vmatprep.subr.bf16.mxu0 %v15089_v2 }
0x15c4   :  { %13788 = vmatmul.mubr.msk.f32.gmra.mrb[78].mxu0 %vm1374_vm1, %v6081_v37 }
0x15c5   :  { %15092 = vmatpush3.bf16.msra.mxu0 %v15089_v2  ;;  %13822 = vmatprep.mubr.f32.mxu0 %v17741_v63  ;;  %v6553_v63 = vld [vmem:[#allocation24 + $0x80] sm:$0xff] }
0x15c6   :  { %15094 = vmatprep.subr.bf16.mxu0 %v15093_v4 }
0x15c9   :  { %15096 = vmatpush3.bf16.msra.mxu0 %v15093_v4 }
0x15ca   :  { %15098 = vmatprep.subr.bf16.mxu0 %v15097_v11 }
0x15cd   :  { %15100 = vmatpush3.bf16.msra.mxu0 %v15097_v11 }
0x15ce   :  { %15102 = vmatprep.subr.bf16.mxu0 %v15101_v35 }
0x15d1   :  { %15104 = vmatpush3.bf16.msra.mxu0 %v15101_v35 }
0x15d2   :  { %15106 = vmatprep.subr.bf16.mxu0 %v15105_v30 }
0x15d5   :  { %15108 = vmatpush3.bf16.msra.mxu0 %v15105_v30 }
0x15d8   :  { %13823 = vmatmul.mubr.f32.vlgmr.msra.gmra.mrb[80].mxu0 %v17739_v19  ;;  %v6556_v19 = vld [vmem:[#allocation24 + $0x98] sm:$0xff] }
0x15d9   :  { %13825 = vmatprep.mubr.f32.mxu0 %v17747_v20  ;;  %v6558_v20 = vld [vmem:[#allocation24 + $0xa8] sm:$0xff] }
0x15dc   :  { %13826 = vmatmul.mubr.f32.gmra.mrb[82].mxu0 %v17745_v3  ;;  %v6557_v3 = vld [vmem:[#allocation24 + $0xa0] sm:$0xff] }
0x15dd   :  { %13836 = vmatprep.mubr.msk.f32.mxu0 %vm1374_vm1, %v6553_v63 }
0x16ab   :  { %v13824_v31 = vpop.f32.mrb[80].mxu0 }
0x16ac   :  { %v6644_v54 = vpop.f32.mrb[81].mxu0 }
0x16ad   :  { %v15109_v1 = vpack.c.bf16 %v13824_v31, %v6644_v54 }
0x16af   :  { %v13827_v32 = vpop.f32.mrb[82].mxu0  ;;  %15110 = vmatprep.subr.bf16.mxu0 %v15109_v1 }
0x16b0   :  { %v6654_v13 = vpop.f32.mrb[83].mxu0  ;;  %15112 = vmatpush3.bf16.msra.mxu0 %v15109_v1 }
0x16b1   :  { %v15113_v41 = vpack.c.bf16 %v13827_v32, %v6654_v13 }
0x16b3   :  { %15114 = vmatprep.subr.bf16.mxu0 %v15113_v41 }
0x16b4   :  { %15116 = vmatpush3.bf16.msra.mxu0 %v15113_v41 }
0x16b7   :  { %13837 = vmatmul.mubr.msk.f32.vlgmr.msra.gmra.mrb[72].mxu0 %vm1374_vm1, %v6554_v33 }
0x16b8   :  { %13839 = vmatprep.mubr.msk.f32.mxu0 %vm1374_vm1, %v6555_v39 }
0x16bb   :  { %13840 = vmatmul.mubr.msk.f32.gmra.mrb[74].mxu0 %vm1374_vm1, %v6556_v19 }
0x16bc   :  { %13842 = vmatprep.mubr.msk.f32.mxu0 %vm1374_vm1, %v6557_v3 }
0x16bf   :  { %13843 = vmatmul.mubr.msk.f32.gmra.mrb[76].mxu0 %vm1374_vm1, %v6558_v20 }
0x16c0   :  { %13845 = vmatprep.mubr.msk.f32.mxu0 %vm1374_vm1, %v6559_v50 }
0x16c3   :  { %13846 = vmatmul.mubr.msk.f32.gmra.mrb[78].mxu0 %vm1374_vm1, %v6560_v21 }
0x178a   :  { %v13838_v18 = vpop.f32.mrb[72].mxu0 }
0x178b   :  { %v6801_v44 = vsel %vm2407_vm4, %v13838_v18, 0.0  ;;  %v6753_v16 = vpop.f32.mrb[73].mxu0 }
0x178c   :  { %v6800_v42 = vsel %vm2407_vm4, %v6753_v16, 0.0 }
0x178d   :  { %v6802_v61 = vadd.f32 %v6801_v44, %v6800_v42 }
0x178e   :  { %v13841_v45 = vpop.f32.mrb[74].mxu0 }
0x178f   :  { %v6763_v46 = vpop.f32.mrb[75].mxu0  ;;  %v6805_v47 = vsel %vm2407_vm4, %v13841_v45, 0.0 }
0x1790   :  { %v6803_v48 = vsel %vm2407_vm4, %v6763_v46, 0.0 }
0x1791   :  { %v6804_v49 = vadd.f32 %v6803_v48, %v6802_v61 }
0x1792   :  { %v13844_v52 = vpop.f32.mrb[76].mxu0 }
0x1793   :  { %v6773_v55 = vpop.f32.mrb[77].mxu0  ;;  %v6806_v57 = vadd.f32 %v6805_v47, %v6804_v49  ;;  %v6809_v60 = vsel %vm2407_vm4, %v13844_v52, 0.0  ;;  %v11866_v47 = vld [vmem:[%s19253_s25] ss:$0 sm:$0xff] }
0x1794   :  { %v6807_v53 = vsel %vm2407_vm4, %v6773_v55, 0.0 }
0x1795   :  { %v6808_v56 = vadd.f32 %v6807_v53, %v6806_v57 }
0x1796   :  { %v13847_v58 = vpop.f32.mrb[78].mxu0 }
0x1797   :  { %v6783_v10 = vpop.f32.mrb[79].mxu0  ;;  %v6810_v62 = vadd.f32 %v6809_v60, %v6808_v56  ;;  %v6813_v36 = vsel %vm2407_vm4, %v13847_v58, 0.0  ;;  %v11867_v56 = vld [vmem:[%s19254_s9] ss:$0 sm:$0xff] }
0x1798   :  { %v6811_v2 = vsel %vm2407_vm4, %v6783_v10, 0.0 }
0x1799   :  { %v6812_v0 = vadd.f32 %v6811_v2, %v6810_v62 }
0x179b   :  { %v6814_v37 = vadd.f32 %v6813_v36, %v6812_v0 }
0x179d   :  { %v6815_v4 = vrot.slane %v6814_v37, 4 }
0x179f   :  { %v6816_v7 = vadd.f32 %v6815_v4, %v6814_v37 }
0x17a1   :  { %v6817_v9 = vrot.slane %v6816_v7, 2 }
0x17a3   :  { %v6818_v11 = vadd.f32 %v6817_v9, %v6816_v7 }
0x17a5   :  { %v6819_v22 = vrot.slane %v6818_v11, 1 }
0x17a7   :  { %v6820_v24 = vadd.f32 %v6819_v22, %v6818_v11 }
0x17a9   :  { %v6822_v35 = vmul.f32 0.015625, %v6820_v24 }
0x17ab   :  { %v6823_v27 = vsub.f32 %v6753_v16, %v6822_v35  ;;  %v6824_v28 = vsub.f32 %v13838_v18, %v6822_v35  ;;  %v6825_v30 = vsub.f32 %v6763_v46, %v6822_v35  ;;  %v6826_v63 = vsub.f32 %v13841_v45, %v6822_v35 }
0x17ac   :  { %v6827_v31 = vsub.f32 %v6773_v55, %v6822_v35  ;;  %v6828_v54 = vsub.f32 %v13844_v52, %v6822_v35  ;;  %v6829_v1 = vsub.f32 %v6783_v10, %v6822_v35  ;;  %v6830_v32 = vsub.f32 %v13847_v58, %v6822_v35  ;;  %v7098_v35 = vld [vmem:[#allocation17 + $0x50] sm:$0xff] }
0x17ad   :  { %v6831_v13 = vmul.f32 %v6823_v27, %v6823_v27  ;;  %v6832_v41 = vmul.f32 %v6824_v28, %v6824_v28  ;;  %v6833_v33 = vmul.f32 %v6825_v30, %v6825_v30  ;;  %v6834_v39 = vmul.f32 %v6826_v63, %v6826_v63 }
0x17ae   :  { %v6835_v50 = vmul.f32 %v6827_v31, %v6827_v31  ;;  %v6836_v38 = vmul.f32 %v6828_v54, %v6828_v54  ;;  %v6837_v14 = vmul.f32 %v6829_v1, %v6829_v1  ;;  %v6838_v51 = vmul.f32 %v6830_v32, %v6830_v32 }
0x17af   :  { %v6839_v19 = vsel %vm2407_vm4, %v6831_v13, 0.0  ;;  %v6840_v3 = vsel %vm2407_vm4, %v6832_v41, 0.0  ;;  %v6842_v21 = vsel %vm2407_vm4, %v6833_v33, 0.0  ;;  %v6844_v25 = vsel %vm2407_vm4, %v6834_v39, 0.0  ;;  %v7100_v39 = vld [vmem:[#allocation17 + $0x60] sm:$0xff] }
0x17b0   :  { %v6841_v20 = vadd.f32 %v6840_v3, %v6839_v19  ;;  %v6846_v34 = vsel %vm2407_vm4, %v6835_v50, 0.0  ;;  %v6848_v17 = vsel %vm2407_vm4, %v6836_v38, 0.0  ;;  %v6850_v23 = vsel %vm2407_vm4, %v6837_v14, 0.0  ;;  %v7101_v19 = vld [vmem:[#allocation17 + $0x68] sm:$0xff]  ;;  %v7102_v14 = vld [vmem:[#allocation17 + $0x70] sm:$0xff] }
0x17b1   :  { %v6852_v40 = vsel %vm2407_vm4, %v6838_v51, 0.0 }
0x17b2   :  { %v6843_v6 = vadd.f32 %v6842_v21, %v6841_v20 }
0x17b4   :  { %v6845_v5 = vadd.f32 %v6844_v25, %v6843_v6  ;;  %v15141_v6 = vpack.c.bf16 %v7101_v19, %v7100_v39  ;;  %v7082_v19 = vld [vmem:[#allocation26 + $0x98] sm:$0xff] }
0x17b6   :  { %v6847_v26 = vadd.f32 %v6846_v34, %v6845_v5  ;;  %v7103_v34 = vld [vmem:[#allocation17 + $0x78] sm:$0xff] }
0x17b8   :  { %v6849_v29 = vadd.f32 %v6848_v17, %v6847_v26  ;;  %v15145_v17 = vpack.c.bf16 %v7103_v34, %v7102_v14  ;;  %v7086_v34 = vld [vmem:[#allocation26 + $0xb8] sm:$0xff] }
0x17ba   :  { %v6851_v15 = vadd.f32 %v6850_v23, %v6849_v29  ;;  %v7613_v23 = vld [vmem:[#allocation17 + $0x80] sm:$0xff] }
0x17bc   :  { %v6853_v12 = vadd.f32 %v6852_v40, %v6851_v15  ;;  %v7614_v15 = vld [vmem:[#allocation17 + $0x88] sm:$0xff] }
0x17be   :  { %v6854_v18 = vrot.slane %v6853_v12, 4 }
0x17c0   :  { %v6855_v44 = vadd.f32 %v6854_v18, %v6853_v12  ;;  %v15181_v12 = vpack.c.bf16 %v7614_v15, %v7613_v23  ;;  %v7091_v23 = vld [vmem:[#allocation26 + $0xe0] sm:$0xff]  ;;  %v7092_v15 = vld [vmem:[#allocation26 + $0xe8] sm:$0xff] }
0x17c2   :  { %v6856_v16 = vrot.slane %v6855_v44, 2 }
0x17c4   :  { %v6857_v42 = vadd.f32 %v6856_v16, %v6855_v44  ;;  %v7615_v44 = vld [vmem:[#allocation17 + $0x90] sm:$0xff]  ;;  %v7616_v16 = vld [vmem:[#allocation17 + $0x98] sm:$0xff] }
0x17c6   :  { %v6858_v61 = vrot.slane %v6857_v42, 1 }
0x17c8   :  { %v6859_v45 = vadd.f32 %v6858_v61, %v6857_v42  ;;  %v15185_v42 = vpack.c.bf16 %v7616_v16, %v7615_v44  ;;  %v7617_v61 = vld [vmem:[#allocation17 + $0xa0] sm:$0xff] }
0x17c9   :  { %v6926_v44 = vld [vmem:[#allocation26 + $0x8] sm:$0xff]  ;;  %v6927_v16 = vld [vmem:[#allocation26 + $0x10] sm:$0xff] }
0x17ca   :  { %v6860_v46 = vmul.f32 0.015625, %v6859_v45  ;;  %v7618_v45 = vld [vmem:[#allocation17 + $0xa8] sm:$0xff] }
0x17cc   :  { %v6861_v48 = vadd.f32 1e-05, %v6860_v46  ;;  %v15189_v46 = vpack.c.bf16 %v7618_v45, %v7617_v61  ;;  %v6929_v61 = vld [vmem:[#allocation26 + $0x20] sm:$0xff]  ;;  %v6930_v45 = vld [vmem:[#allocation26 + $0x28] sm:$0xff] }
0x17ce   :  { %15833 = vrsqrt.f32 %v6861_v48  ;;  %v7619_v48 = vld [vmem:[#allocation17 + $0xb0] sm:$0xff] }
0x17d8   :  { %v15834_v49 = vpop.eup %15833 }
0x17d9   :  { %v6869_v52 = vmul.f32 %v15834_v49, %v6829_v1  ;;  %v6863_v55 = vmul.f32 %v15834_v49, %v6823_v27  ;;  %v6864_v57 = vmul.f32 %v15834_v49, %v6824_v28  ;;  %v6865_v53 = vmul.f32 %v15834_v49, %v6825_v30  ;;  %v7099_v1 = vld [vmem:[#allocation17 + $0x58] sm:$0xff] }
0x17da   :  { %v6866_v60 = vmul.f32 %v15834_v49, %v6826_v63  ;;  %v6867_v58 = vmul.f32 %v15834_v49, %v6827_v31  ;;  %v6868_v10 = vmul.f32 %v15834_v49, %v6828_v54  ;;  %v6870_v62 = vmul.f32 %v15834_v49, %v6830_v32  ;;  %v7620_v49 = vld [vmem:[#allocation17 + $0xb8] sm:$0xff] }
0x17db   :  { %v6878_v2 = vmul.f32 %v11866_v47, %v6863_v55  ;;  %v6879_v0 = vmul.f32 %v11866_v47, %v6864_v57  ;;  %v6880_v36 = vmul.f32 %v11866_v47, %v6865_v53  ;;  %v6884_v22 = vmul.f32 %v11866_v47, %v6869_v52  ;;  %v7079_v52 = vld [vmem:[#allocation26 + $0x80] sm:$0xff] }
0x17dc   :  { %v6881_v37 = vmul.f32 %v11866_v47, %v6866_v60  ;;  %v6882_v4 = vmul.f32 %v11866_v47, %v6867_v58  ;;  %v6883_v28 = vmul.f32 %v11866_v47, %v6868_v10  ;;  %v15137_v13 = vpack.c.bf16 %v7099_v1, %v7098_v35  ;;  %13920 = vmatprep.mubr.msk.f32.mxu0 %vm2407_vm4, %v7079_v52  ;;  %v6935_v52 = vld [vmem:[#allocation26 + $0x50] sm:$0xff] }
0x17dd   :  { %v6893_v7 = vadd.f32 %v11867_v56, %v6878_v2  ;;  %v6894_v9 = vadd.f32 %v11867_v56, %v6879_v0  ;;  %v6895_v11 = vadd.f32 %v11867_v56, %v6880_v36  ;;  %v6885_v3 = vmul.f32 %v11866_v47, %v6870_v62 }
0x17de   :  { %v6896_v24 = vadd.f32 %v11867_v56, %v6881_v37  ;;  %v6897_v27 = vadd.f32 %v11867_v56, %v6882_v4  ;;  %v6898_v33 = vadd.f32 %v11867_v56, %v6883_v28  ;;  %v6899_v20 = vadd.f32 %v11867_v56, %v6884_v22 }
0x17df   :  { %vm6901_vm11 = vcmp.ge.f32.partialorder %v6893_v7, 0.0  ;;  %v6909_v30 = vmul.f32 0.01, %v6893_v7  ;;  %vm6902_vm12 = vcmp.ge.f32.partialorder %v6894_v9, 0.0  ;;  %v6910_v63 = vmul.f32 0.01, %v6894_v9 }
0x17e0   :  { %vm6903_vm13 = vcmp.ge.f32.partialorder %v6895_v11, 0.0  ;;  %v6911_v31 = vmul.f32 0.01, %v6895_v11  ;;  %v6912_v41 = vmul.f32 0.01, %v6896_v24  ;;  %vm6904_vm14 = vcmp.ge.f32.partialorder %v6896_v24, 0.0 }
0x17e1   :  { %v17804_v54 = vsel %vm6901_vm11, %v6893_v7, %v6909_v30  ;;  %v17806_v32 = vsel %vm6902_vm12, %v6894_v9, %v6910_v63  ;;  %v6913_v21 = vmul.f32 0.01, %v6897_v27  ;;  %vm6905_vm15 = vcmp.ge.f32.partialorder %v6897_v27, 0.0 }
0x17e2   :  { %13864 = vmatprep.mubr.msk.f32.mxu1 %vm2407_vm4, %v17804_v54  ;;  %v17812_v50 = vsel %vm6903_vm13, %v6895_v11, %v6911_v31  ;;  %v6920_v38 = vsel %vm6904_vm14, %v6896_v24, %v6912_v41  ;;  %v6914_v25 = vmul.f32 0.01, %v6898_v33  ;;  %v6900_v5 = vadd.f32 %v11867_v56, %v6885_v3  ;;  %v7081_v41 = vld [vmem:[#allocation26 + $0x90] sm:$0xff] }
0x17e3   :  { %13865 = vmatmul.mubr.msk.f32.vlgmr.msra.gmra.mrb[52].mxu1 %vm2407_vm4, %v17806_v32  ;;  %v6921_v26 = vsel %vm6905_vm15, %v6897_v27, %v6913_v21  ;;  %vm6906_vm0 = vcmp.ge.f32.partialorder %v6898_v33, 0.0  ;;  %v6915_v51 = vmul.f32 0.01, %v6899_v20  ;;  %vm6907_vm3 = vcmp.ge.f32.partialorder %v6899_v20, 0.0 }
0x17e4   :  { %13867 = vmatprep.mubr.msk.f32.mxu1 %vm2407_vm4, %v17812_v50  ;;  %15136 = vmatpush3.bf16.msra.mxu1 %v17783_v43  ;;  %v6922_v43 = vsel %vm6906_vm0, %v6898_v33, %v6914_v25  ;;  %v6916_v29 = vmul.f32 0.01, %v6900_v5  ;;  %vm6908_vm2 = vcmp.ge.f32.partialorder %v6900_v5, 0.0  ;;  %v15193_v47 = vpack.c.bf16 %v7620_v49, %v7619_v48  ;;  %v7085_v25 = vld [vmem:[#allocation26 + $0xb0] sm:$0xff]  ;;  %v6932_v48 = vld [vmem:[#allocation26 + $0x38] sm:$0xff]  ;;  %v6933_v49 = vld [vmem:[#allocation26 + $0x40] sm:$0xff] }
0x17e5   :  { %15138 = vmatprep.subr.bf16.mxu1 %v15137_v13  ;;  %v6923_v40 = vsel %vm6907_vm3, %v6899_v20, %v6915_v51  ;;  %v7083_v20 = vld [vmem:[#allocation26 + $0xa0] sm:$0xff] }
0x17e6   :  { %v6924_v18 = vsel %vm6908_vm2, %v6900_v5, %v6916_v29  ;;  %v7087_v51 = vld [vmem:[#allocation26 + $0xc0] sm:$0xff]  ;;  %v7090_v29 = vld [vmem:[#allocation26 + $0xd8] sm:$0xff] }
0x17e7   :  { %13868 = vmatmul.mubr.msk.f32.gmra.mrb[54].mxu1 %vm2407_vm4, %v6920_v38 }
0x17e8   :  { %13870 = vmatprep.mubr.msk.f32.mxu1 %vm2407_vm4, %v6921_v26  ;;  %15140 = vmatpush3.bf16.msra.mxu1 %v15137_v13 }
0x17e9   :  { %15142 = vmatprep.subr.bf16.mxu1 %v15141_v6 }
0x17eb   :  { %13871 = vmatmul.mubr.msk.f32.gmra.mrb[56].mxu1 %vm2407_vm4, %v6922_v43 }
0x17ec   :  { %13873 = vmatprep.mubr.msk.f32.mxu1 %vm2407_vm4, %v6923_v40  ;;  %15144 = vmatpush3.bf16.msra.mxu1 %v15141_v6  ;;  %v7084_v6 = vld [vmem:[#allocation26 + $0xa8] sm:$0xff] }
0x17ed   :  { %15146 = vmatprep.subr.bf16.mxu1 %v15145_v17 }
0x17ef   :  { %13874 = vmatmul.mubr.msk.f32.gmra.mrb[58].mxu1 %vm2407_vm4, %v6924_v18 }
0x17f0   :  { %15148 = vmatpush3.bf16.msra.mxu1 %v15145_v17  ;;  %13892 = vmatprep.mubr.msk.f32.mxu1 %vm2407_vm4, %v17804_v54  ;;  %v7088_v17 = vld [vmem:[#allocation26 + $0xc8] sm:$0xff] }
0x17f1   :  { %15182 = vmatprep.subr.bf16.mxu1 %v15181_v12 }
0x17f3   :  { %13893 = vmatmul.mubr.msk.f32.vlgmr.msra.gmra.mrb[60].mxu1 %vm2407_vm4, %v17806_v32 }
0x17f4   :  { %13895 = vmatprep.mubr.msk.f32.mxu1 %vm2407_vm4, %v17812_v50  ;;  %15184 = vmatpush3.bf16.msra.mxu1 %v15181_v12  ;;  %v7094_v12 = vld [vmem:[#allocation26 + $0xf8] sm:$0xff] }
0x17f5   :  { %15186 = vmatprep.subr.bf16.mxu1 %v15185_v42 }
0x17f7   :  { %13896 = vmatmul.mubr.msk.f32.gmra.mrb[62].mxu1 %vm2407_vm4, %v6920_v38 }
0x17f8   :  { %13898 = vmatprep.mubr.msk.f32.mxu1 %vm2407_vm4, %v6921_v26  ;;  %15188 = vmatpush3.bf16.msra.mxu1 %v15185_v42  ;;  %v6928_v42 = vld [vmem:[#allocation26 + $0x18] sm:$0xff] }
0x17f9   :  { %15190 = vmatprep.subr.bf16.mxu1 %v15189_v46 }
0x17fb   :  { %13899 = vmatmul.mubr.msk.f32.gmra.mrb[64].mxu1 %vm2407_vm4, %v6922_v43 }
0x17fc   :  { %13901 = vmatprep.mubr.msk.f32.mxu1 %vm2407_vm4, %v6923_v40  ;;  %15192 = vmatpush3.bf16.msra.mxu1 %v15189_v46  ;;  %v6931_v46 = vld [vmem:[#allocation26 + $0x30] sm:$0xff] }
0x17fd   :  { %15194 = vmatprep.subr.bf16.mxu1 %v15193_v47 }
0x17ff   :  { %13902 = vmatmul.mubr.msk.f32.gmra.mrb[66].mxu1 %vm2407_vm4, %v6924_v18 }
0x1800   :  { %15196 = vmatpush3.bf16.msra.mxu1 %v15193_v47  ;;  %14000 = vmatprep.mubr.msk.f32.mxu1 %vm2407_vm4, %v17804_v54  ;;  %v6934_v47 = vld [vmem:[#allocation26 + $0x48] sm:$0xff] }
0x1803   :  { %14001 = vmatmul.mubr.msk.f32.vlgmr.msra.gmra.mrb[68].mxu1 %vm2407_vm4, %v17806_v32  ;;  %v7080_v32 = vld [vmem:[#allocation26 + $0x88] sm:$0xff] }
0x1804   :  { %14003 = vmatprep.mubr.msk.f32.mxu1 %vm2407_vm4, %v17812_v50 }
0x1807   :  { %14004 = vmatmul.mubr.msk.f32.gmra.mrb[70].mxu1 %vm2407_vm4, %v6920_v38 }
0x1808   :  { %14006 = vmatprep.mubr.msk.f32.mxu1 %vm2407_vm4, %v6921_v26 }
0x180b   :  { %14007 = vmatmul.mubr.msk.f32.gmra.mrb[72].mxu1 %vm2407_vm4, %v6922_v43  ;;  %v7089_v43 = vld [vmem:[#allocation26 + $0xd0] sm:$0xff] }
0x180c   :  { %14009 = vmatprep.mubr.msk.f32.mxu1 %vm2407_vm4, %v6923_v40  ;;  %v7093_v40 = vld [vmem:[#allocation26 + $0xf0] sm:$0xff] }
0x180f   :  { %14010 = vmatmul.mubr.msk.f32.gmra.mrb[74].mxu1 %vm2407_vm4, %v6924_v18  ;;  %v6925_v18 = vld [vmem:[#allocation26] sm:$0xff] }
0x18b6   :  { %v13866_v55 = vpop.f32.mrb[52].mxu1 }
0x18b7   :  { %v7039_v57 = vpop.f32.mrb[53].mxu1 }
0x18b8   :  { %v15165_v53 = vpack.c.bf16 %v13866_v55, %v7039_v57  ;;  %v6936_v55 = vld [vmem:[#allocation26 + $0x58] sm:$0xff]  ;;  %v6937_v57 = vld [vmem:[#allocation26 + $0x60] sm:$0xff] }
0x18ba   :  { %v13869_v56 = vpop.f32.mrb[54].mxu1 }
0x18bb   :  { %v7049_v60 = vpop.f32.mrb[55].mxu1 }
0x18bc   :  { %v15169_v58 = vpack.c.bf16 %v13869_v56, %v7049_v60  ;;  %v6939_v56 = vld [vmem:[#allocation26 + $0x70] sm:$0xff]  ;;  %v6940_v60 = vld [vmem:[#allocation26 + $0x78] sm:$0xff] }
0x18be   :  { %v13872_v10 = vpop.f32.mrb[56].mxu1 }
0x18bf   :  { %v7059_v62 = vpop.f32.mrb[57].mxu1 }
0x18c0   :  { %v15173_v2 = vpack.c.bf16 %v13872_v10, %v7059_v62  ;;  %v7597_v10 = vld [vmem:[#allocation26 + $0x108] sm:$0xff]  ;;  %v7598_v62 = vld [vmem:[#allocation26 + $0x110] sm:$0xff] }
0x18c2   :  { %v13875_v0 = vpop.f32.mrb[58].mxu1 }
0x18c3   :  { %v7069_v36 = vpop.f32.mrb[59].mxu1 }
0x18c4   :  { %v15177_v37 = vpack.c.bf16 %v13875_v0, %v7069_v36  ;;  %v7600_v0 = vld [vmem:[#allocation26 + $0x120] sm:$0xff]  ;;  %v7601_v36 = vld [vmem:[#allocation26 + $0x128] sm:$0xff] }
0x18c6   :  { %v13894_v4 = vpop.f32.mrb[60].mxu1 }
0x18c7   :  { %v7170_v7 = vpop.f32.mrb[61].mxu1 }
0x18c8   :  { %v15149_v9 = vpack.c.bf16 %v13894_v4, %v7170_v7  ;;  %v7603_v4 = vld [vmem:[#allocation26 + $0x138] sm:$0xff]  ;;  %v7604_v7 = vld [vmem:[#allocation26 + $0x140] sm:$0xff] }
0x18ca   :  { %v13897_v11 = vpop.f32.mrb[62].mxu1  ;;  %15150 = vmatprep.subr.bf16.mxu0 %v15149_v9 }
0x18cb   :  { %v7180_v22 = vpop.f32.mrb[63].mxu1  ;;  %15152 = vmatpush3.bf16.msra.mxu0 %v15149_v9  ;;  %v7605_v9 = vld [vmem:[#allocation26 + $0x148] sm:$0xff] }
0x18cc   :  { %v15153_v24 = vpack.c.bf16 %v13897_v11, %v7180_v22  ;;  %v7606_v11 = vld [vmem:[#allocation26 + $0x150] sm:$0xff]  ;;  %v7607_v22 = vld [vmem:[#allocation26 + $0x158] sm:$0xff] }
0x18ce   :  { %v13900_v35 = vpop.f32.mrb[64].mxu1  ;;  %15154 = vmatprep.subr.bf16.mxu0 %v15153_v24 }
0x18cf   :  { %v7190_v1 = vpop.f32.mrb[65].mxu1  ;;  %15156 = vmatpush3.bf16.msra.mxu0 %v15153_v24  ;;  %v7608_v24 = vld [vmem:[#allocation26 + $0x160] sm:$0xff] }
0x18d0   :  { %v15157_v27 = vpack.c.bf16 %v13900_v35, %v7190_v1  ;;  %v7609_v35 = vld [vmem:[#allocation26 + $0x168] sm:$0xff]  ;;  %v7610_v1 = vld [vmem:[#allocation26 + $0x170] sm:$0xff] }
0x18d2   :  { %v13903_v28 = vpop.f32.mrb[66].mxu1  ;;  %15158 = vmatprep.subr.bf16.mxu0 %v15157_v27 }
0x18d3   :  { %v7200_v30 = vpop.f32.mrb[67].mxu1  ;;  %15160 = vmatpush3.bf16.msra.mxu0 %v15157_v27  ;;  %v7611_v27 = vld [vmem:[#allocation26 + $0x178] sm:$0xff] }
0x18d4   :  { %v15161_v63 = vpack.c.bf16 %v13903_v28, %v7200_v30  ;;  %v8188_v28 = vld [vmem:[#allocation18] sm:$0xff]  ;;  %v8189_v30 = vld [vmem:[#allocation18 + $0x8] sm:$0xff] }
0x18d6   :  { %15162 = vmatprep.subr.bf16.mxu0 %v15161_v63  ;;  %v14002_v31 = vpop.f32.mrb[68].mxu1 }
0x18d7   :  { %15164 = vmatpush3.bf16.msra.mxu0 %v15161_v63  ;;  %v7687_v54 = vpop.f32.mrb[69].mxu1  ;;  %v9052_v63 = vld [vmem:[#allocation18 + $0x40] sm:$0xff] }
0x18d8   :  { %v15197_v13 = vpack.c.bf16 %v14002_v31, %v7687_v54  ;;  %15166 = vmatprep.subr.bf16.mxu0 %v15165_v53  ;;  %v15213_v31 = vpack.c.bf16 %v8189_v30, %v8188_v28  ;;  %v9053_v54 = vld [vmem:[#allocation18 + $0x48] sm:$0xff] }
0x18da   :  { %13921 = vmatmul.mubr.msk.f32.vlgmr.msra.gmra.mrb[84].mxu0 %vm2407_vm4, %v7080_v32  ;;  %v14005_v33 = vpop.f32.mrb[70].mxu1  ;;  %v8190_v32 = vld [vmem:[#allocation18 + $0x10] sm:$0xff]  ;;  %15214 = vmatprep.subr.bf16.mxu1 %v15213_v31 }
0x18db   :  { %15168 = vmatpush3.bf16.msra.mxu0 %v15165_v53  ;;  %v7697_v39 = vpop.f32.mrb[71].mxu1  ;;  %13923 = vmatprep.mubr.msk.f32.mxu0 %vm2407_vm4, %v7081_v41  ;;  %v6938_v53 = vld [vmem:[#allocation26 + $0x68] sm:$0xff]  ;;  %v15293_v41 = vpack.c.bf16 %v9053_v54, %v9052_v63 }
0x18dc   :  { %v15201_v3 = vpack.c.bf16 %v14005_v33, %v7697_v39  ;;  %15170 = vmatprep.subr.bf16.mxu0 %v15169_v58  ;;  %v9054_v39 = vld [vmem:[#allocation18 + $0x50] sm:$0xff]  ;;  %15216 = vmatpush3.bf16.msra.mxu1 %v15213_v31 }
0x18de   :  { %13924 = vmatmul.mubr.msk.f32.gmra.mrb[86].mxu0 %vm2407_vm4, %v7082_v19  ;;  %v14008_v50 = vpop.f32.mrb[72].mxu1  ;;  %v9055_v19 = vld [vmem:[#allocation18 + $0x58] sm:$0xff] }
0x18df   :  { %15172 = vmatpush3.bf16.msra.mxu0 %v15169_v58  ;;  %v7707_v21 = vpop.f32.mrb[73].mxu1  ;;  %13926 = vmatprep.mubr.msk.f32.mxu0 %vm2407_vm4, %v7083_v20  ;;  %v7596_v58 = vld [vmem:[#allocation26 + $0x100] sm:$0xff] }
0x18e0   :  { %v15205_v38 = vpack.c.bf16 %v14008_v50, %v7707_v21  ;;  %15174 = vmatprep.subr.bf16.mxu0 %v15173_v2 }
0x18e2   :  { %13927 = vmatmul.mubr.msk.f32.gmra.mrb[88].mxu0 %vm2407_vm4, %v7084_v6  ;;  %v14011_v5 = vpop.f32.mrb[74].mxu1 }
0x18e3   :  { %15176 = vmatpush3.bf16.msra.mxu0 %v15173_v2  ;;  %v7717_v14 = vpop.f32.mrb[75].mxu1  ;;  %13929 = vmatprep.mubr.msk.f32.mxu0 %vm2407_vm4, %v7085_v25  ;;  %v7599_v2 = vld [vmem:[#allocation26 + $0x118] sm:$0xff] }
0x18e4   :  { %v15209_v26 = vpack.c.bf16 %v14011_v5, %v7717_v14  ;;  %15178 = vmatprep.subr.bf16.mxu0 %v15177_v37 }
0x18e6   :  { %13930 = vmatmul.mubr.msk.f32.gmra.mrb[90].mxu0 %vm2407_vm4, %v7086_v34 }
0x18e7   :  { %15180 = vmatpush3.bf16.msra.mxu0 %v15177_v37  ;;  %13932 = vmatprep.mubr.msk.f32.mxu0 %vm2407_vm4, %v7087_v51  ;;  %v7602_v37 = vld [vmem:[#allocation26 + $0x130] sm:$0xff] }
0x18e8   :  { %15198 = vmatprep.subr.bf16.mxu0 %v15197_v13 }
0x18ea   :  { %13933 = vmatmul.mubr.msk.f32.gmra.mrb[92].mxu0 %vm2407_vm4, %v7088_v17 }
0x18eb   :  { %13935 = vmatprep.mubr.msk.f32.mxu0 %vm2407_vm4, %v7089_v43 }
0x18ee   :  { %13936 = vmatmul.mubr.msk.f32.gmra.mrb[94].mxu0 %vm2407_vm4, %v7090_v29 }
0x18ef   :  { %13938 = vmatprep.mubr.msk.f32.mxu0 %vm2407_vm4, %v7091_v23 }
0x18f2   :  { %13939 = vmatmul.mubr.msk.f32.gmra.mrb[96].mxu0 %vm2407_vm4, %v7092_v15 }
0x18f3   :  { %13941 = vmatprep.mubr.msk.f32.mxu0 %vm2407_vm4, %v7093_v40 }
0x18f6   :  { %13942 = vmatmul.mubr.msk.f32.gmra.mrb[98].mxu0 %vm2407_vm4, %v7094_v12 }
0x18f7   :  { %13960 = vmatprep.mubr.msk.f32.mxu0 %vm2407_vm4, %v6925_v18 }
0x18fa   :  { %13961 = vmatmul.mubr.msk.f32.vlgmr.msra.gmra.mrb[84].mxu0 %vm2407_vm4, %v6926_v44 }
0x18fb   :  { %15200 = vmatpush3.bf16.msra.mxu0 %v15197_v13  ;;  %13963 = vmatprep.mubr.msk.f32.mxu0 %vm2407_vm4, %v6927_v16  ;;  %v8191_v13 = vld [vmem:[#allocation18 + $0x18] sm:$0xff] }
0x18fc   :  { %15202 = vmatprep.subr.bf16.mxu0 %v15201_v3  ;;  %v15217_v33 = vpack.c.bf16 %v8191_v13, %v8190_v32 }
0x18fe   :  { %13964 = vmatmul.mubr.msk.f32.gmra.mrb[86].mxu0 %vm2407_vm4, %v6928_v42  ;;  %15218 = vmatprep.subr.bf16.mxu1 %v15217_v33 }
0x18ff   :  { %15204 = vmatpush3.bf16.msra.mxu0 %v15201_v3  ;;  %13966 = vmatprep.mubr.msk.f32.mxu0 %vm2407_vm4, %v6929_v61  ;;  %v15297_v3 = vpack.c.bf16 %v9055_v19, %v9054_v39 }
0x1900   :  { %15206 = vmatprep.subr.bf16.mxu0 %v15205_v38  ;;  %15220 = vmatpush3.bf16.msra.mxu1 %v15217_v33 }
0x1902   :  { %13967 = vmatmul.mubr.msk.f32.gmra.mrb[88].mxu0 %vm2407_vm4, %v6930_v45 }
0x1903   :  { %15208 = vmatpush3.bf16.msra.mxu0 %v15205_v38  ;;  %13969 = vmatprep.mubr.msk.f32.mxu0 %vm2407_vm4, %v6931_v46 }
0x1904   :  { %15210 = vmatprep.subr.bf16.mxu0 %v15209_v26 }
0x1906   :  { %13970 = vmatmul.mubr.msk.f32.gmra.mrb[90].mxu0 %vm2407_vm4, %v6932_v48 }
0x1907   :  { %15212 = vmatpush3.bf16.msra.mxu0 %v15209_v26  ;;  %13972 = vmatprep.mubr.msk.f32.mxu0 %vm2407_vm4, %v6933_v49 }
0x1908   :  { %15294 = vmatprep.subr.bf16.mxu0 %v15293_v41 }
0x190a   :  { %13973 = vmatmul.mubr.msk.f32.gmra.mrb[92].mxu0 %vm2407_vm4, %v6934_v47 }
0x190b   :  { %13975 = vmatprep.mubr.msk.f32.mxu0 %vm2407_vm4, %v6935_v52 }
0x190e   :  { %13976 = vmatmul.mubr.msk.f32.gmra.mrb[94].mxu0 %vm2407_vm4, %v6936_v55 }
0x190f   :  { %13978 = vmatprep.mubr.msk.f32.mxu0 %vm2407_vm4, %v6937_v57 }
0x1912   :  { %13979 = vmatmul.mubr.msk.f32.gmra.mrb[96].mxu0 %vm2407_vm4, %v6938_v53  ;;  %v8419_v53 = vld [vmem:[#allocation18 + $0x20] sm:$0xff] }
0x1913   :  { %13981 = vmatprep.mubr.msk.f32.mxu0 %vm2407_vm4, %v6939_v56  ;;  %v8420_v56 = vld [vmem:[#allocation18 + $0x28] sm:$0xff] }
0x1916   :  { %13982 = vmatmul.mubr.msk.f32.gmra.mrb[98].mxu0 %vm2407_vm4, %v6940_v60 }
0x1917   :  { %14028 = vmatprep.mubr.msk.f32.mxu0 %vm2407_vm4, %v7596_v58  ;;  %v17904_v58 = vpack.c.bf16 %v8420_v56, %v8419_v53 }
0x1919   :  { %15222 = vmatprep.subr.bf16.mxu1 %v17904_v58 }
0x191a   :  { %14029 = vmatmul.mubr.msk.f32.vlgmr.msra.gmra.mrb[84].mxu0 %vm2407_vm4, %v7597_v10 }
0x191b   :  { %14031 = vmatprep.mubr.msk.f32.mxu0 %vm2407_vm4, %v7598_v62  ;;  %15296 = vmatpush3.bf16.msra.mxu0 %v15293_v41 }
0x191c   :  { %15298 = vmatprep.subr.bf16.mxu0 %v15297_v3 }
0x191e   :  { %14032 = vmatmul.mubr.msk.f32.gmra.mrb[86].mxu0 %vm2407_vm4, %v7599_v2 }
0x191f   :  { %14034 = vmatprep.mubr.msk.f32.mxu0 %vm2407_vm4, %v7600_v0  ;;  %15300 = vmatpush3.bf16.msra.mxu0 %v15297_v3 }
0x1920   :  { %15333 = vmatprep.subr.bf16.mxu0 %v16413_v8 }
0x1922   :  { %14035 = vmatmul.mubr.msk.f32.gmra.mrb[88].mxu0 %vm2407_vm4, %v7601_v36 }
0x1923   :  { %14037 = vmatprep.mubr.msk.f32.mxu0 %vm2407_vm4, %v7602_v37 }
0x1926   :  { %14038 = vmatmul.mubr.msk.f32.gmra.mrb[90].mxu0 %vm2407_vm4, %v7603_v4 }
0x1927   :  { %14040 = vmatprep.mubr.msk.f32.mxu0 %vm2407_vm4, %v7604_v7 }
0x192a   :  { %14041 = vmatmul.mubr.msk.f32.gmra.mrb[92].mxu0 %vm2407_vm4, %v7605_v9 }
0x192b   :  { %14043 = vmatprep.mubr.msk.f32.mxu0 %vm2407_vm4, %v7606_v11 }
0x192e   :  { %14044 = vmatmul.mubr.msk.f32.gmra.mrb[94].mxu0 %vm2407_vm4, %v7607_v22 }
0x192f   :  { %14046 = vmatprep.mubr.msk.f32.mxu0 %vm2407_vm4, %v7608_v24 }
0x1932   :  { %14047 = vmatmul.mubr.msk.f32.gmra.mrb[96].mxu0 %vm2407_vm4, %v7609_v35 }
0x1933   :  { %14049 = vmatprep.mubr.msk.f32.mxu0 %vm2407_vm4, %v7610_v1 }
0x1936   :  { %14050 = vmatmul.mubr.msk.f32.gmra.mrb[98].mxu0 %vm2407_vm4, %v7611_v27 }
0x19ed   :  { %v14030_v20 = vpop.f32.mrb[84].mxu0 }
0x19ee   :  { %v7936_v50 = vsel %vm1374_vm1, %v14030_v20, 0.0  ;;  %v7840_v21 = vpop.f32.mrb[85].mxu0 }
0x19ef   :  { %v7935_v6 = vsel %vm1374_vm1, %v7840_v21, 0.0 }
0x19f0   :  { %v7937_v38 = vadd.f32 %v7936_v50, %v7935_v6 }
0x19f1   :  { %v14033_v25 = vpop.f32.mrb[86].mxu0 }
0x19f2   :  { %v7850_v5 = vpop.f32.mrb[87].mxu0  ;;  %v7940_v26 = vsel %vm1374_vm1, %v14033_v25, 0.0 }
0x19f3   :  { %v7938_v14 = vsel %vm1374_vm1, %v7850_v5, 0.0 }
0x19f4   :  { %v7939_v34 = vadd.f32 %v7938_v14, %v7937_v38 }
0x19f5   :  { %v14036_v51 = vpop.f32.mrb[88].mxu0 }
0x19f6   :  { %v7860_v17 = vpop.f32.mrb[89].mxu0  ;;  %v7941_v43 = vadd.f32 %v7940_v26, %v7939_v34  ;;  %v7944_v15 = vsel %vm1374_vm1, %v14036_v51, 0.0 }
0x19f7   :  { %v7942_v29 = vsel %vm1374_vm1, %v7860_v17, 0.0 }
0x19f8   :  { %v7943_v23 = vadd.f32 %v7942_v29, %v7941_v43 }
0x19f9   :  { %v14039_v40 = vpop.f32.mrb[90].mxu0 }
0x19fa   :  { %v7870_v12 = vpop.f32.mrb[91].mxu0  ;;  %v7945_v18 = vadd.f32 %v7944_v15, %v7943_v23  ;;  %v7948_v42 = vsel %vm1374_vm1, %v14039_v40, 0.0 }
0x19fb   :  { %v7946_v44 = vsel %vm1374_vm1, %v7870_v12, 0.0 }
0x19fc   :  { %v7947_v16 = vadd.f32 %v7946_v44, %v7945_v18 }
0x19fd   :  { %v14042_v61 = vpop.f32.mrb[92].mxu0 }
0x19fe   :  { %v7880_v45 = vpop.f32.mrb[93].mxu0  ;;  %v7949_v46 = vadd.f32 %v7948_v42, %v7947_v16  ;;  %v7952_v47 = vsel %vm1374_vm1, %v14042_v61, 0.0 }
0x19ff   :  { %v7950_v48 = vsel %vm1374_vm1, %v7880_v45, 0.0 }
0x1a00   :  { %v7951_v49 = vadd.f32 %v7950_v48, %v7949_v46 }
0x1a01   :  { %v14045_v52 = vpop.f32.mrb[94].mxu0 }
0x1a02   :  { %v7890_v55 = vpop.f32.mrb[95].mxu0  ;;  %v7953_v57 = vadd.f32 %v7952_v47, %v7951_v49  ;;  %v7956_v62 = vsel %vm1374_vm1, %v14045_v52, 0.0 }
0x1a03   :  { %v7954_v60 = vsel %vm1374_vm1, %v7890_v55, 0.0 }
0x1a04   :  { %v7955_v10 = vadd.f32 %v7954_v60, %v7953_v57 }
0x1a05   :  { %v14048_v2 = vpop.f32.mrb[96].mxu0 }
0x1a06   :  { %v7900_v0 = vpop.f32.mrb[97].mxu0  ;;  %v7957_v36 = vadd.f32 %v7956_v62, %v7955_v10  ;;  %v7960_v7 = vsel %vm1374_vm1, %v14048_v2, 0.0 }
0x1a07   :  { %v7958_v37 = vsel %vm1374_vm1, %v7900_v0, 0.0 }
0x1a08   :  { %v7959_v4 = vadd.f32 %v7958_v37, %v7957_v36 }
0x1a09   :  { %v14051_v9 = vpop.f32.mrb[98].mxu0 }
0x1a0a   :  { %v7910_v11 = vpop.f32.mrb[99].mxu0  ;;  %v7961_v22 = vadd.f32 %v7960_v7, %v7959_v4  ;;  %v7964_v1 = vsel %vm1374_vm1, %v14051_v9, 0.0 }
0x1a0b   :  { %v7962_v24 = vsel %vm1374_vm1, %v7910_v11, 0.0 }
0x1a0c   :  { %v7963_v35 = vadd.f32 %v7962_v24, %v7961_v22 }
0x1a0e   :  { %v7965_v27 = vadd.f32 %v7964_v1, %v7963_v35 }
0x1a10   :  { %v7966_v28 = vrot.slane %v7965_v27, 4 }
0x1a12   :  { %v7967_v30 = vadd.f32 %v7966_v28, %v7965_v27 }
0x1a14   :  { %v7968_v63 = vrot.slane %v7967_v30, 2 }
0x1a16   :  { %v7969_v31 = vadd.f32 %v7968_v63, %v7967_v30 }
0x1a18   :  { %v7970_v54 = vrot.slane %v7969_v31, 1 }
0x1a1a   :  { %v7971_v32 = vadd.f32 %v7970_v54, %v7969_v31 }
0x1a1c   :  { %v7973_v13 = vmul.f32 0.0078125, %v7971_v32 }
0x1a1e   :  { %v17912_v41 = vsub.f32 %v7840_v21, %v7973_v13  ;;  %v17914_v33 = vsub.f32 %v14030_v20, %v7973_v13  ;;  %v17916_v39 = vsub.f32 %v7850_v5, %v7973_v13  ;;  %v17918_v19 = vsub.f32 %v14033_v25, %v7973_v13 }
0x1a1f   :  { %v17920_v3 = vsub.f32 %v7860_v17, %v7973_v13  ;;  %v17922_v50 = vsub.f32 %v14036_v51, %v7973_v13  ;;  %v17924_v6 = vsub.f32 %v7870_v12, %v7973_v13  ;;  %v17926_v38 = vsub.f32 %v14039_v40, %v7973_v13 }
0x1a20   :  { %v17928_v14 = vsub.f32 %v7880_v45, %v7973_v13  ;;  %v17930_v34 = vsub.f32 %v14042_v61, %v7973_v13  ;;  %v17932_v21 = vsub.f32 %v7890_v55, %v7973_v13  ;;  %v17934_v20 = vsub.f32 %v14045_v52, %v7973_v13 }
0x1a21   :  { %v17936_v5 = vsub.f32 %v7900_v0, %v7973_v13  ;;  %v17938_v25 = vsub.f32 %v14048_v2, %v7973_v13  ;;  %v7988_v26 = vsub.f32 %v7910_v11, %v7973_v13  ;;  %v17940_v17 = vsub.f32 %v14051_v9, %v7973_v13 }
0x1a22   :  { %v7990_v51 = vmul.f32 %v17912_v41, %v17912_v41  ;;  %v7991_v43 = vmul.f32 %v17914_v33, %v17914_v33  ;;  %v7992_v29 = vmul.f32 %v17916_v39, %v17916_v39  ;;  %v7993_v23 = vmul.f32 %v17918_v19, %v17918_v19 }
0x1a23   :  { %v7994_v18 = vmul.f32 %v17920_v3, %v17920_v3  ;;  %v7995_v42 = vmul.f32 %v17922_v50, %v17922_v50  ;;  %v7996_v46 = vmul.f32 %v17924_v6, %v17924_v6  ;;  %v7997_v47 = vmul.f32 %v17926_v38, %v17926_v38 }
0x1a24   :  { %v8006_v15 = vsel %vm1374_vm1, %v7990_v51, 0.0  ;;  %v8007_v40 = vsel %vm1374_vm1, %v7991_v43, 0.0  ;;  %v8009_v44 = vsel %vm1374_vm1, %v7992_v29, 0.0  ;;  %v8011_v61 = vsel %vm1374_vm1, %v7993_v23, 0.0 }
0x1a25   :  { %v8008_v12 = vadd.f32 %v8007_v40, %v8006_v15  ;;  %v8013_v48 = vsel %vm1374_vm1, %v7994_v18, 0.0  ;;  %v8015_v52 = vsel %vm1374_vm1, %v7995_v42, 0.0  ;;  %v7998_v57 = vmul.f32 %v17928_v14, %v17928_v14 }
0x1a26   :  { %v8017_v53 = vsel %vm1374_vm1, %v7996_v46, 0.0  ;;  %v7999_v60 = vmul.f32 %v17930_v34, %v17930_v34  ;;  %v8019_v10 = vsel %vm1374_vm1, %v7997_v47, 0.0  ;;  %v8000_v2 = vmul.f32 %v17932_v21, %v17932_v21  ;;  %v18003_v47 = vld [vmem:[%s19256_s30] ss:$0 sm:$0xff] }
0x1a27   :  { %v8010_v16 = vadd.f32 %v8009_v44, %v8008_v12  ;;  %v8021_v0 = vsel %vm1374_vm1, %v7998_v57, 0.0  ;;  %v8001_v37 = vmul.f32 %v17934_v20, %v17934_v20  ;;  %v8002_v9 = vmul.f32 %v17936_v5, %v17936_v5 }
0x1a28   :  { %v8023_v4 = vsel %vm1374_vm1, %v7999_v60, 0.0  ;;  %v8025_v11 = vsel %vm1374_vm1, %v8000_v2, 0.0  ;;  %v8003_v24 = vmul.f32 %v17938_v25, %v17938_v25  ;;  %v8004_v27 = vmul.f32 %v7988_v26, %v7988_v26 }
0x1a29   :  { %v8012_v45 = vadd.f32 %v8011_v61, %v8010_v16  ;;  %v8027_v35 = vsel %vm1374_vm1, %v8001_v37, 0.0  ;;  %v8029_v28 = vsel %vm1374_vm1, %v8002_v9, 0.0  ;;  %v8005_v63 = vmul.f32 %v17940_v17, %v17940_v17  ;;  %v17991_v61 = vld [vmem:[%s19255_s7] ss:$0 sm:$0xff] }
0x1a2a   :  { %v8031_v31 = vsel %vm1374_vm1, %v8003_v24, 0.0  ;;  %v8033_v32 = vsel %vm1374_vm1, %v8004_v27, 0.0 }
0x1a2b   :  { %v8014_v49 = vadd.f32 %v8013_v48, %v8012_v45  ;;  %v8035_v51 = vsel %vm1374_vm1, %v8005_v63, 0.0 }
0x1a2d   :  { %v8016_v55 = vadd.f32 %v8015_v52, %v8014_v49 }
0x1a2f   :  { %v8018_v56 = vadd.f32 %v8017_v53, %v8016_v55 }
0x1a31   :  { %v8020_v62 = vadd.f32 %v8019_v10, %v8018_v56 }
0x1a33   :  { %v8022_v36 = vadd.f32 %v8021_v0, %v8020_v62  ;;  %v8421_v0 = vld [vmem:[#allocation18 + $0x30] sm:$0xff] }
0x1a35   :  { %v8024_v7 = vadd.f32 %v8023_v4, %v8022_v36  ;;  %v8422_v36 = vld [vmem:[#allocation18 + $0x38] sm:$0xff] }
0x1a37   :  { %v8026_v22 = vadd.f32 %v8025_v11, %v8024_v7 }
0x1a39   :  { %v8028_v1 = vadd.f32 %v8027_v35, %v8026_v22  ;;  %v15225_v35 = vpack.c.bf16 %v8422_v36, %v8421_v0  ;;  %v8386_v0 = vld [vmem:[#allocation27 + $0x100] sm:$0xff] }
0x1a3b   :  { %v8030_v30 = vadd.f32 %v8029_v28, %v8028_v1 }
0x1a3d   :  { %v8032_v54 = vadd.f32 %v8031_v31, %v8030_v30 }
0x1a3f   :  { %v8034_v13 = vadd.f32 %v8033_v32, %v8032_v54 }
0x1a41   :  { %v8036_v43 = vadd.f32 %v8035_v51, %v8034_v13 }
0x1a43   :  { %v8037_v29 = vrot.slane %v8036_v43, 4 }
0x1a45   :  { %v8038_v23 = vadd.f32 %v8037_v29, %v8036_v43 }
0x1a47   :  { %v8039_v15 = vrot.slane %v8038_v23, 2 }
0x1a49   :  { %v8040_v40 = vadd.f32 %v8039_v15, %v8038_v23 }
0x1a4b   :  { %v8041_v12 = vrot.slane %v8040_v40, 1 }
0x1a4d   :  { %v8042_v18 = vadd.f32 %v8041_v12, %v8040_v40 }
0x1a4f   :  { %v8043_v44 = vmul.f32 0.0078125, %v8042_v18 }
0x1a51   :  { %v8044_v16 = vadd.f32 1e-05, %v8043_v44 }
0x1a53   :  { %15835 = vrsqrt.f32 %v8044_v16 }
0x1a5d   :  { %v17988_v42 = vpop.eup %15835 }
0x1a5e   :  { %v17994_v45 = vmul.f32 %v17988_v42, %v7988_v26  ;;  %v8046_v46 = vmul.f32 %v17988_v42, %v17912_v41  ;;  %v8047_v48 = vmul.f32 %v17988_v42, %v17914_v33  ;;  %v8048_v49 = vmul.f32 %v17988_v42, %v17916_v39 }
0x1a5f   :  { %v8049_v52 = vmul.f32 %v17988_v42, %v17918_v19  ;;  %v8050_v55 = vmul.f32 %v17988_v42, %v17920_v3  ;;  %v8051_v26 = vmul.f32 %v17988_v42, %v17922_v50  ;;  %v8052_v41 = vmul.f32 %v17988_v42, %v17924_v6 }
0x1a60   :  { %v8069_v57 = vmul.f32 %v17991_v61, %v8046_v46  ;;  %v8070_v33 = vmul.f32 %v17991_v61, %v8047_v48  ;;  %v8071_v39 = vmul.f32 %v17991_v61, %v8048_v49  ;;  %v8053_v30 = vmul.f32 %v17988_v42, %v17926_v38 }
0x1a61   :  { %v8072_v53 = vmul.f32 %v17991_v61, %v8049_v52  ;;  %v8073_v56 = vmul.f32 %v17991_v61, %v8050_v55  ;;  %v8074_v19 = vmul.f32 %v17991_v61, %v8051_v26  ;;  %v8075_v6 = vmul.f32 %v17991_v61, %v8052_v41 }
0x1a62   :  { %v8092_v3 = vadd.f32 %v18003_v47, %v8069_v57  ;;  %v8093_v60 = vadd.f32 %v18003_v47, %v8070_v33  ;;  %v8094_v50 = vadd.f32 %v18003_v47, %v8071_v39  ;;  %v8054_v31 = vmul.f32 %v17988_v42, %v17928_v14 }
0x1a63   :  { %v8095_v10 = vadd.f32 %v18003_v47, %v8072_v53  ;;  %v8096_v62 = vadd.f32 %v18003_v47, %v8073_v56  ;;  %v8097_v2 = vadd.f32 %v18003_v47, %v8074_v19  ;;  %v8098_v24 = vadd.f32 %v18003_v47, %v8075_v6 }
0x1a64   :  { %vm8108_vm4 = vcmp.ge.f32.partialorder %v8092_v3, 0.0  ;;  %v8124_v37 = vmul.f32 0.01, %v8092_v3  ;;  %vm8109_vm5 = vcmp.ge.f32.partialorder %v8093_v60, 0.0  ;;  %v8125_v4 = vmul.f32 0.01, %v8093_v60 }
0x1a65   :  { %vm8110_vm6 = vcmp.ge.f32.partialorder %v8094_v50, 0.0  ;;  %v8126_v7 = vmul.f32 0.01, %v8094_v50  ;;  %vm8111_vm7 = vcmp.ge.f32.partialorder %v8095_v10, 0.0  ;;  %v8127_v9 = vmul.f32 0.01, %v8095_v10 }
0x1a66   :  { %v18026_v11 = vsel %vm8108_vm4, %v8092_v3, %v8124_v37  ;;  %v18028_v22 = vsel %vm8109_vm5, %v8093_v60, %v8125_v4  ;;  %vm8112_vm9 = vcmp.ge.f32.partialorder %v8096_v62, 0.0  ;;  %v8128_v28 = vmul.f32 0.01, %v8096_v62 }
0x1a67   :  { %14060 = vmatprep.mubr.msk.f32.mxu1 %vm1374_vm1, %v18026_v11  ;;  %14284 = vmatprep.mubr.msk.f32.mxu0 %vm1374_vm1, %v18026_v11  ;;  %v18039_v1 = vsel %vm8110_vm6, %v8094_v50, %v8126_v7  ;;  %v18041_v27 = vsel %vm8111_vm7, %v8095_v10, %v8127_v9  ;;  %vm8113_vm10 = vcmp.ge.f32.partialorder %v8097_v2, 0.0  ;;  %v8129_v63 = vmul.f32 0.01, %v8097_v2 }
0x1a68   :  { %14061 = vmatmul.mubr.msk.f32.vlgmr.msra.gmra.mrb[76].mxu1 %vm1374_vm1, %v18028_v22  ;;  %14285 = vmatmul.mubr.msk.f32.vlgmr.msra.gmra.mrb[100].mxu0 %vm1374_vm1, %v18028_v22  ;;  %v8055_v54 = vmul.f32 %v17988_v42, %v17930_v34  ;;  %v8130_v32 = vmul.f32 0.01, %v8098_v24  ;;  %v8076_v13 = vmul.f32 %v17991_v61, %v8053_v30  ;;  %v8056_v38 = vmul.f32 %v17988_v42, %v17932_v21 }
0x1a69   :  { %14063 = vmatprep.mubr.msk.f32.mxu1 %vm1374_vm1, %v18039_v1  ;;  %14287 = vmatprep.mubr.msk.f32.mxu0 %vm1374_vm1, %v18039_v1  ;;  %v8057_v51 = vmul.f32 %v17988_v42, %v17934_v20  ;;  %v8077_v43 = vmul.f32 %v17991_v61, %v8054_v31  ;;  %v8058_v14 = vmul.f32 %v17988_v42, %v17936_v5  ;;  %vm8114_vm11 = vcmp.ge.f32.partialorder %v8098_v24, 0.0 }
0x1a6a   :  { %15224 = vmatpush3.bf16.msra.mxu1 %v17904_v58  ;;  %v8078_v29 = vmul.f32 %v17991_v61, %v8055_v54  ;;  %v8059_v34 = vmul.f32 %v17988_v42, %v17938_v25  ;;  %v18070_v21 = vsel %vm8112_vm9, %v8096_v62, %v8128_v28  ;;  %v8099_v58 = vadd.f32 %v18003_v47, %v8076_v13 }
0x1a6b   :  { %15226 = vmatprep.subr.bf16.mxu1 %v15225_v35  ;;  %v8079_v20 = vmul.f32 %v17991_v61, %v8056_v38  ;;  %v8100_v5 = vadd.f32 %v18003_v47, %v8077_v43  ;;  %v18080_v25 = vsel %vm8113_vm10, %v8097_v2, %v8129_v63  ;;  %v18082_v23 = vsel %vm8114_vm11, %v8098_v24, %v8130_v32 }
0x1a6c   :  { %14064 = vmatmul.mubr.msk.f32.gmra.mrb[78].mxu1 %vm1374_vm1, %v18041_v27  ;;  %14288 = vmatmul.mubr.msk.f32.gmra.mrb[102].mxu0 %vm1374_vm1, %v18041_v27  ;;  %v8131_v15 = vmul.f32 0.01, %v8099_v58  ;;  %v8101_v40 = vadd.f32 %v18003_v47, %v8078_v29  ;;  %v8080_v12 = vmul.f32 %v17991_v61, %v8057_v51  ;;  %vm8115_vm12 = vcmp.ge.f32.partialorder %v8099_v58, 0.0 }
0x1a6d   :  { %14066 = vmatprep.mubr.msk.f32.mxu1 %vm1374_vm1, %v18070_v21  ;;  %14290 = vmatprep.mubr.msk.f32.mxu0 %vm1374_vm1, %v18070_v21  ;;  %v8132_v18 = vmul.f32 0.01, %v8100_v5  ;;  %v8102_v44 = vadd.f32 %v18003_v47, %v8079_v20  ;;  %v8081_v16 = vmul.f32 %v17991_v61, %v8058_v14  ;;  %vm8116_vm13 = vcmp.ge.f32.partialorder %v8100_v5, 0.0 }
0x1a6e   :  { %15228 = vmatpush3.bf16.msra.mxu1 %v15225_v35  ;;  %v8083_v46 = vmul.f32 %v17991_v61, %v17994_v45  ;;  %v8061_v48 = vmul.f32 %v17988_v42, %v17940_v17  ;;  %v8147_v49 = vsel %vm8115_vm12, %v8099_v58, %v8131_v15  ;;  %v8133_v52 = vmul.f32 0.01, %v8101_v40 }
0x1a6f   :  { %v8103_v55 = vadd.f32 %v18003_v47, %v8080_v12  ;;  %v8082_v26 = vmul.f32 %v17991_v61, %v8059_v34  ;;  %v8148_v41 = vsel %vm8116_vm13, %v8100_v5, %v8132_v18  ;;  %vm8117_vm14 = vcmp.ge.f32.partialorder %v8101_v40, 0.0 }
0x1a70   :  { %14067 = vmatmul.mubr.msk.f32.gmra.mrb[80].mxu1 %vm1374_vm1, %v18080_v25  ;;  %14291 = vmatmul.mubr.msk.f32.gmra.mrb[104].mxu0 %vm1374_vm1, %v18080_v25  ;;  %v8134_v57 = vmul.f32 0.01, %v8102_v44  ;;  %v8104_v33 = vadd.f32 %v18003_v47, %v8081_v16  ;;  %vm8118_vm15 = vcmp.ge.f32.partialorder %v8102_v44, 0.0  ;;  %v8149_v17 = vsel %vm8117_vm14, %v8101_v40, %v8133_v52 }
0x1a71   :  { %14069 = vmatprep.mubr.msk.f32.mxu1 %vm1374_vm1, %v18082_v23  ;;  %14293 = vmatprep.mubr.msk.f32.mxu0 %vm1374_vm1, %v18082_v23  ;;  %v8135_v42 = vmul.f32 0.01, %v8103_v55  ;;  %v8105_v45 = vadd.f32 %v18003_v47, %v8082_v26  ;;  %v8084_v39 = vmul.f32 %v17991_v61, %v8061_v48  ;;  %v8106_v53 = vadd.f32 %v18003_v47, %v8083_v46 }
0x1a72   :  { %v8150_v56 = vsel %vm8118_vm15, %v8102_v44, %v8134_v57  ;;  %vm8119_vm0 = vcmp.ge.f32.partialorder %v8103_v55, 0.0  ;;  %v8136_v19 = vmul.f32 0.01, %v8104_v33  ;;  %vm8120_vm3 = vcmp.ge.f32.partialorder %v8104_v33, 0.0 }
0x1a73   :  { %v8151_v3 = vsel %vm8119_vm0, %v8103_v55, %v8135_v42  ;;  %v8137_v60 = vmul.f32 0.01, %v8105_v45  ;;  %v8107_v50 = vadd.f32 %v18003_v47, %v8084_v39  ;;  %vm8121_vm2 = vcmp.ge.f32.partialorder %v8105_v45, 0.0 }
0x1a74   :  { %14070 = vmatmul.mubr.msk.f32.gmra.mrb[82].mxu1 %vm1374_vm1, %v8147_v49  ;;  %14294 = vmatmul.mubr.msk.f32.gmra.mrb[106].mxu0 %vm1374_vm1, %v8147_v49  ;;  %v8152_v61 = vsel %vm8120_vm3, %v8104_v33, %v8136_v19  ;;  %v8138_v6 = vmul.f32 0.01, %v8106_v53  ;;  %vm8122_vm4 = vcmp.ge.f32.partialorder %v8106_v53, 0.0 }
0x1a75   :  { %14072 = vmatprep.mubr.msk.f32.mxu1 %vm1374_vm1, %v8148_v41  ;;  %14296 = vmatprep.mubr.msk.f32.mxu0 %vm1374_vm1, %v8148_v41  ;;  %v8153_v10 = vsel %vm8121_vm2, %v8105_v45, %v8137_v60  ;;  %v8139_v62 = vmul.f32 0.01, %v8107_v50  ;;  %vm8123_vm5 = vcmp.ge.f32.partialorder %v8107_v50, 0.0 }
0x1a76   :  { %v8154_v2 = vsel %vm8122_vm4, %v8106_v53, %v8138_v6 }
0x1a77   :  { %v8155_v47 = vsel %vm8123_vm5, %v8107_v50, %v8139_v62 }
0x1a78   :  { %14073 = vmatmul.mubr.msk.f32.gmra.mrb[84].mxu1 %vm1374_vm1, %v8149_v17  ;;  %14297 = vmatmul.mubr.msk.f32.gmra.mrb[108].mxu0 %vm1374_vm1, %v8149_v17 }
0x1a79   :  { %14075 = vmatprep.mubr.msk.f32.mxu1 %vm1374_vm1, %v8150_v56  ;;  %14299 = vmatprep.mubr.msk.f32.mxu0 %vm1374_vm1, %v8150_v56 }
0x1a7c   :  { %14076 = vmatmul.mubr.msk.f32.gmra.mrb[86].mxu1 %vm1374_vm1, %v8151_v3  ;;  %14300 = vmatmul.mubr.msk.f32.gmra.mrb[110].mxu0 %vm1374_vm1, %v8151_v3 }
0x1a7d   :  { %14078 = vmatprep.mubr.msk.f32.mxu1 %vm1374_vm1, %v8152_v61  ;;  %14302 = vmatprep.mubr.msk.f32.mxu0 %vm1374_vm1, %v8152_v61 }
0x1a80   :  { %14079 = vmatmul.mubr.msk.f32.gmra.mrb[88].mxu1 %vm1374_vm1, %v8153_v10  ;;  %14303 = vmatmul.mubr.msk.f32.gmra.mrb[112].mxu0 %vm1374_vm1, %v8153_v10 }
0x1a81   :  { %14081 = vmatprep.mubr.msk.f32.mxu1 %vm1374_vm1, %v8154_v2  ;;  %14305 = vmatprep.mubr.msk.f32.mxu0 %vm1374_vm1, %v8154_v2 }
0x1a84   :  { %14082 = vmatmul.mubr.msk.f32.gmra.mrb[90].mxu1 %vm1374_vm1, %v8155_v47  ;;  %14306 = vmatmul.mubr.msk.f32.gmra.mrb[114].mxu0 %vm1374_vm1, %v8155_v47 }
0x1a85   :  { %14092 = vmatprep.mubr.msk.f32.mxu1 %vm1374_vm1, %v18026_v11 }
0x1a88   :  { %14093 = vmatmul.mubr.msk.f32.vlgmr.msra.gmra.mrb[92].mxu1 %vm1374_vm1, %v18028_v22 }
0x1a89   :  { %14095 = vmatprep.mubr.msk.f32.mxu1 %vm1374_vm1, %v18039_v1 }
0x1a8c   :  { %14096 = vmatmul.mubr.msk.f32.gmra.mrb[94].mxu1 %vm1374_vm1, %v18041_v27 }
0x1a8d   :  { %14098 = vmatprep.mubr.msk.f32.mxu1 %vm1374_vm1, %v18070_v21 }
0x1a90   :  { %14099 = vmatmul.mubr.msk.f32.gmra.mrb[96].mxu1 %vm1374_vm1, %v18080_v25 }
0x1a91   :  { %14101 = vmatprep.mubr.msk.f32.mxu1 %vm1374_vm1, %v18082_v23 }
0x1a94   :  { %14102 = vmatmul.mubr.msk.f32.gmra.mrb[98].mxu1 %vm1374_vm1, %v8147_v49 }
0x1a95   :  { %14104 = vmatprep.mubr.msk.f32.mxu1 %vm1374_vm1, %v8148_v41 }
0x1a98   :  { %14105 = vmatmul.mubr.msk.f32.gmra.mrb[100].mxu1 %vm1374_vm1, %v8149_v17 }
0x1a99   :  { %14107 = vmatprep.mubr.msk.f32.mxu1 %vm1374_vm1, %v8150_v56 }
0x1a9c   :  { %14108 = vmatmul.mubr.msk.f32.gmra.mrb[102].mxu1 %vm1374_vm1, %v8151_v3 }
0x1a9d   :  { %14110 = vmatprep.mubr.msk.f32.mxu1 %vm1374_vm1, %v8152_v61 }
0x1aa0   :  { %14111 = vmatmul.mubr.msk.f32.gmra.mrb[104].mxu1 %vm1374_vm1, %v8153_v10 }
0x1aa1   :  { %14113 = vmatprep.mubr.msk.f32.mxu1 %vm1374_vm1, %v8154_v2 }
0x1aa4   :  { %14114 = vmatmul.mubr.msk.f32.gmra.mrb[106].mxu1 %vm1374_vm1, %v8155_v47 }
0x1aa5   :  { %14148 = vmatprep.mubr.f32.mxu1 %v8386_v0 }
0x1b3b   :  { %v14062_v36 = vpop.f32.mrb[76].mxu1  ;;  %v14286_v37 = vpop.f32.mrb[100].mxu0 }
0x1b3c   :  { %v8306_v4 = vpop.f32.mrb[77].mxu1  ;;  %v9122_v7 = vpop.f32.mrb[101].mxu0 }
0x1b3d   :  { %v18148_v9 = vpack.c.bf16 %v14062_v36, %v8306_v4  ;;  %v18150_v11 = vpack.c.bf16 %v14286_v37, %v9122_v7 }
0x1b3f   :  { %v14065_v22 = vpop.f32.mrb[78].mxu1  ;;  %v14289_v24 = vpop.f32.mrb[102].mxu0 }
0x1b40   :  { %v8316_v35 = vpop.f32.mrb[79].mxu1  ;;  %v9132_v1 = vpop.f32.mrb[103].mxu0 }
0x1b41   :  { %v18152_v27 = vpack.c.bf16 %v14065_v22, %v8316_v35  ;;  %v18154_v28 = vpack.c.bf16 %v14289_v24, %v9132_v1 }
0x1b43   :  { %v14068_v30 = vpop.f32.mrb[80].mxu1  ;;  %v14292_v63 = vpop.f32.mrb[104].mxu0 }
0x1b44   :  { %v8326_v31 = vpop.f32.mrb[81].mxu1  ;;  %v9142_v54 = vpop.f32.mrb[105].mxu0 }
0x1b45   :  { %v18156_v32 = vpack.c.bf16 %v14068_v30, %v8326_v31  ;;  %v18158_v13 = vpack.c.bf16 %v14292_v63, %v9142_v54  ;;  %v8387_v31 = vld [vmem:[#allocation27 + $0x108] sm:$0xff]  ;;  %v8388_v54 = vld [vmem:[#allocation27 + $0x110] sm:$0xff] }
0x1b47   :  { %v14071_v38 = vpop.f32.mrb[82].mxu1  ;;  %v14295_v51 = vpop.f32.mrb[106].mxu0 }
0x1b48   :  { %v8336_v43 = vpop.f32.mrb[83].mxu1  ;;  %v9152_v29 = vpop.f32.mrb[107].mxu0 }
0x1b49   :  { %v18160_v14 = vpack.c.bf16 %v14071_v38, %v8336_v43  ;;  %v18162_v34 = vpack.c.bf16 %v14295_v51, %v9152_v29  ;;  %v8389_v38 = vld [vmem:[#allocation27 + $0x118] sm:$0xff]  ;;  %v8390_v51 = vld [vmem:[#allocation27 + $0x120] sm:$0xff]  ;;  %v8391_v43 = vld [vmem:[#allocation27 + $0x128] sm:$0xff] }
0x1b4a   :  { %v8392_v29 = vld [vmem:[#allocation27 + $0x130] sm:$0xff] }
0x1b4b   :  { %v14074_v21 = vpop.f32.mrb[84].mxu1  ;;  %v14298_v58 = vpop.f32.mrb[108].mxu0 }
0x1b4c   :  { %v8346_v20 = vpop.f32.mrb[85].mxu1  ;;  %v9162_v5 = vpop.f32.mrb[109].mxu0 }
0x1b4d   :  { %v18164_v25 = vpack.c.bf16 %v14074_v21, %v8346_v20  ;;  %v18166_v23 = vpack.c.bf16 %v14298_v58, %v9162_v5  ;;  %v8393_v21 = vld [vmem:[#allocation27 + $0x138] sm:$0xff]  ;;  %v8395_v58 = vld [vmem:[#allocation27 + $0x148] sm:$0xff] }
0x1b4e   :  { %v8397_v20 = vld [vmem:[#allocation27 + $0x158] sm:$0xff]  ;;  %v8399_v5 = vld [vmem:[#allocation27 + $0x168] sm:$0xff] }
0x1b4f   :  { %v14077_v15 = vpop.f32.mrb[86].mxu1  ;;  %v14301_v40 = vpop.f32.mrb[110].mxu0 }
0x1b50   :  { %v8356_v12 = vpop.f32.mrb[87].mxu1  ;;  %v9172_v18 = vpop.f32.mrb[111].mxu0 }
0x1b51   :  { %v18168_v44 = vpack.c.bf16 %v14077_v15, %v8356_v12  ;;  %v18170_v16 = vpack.c.bf16 %v14301_v40, %v9172_v18  ;;  %v8401_v15 = vld [vmem:[#allocation27 + $0x178] sm:$0xff]  ;;  %v8403_v40 = vld [vmem:[#allocation27 + $0x188] sm:$0xff]  ;;  %v8404_v12 = vld [vmem:[#allocation27 + $0x190] sm:$0xff] }
0x1b52   :  { %v8405_v18 = vld [vmem:[#allocation27 + $0x198] sm:$0xff] }
0x1b53   :  { %v14080_v46 = vpop.f32.mrb[88].mxu1  ;;  %v14304_v48 = vpop.f32.mrb[112].mxu0 }
0x1b54   :  { %v8366_v49 = vpop.f32.mrb[89].mxu1  ;;  %v9182_v52 = vpop.f32.mrb[113].mxu0 }
0x1b55   :  { %v18172_v55 = vpack.c.bf16 %v14080_v46, %v8366_v49  ;;  %v18174_v26 = vpack.c.bf16 %v14304_v48, %v9182_v52  ;;  %v8407_v46 = vld [vmem:[#allocation27 + $0x1a8] sm:$0xff]  ;;  %v8408_v48 = vld [vmem:[#allocation27 + $0x1b0] sm:$0xff]  ;;  %v8409_v49 = vld [vmem:[#allocation27 + $0x1b8] sm:$0xff] }
0x1b56   :  { %v8410_v52 = vld [vmem:[#allocation27 + $0x1c0] sm:$0xff] }
0x1b57   :  { %v14083_v41 = vpop.f32.mrb[90].mxu1  ;;  %v14307_v57 = vpop.f32.mrb[114].mxu0 }
0x1b58   :  { %v8376_v33 = vpop.f32.mrb[91].mxu1  ;;  %v9192_v17 = vpop.f32.mrb[115].mxu0 }
0x1b59   :  { %v18176_v42 = vpack.c.bf16 %v14083_v41, %v8376_v33  ;;  %v18178_v45 = vpack.c.bf16 %v14307_v57, %v9192_v17  ;;  %v8412_v41 = vld [vmem:[#allocation27 + $0x1d0] sm:$0xff]  ;;  %v8413_v57 = vld [vmem:[#allocation27 + $0x1d8] sm:$0xff]  ;;  %v8414_v33 = vld [vmem:[#allocation27 + $0x1e0] sm:$0xff] }
0x1b5a   :  { %v8415_v17 = vld [vmem:[#allocation27 + $0x1e8] sm:$0xff] }
0x1b5b   :  { %v14094_v39 = vpop.f32.mrb[92].mxu1 }
0x1b5c   :  { %v8489_v53 = vpop.f32.mrb[93].mxu1 }
0x1b5d   :  { %v15229_v56 = vpack.c.bf16 %v14094_v39, %v8489_v53  ;;  %v8417_v39 = vld [vmem:[#allocation27 + $0x1f8] sm:$0xff]  ;;  %v8156_v53 = vld [vmem:[#allocation27] sm:$0xff] }
0x1b5f   :  { %v14097_v19 = vpop.f32.mrb[94].mxu1  ;;  %15230 = vmatprep.subr.bf16.mxu1 %v15229_v56 }
0x1b60   :  { %v8499_v3 = vpop.f32.mrb[95].mxu1  ;;  %15232 = vmatpush3.bf16.msra.mxu1 %v15229_v56  ;;  %v8157_v56 = vld [vmem:[#allocation27 + $0x8] sm:$0xff] }
0x1b61   :  { %v15233_v60 = vpack.c.bf16 %v14097_v19, %v8499_v3  ;;  %v8158_v19 = vld [vmem:[#allocation27 + $0x10] sm:$0xff]  ;;  %v8159_v3 = vld [vmem:[#allocation27 + $0x18] sm:$0xff] }
0x1b63   :  { %v14100_v50 = vpop.f32.mrb[96].mxu1  ;;  %15234 = vmatprep.subr.bf16.mxu1 %v15233_v60 }
0x1b64   :  { %v8509_v61 = vpop.f32.mrb[97].mxu1  ;;  %15236 = vmatpush3.bf16.msra.mxu1 %v15233_v60  ;;  %v8160_v60 = vld [vmem:[#allocation27 + $0x20] sm:$0xff] }
0x1b65   :  { %v15237_v6 = vpack.c.bf16 %v14100_v50, %v8509_v61  ;;  %v8161_v50 = vld [vmem:[#allocation27 + $0x28] sm:$0xff]  ;;  %v8162_v61 = vld [vmem:[#allocation27 + $0x30] sm:$0xff] }
0x1b67   :  { %v14103_v10 = vpop.f32.mrb[98].mxu1  ;;  %15238 = vmatprep.subr.bf16.mxu1 %v15237_v6 }
0x1b68   :  { %v8519_v62 = vpop.f32.mrb[99].mxu1  ;;  %15240 = vmatpush3.bf16.msra.mxu1 %v15237_v6  ;;  %v8163_v6 = vld [vmem:[#allocation27 + $0x38] sm:$0xff] }
0x1b69   :  { %v15241_v2 = vpack.c.bf16 %v14103_v10, %v8519_v62  ;;  %v8165_v10 = vld [vmem:[#allocation27 + $0x48] sm:$0xff]  ;;  %v8167_v62 = vld [vmem:[#allocation27 + $0x58] sm:$0xff] }
0x1b6b   :  { %v14106_v47 = vpop.f32.mrb[100].mxu1  ;;  %15242 = vmatprep.subr.bf16.mxu1 %v15241_v2 }
0x1b6c   :  { %v8529_v0 = vpop.f32.mrb[101].mxu1  ;;  %15244 = vmatpush3.bf16.msra.mxu1 %v15241_v2  ;;  %v8169_v2 = vld [vmem:[#allocation27 + $0x68] sm:$0xff] }
0x1b6d   :  { %v15245_v36 = vpack.c.bf16 %v14106_v47, %v8529_v0  ;;  %v8171_v47 = vld [vmem:[#allocation27 + $0x78] sm:$0xff]  ;;  %v8173_v0 = vld [vmem:[#allocation27 + $0x88] sm:$0xff] }
0x1b6f   :  { %v14109_v37 = vpop.f32.mrb[102].mxu1  ;;  %15246 = vmatprep.subr.bf16.mxu1 %v15245_v36 }
0x1b70   :  { %v8539_v4 = vpop.f32.mrb[103].mxu1  ;;  %15248 = vmatpush3.bf16.msra.mxu1 %v15245_v36  ;;  %v8174_v36 = vld [vmem:[#allocation27 + $0x90] sm:$0xff] }
0x1b71   :  { %v15249_v7 = vpack.c.bf16 %v14109_v37, %v8539_v4  ;;  %v8176_v37 = vld [vmem:[#allocation27 + $0xa0] sm:$0xff]  ;;  %v8178_v4 = vld [vmem:[#allocation27 + $0xb0] sm:$0xff] }
0x1b73   :  { %v14112_v22 = vpop.f32.mrb[104].mxu1  ;;  %15250 = vmatprep.subr.bf16.mxu1 %v15249_v7 }
0x1b74   :  { %v8549_v24 = vpop.f32.mrb[105].mxu1  ;;  %15252 = vmatpush3.bf16.msra.mxu1 %v15249_v7  ;;  %v8179_v7 = vld [vmem:[#allocation27 + $0xb8] sm:$0xff] }
0x1b75   :  { %v15253_v35 = vpack.c.bf16 %v14112_v22, %v8549_v24  ;;  %v8180_v22 = vld [vmem:[#allocation27 + $0xc0] sm:$0xff]  ;;  %v8182_v24 = vld [vmem:[#allocation27 + $0xd0] sm:$0xff] }
0x1b77   :  { %v14115_v1 = vpop.f32.mrb[106].mxu1  ;;  %15254 = vmatprep.subr.bf16.mxu1 %v15253_v35 }
0x1b78   :  { %v8559_v30 = vpop.f32.mrb[107].mxu1  ;;  %15256 = vmatpush3.bf16.msra.mxu1 %v15253_v35  ;;  %v8183_v35 = vld [vmem:[#allocation27 + $0xd8] sm:$0xff] }
0x1b79   :  { %v15257_v63 = vpack.c.bf16 %v14115_v1, %v8559_v30  ;;  %v8184_v1 = vld [vmem:[#allocation27 + $0xe0] sm:$0xff]  ;;  %v8185_v30 = vld [vmem:[#allocation27 + $0xe8] sm:$0xff] }
0x1b7b   :  { %15258 = vmatprep.subr.bf16.mxu1 %v15257_v63 }
0x1b7c   :  { %15260 = vmatpush3.bf16.msra.mxu1 %v15257_v63  ;;  %v8186_v63 = vld [vmem:[#allocation27 + $0xf0] sm:$0xff] }
0x1b7d   :  { %15262 = vmatprep.subr.bf16.mxu1 %v18148_v9 }
0x1b7f   :  { %14149 = vmatmul.mubr.f32.vlgmr.msra.gmra.mrb[108].mxu1 %v8387_v31  ;;  %v8187_v31 = vld [vmem:[#allocation27 + $0xf8] sm:$0xff] }
0x1b80   :  { %15264 = vmatpush3.bf16.msra.mxu1 %v18148_v9  ;;  %14151 = vmatprep.mubr.f32.mxu1 %v8388_v54  ;;  %v8394_v9 = vld [vmem:[#allocation27 + $0x140] sm:$0xff] }
0x1b81   :  { %15266 = vmatprep.subr.bf16.mxu1 %v18152_v27  ;;  %v9019_v54 = vld [vmem:[#allocation27 + $0x200] sm:$0xff] }
0x1b83   :  { %14152 = vmatmul.mubr.f32.gmra.mrb[110].mxu1 %v8389_v38  ;;  %v9020_v38 = vld [vmem:[#allocation27 + $0x208] sm:$0xff] }
0x1b84   :  { %15268 = vmatpush3.bf16.msra.mxu1 %v18152_v27  ;;  %14154 = vmatprep.mubr.f32.mxu1 %v8390_v51  ;;  %v8396_v27 = vld [vmem:[#allocation27 + $0x150] sm:$0xff] }
0x1b85   :  { %15270 = vmatprep.subr.bf16.mxu1 %v18156_v32  ;;  %v9021_v51 = vld [vmem:[#allocation27 + $0x210] sm:$0xff] }
0x1b87   :  { %14155 = vmatmul.mubr.f32.gmra.mrb[112].mxu1 %v8391_v43  ;;  %v9022_v43 = vld [vmem:[#allocation27 + $0x218] sm:$0xff] }
0x1b88   :  { %15272 = vmatpush3.bf16.msra.mxu1 %v18156_v32  ;;  %14157 = vmatprep.mubr.f32.mxu1 %v8392_v29  ;;  %v8398_v32 = vld [vmem:[#allocation27 + $0x160] sm:$0xff] }
0x1b89   :  { %15274 = vmatprep.subr.bf16.mxu1 %v18160_v14  ;;  %v9023_v29 = vld [vmem:[#allocation27 + $0x220] sm:$0xff] }
0x1b8b   :  { %14158 = vmatmul.mubr.f32.gmra.mrb[114].mxu1 %v8393_v21  ;;  %v9024_v21 = vld [vmem:[#allocation27 + $0x228] sm:$0xff] }
0x1b8c   :  { %15276 = vmatpush3.bf16.msra.mxu1 %v18160_v14  ;;  %14160 = vmatprep.mubr.f32.mxu1 %v8394_v9  ;;  %v8400_v14 = vld [vmem:[#allocation27 + $0x170] sm:$0xff] }
0x1b8d   :  { %15278 = vmatprep.subr.bf16.mxu1 %v18164_v25  ;;  %v9025_v9 = vld [vmem:[#allocation27 + $0x230] sm:$0xff] }
0x1b8f   :  { %14161 = vmatmul.mubr.f32.gmra.mrb[116].mxu1 %v8395_v58  ;;  %v9026_v58 = vld [vmem:[#allocation27 + $0x238] sm:$0xff] }
0x1b90   :  { %15280 = vmatpush3.bf16.msra.mxu1 %v18164_v25  ;;  %14163 = vmatprep.mubr.f32.mxu1 %v8396_v27  ;;  %v8402_v25 = vld [vmem:[#allocation27 + $0x180] sm:$0xff] }
0x1b91   :  { %15282 = vmatprep.subr.bf16.mxu1 %v18168_v44  ;;  %v9027_v27 = vld [vmem:[#allocation27 + $0x240] sm:$0xff] }
0x1b93   :  { %14164 = vmatmul.mubr.f32.gmra.mrb[118].mxu1 %v8397_v20  ;;  %v9028_v20 = vld [vmem:[#allocation27 + $0x248] sm:$0xff] }
0x1b94   :  { %15284 = vmatpush3.bf16.msra.mxu1 %v18168_v44  ;;  %14166 = vmatprep.mubr.f32.mxu1 %v8398_v32  ;;  %v8406_v44 = vld [vmem:[#allocation27 + $0x1a0] sm:$0xff]  ;;  %v9029_v32 = vld [vmem:[#allocation27 + $0x250] sm:$0xff] }
0x1b95   :  { %15286 = vmatprep.subr.bf16.mxu1 %v18172_v55 }
0x1b97   :  { %14167 = vmatmul.mubr.f32.gmra.mrb[120].mxu1 %v8399_v5  ;;  %v9030_v5 = vld [vmem:[#allocation27 + $0x258] sm:$0xff] }
0x1b98   :  { %15288 = vmatpush3.bf16.msra.mxu1 %v18172_v55  ;;  %14169 = vmatprep.mubr.f32.mxu1 %v8400_v14  ;;  %v8411_v55 = vld [vmem:[#allocation27 + $0x1c8] sm:$0xff]  ;;  %v9031_v14 = vld [vmem:[#allocation27 + $0x260] sm:$0xff] }
0x1b99   :  { %15290 = vmatprep.subr.bf16.mxu1 %v18176_v42 }
0x1b9b   :  { %14170 = vmatmul.mubr.f32.gmra.mrb[122].mxu1 %v8401_v15  ;;  %v9032_v15 = vld [vmem:[#allocation27 + $0x268] sm:$0xff] }
0x1b9c   :  { %15292 = vmatpush3.bf16.msra.mxu1 %v18176_v42  ;;  %14172 = vmatprep.mubr.f32.mxu1 %v8402_v25  ;;  %v8416_v42 = vld [vmem:[#allocation27 + $0x1f0] sm:$0xff] }
0x1b9d   :  { %15302 = vmatprep.subr.bf16.mxu1 %v18150_v11  ;;  %v9033_v25 = vld [vmem:[#allocation27 + $0x270] sm:$0xff] }
0x1b9f   :  { %14173 = vmatmul.mubr.f32.gmra.mrb[124].mxu1 %v8403_v40  ;;  %v9034_v40 = vld [vmem:[#allocation27 + $0x278] sm:$0xff] }
0x1ba0   :  { %14175 = vmatprep.mubr.f32.mxu1 %v8404_v12  ;;  %v9035_v12 = vld [vmem:[#allocation27 + $0x280] sm:$0xff] }
0x1ba3   :  { %14176 = vmatmul.mubr.f32.gmra.mrb[126].mxu1 %v8405_v18  ;;  %v9036_v18 = vld [vmem:[#allocation27 + $0x288] sm:$0xff] }
0x1ba4   :  { %14178 = vmatprep.mubr.f32.mxu1 %v8406_v44  ;;  %v9037_v44 = vld [vmem:[#allocation27 + $0x290] sm:$0xff] }
0x1ba7   :  { %14179 = vmatmul.mubr.f32.gmra.mrb[128].mxu1 %v8407_v46  ;;  %v9038_v46 = vld [vmem:[#allocation27 + $0x298] sm:$0xff] }
0x1ba8   :  { %14181 = vmatprep.mubr.f32.mxu1 %v8408_v48  ;;  %v9039_v48 = vld [vmem:[#allocation27 + $0x2a0] sm:$0xff] }
0x1bab   :  { %14182 = vmatmul.mubr.f32.gmra.mrb[130].mxu1 %v8409_v49  ;;  %v9040_v49 = vld [vmem:[#allocation27 + $0x2a8] sm:$0xff] }
0x1bac   :  { %14184 = vmatprep.mubr.f32.mxu1 %v8410_v52  ;;  %v9041_v52 = vld [vmem:[#allocation27 + $0x2b0] sm:$0xff] }
0x1baf   :  { %14185 = vmatmul.mubr.f32.gmra.mrb[132].mxu1 %v8411_v55  ;;  %v9042_v55 = vld [vmem:[#allocation27 + $0x2b8] sm:$0xff] }
0x1bb0   :  { %14187 = vmatprep.mubr.f32.mxu1 %v8412_v41  ;;  %v9043_v41 = vld [vmem:[#allocation27 + $0x2c0] sm:$0xff] }
0x1bb3   :  { %14188 = vmatmul.mubr.f32.gmra.mrb[134].mxu1 %v8413_v57  ;;  %v9044_v57 = vld [vmem:[#allocation27 + $0x2c8] sm:$0xff] }
0x1bb4   :  { %14190 = vmatprep.mubr.f32.mxu1 %v8414_v33  ;;  %v9045_v33 = vld [vmem:[#allocation27 + $0x2d0] sm:$0xff] }
0x1bb7   :  { %14191 = vmatmul.mubr.f32.gmra.mrb[136].mxu1 %v8415_v17  ;;  %v9046_v17 = vld [vmem:[#allocation27 + $0x2d8] sm:$0xff] }
0x1bb8   :  { %14193 = vmatprep.mubr.f32.mxu1 %v8416_v42  ;;  %v9047_v42 = vld [vmem:[#allocation27 + $0x2e0] sm:$0xff] }
0x1bbb   :  { %14194 = vmatmul.mubr.f32.gmra.mrb[138].mxu1 %v8417_v39  ;;  %v9048_v39 = vld [vmem:[#allocation27 + $0x2e8] sm:$0xff] }
0x1bbc   :  { %14228 = vmatprep.mubr.f32.mxu1 %v8156_v53  ;;  %v9049_v53 = vld [vmem:[#allocation27 + $0x2f0] sm:$0xff] }
0x1bbf   :  { %14229 = vmatmul.mubr.f32.vlgmr.msra.gmra.mrb[108].mxu1 %v8157_v56  ;;  %v9050_v56 = vld [vmem:[#allocation27 + $0x2f8] sm:$0xff] }
0x1bc0   :  { %15304 = vmatpush3.bf16.msra.mxu1 %v18150_v11  ;;  %14231 = vmatprep.mubr.f32.mxu1 %v8158_v19  ;;  %v8164_v11 = vld [vmem:[#allocation27 + $0x40] sm:$0xff] }
0x1bc1   :  { %15306 = vmatprep.subr.bf16.mxu1 %v18154_v28 }
0x1bc3   :  { %14232 = vmatmul.mubr.f32.gmra.mrb[110].mxu1 %v8159_v3 }
0x1bc4   :  { %15308 = vmatpush3.bf16.msra.mxu1 %v18154_v28  ;;  %14234 = vmatprep.mubr.f32.mxu1 %v8160_v60  ;;  %v8166_v28 = vld [vmem:[#allocation27 + $0x50] sm:$0xff] }
0x1bc5   :  { %15310 = vmatprep.subr.bf16.mxu1 %v18158_v13 }
0x1bc7   :  { %14235 = vmatmul.mubr.f32.gmra.mrb[112].mxu1 %v8161_v50 }
0x1bc8   :  { %15312 = vmatpush3.bf16.msra.mxu1 %v18158_v13  ;;  %14237 = vmatprep.mubr.f32.mxu1 %v8162_v61  ;;  %v8168_v13 = vld [vmem:[#allocation27 + $0x60] sm:$0xff] }
0x1bc9   :  { %15314 = vmatprep.subr.bf16.mxu1 %v18162_v34 }
0x1bcb   :  { %14238 = vmatmul.mubr.f32.gmra.mrb[114].mxu1 %v8163_v6 }
0x1bcc   :  { %15316 = vmatpush3.bf16.msra.mxu1 %v18162_v34  ;;  %14240 = vmatprep.mubr.f32.mxu1 %v8164_v11  ;;  %v8170_v34 = vld [vmem:[#allocation27 + $0x70] sm:$0xff] }
0x1bcd   :  { %15318 = vmatprep.subr.bf16.mxu1 %v18166_v23 }
0x1bcf   :  { %14241 = vmatmul.mubr.f32.gmra.mrb[116].mxu1 %v8165_v10 }
0x1bd0   :  { %15320 = vmatpush3.bf16.msra.mxu1 %v18166_v23  ;;  %14243 = vmatprep.mubr.f32.mxu1 %v8166_v28  ;;  %v8172_v23 = vld [vmem:[#allocation27 + $0x80] sm:$0xff] }
0x1bd1   :  { %15322 = vmatprep.subr.bf16.mxu1 %v18170_v16 }
0x1bd3   :  { %14244 = vmatmul.mubr.f32.gmra.mrb[118].mxu1 %v8167_v62 }
0x1bd4   :  { %15324 = vmatpush3.bf16.msra.mxu1 %v18170_v16  ;;  %14246 = vmatprep.mubr.f32.mxu1 %v8168_v13  ;;  %v8175_v16 = vld [vmem:[#allocation27 + $0x98] sm:$0xff] }
0x1bd5   :  { %15326 = vmatprep.subr.bf16.mxu1 %v18174_v26 }
0x1bd7   :  { %14247 = vmatmul.mubr.f32.gmra.mrb[120].mxu1 %v8169_v2 }
0x1bd8   :  { %15328 = vmatpush3.bf16.msra.mxu1 %v18174_v26  ;;  %14249 = vmatprep.mubr.f32.mxu1 %v8170_v34  ;;  %v8177_v26 = vld [vmem:[#allocation27 + $0xa8] sm:$0xff] }
0x1bd9   :  { %15330 = vmatprep.subr.bf16.mxu1 %v18178_v45 }
0x1bdb   :  { %14250 = vmatmul.mubr.f32.gmra.mrb[122].mxu1 %v8171_v47 }
0x1bdc   :  { %15332 = vmatpush3.bf16.msra.mxu1 %v18178_v45  ;;  %14252 = vmatprep.mubr.f32.mxu1 %v8172_v23  ;;  %v8181_v45 = vld [vmem:[#allocation27 + $0xc8] sm:$0xff] }
0x1bdd   :  { %15381 = vmatprep.subr.bf16.mxu1 %v16413_v8 }
0x1bdf   :  { %14253 = vmatmul.mubr.f32.gmra.mrb[124].mxu1 %v8173_v0 }
0x1be0   :  { %14255 = vmatprep.mubr.f32.mxu1 %v8174_v36 }
0x1be3   :  { %14256 = vmatmul.mubr.f32.gmra.mrb[126].mxu1 %v8175_v16 }
0x1be4   :  { %14258 = vmatprep.mubr.f32.mxu1 %v8176_v37 }
0x1be7   :  { %14259 = vmatmul.mubr.f32.gmra.mrb[128].mxu1 %v8177_v26 }
0x1be8   :  { %14261 = vmatprep.mubr.f32.mxu1 %v8178_v4 }
0x1beb   :  { %14262 = vmatmul.mubr.f32.gmra.mrb[130].mxu1 %v8179_v7 }
0x1bec   :  { %14264 = vmatprep.mubr.f32.mxu1 %v8180_v22 }
0x1bef   :  { %14265 = vmatmul.mubr.f32.gmra.mrb[132].mxu1 %v8181_v45 }
0x1bf0   :  { %14267 = vmatprep.mubr.f32.mxu1 %v8182_v24 }
0x1bf3   :  { %14268 = vmatmul.mubr.f32.gmra.mrb[134].mxu1 %v8183_v35 }
0x1bf4   :  { %14270 = vmatprep.mubr.f32.mxu1 %v8184_v1 }
0x1bf7   :  { %14271 = vmatmul.mubr.f32.gmra.mrb[136].mxu1 %v8185_v30 }
0x1bf8   :  { %14273 = vmatprep.mubr.f32.mxu1 %v8186_v63 }
0x1bfb   :  { %14274 = vmatmul.mubr.f32.gmra.mrb[138].mxu1 %v8187_v31 }
0x1bfc   :  { %14340 = vmatprep.mubr.f32.mxu1 %v9019_v54 }
0x1bff   :  { %14341 = vmatmul.mubr.f32.vlgmr.msra.gmra.mrb[108].mxu1 %v9020_v38 }
0x1c00   :  { %14343 = vmatprep.mubr.f32.mxu1 %v9021_v51 }
0x1c03   :  { %14344 = vmatmul.mubr.f32.gmra.mrb[110].mxu1 %v9022_v43 }
0x1c04   :  { %14346 = vmatprep.mubr.f32.mxu1 %v9023_v29 }
0x1c07   :  { %14347 = vmatmul.mubr.f32.gmra.mrb[112].mxu1 %v9024_v21 }
0x1c08   :  { %14349 = vmatprep.mubr.f32.mxu1 %v9025_v9 }
0x1c0b   :  { %14350 = vmatmul.mubr.f32.gmra.mrb[114].mxu1 %v9026_v58 }
0x1c0c   :  { %14352 = vmatprep.mubr.f32.mxu1 %v9027_v27 }
0x1c0f   :  { %14353 = vmatmul.mubr.f32.gmra.mrb[116].mxu1 %v9028_v20 }
0x1c10   :  { %14355 = vmatprep.mubr.f32.mxu1 %v9029_v32 }
0x1c13   :  { %14356 = vmatmul.mubr.f32.gmra.mrb[118].mxu1 %v9030_v5 }
0x1c14   :  { %14358 = vmatprep.mubr.f32.mxu1 %v9031_v14 }
0x1c17   :  { %14359 = vmatmul.mubr.f32.gmra.mrb[120].mxu1 %v9032_v15 }
0x1c18   :  { %14361 = vmatprep.mubr.f32.mxu1 %v9033_v25 }
0x1c1b   :  { %14362 = vmatmul.mubr.f32.gmra.mrb[122].mxu1 %v9034_v40 }
0x1c1c   :  { %14364 = vmatprep.mubr.f32.mxu1 %v9035_v12 }
0x1c1f   :  { %14365 = vmatmul.mubr.f32.gmra.mrb[124].mxu1 %v9036_v18 }
0x1c20   :  { %14367 = vmatprep.mubr.f32.mxu1 %v9037_v44 }
0x1c23   :  { %14368 = vmatmul.mubr.f32.gmra.mrb[126].mxu1 %v9038_v46 }
0x1c24   :  { %14370 = vmatprep.mubr.f32.mxu1 %v9039_v48 }
0x1c27   :  { %14371 = vmatmul.mubr.f32.gmra.mrb[128].mxu1 %v9040_v49 }
0x1c28   :  { %14373 = vmatprep.mubr.f32.mxu1 %v9041_v52 }
0x1c2b   :  { %14374 = vmatmul.mubr.f32.gmra.mrb[130].mxu1 %v9042_v55 }
0x1c2c   :  { %14376 = vmatprep.mubr.f32.mxu1 %v9043_v41 }
0x1c2f   :  { %14377 = vmatmul.mubr.f32.gmra.mrb[132].mxu1 %v9044_v57 }
0x1c30   :  { %14379 = vmatprep.mubr.f32.mxu1 %v9045_v33 }
0x1c33   :  { %14380 = vmatmul.mubr.f32.gmra.mrb[134].mxu1 %v9046_v17 }
0x1c34   :  { %14382 = vmatprep.mubr.f32.mxu1 %v9047_v42 }
0x1c37   :  { %14383 = vmatmul.mubr.f32.gmra.mrb[136].mxu1 %v9048_v39 }
0x1c38   :  { %14385 = vmatprep.mubr.f32.mxu1 %v9049_v53 }
0x1c3b   :  { %14386 = vmatmul.mubr.f32.gmra.mrb[138].mxu1 %v9050_v56 }
0x1cd2   :  { %v18213_v19 = vpop.f32.mrb[108].mxu1 }
0x1cd3   :  { %v9459_v3 = vsel %vm1374_vm1, %v18213_v19, 0.0  ;;  %v18217_v60 = vpop.f32.mrb[109].mxu1 }
0x1cd4   :  { %v9458_v50 = vsel %vm1374_vm1, %v18217_v60, 0.0 }
0x1cd5   :  { %v9460_v61 = vadd.f32 %v9459_v3, %v9458_v50 }
0x1cd6   :  { %v18221_v6 = vpop.f32.mrb[110].mxu1 }
0x1cd7   :  { %v18223_v11 = vpop.f32.mrb[111].mxu1  ;;  %v9463_v62 = vsel %vm1374_vm1, %v18221_v6, 0.0 }
0x1cd8   :  { %v9461_v10 = vsel %vm1374_vm1, %v18223_v11, 0.0 }
0x1cd9   :  { %v9462_v28 = vadd.f32 %v9461_v10, %v9460_v61 }
0x1cda   :  { %v18229_v13 = vpop.f32.mrb[112].mxu1 }
0x1cdb   :  { %v18231_v2 = vpop.f32.mrb[113].mxu1  ;;  %v9464_v34 = vadd.f32 %v9463_v62, %v9462_v28  ;;  %v9467_v0 = vsel %vm1374_vm1, %v18229_v13, 0.0 }
0x1cdc   :  { %v9465_v47 = vsel %vm1374_vm1, %v18231_v2, 0.0 }
0x1cdd   :  { %v9466_v23 = vadd.f32 %v9465_v47, %v9464_v34 }
0x1cde   :  { %v18237_v36 = vpop.f32.mrb[114].mxu1 }
0x1cdf   :  { %v18239_v16 = vpop.f32.mrb[115].mxu1  ;;  %v9468_v37 = vadd.f32 %v9467_v0, %v9466_v23  ;;  %v9471_v7 = vsel %vm1374_vm1, %v18237_v36, 0.0 }
0x1ce0   :  { %v9469_v26 = vsel %vm1374_vm1, %v18239_v16, 0.0 }
0x1ce1   :  { %v9470_v4 = vadd.f32 %v9469_v26, %v9468_v37 }
0x1ce2   :  { %v18245_v22 = vpop.f32.mrb[116].mxu1 }
0x1ce3   :  { %v18247_v45 = vpop.f32.mrb[117].mxu1  ;;  %v9472_v24 = vadd.f32 %v9471_v7, %v9470_v4  ;;  %v9475_v30 = vsel %vm1374_vm1, %v18245_v22, 0.0 }
0x1ce4   :  { %v9473_v35 = vsel %vm1374_vm1, %v18247_v45, 0.0 }
0x1ce5   :  { %v9474_v1 = vadd.f32 %v9473_v35, %v9472_v24 }
0x1ce6   :  { %v18253_v63 = vpop.f32.mrb[118].mxu1 }
0x1ce7   :  { %v18255_v31 = vpop.f32.mrb[119].mxu1  ;;  %v9476_v54 = vadd.f32 %v9475_v30, %v9474_v1  ;;  %v9479_v43 = vsel %vm1374_vm1, %v18253_v63, 0.0 }
0x1ce8   :  { %v9477_v38 = vsel %vm1374_vm1, %v18255_v31, 0.0 }
0x1ce9   :  { %v9478_v51 = vadd.f32 %v9477_v38, %v9476_v54 }
0x1cea   :  { %v18261_v29 = vpop.f32.mrb[120].mxu1 }
0x1ceb   :  { %v18263_v21 = vpop.f32.mrb[121].mxu1  ;;  %v9480_v9 = vadd.f32 %v9479_v43, %v9478_v51  ;;  %v9483_v20 = vsel %vm1374_vm1, %v18261_v29, 0.0 }
0x1cec   :  { %v9481_v58 = vsel %vm1374_vm1, %v18263_v21, 0.0 }
0x1ced   :  { %v9482_v27 = vadd.f32 %v9481_v58, %v9480_v9 }
0x1cee   :  { %v18269_v32 = vpop.f32.mrb[122].mxu1 }
0x1cef   :  { %v18271_v5 = vpop.f32.mrb[123].mxu1  ;;  %v9484_v14 = vadd.f32 %v9483_v20, %v9482_v27  ;;  %v9487_v40 = vsel %vm1374_vm1, %v18269_v32, 0.0 }
0x1cf0   :  { %v9485_v15 = vsel %vm1374_vm1, %v18271_v5, 0.0 }
0x1cf1   :  { %v9486_v25 = vadd.f32 %v9485_v15, %v9484_v14 }
0x1cf2   :  { %v18277_v12 = vpop.f32.mrb[124].mxu1 }
0x1cf3   :  { %v18279_v18 = vpop.f32.mrb[125].mxu1  ;;  %v9488_v44 = vadd.f32 %v9487_v40, %v9486_v25  ;;  %v9491_v49 = vsel %vm1374_vm1, %v18277_v12, 0.0 }
0x1cf4   :  { %v9489_v46 = vsel %vm1374_vm1, %v18279_v18, 0.0 }
0x1cf5   :  { %v9490_v48 = vadd.f32 %v9489_v46, %v9488_v44 }
0x1cf6   :  { %v18285_v52 = vpop.f32.mrb[126].mxu1 }
0x1cf7   :  { %v18287_v55 = vpop.f32.mrb[127].mxu1  ;;  %v9492_v41 = vadd.f32 %v9491_v49, %v9490_v48  ;;  %v9495_v17 = vsel %vm1374_vm1, %v18285_v52, 0.0 }
0x1cf8   :  { %v9493_v57 = vsel %vm1374_vm1, %v18287_v55, 0.0 }
0x1cf9   :  { %v9494_v33 = vadd.f32 %v9493_v57, %v9492_v41 }
0x1cfa   :  { %v18293_v42 = vpop.f32.mrb[128].mxu1 }
0x1cfb   :  { %v18295_v39 = vpop.f32.mrb[129].mxu1  ;;  %v9496_v53 = vadd.f32 %v9495_v17, %v9494_v33  ;;  %v9499_v50 = vsel %vm1374_vm1, %v18293_v42, 0.0 }
0x1cfc   :  { %v9497_v56 = vsel %vm1374_vm1, %v18295_v39, 0.0 }
0x1cfd   :  { %v9498_v3 = vadd.f32 %v9497_v56, %v9496_v53 }
0x1cfe   :  { %v14375_v61 = vpop.f32.mrb[130].mxu1 }
0x1cff   :  { %v9377_v10 = vpop.f32.mrb[131].mxu1  ;;  %v9500_v28 = vadd.f32 %v9499_v50, %v9498_v3  ;;  %v9503_v47 = vsel %vm1374_vm1, %v14375_v61, 0.0 }
0x1d00   :  { %v9501_v62 = vsel %vm1374_vm1, %v9377_v10, 0.0 }
0x1d01   :  { %v9502_v34 = vadd.f32 %v9501_v62, %v9500_v28 }
0x1d02   :  { %v14378_v23 = vpop.f32.mrb[132].mxu1 }
0x1d03   :  { %v9387_v0 = vpop.f32.mrb[133].mxu1  ;;  %v9504_v37 = vadd.f32 %v9503_v47, %v9502_v34  ;;  %v9507_v7 = vsel %vm1374_vm1, %v14378_v23, 0.0 }
0x1d04   :  { %v9505_v26 = vsel %vm1374_vm1, %v9387_v0, 0.0 }
0x1d05   :  { %v9506_v4 = vadd.f32 %v9505_v26, %v9504_v37 }
0x1d06   :  { %v14381_v24 = vpop.f32.mrb[134].mxu1 }
0x1d07   :  { %v9397_v35 = vpop.f32.mrb[135].mxu1  ;;  %v9508_v1 = vadd.f32 %v9507_v7, %v9506_v4  ;;  %v9511_v38 = vsel %vm1374_vm1, %v14381_v24, 0.0 }
0x1d08   :  { %v9509_v30 = vsel %vm1374_vm1, %v9397_v35, 0.0 }
0x1d09   :  { %v9510_v54 = vadd.f32 %v9509_v30, %v9508_v1 }
0x1d0a   :  { %v14384_v51 = vpop.f32.mrb[136].mxu1 }
0x1d0b   :  { %v9407_v43 = vpop.f32.mrb[137].mxu1  ;;  %v9512_v9 = vadd.f32 %v9511_v38, %v9510_v54  ;;  %v9515_v20 = vsel %vm1374_vm1, %v14384_v51, 0.0 }
0x1d0c   :  { %v9513_v58 = vsel %vm1374_vm1, %v9407_v43, 0.0 }
0x1d0d   :  { %v9514_v27 = vadd.f32 %v9513_v58, %v9512_v9 }
0x1d0e   :  { %v14387_v14 = vpop.f32.mrb[138].mxu1 }
0x1d0f   :  { %v9417_v15 = vpop.f32.mrb[139].mxu1  ;;  %v9516_v25 = vadd.f32 %v9515_v20, %v9514_v27  ;;  %v9519_v46 = vsel %vm1374_vm1, %v14387_v14, 0.0 }
0x1d10   :  { %v9517_v40 = vsel %vm1374_vm1, %v9417_v15, 0.0 }
0x1d11   :  { %v9518_v44 = vadd.f32 %v9517_v40, %v9516_v25 }
0x1d13   :  { %v9520_v48 = vadd.f32 %v9519_v46, %v9518_v44 }
0x1d15   :  { %v9521_v49 = vrot.slane %v9520_v48, 4 }
0x1d17   :  { %v9522_v41 = vadd.f32 %v9521_v49, %v9520_v48 }
0x1d19   :  { %v9523_v57 = vrot.slane %v9522_v41, 2 }
0x1d1b   :  { %v9524_v33 = vadd.f32 %v9523_v57, %v9522_v41 }
0x1d1d   :  { %v9525_v17 = vrot.slane %v9524_v33, 1 }
0x1d1f   :  { %v9526_v53 = vadd.f32 %v9525_v17, %v9524_v33 }
0x1d21   :  { %v9528_v56 = vmul.f32 0.00390625, %v9526_v53 }
0x1d23   :  { %v18312_v3 = vsub.f32 %v18217_v60, %v9528_v56  ;;  %v18315_v50 = vsub.f32 %v18213_v19, %v9528_v56  ;;  %v18318_v28 = vsub.f32 %v18223_v11, %v9528_v56  ;;  %v18321_v62 = vsub.f32 %v18221_v6, %v9528_v56 }
0x1d24   :  { %v18324_v34 = vsub.f32 %v18231_v2, %v9528_v56  ;;  %v18327_v47 = vsub.f32 %v18229_v13, %v9528_v56  ;;  %v18330_v37 = vsub.f32 %v18239_v16, %v9528_v56  ;;  %v18333_v60 = vsub.f32 %v18237_v36, %v9528_v56 }
0x1d25   :  { %v18336_v19 = vsub.f32 %v18247_v45, %v9528_v56  ;;  %v18339_v11 = vsub.f32 %v18245_v22, %v9528_v56  ;;  %v18342_v6 = vsub.f32 %v18255_v31, %v9528_v56  ;;  %v18345_v2 = vsub.f32 %v18253_v63, %v9528_v56 }
0x1d26   :  { %v18348_v13 = vsub.f32 %v18263_v21, %v9528_v56  ;;  %v18351_v16 = vsub.f32 %v18261_v29, %v9528_v56  ;;  %v18354_v36 = vsub.f32 %v18271_v5, %v9528_v56  ;;  %v18357_v45 = vsub.f32 %v18269_v32, %v9528_v56 }
0x1d27   :  { %v18360_v22 = vsub.f32 %v18279_v18, %v9528_v56  ;;  %v18363_v31 = vsub.f32 %v18277_v12, %v9528_v56  ;;  %v18366_v63 = vsub.f32 %v18287_v55, %v9528_v56  ;;  %v18369_v21 = vsub.f32 %v18285_v52, %v9528_v56 }
0x1d28   :  { %v18372_v29 = vsub.f32 %v18295_v39, %v9528_v56  ;;  %v18375_v5 = vsub.f32 %v18293_v42, %v9528_v56  ;;  %v18377_v32 = vsub.f32 %v9377_v10, %v9528_v56  ;;  %v18379_v26 = vsub.f32 %v14375_v61, %v9528_v56 }
0x1d29   :  { %v18381_v18 = vsub.f32 %v9387_v0, %v9528_v56  ;;  %v18383_v12 = vsub.f32 %v14378_v23, %v9528_v56  ;;  %v18385_v4 = vsub.f32 %v9397_v35, %v9528_v56  ;;  %v18387_v55 = vsub.f32 %v14381_v24, %v9528_v56 }
0x1d2a   :  { %v18389_v52 = vsub.f32 %v9407_v43, %v9528_v56  ;;  %v18391_v7 = vsub.f32 %v14384_v51, %v9528_v56  ;;  %v18393_v39 = vsub.f32 %v9417_v15, %v9528_v56  ;;  %v18395_v42 = vsub.f32 %v14387_v14, %v9528_v56 }
0x1d2b   :  { %v9561_v61 = vmul.f32 %v18312_v3, %v18312_v3  ;;  %v9562_v10 = vmul.f32 %v18315_v50, %v18315_v50  ;;  %v9563_v23 = vmul.f32 %v18318_v28, %v18318_v28  ;;  %v9564_v0 = vmul.f32 %v18321_v62, %v18321_v62 }
0x1d2c   :  { %v9565_v30 = vmul.f32 %v18324_v34, %v18324_v34  ;;  %v9566_v51 = vmul.f32 %v18327_v47, %v18327_v47  ;;  %v9567_v58 = vmul.f32 %v18330_v37, %v18330_v37  ;;  %v9568_v14 = vmul.f32 %v18333_v60, %v18333_v60 }
0x1d2d   :  { %v9593_v24 = vsel %vm1374_vm1, %v9561_v61, 0.0  ;;  %v9594_v35 = vsel %vm1374_vm1, %v9562_v10, 0.0  ;;  %v9596_v54 = vsel %vm1374_vm1, %v9563_v23, 0.0  ;;  %v9598_v43 = vsel %vm1374_vm1, %v9564_v0, 0.0 }
0x1d2e   :  { %v9595_v1 = vadd.f32 %v9594_v35, %v9593_v24  ;;  %v9600_v27 = vsel %vm1374_vm1, %v9565_v30, 0.0  ;;  %v9602_v15 = vsel %vm1374_vm1, %v9566_v51, 0.0  ;;  %v9569_v40 = vmul.f32 %v18336_v19, %v18336_v19 }
0x1d2f   :  { %v9604_v44 = vsel %vm1374_vm1, %v9567_v58, 0.0  ;;  %v9570_v48 = vmul.f32 %v18339_v11, %v18339_v11  ;;  %v9606_v49 = vsel %vm1374_vm1, %v9568_v14, 0.0  ;;  %v9571_v57 = vmul.f32 %v18342_v6, %v18342_v6 }
0x1d30   :  { %v9597_v38 = vadd.f32 %v9596_v54, %v9595_v1  ;;  %v9608_v33 = vsel %vm1374_vm1, %v9569_v40, 0.0  ;;  %v9572_v53 = vmul.f32 %v18345_v2, %v18345_v2  ;;  %v9573_v10 = vmul.f32 %v18348_v13, %v18348_v13 }
0x1d31   :  { %v9610_v56 = vsel %vm1374_vm1, %v9570_v48, 0.0  ;;  %v9612_v23 = vsel %vm1374_vm1, %v9571_v57, 0.0  ;;  %v9574_v24 = vmul.f32 %v18351_v16, %v18351_v16  ;;  %v9575_v30 = vmul.f32 %v18354_v36, %v18354_v36 }
0x1d32   :  { %v9599_v9 = vadd.f32 %v9598_v43, %v9597_v38  ;;  %v9614_v35 = vsel %vm1374_vm1, %v9572_v53, 0.0  ;;  %v9616_v54 = vsel %vm1374_vm1, %v9573_v10, 0.0  ;;  %v9576_v51 = vmul.f32 %v18357_v45, %v18357_v45 }
0x1d33   :  { %v9618_v43 = vsel %vm1374_vm1, %v9574_v24, 0.0  ;;  %v9577_v58 = vmul.f32 %v18360_v22, %v18360_v22  ;;  %v9578_v14 = vmul.f32 %v18363_v31, %v18363_v31  ;;  %v9579_v40 = vmul.f32 %v18366_v63, %v18366_v63 }
0x1d34   :  { %v9601_v20 = vadd.f32 %v9600_v27, %v9599_v9  ;;  %v9620_v27 = vsel %vm1374_vm1, %v9575_v30, 0.0  ;;  %v9580_v48 = vmul.f32 %v18369_v21, %v18369_v21  ;;  %v9581_v57 = vmul.f32 %v18372_v29, %v18372_v29 }
0x1d35   :  { %v9582_v53 = vmul.f32 %v18375_v5, %v18375_v5  ;;  %v9583_v10 = vmul.f32 %v18377_v32, %v18377_v32  ;;  %v9584_v24 = vmul.f32 %v18379_v26, %v18379_v26  ;;  %v9585_v30 = vmul.f32 %v18381_v18, %v18381_v18 }
0x1d36   :  { %v9603_v25 = vadd.f32 %v9602_v15, %v9601_v20  ;;  %v9622_v15 = vsel %vm1374_vm1, %v9576_v51, 0.0  ;;  %v9586_v51 = vmul.f32 %v18383_v12, %v18383_v12 }
0x1d38   :  { %v9605_v46 = vadd.f32 %v9604_v44, %v9603_v25  ;;  %v9624_v44 = vsel %vm1374_vm1, %v9577_v58, 0.0  ;;  %v9587_v58 = vmul.f32 %v18385_v4, %v18385_v4 }
0x1d3a   :  { %v9607_v41 = vadd.f32 %v9606_v49, %v9605_v46  ;;  %v9626_v49 = vsel %vm1374_vm1, %v9578_v14, 0.0  ;;  %v9588_v14 = vmul.f32 %v18387_v55, %v18387_v55 }
0x1d3c   :  { %v9609_v17 = vadd.f32 %v9608_v33, %v9607_v41  ;;  %v9628_v33 = vsel %vm1374_vm1, %v9579_v40, 0.0  ;;  %v9589_v40 = vmul.f32 %v18389_v52, %v18389_v52 }
0x1d3e   :  { %v9611_v61 = vadd.f32 %v9610_v56, %v9609_v17  ;;  %v9630_v56 = vsel %vm1374_vm1, %v9580_v48, 0.0  ;;  %v9590_v48 = vmul.f32 %v18391_v7, %v18391_v7 }
0x1d40   :  { %v9613_v0 = vadd.f32 %v9612_v23, %v9611_v61  ;;  %v9632_v23 = vsel %vm1374_vm1, %v9581_v57, 0.0  ;;  %v9591_v57 = vmul.f32 %v18393_v39, %v18393_v39 }
0x1d42   :  { %v9615_v1 = vadd.f32 %v9614_v35, %v9613_v0  ;;  %v9634_v35 = vsel %vm1374_vm1, %v9582_v53, 0.0  ;;  %v9592_v53 = vmul.f32 %v18395_v42, %v18395_v42 }
0x1d44   :  { %v9617_v38 = vadd.f32 %v9616_v54, %v9615_v1  ;;  %v9636_v54 = vsel %vm1374_vm1, %v9583_v10, 0.0  ;;  %v9652_v10 = vsel %vm1374_vm1, %v9591_v57, 0.0 }
0x1d46   :  { %v9619_v9 = vadd.f32 %v9618_v43, %v9617_v38  ;;  %v9638_v43 = vsel %vm1374_vm1, %v9584_v24, 0.0  ;;  %v9872_v24 = vld [vmem:[#allocation29 + $0x8] sm:$0xff] }
0x1d47   :  { %9999 = vmatprep.mubr.f32.mxu0 %v9872_v24 }
0x1d48   :  { %v9621_v20 = vadd.f32 %v9620_v27, %v9619_v9  ;;  %v9640_v27 = vsel %vm1374_vm1, %v9585_v30, 0.0 }
0x1d4a   :  { %v9623_v25 = vadd.f32 %v9622_v15, %v9621_v20  ;;  %v9642_v15 = vsel %vm1374_vm1, %v9586_v51, 0.0 }
0x1d4c   :  { %v9625_v46 = vadd.f32 %v9624_v44, %v9623_v25  ;;  %v9644_v44 = vsel %vm1374_vm1, %v9587_v58, 0.0 }
0x1d4e   :  { %v9627_v41 = vadd.f32 %v9626_v49, %v9625_v46  ;;  %v9646_v49 = vsel %vm1374_vm1, %v9588_v14, 0.0 }
0x1d50   :  { %v9629_v17 = vadd.f32 %v9628_v33, %v9627_v41  ;;  %v9648_v33 = vsel %vm1374_vm1, %v9589_v40, 0.0 }
0x1d52   :  { %v9631_v61 = vadd.f32 %v9630_v56, %v9629_v17  ;;  %v9650_v56 = vsel %vm1374_vm1, %v9590_v48, 0.0 }
0x1d54   :  { %v9633_v0 = vadd.f32 %v9632_v23, %v9631_v61 }
0x1d56   :  { %v9635_v1 = vadd.f32 %v9634_v35, %v9633_v0  ;;  %v9654_v0 = vsel %vm1374_vm1, %v9592_v53, 0.0  ;;  %v10297_v35 = vld [vmem:[#allocation29 + $0x208] sm:$0xff] }
0x1d57   :  { %10424 = vmatprep.mubr.f32.mxu1 %v10297_v35 }
0x1d58   :  { %v9637_v38 = vadd.f32 %v9636_v54, %v9635_v1 }
0x1d5a   :  { %v9639_v9 = vadd.f32 %v9638_v43, %v9637_v38 }
0x1d5c   :  { %v9641_v20 = vadd.f32 %v9640_v27, %v9639_v9 }
0x1d5e   :  { %v9643_v25 = vadd.f32 %v9642_v15, %v9641_v20 }
0x1d60   :  { %v9645_v46 = vadd.f32 %v9644_v44, %v9643_v25  ;;  %v18500_v25 = vld [vmem:[%s19257_s2] ss:$0 sm:$0xff] }
0x1d62   :  { %v9647_v41 = vadd.f32 %v9646_v49, %v9645_v46  ;;  %v18509_v49 = vld [vmem:[%s19258_s11] ss:$0 sm:$0xff] }
0x1d64   :  { %v9649_v17 = vadd.f32 %v9648_v33, %v9647_v41 }
0x1d66   :  { %v9651_v61 = vadd.f32 %v9650_v56, %v9649_v17 }
0x1d68   :  { %v9653_v23 = vadd.f32 %v9652_v10, %v9651_v61 }
0x1d6a   :  { %v9655_v1 = vadd.f32 %v9654_v0, %v9653_v23 }
0x1d6c   :  { %v9656_v30 = vrot.slane %v9655_v1, 4 }
0x1d6e   :  { %v9657_v54 = vadd.f32 %v9656_v30, %v9655_v1 }
0x1d70   :  { %v9658_v38 = vrot.slane %v9657_v54, 2 }
0x1d72   :  { %v9659_v51 = vadd.f32 %v9658_v38, %v9657_v54 }
0x1d74   :  { %v9660_v43 = vrot.slane %v9659_v51, 1 }
0x1d76   :  { %v9661_v9 = vadd.f32 %v9660_v43, %v9659_v51 }
0x1d78   :  { %v9662_v58 = vmul.f32 0.00390625, %v9661_v9 }
0x1d7a   :  { %v9663_v27 = vadd.f32 1e-05, %v9662_v58 }
0x1d7c   :  { %15837 = vrsqrt.f32 %v9663_v27 }
0x1d86   :  { %v18493_v20 = vpop.eup %15837 }
0x1d87   :  { %v9665_v14 = vmul.f32 %v18493_v20, %v18312_v3  ;;  %v9666_v15 = vmul.f32 %v18493_v20, %v18315_v50  ;;  %v9667_v40 = vmul.f32 %v18493_v20, %v18318_v28  ;;  %v9668_v44 = vmul.f32 %v18493_v20, %v18321_v62 }
0x1d88   :  { %v9669_v3 = vmul.f32 %v18493_v20, %v18324_v34  ;;  %v9670_v50 = vmul.f32 %v18493_v20, %v18327_v47  ;;  %v9671_v33 = vmul.f32 %v18493_v20, %v18330_v37  ;;  %v9672_v17 = vmul.f32 %v18493_v20, %v18333_v60 }
0x1d89   :  { %v9704_v46 = vmul.f32 %v18500_v25, %v9665_v14  ;;  %v9705_v48 = vmul.f32 %v18500_v25, %v9666_v15  ;;  %v9706_v41 = vmul.f32 %v18500_v25, %v9667_v40  ;;  %v9707_v57 = vmul.f32 %v18500_v25, %v9668_v44 }
0x1d8a   :  { %v9708_v53 = vmul.f32 %v18500_v25, %v9669_v3  ;;  %v9709_v34 = vmul.f32 %v18500_v25, %v9670_v50  ;;  %v9673_v61 = vmul.f32 %v18493_v20, %v18336_v19  ;;  %v9674_v0 = vmul.f32 %v18493_v20, %v18339_v11 }
0x1d8b   :  { %v9743_v28 = vadd.f32 %v18509_v49, %v9704_v46  ;;  %v9744_v62 = vadd.f32 %v18509_v49, %v9705_v48  ;;  %v9745_v47 = vadd.f32 %v18509_v49, %v9706_v41  ;;  %v9746_v56 = vadd.f32 %v18509_v49, %v9707_v57 }
0x1d8c   :  { %v9675_v37 = vmul.f32 %v18493_v20, %v18342_v6  ;;  %v9710_v60 = vmul.f32 %v18500_v25, %v9671_v33  ;;  %v9711_v24 = vmul.f32 %v18500_v25, %v9672_v17  ;;  %v9747_v35 = vadd.f32 %v18509_v49, %v9708_v53 }
0x1d8d   :  { %v9807_v10 = vmul.f32 0.01, %v9743_v28  ;;  %v9808_v23 = vmul.f32 0.01, %v9744_v62  ;;  %v9748_v1 = vadd.f32 %v18509_v49, %v9709_v34  ;;  %v9809_v30 = vmul.f32 0.01, %v9745_v47 }
0x1d8e   :  { %v9810_v54 = vmul.f32 0.01, %v9746_v56  ;;  %v9676_v19 = vmul.f32 %v18493_v20, %v18345_v2  ;;  %vm9775_vm6 = vcmp.ge.f32.partialorder %v9743_v28, 0.0  ;;  %vm9776_vm7 = vcmp.ge.f32.partialorder %v9744_v62, 0.0 }
0x1d8f   :  { %vm9777_vm9 = vcmp.ge.f32.partialorder %v9745_v47, 0.0  ;;  %v9712_v11 = vmul.f32 %v18500_v25, %v9673_v61  ;;  %v9839_v38 = vsel %vm9775_vm6, %v9743_v28, %v9807_v10  ;;  %v9840_v6 = vsel %vm9776_vm7, %v9744_v62, %v9808_v23 }
0x1d90   :  { %vm9778_vm10 = vcmp.ge.f32.partialorder %v9746_v56, 0.0  ;;  %v9713_v51 = vmul.f32 %v18500_v25, %v9674_v0  ;;  %v9749_v43 = vadd.f32 %v18509_v49, %v9710_v60  ;;  %v9750_v9 = vadd.f32 %v18509_v49, %v9711_v24 }
0x1d91   :  { %v18543_v58 = vpack.c.bf16 %v9840_v6, %v9839_v38  ;;  %v9811_v27 = vmul.f32 0.01, %v9747_v35  ;;  %v9812_v14 = vmul.f32 0.01, %v9748_v1  ;;  %v9841_v15 = vsel %vm9777_vm9, %v9745_v47, %v9809_v30 }
0x1d92   :  { %v9842_v2 = vsel %vm9778_vm10, %v9746_v56, %v9810_v54  ;;  %vm9779_vm11 = vcmp.ge.f32.partialorder %v9747_v35, 0.0  ;;  %vm9780_vm12 = vcmp.ge.f32.partialorder %v9748_v1, 0.0  ;;  %v9677_v40 = vmul.f32 %v18493_v20, %v18348_v13 }
0x1d93   :  { %15335 = vmatpush1.bf16.msra.mxu0 %v18543_v58  ;;  %15383 = vmatpush1.bf16.msra.mxu1 %v18543_v58  ;;  %v9678_v44 = vmul.f32 %v18493_v20, %v18351_v16  ;;  %v9714_v46 = vmul.f32 %v18500_v25, %v9675_v37  ;;  %v9715_v48 = vmul.f32 %v18500_v25, %v9676_v19  ;;  %v9813_v57 = vmul.f32 0.01, %v9749_v43 }
0x1d94   :  { %15336 = vmatprep.subr.bf16.mxu0 %v16413_v8  ;;  %15384 = vmatprep.subr.bf16.mxu1 %v16413_v8  ;;  %v9751_v3 = vadd.f32 %v18509_v49, %v9712_v11  ;;  %v9752_v50 = vadd.f32 %v18509_v49, %v9713_v51  ;;  %v18557_v41 = vpack.c.bf16 %v9842_v2, %v9841_v15  ;;  %v9814_v28 = vmul.f32 0.01, %v9750_v9 }
0x1d95   :  { %v9843_v13 = vsel %vm9779_vm11, %v9747_v35, %v9811_v27  ;;  %v9844_v62 = vsel %vm9780_vm12, %v9748_v1, %v9812_v14  ;;  %vm9781_vm13 = vcmp.ge.f32.partialorder %v9749_v43, 0.0  ;;  %vm9782_vm14 = vcmp.ge.f32.partialorder %v9750_v9, 0.0 }
0x1d96   :  { %v9679_v16 = vmul.f32 %v18493_v20, %v18354_v36  ;;  %v9680_v33 = vmul.f32 %v18493_v20, %v18357_v45  ;;  %v9716_v17 = vmul.f32 %v18500_v25, %v9677_v40  ;;  %v9717_v53 = vmul.f32 %v18500_v25, %v9678_v44 }
0x1d97   :  { %15338 = vmatpush1.bf16.msra.mxu0 %v18557_v41  ;;  %15386 = vmatpush1.bf16.msra.mxu1 %v18557_v41  ;;  %v9753_v34 = vadd.f32 %v18509_v49, %v9714_v46  ;;  %v9754_v47 = vadd.f32 %v18509_v49, %v9715_v48  ;;  %v18571_v56 = vpack.c.bf16 %v9844_v62, %v9843_v13  ;;  %v9815_v61 = vmul.f32 0.01, %v9751_v3 }
0x1d98   :  { %15339 = vmatprep.subr.bf16.mxu0 %v16413_v8  ;;  %15387 = vmatprep.subr.bf16.mxu1 %v16413_v8  ;;  %v9816_v10 = vmul.f32 0.01, %v9752_v50  ;;  %v9845_v36 = vsel %vm9781_vm13, %v9749_v43, %v9813_v57  ;;  %v9846_v23 = vsel %vm9782_vm14, %v9750_v9, %v9814_v28  ;;  %vm9783_vm15 = vcmp.ge.f32.partialorder %v9751_v3, 0.0 }
0x1d99   :  { %vm9784_vm0 = vcmp.ge.f32.partialorder %v9752_v50, 0.0  ;;  %v9681_v45 = vmul.f32 %v18493_v20, %v18360_v22  ;;  %v9682_v0 = vmul.f32 %v18493_v20, %v18363_v31  ;;  %v9718_v37 = vmul.f32 %v18500_v25, %v9679_v16 }
0x1d9a   :  { %v9719_v60 = vmul.f32 %v18500_v25, %v9680_v33  ;;  %v9755_v24 = vadd.f32 %v18509_v49, %v9716_v17  ;;  %v9756_v35 = vadd.f32 %v18509_v49, %v9717_v53  ;;  %v18585_v1 = vpack.c.bf16 %v9846_v23, %v9845_v36 }
0x1d9b   :  { %15341 = vmatpush1.bf16.msra.mxu0 %v18571_v56  ;;  %15389 = vmatpush1.bf16.msra.mxu1 %v18571_v56  ;;  %v9817_v30 = vmul.f32 0.01, %v9753_v34  ;;  %v9818_v54 = vmul.f32 0.01, %v9754_v47  ;;  %v9847_v22 = vsel %vm9783_vm15, %v9751_v3, %v9815_v61  ;;  %v9848_v19 = vsel %vm9784_vm0, %v9752_v50, %v9816_v10 }
0x1d9c   :  { %15342 = vmatprep.subr.bf16.mxu0 %v16413_v8  ;;  %15390 = vmatprep.subr.bf16.mxu1 %v16413_v8  ;;  %vm9785_vm3 = vcmp.ge.f32.partialorder %v9753_v34, 0.0  ;;  %vm9786_vm2 = vcmp.ge.f32.partialorder %v9754_v47, 0.0  ;;  %v9683_v31 = vmul.f32 %v18493_v20, %v18366_v63  ;;  %v9684_v11 = vmul.f32 %v18493_v20, %v18369_v21 }
0x1d9d   :  { %v9720_v38 = vmul.f32 %v18500_v25, %v9681_v45  ;;  %v9721_v6 = vmul.f32 %v18500_v25, %v9682_v0  ;;  %v9757_v51 = vadd.f32 %v18509_v49, %v9718_v37  ;;  %v9758_v43 = vadd.f32 %v18509_v49, %v9719_v60 }
0x1d9e   :  { %v18599_v9 = vpack.c.bf16 %v9848_v19, %v9847_v22  ;;  %v9819_v27 = vmul.f32 0.01, %v9755_v24  ;;  %v9820_v14 = vmul.f32 0.01, %v9756_v35  ;;  %v9849_v63 = vsel %vm9785_vm3, %v9753_v34, %v9817_v30 }
0x1d9f   :  { %15344 = vmatpush1.bf16.msra.mxu0 %v18585_v1  ;;  %15392 = vmatpush1.bf16.msra.mxu1 %v18585_v1  ;;  %v9850_v15 = vsel %vm9786_vm2, %v9754_v47, %v9818_v54  ;;  %vm9787_vm4 = vcmp.ge.f32.partialorder %v9755_v24, 0.0  ;;  %vm9788_vm5 = vcmp.ge.f32.partialorder %v9756_v35, 0.0  ;;  %v9685_v21 = vmul.f32 %v18493_v20, %v18372_v29 }
0x1da0   :  { %15345 = vmatprep.subr.bf16.mxu0 %v16413_v8  ;;  %15393 = vmatprep.subr.bf16.mxu1 %v16413_v8  ;;  %v9686_v2 = vmul.f32 %v18493_v20, %v18375_v5  ;;  %v9722_v40 = vmul.f32 %v18500_v25, %v9683_v31  ;;  %v9723_v44 = vmul.f32 %v18500_v25, %v9684_v11  ;;  %v9821_v50 = vmul.f32 0.01, %v9757_v51 }
0x1da1   :  { %v9759_v46 = vadd.f32 %v18509_v49, %v9720_v38  ;;  %v9760_v48 = vadd.f32 %v18509_v49, %v9721_v6  ;;  %v18613_v3 = vpack.c.bf16 %v9850_v15, %v9849_v63  ;;  %v9822_v57 = vmul.f32 0.01, %v9758_v43 }
0x1da2   :  { %v9851_v29 = vsel %vm9787_vm4, %v9755_v24, %v9819_v27  ;;  %v9852_v28 = vsel %vm9788_vm5, %v9756_v35, %v9820_v14  ;;  %vm9789_vm6 = vcmp.ge.f32.partialorder %v9757_v51, 0.0  ;;  %vm9790_vm7 = vcmp.ge.f32.partialorder %v9758_v43, 0.0 }
0x1da3   :  { %15347 = vmatpush1.bf16.msra.mxu0 %v18599_v9  ;;  %15395 = vmatpush1.bf16.msra.mxu1 %v18599_v9  ;;  %v9687_v5 = vmul.f32 %v18493_v20, %v18377_v32  ;;  %v9688_v13 = vmul.f32 %v18493_v20, %v18379_v26  ;;  %v9724_v62 = vmul.f32 %v18500_v25, %v9685_v21  ;;  %v9823_v34 = vmul.f32 0.01, %v9759_v46 }
0x1da4   :  { %15348 = vmatprep.subr.bf16.mxu0 %v16413_v8  ;;  %15396 = vmatprep.subr.bf16.mxu1 %v16413_v8  ;;  %v9725_v16 = vmul.f32 %v18500_v25, %v9686_v2  ;;  %v9761_v33 = vadd.f32 %v18509_v49, %v9722_v40  ;;  %v9762_v17 = vadd.f32 %v18509_v49, %v9723_v44  ;;  %v9824_v47 = vmul.f32 0.01, %v9760_v48 }
0x1da5   :  { %v18627_v53 = vpack.c.bf16 %v9852_v28, %v9851_v29  ;;  %v9853_v32 = vsel %vm9789_vm6, %v9757_v51, %v9821_v50  ;;  %v9854_v61 = vsel %vm9790_vm7, %v9758_v43, %v9822_v57  ;;  %vm9791_vm9 = vcmp.ge.f32.partialorder %v9759_v46, 0.0 }
0x1da6   :  { %vm9792_vm10 = vcmp.ge.f32.partialorder %v9760_v48, 0.0  ;;  %v9689_v26 = vmul.f32 %v18493_v20, %v18381_v18  ;;  %v9690_v10 = vmul.f32 %v18493_v20, %v18383_v12  ;;  %v9726_v36 = vmul.f32 %v18500_v25, %v9687_v5 }
0x1da7   :  { %15350 = vmatpush1.bf16.msra.mxu0 %v18613_v3  ;;  %15398 = vmatpush1.bf16.msra.mxu1 %v18613_v3  ;;  %v9727_v23 = vmul.f32 %v18500_v25, %v9688_v13  ;;  %v9763_v45 = vadd.f32 %v18509_v49, %v9724_v62  ;;  %v9764_v0 = vadd.f32 %v18509_v49, %v9725_v16  ;;  %v9825_v60 = vmul.f32 0.01, %v9761_v33 }
0x1da8   :  { %15351 = vmatprep.subr.bf16.mxu0 %v16413_v8  ;;  %15399 = vmatprep.subr.bf16.mxu1 %v16413_v8  ;;  %v18641_v37 = vpack.c.bf16 %v9854_v61, %v9853_v32  ;;  %v9826_v24 = vmul.f32 0.01, %v9762_v17  ;;  %v9855_v18 = vsel %vm9791_vm9, %v9759_v46, %v9823_v34  ;;  %v9856_v35 = vsel %vm9792_vm10, %v9760_v48, %v9824_v47 }
0x1da9   :  { %vm9793_vm11 = vcmp.ge.f32.partialorder %v9761_v33, 0.0  ;;  %vm9794_vm12 = vcmp.ge.f32.partialorder %v9762_v17, 0.0  ;;  %v9691_v12 = vmul.f32 %v18493_v20, %v18385_v4  ;;  %v9692_v30 = vmul.f32 %v18493_v20, %v18387_v55 }
0x1daa   :  { %v9728_v54 = vmul.f32 %v18500_v25, %v9689_v26  ;;  %v9729_v22 = vmul.f32 %v18500_v25, %v9690_v10  ;;  %v9765_v19 = vadd.f32 %v18509_v49, %v9726_v36  ;;  %v9766_v31 = vadd.f32 %v18509_v49, %v9727_v23 }
0x1dab   :  { %15353 = vmatpush1.bf16.msra.mxu0 %v18627_v53  ;;  %15401 = vmatpush1.bf16.msra.mxu1 %v18627_v53  ;;  %v18655_v11 = vpack.c.bf16 %v9856_v35, %v9855_v18  ;;  %v9827_v38 = vmul.f32 0.01, %v9763_v45  ;;  %v9828_v6 = vmul.f32 0.01, %v9764_v0  ;;  %v9857_v4 = vsel %vm9793_vm11, %v9761_v33, %v9825_v60 }
0x1dac   :  { %15354 = vmatprep.subr.bf16.mxu0 %v16413_v8  ;;  %15402 = vmatprep.subr.bf16.mxu1 %v16413_v8  ;;  %v9858_v51 = vsel %vm9794_vm12, %v9762_v17, %v9826_v24  ;;  %vm9795_vm13 = vcmp.ge.f32.partialorder %v9763_v45, 0.0  ;;  %vm9796_vm14 = vcmp.ge.f32.partialorder %v9764_v0, 0.0  ;;  %v9693_v55 = vmul.f32 %v18493_v20, %v18389_v52 }
0x1dad   :  { %v9694_v43 = vmul.f32 %v18493_v20, %v18391_v7  ;;  %v9730_v27 = vmul.f32 %v18500_v25, %v9691_v12  ;;  %v9731_v14 = vmul.f32 %v18500_v25, %v9692_v30  ;;  %v9767_v63 = vadd.f32 %v18509_v49, %v9728_v54 }
0x1dae   :  { %v9768_v15 = vadd.f32 %v18509_v49, %v9729_v22  ;;  %v18669_v21 = vpack.c.bf16 %v9858_v51, %v9857_v4  ;;  %v9829_v2 = vmul.f32 0.01, %v9765_v19  ;;  %v9830_v40 = vmul.f32 0.01, %v9766_v31  ;;  %v9873_v4 = vld [vmem:[#allocation29 + $0x10] sm:$0xff] }
0x1daf   :  { %15356 = vmatpush1.bf16.msra.mxu0 %v18641_v37  ;;  %15404 = vmatpush1.bf16.msra.mxu1 %v18641_v37  ;;  %v9859_v52 = vsel %vm9795_vm13, %v9763_v45, %v9827_v38  ;;  %v9860_v44 = vsel %vm9796_vm14, %v9764_v0, %v9828_v6  ;;  %vm9797_vm15 = vcmp.ge.f32.partialorder %v9765_v19, 0.0  ;;  %vm9798_vm0 = vcmp.ge.f32.partialorder %v9766_v31, 0.0  ;;  %v9874_v38 = vld [vmem:[#allocation29 + $0x18] sm:$0xff]  ;;  %v10298_v51 = vld [vmem:[#allocation29 + $0x210] sm:$0xff] }
0x1db0   :  { %15357 = vmatprep.subr.bf16.mxu0 %v16413_v8  ;;  %15405 = vmatprep.subr.bf16.mxu1 %v16413_v8  ;;  %v9695_v7 = vmul.f32 %v18493_v20, %v18393_v39  ;;  %v9696_v46 = vmul.f32 %v18493_v20, %v18395_v42  ;;  %v9732_v48 = vmul.f32 %v18500_v25, %v9693_v55  ;;  %v9831_v5 = vmul.f32 0.01, %v9767_v63  ;;  %v10299_v6 = vld [vmem:[#allocation29 + $0x218] sm:$0xff]  ;;  %v9876_v55 = vld [vmem:[#allocation29 + $0x28] sm:$0xff] }
0x1db1   :  { %v9733_v50 = vmul.f32 %v18500_v25, %v9694_v43  ;;  %v9769_v57 = vadd.f32 %v18509_v49, %v9730_v27  ;;  %v9770_v29 = vadd.f32 %v18509_v49, %v9731_v14  ;;  %v18683_v28 = vpack.c.bf16 %v9860_v44, %v9859_v52  ;;  %v10301_v43 = vld [vmem:[#allocation29 + $0x228] sm:$0xff]  ;;  %v9875_v27 = vld [vmem:[#allocation29 + $0x20] sm:$0xff] }
0x1db2   :  { %v9832_v13 = vmul.f32 0.01, %v9768_v15  ;;  %v9861_v39 = vsel %vm9797_vm15, %v9765_v19, %v9829_v2  ;;  %v9862_v62 = vsel %vm9798_vm0, %v9766_v31, %v9830_v40  ;;  %vm9799_vm3 = vcmp.ge.f32.partialorder %v9767_v63, 0.0  ;;  %v9871_v19 = vld [vmem:[#allocation29] sm:$0xff]  ;;  %v10302_v2 = vld [vmem:[#allocation29 + $0x230] sm:$0xff]  ;;  %v9880_v40 = vld [vmem:[#allocation29 + $0x48] sm:$0xff] }
0x1db3   :  { %15359 = vmatpush1.bf16.msra.mxu0 %v18655_v11  ;;  %15407 = vmatpush1.bf16.msra.mxu1 %v18655_v11  ;;  %vm9800_vm2 = vcmp.ge.f32.partialorder %v9768_v15, 0.0  ;;  %v9734_v42 = vmul.f32 %v18500_v25, %v9695_v7  ;;  %v9735_v20 = vmul.f32 %v18500_v25, %v9696_v46  ;;  %v9771_v16 = vadd.f32 %v18509_v49, %v9732_v48  ;;  %v10296_v31 = vld [vmem:[#allocation29 + $0x200] sm:$0xff]  ;;  %v9882_v7 = vld [vmem:[#allocation29 + $0x58] sm:$0xff]  ;;  %v9881_v46 = vld [vmem:[#allocation29 + $0x50] sm:$0xff] }
0x1db4   :  { %15360 = vmatprep.subr.bf16.mxu0 %v16413_v8  ;;  %15408 = vmatprep.subr.bf16.mxu1 %v16413_v8  ;;  %v9772_v33 = vadd.f32 %v18509_v49, %v9733_v50  ;;  %v18693_v17 = vpack.c.bf16 %v9862_v62, %v9861_v39  ;;  %v9833_v34 = vmul.f32 0.01, %v9769_v57  ;;  %v9834_v47 = vmul.f32 0.01, %v9770_v29  ;;  %v10300_v14 = vld [vmem:[#allocation29 + $0x220] sm:$0xff]  ;;  %v10306_v48 = vld [vmem:[#allocation29 + $0x250] sm:$0xff] }
0x1db5   :  { %v9863_v32 = vsel %vm9799_vm3, %v9767_v63, %v9831_v5  ;;  %v9864_v61 = vsel %vm9800_vm2, %v9768_v15, %v9832_v13  ;;  %vm9801_vm4 = vcmp.ge.f32.partialorder %v9769_v57, 0.0  ;;  %vm9802_vm5 = vcmp.ge.f32.partialorder %v9770_v29, 0.0  ;;  %v9878_v63 = vld [vmem:[#allocation29 + $0x38] sm:$0xff]  ;;  %v9877_v15 = vld [vmem:[#allocation29 + $0x30] sm:$0xff]  ;;  %v9879_v52 = vld [vmem:[#allocation29 + $0x40] sm:$0xff] }
0x1db6   :  { %v9773_v25 = vadd.f32 %v18509_v49, %v9734_v42  ;;  %v9774_v26 = vadd.f32 %v18509_v49, %v9735_v20  ;;  %v18701_v10 = vpack.c.bf16 %v9864_v61, %v9863_v32  ;;  %v9835_v36 = vmul.f32 0.01, %v9771_v16  ;;  %v10304_v44 = vld [vmem:[#allocation29 + $0x240] sm:$0xff]  ;;  %v9884_v50 = vld [vmem:[#allocation29 + $0x68] sm:$0xff]  ;;  %v9886_v5 = vld [vmem:[#allocation29 + $0x78] sm:$0xff] }
0x1db7   :  { %15362 = vmatpush1.bf16.msra.mxu0 %v18669_v21  ;;  %15410 = vmatpush1.bf16.msra.mxu1 %v18669_v21  ;;  %v9836_v23 = vmul.f32 0.01, %v9772_v33  ;;  %v9865_v45 = vsel %vm9801_vm4, %v9769_v57, %v9833_v34  ;;  %v9866_v0 = vsel %vm9802_vm5, %v9770_v29, %v9834_v47  ;;  %vm9803_vm6 = vcmp.ge.f32.partialorder %v9771_v16, 0.0  ;;  %v9883_v57 = vld [vmem:[#allocation29 + $0x60] sm:$0xff]  ;;  %v9885_v13 = vld [vmem:[#allocation29 + $0x70] sm:$0xff]  ;;  %v9888_v62 = vld [vmem:[#allocation29 + $0x88] sm:$0xff] }
0x1db8   :  { %15363 = vmatprep.subr.bf16.mxu0 %v16413_v8  ;;  %15411 = vmatprep.subr.bf16.mxu1 %v16413_v8  ;;  %vm9804_vm7 = vcmp.ge.f32.partialorder %v9772_v33, 0.0  ;;  %v18707_v60 = vpack.c.bf16 %v9866_v0, %v9865_v45  ;;  %v9837_v24 = vmul.f32 0.01, %v9773_v25  ;;  %v9838_v49 = vmul.f32 0.01, %v9774_v26  ;;  %v10308_v29 = vld [vmem:[#allocation29 + $0x260] sm:$0xff] }
0x1db9   :  { %v9867_v18 = vsel %vm9803_vm6, %v9771_v16, %v9835_v36  ;;  %v9868_v35 = vsel %vm9804_vm7, %v9772_v33, %v9836_v23  ;;  %vm9805_vm9 = vcmp.ge.f32.partialorder %v9773_v25, 0.0  ;;  %vm9806_vm10 = vcmp.ge.f32.partialorder %v9774_v26, 0.0  ;;  %v10310_v39 = vld [vmem:[#allocation29 + $0x270] sm:$0xff]  ;;  %v9887_v42 = vld [vmem:[#allocation29 + $0x80] sm:$0xff]  ;;  %v9890_v16 = vld [vmem:[#allocation29 + $0x98] sm:$0xff] }
0x1dba   :  { %v18713_v12 = vpack.c.bf16 %v9868_v35, %v9867_v18  ;;  %v9869_v30 = vsel %vm9805_vm9, %v9773_v25, %v9837_v24  ;;  %v9870_v54 = vsel %vm9806_vm10, %v9774_v26, %v9838_v49  ;;  %v10312_v20 = vld [vmem:[#allocation29 + $0x280] sm:$0xff]  ;;  %v9889_v33 = vld [vmem:[#allocation29 + $0x90] sm:$0xff]  ;;  %v9892_v47 = vld [vmem:[#allocation29 + $0xa8] sm:$0xff] }
0x1dbb   :  { %15365 = vmatpush1.bf16.msra.mxu0 %v18683_v28  ;;  %15413 = vmatpush1.bf16.msra.mxu1 %v18683_v28  ;;  %v18719_v22 = vpack.c.bf16 %v9870_v54, %v9869_v30  ;;  %v10314_v34 = vld [vmem:[#allocation29 + $0x290] sm:$0xff]  ;;  %v9891_v32 = vld [vmem:[#allocation29 + $0xa0] sm:$0xff]  ;;  %v9894_v25 = vld [vmem:[#allocation29 + $0xb8] sm:$0xff] }
0x1dbc   :  { %15366 = vmatprep.subr.bf16.mxu0 %v16413_v8  ;;  %15414 = vmatprep.subr.bf16.mxu1 %v16413_v8  ;;  %v10316_v61 = vld [vmem:[#allocation29 + $0x2a0] sm:$0xff]  ;;  %v9893_v26 = vld [vmem:[#allocation29 + $0xb0] sm:$0xff]  ;;  %v9896_v23 = vld [vmem:[#allocation29 + $0xc8] sm:$0xff] }
0x1dbd   :  { %v10318_v36 = vld [vmem:[#allocation29 + $0x2b0] sm:$0xff]  ;;  %v9895_v45 = vld [vmem:[#allocation29 + $0xc0] sm:$0xff]  ;;  %v9898_v24 = vld [vmem:[#allocation29 + $0xd8] sm:$0xff] }
0x1dbe   :  { %v10320_v0 = vld [vmem:[#allocation29 + $0x2c0] sm:$0xff]  ;;  %v9897_v49 = vld [vmem:[#allocation29 + $0xd0] sm:$0xff]  ;;  %v9900_v35 = vld [vmem:[#allocation29 + $0xe8] sm:$0xff] }
0x1dbf   :  { %15368 = vmatpush1.bf16.msra.mxu0 %v18693_v17  ;;  %15416 = vmatpush1.bf16.msra.mxu1 %v18693_v17  ;;  %v10322_v18 = vld [vmem:[#allocation29 + $0x2d0] sm:$0xff]  ;;  %v9899_v30 = vld [vmem:[#allocation29 + $0xe0] sm:$0xff] }
0x1dc0   :  { %15369 = vmatprep.subr.bf16.mxu0 %v16413_v8  ;;  %15417 = vmatprep.subr.bf16.mxu1 %v16413_v8  ;;  %v10324_v54 = vld [vmem:[#allocation29 + $0x2e0] sm:$0xff] }
0x1dc3   :  { %15371 = vmatpush1.bf16.msra.mxu0 %v18701_v10  ;;  %15419 = vmatpush1.bf16.msra.mxu1 %v18701_v10 }
0x1dc4   :  { %15372 = vmatprep.subr.bf16.mxu0 %v16413_v8  ;;  %15420 = vmatprep.subr.bf16.mxu1 %v16413_v8 }
0x1dc7   :  { %15374 = vmatpush1.bf16.msra.mxu0 %v18707_v60  ;;  %15422 = vmatpush1.bf16.msra.mxu1 %v18707_v60 }
0x1dc8   :  { %15375 = vmatprep.subr.bf16.mxu0 %v16413_v8  ;;  %15423 = vmatprep.subr.bf16.mxu1 %v16413_v8 }
0x1dcb   :  { %15377 = vmatpush1.bf16.msra.mxu0 %v18713_v12  ;;  %15425 = vmatpush1.bf16.msra.mxu1 %v18713_v12 }
0x1dcc   :  { %15378 = vmatprep.subr.bf16.mxu0 %v16413_v8  ;;  %15426 = vmatprep.subr.bf16.mxu1 %v16413_v8 }
0x1dcf   :  { %15380 = vmatpush1.bf16.msra.mxu0 %v18719_v22  ;;  %15428 = vmatpush1.bf16.msra.mxu1 %v18719_v22 }
0x1dd0   :  { %15429 = vmatprep.subr.bf16.mxu0 %v16413_v8 }
0x1dd2   :  { %10000 = vmatmul.mubr.f32.vlgmr.msra.gmra.mrb[116].mxu0 %v9871_v19  ;;  %10425 = vmatmul.mubr.f32.vlgmr.msra.gmra.mrb[140].mxu1 %v10296_v31  ;;  %v9902_v19 = vld [vmem:[#allocation29 + $0xf8] sm:$0xff]  ;;  %v9901_v31 = vld [vmem:[#allocation29 + $0xf0] sm:$0xff] }
0x1dd3   :  { %15431 = vmatpush1.bf16.msra.mxu0 %v18543_v58  ;;  %10004 = vmatprep.mubr.f32.mxu0 %v9874_v38  ;;  %v10303_v58 = vld [vmem:[#allocation29 + $0x238] sm:$0xff]  ;;  %v10326_v38 = vld [vmem:[#allocation29 + $0x2f0] sm:$0xff] }
0x1dd4   :  { %10429 = vmatprep.mubr.f32.mxu1 %v10299_v6  ;;  %15432 = vmatprep.subr.bf16.mxu0 %v16413_v8  ;;  %v9904_v6 = vld [vmem:[#allocation29 + $0x108] sm:$0xff] }
0x1dd6   :  { %10005 = vmatmul.mubr.f32.gmra.mrb[118].mxu0 %v9873_v4  ;;  %10430 = vmatmul.mubr.f32.gmra.mrb[142].mxu1 %v10298_v51  ;;  %v9903_v4 = vld [vmem:[#allocation29 + $0x100] sm:$0xff] }
0x1dd7   :  { %15434 = vmatpush1.bf16.msra.mxu0 %v18557_v41  ;;  %10009 = vmatprep.mubr.f32.mxu0 %v9876_v55  ;;  %v10305_v41 = vld [vmem:[#allocation29 + $0x248] sm:$0xff]  ;;  %v10328_v51 = vld [vmem:[#allocation29 + $0x300] sm:$0xff]  ;;  %v9906_v55 = vld [vmem:[#allocation29 + $0x118] sm:$0xff] }
0x1dd8   :  { %10434 = vmatprep.mubr.f32.mxu1 %v10301_v43  ;;  %15435 = vmatprep.subr.bf16.mxu0 %v16413_v8  ;;  %v10331_v43 = vld [vmem:[#allocation29 + $0x318] sm:$0xff] }
0x1dda   :  { %10010 = vmatmul.mubr.f32.gmra.mrb[120].mxu0 %v9875_v27  ;;  %10435 = vmatmul.mubr.f32.gmra.mrb[144].mxu1 %v10300_v14  ;;  %v10330_v27 = vld [vmem:[#allocation29 + $0x310] sm:$0xff]  ;;  %v9908_v14 = vld [vmem:[#allocation29 + $0x128] sm:$0xff] }
0x1ddb   :  { %15437 = vmatpush1.bf16.msra.mxu0 %v18571_v56  ;;  %10014 = vmatprep.mubr.f32.mxu0 %v9878_v63  ;;  %v10307_v56 = vld [vmem:[#allocation29 + $0x258] sm:$0xff]  ;;  %v9907_v63 = vld [vmem:[#allocation29 + $0x120] sm:$0xff] }
0x1ddc   :  { %10439 = vmatprep.mubr.f32.mxu1 %v10303_v58  ;;  %15438 = vmatprep.subr.bf16.mxu0 %v16413_v8  ;;  %v9910_v58 = vld [vmem:[#allocation29 + $0x138] sm:$0xff] }
0x1dde   :  { %10015 = vmatmul.mubr.f32.gmra.mrb[122].mxu0 %v9877_v15  ;;  %10440 = vmatmul.mubr.f32.gmra.mrb[146].mxu1 %v10302_v2  ;;  %v10335_v15 = vld [vmem:[#allocation29 + $0x338] sm:$0xff]  ;;  %v9909_v2 = vld [vmem:[#allocation29 + $0x130] sm:$0xff] }
0x1ddf   :  { %15440 = vmatpush1.bf16.msra.mxu0 %v18585_v1  ;;  %10019 = vmatprep.mubr.f32.mxu0 %v9880_v40  ;;  %v10309_v1 = vld [vmem:[#allocation29 + $0x268] sm:$0xff]  ;;  %v10334_v40 = vld [vmem:[#allocation29 + $0x330] sm:$0xff] }
0x1de0   :  { %10444 = vmatprep.mubr.f32.mxu1 %v10305_v41  ;;  %15441 = vmatprep.subr.bf16.mxu0 %v16413_v8  ;;  %v9912_v41 = vld [vmem:[#allocation29 + $0x148] sm:$0xff] }
0x1de2   :  { %10020 = vmatmul.mubr.f32.gmra.mrb[124].mxu0 %v9879_v52  ;;  %10445 = vmatmul.mubr.f32.gmra.mrb[148].mxu1 %v10304_v44  ;;  %v10337_v52 = vld [vmem:[#allocation29 + $0x348] sm:$0xff]  ;;  %v9911_v44 = vld [vmem:[#allocation29 + $0x140] sm:$0xff] }
0x1de3   :  { %15443 = vmatpush1.bf16.msra.mxu0 %v18599_v9  ;;  %10024 = vmatprep.mubr.f32.mxu0 %v9882_v7  ;;  %v10311_v9 = vld [vmem:[#allocation29 + $0x278] sm:$0xff]  ;;  %v10336_v7 = vld [vmem:[#allocation29 + $0x340] sm:$0xff] }
0x1de4   :  { %10449 = vmatprep.mubr.f32.mxu1 %v10307_v56  ;;  %15444 = vmatprep.subr.bf16.mxu0 %v16413_v8  ;;  %v9914_v56 = vld [vmem:[#allocation29 + $0x158] sm:$0xff] }
0x1de6   :  { %10025 = vmatmul.mubr.f32.gmra.mrb[126].mxu0 %v9881_v46  ;;  %10450 = vmatmul.mubr.f32.gmra.mrb[150].mxu1 %v10306_v48  ;;  %v10339_v46 = vld [vmem:[#allocation29 + $0x358] sm:$0xff]  ;;  %v9913_v48 = vld [vmem:[#allocation29 + $0x150] sm:$0xff] }
0x1de7   :  { %15446 = vmatpush1.bf16.msra.mxu0 %v18613_v3  ;;  %10029 = vmatprep.mubr.f32.mxu0 %v9884_v50  ;;  %v10313_v3 = vld [vmem:[#allocation29 + $0x288] sm:$0xff]  ;;  %v10338_v50 = vld [vmem:[#allocation29 + $0x350] sm:$0xff] }
0x1de8   :  { %10454 = vmatprep.mubr.f32.mxu1 %v10309_v1  ;;  %15447 = vmatprep.subr.bf16.mxu0 %v16413_v8  ;;  %v9916_v1 = vld [vmem:[#allocation29 + $0x168] sm:$0xff] }
0x1dea   :  { %10030 = vmatmul.mubr.f32.gmra.mrb[128].mxu0 %v9883_v57  ;;  %10455 = vmatmul.mubr.f32.gmra.mrb[152].mxu1 %v10308_v29  ;;  %v10341_v57 = vld [vmem:[#allocation29 + $0x368] sm:$0xff]  ;;  %v9915_v29 = vld [vmem:[#allocation29 + $0x160] sm:$0xff] }
0x1deb   :  { %15449 = vmatpush1.bf16.msra.mxu0 %v18627_v53  ;;  %10034 = vmatprep.mubr.f32.mxu0 %v9886_v5  ;;  %v10315_v53 = vld [vmem:[#allocation29 + $0x298] sm:$0xff]  ;;  %v10340_v5 = vld [vmem:[#allocation29 + $0x360] sm:$0xff] }
0x1dec   :  { %10459 = vmatprep.mubr.f32.mxu1 %v10311_v9  ;;  %15450 = vmatprep.subr.bf16.mxu0 %v16413_v8  ;;  %v9918_v9 = vld [vmem:[#allocation29 + $0x178] sm:$0xff] }
0x1dee   :  { %10035 = vmatmul.mubr.f32.gmra.mrb[130].mxu0 %v9885_v13  ;;  %10460 = vmatmul.mubr.f32.gmra.mrb[154].mxu1 %v10310_v39  ;;  %v10343_v13 = vld [vmem:[#allocation29 + $0x378] sm:$0xff]  ;;  %v9917_v39 = vld [vmem:[#allocation29 + $0x170] sm:$0xff] }
0x1def   :  { %15452 = vmatpush1.bf16.msra.mxu0 %v18641_v37  ;;  %10039 = vmatprep.mubr.f32.mxu0 %v9888_v62  ;;  %v10317_v37 = vld [vmem:[#allocation29 + $0x2a8] sm:$0xff]  ;;  %v10342_v62 = vld [vmem:[#allocation29 + $0x370] sm:$0xff] }
0x1df0   :  { %10464 = vmatprep.mubr.f32.mxu1 %v10313_v3  ;;  %15453 = vmatprep.subr.bf16.mxu0 %v16413_v8  ;;  %v9920_v3 = vld [vmem:[#allocation29 + $0x188] sm:$0xff] }
0x1df2   :  { %10040 = vmatmul.mubr.f32.gmra.mrb[132].mxu0 %v9887_v42  ;;  %10465 = vmatmul.mubr.f32.gmra.mrb[156].mxu1 %v10312_v20  ;;  %v10345_v42 = vld [vmem:[#allocation29 + $0x388] sm:$0xff]  ;;  %v9919_v20 = vld [vmem:[#allocation29 + $0x180] sm:$0xff] }
0x1df3   :  { %15455 = vmatpush1.bf16.msra.mxu0 %v18655_v11  ;;  %10044 = vmatprep.mubr.f32.mxu0 %v9890_v16  ;;  %v10319_v11 = vld [vmem:[#allocation29 + $0x2b8] sm:$0xff]  ;;  %v10344_v16 = vld [vmem:[#allocation29 + $0x380] sm:$0xff] }
0x1df4   :  { %10469 = vmatprep.mubr.f32.mxu1 %v10315_v53  ;;  %15456 = vmatprep.subr.bf16.mxu0 %v16413_v8  ;;  %v9922_v53 = vld [vmem:[#allocation29 + $0x198] sm:$0xff] }
0x1df6   :  { %10045 = vmatmul.mubr.f32.gmra.mrb[134].mxu0 %v9889_v33  ;;  %10470 = vmatmul.mubr.f32.gmra.mrb[158].mxu1 %v10314_v34  ;;  %v10347_v33 = vld [vmem:[#allocation29 + $0x398] sm:$0xff]  ;;  %v9921_v34 = vld [vmem:[#allocation29 + $0x190] sm:$0xff] }
0x1df7   :  { %15458 = vmatpush1.bf16.msra.mxu0 %v18669_v21  ;;  %10049 = vmatprep.mubr.f32.mxu0 %v9892_v47  ;;  %v10321_v21 = vld [vmem:[#allocation29 + $0x2c8] sm:$0xff]  ;;  %v10346_v47 = vld [vmem:[#allocation29 + $0x390] sm:$0xff] }
0x1df8   :  { %10474 = vmatprep.mubr.f32.mxu1 %v10317_v37  ;;  %15459 = vmatprep.subr.bf16.mxu0 %v16413_v8  ;;  %v9924_v37 = vld [vmem:[#allocation29 + $0x1a8] sm:$0xff] }
0x1dfa   :  { %10050 = vmatmul.mubr.f32.gmra.mrb[136].mxu0 %v9891_v32  ;;  %10475 = vmatmul.mubr.f32.gmra.mrb[160].mxu1 %v10316_v61  ;;  %v10349_v32 = vld [vmem:[#allocation29 + $0x3a8] sm:$0xff]  ;;  %v9923_v61 = vld [vmem:[#allocation29 + $0x1a0] sm:$0xff] }
0x1dfb   :  { %15461 = vmatpush1.bf16.msra.mxu0 %v18683_v28  ;;  %10054 = vmatprep.mubr.f32.mxu0 %v9894_v25  ;;  %v10323_v28 = vld [vmem:[#allocation29 + $0x2d8] sm:$0xff]  ;;  %v10348_v25 = vld [vmem:[#allocation29 + $0x3a0] sm:$0xff] }
0x1dfc   :  { %10479 = vmatprep.mubr.f32.mxu1 %v10319_v11  ;;  %15462 = vmatprep.subr.bf16.mxu0 %v16413_v8  ;;  %v9926_v11 = vld [vmem:[#allocation29 + $0x1b8] sm:$0xff] }
0x1dfe   :  { %10055 = vmatmul.mubr.f32.gmra.mrb[138].mxu0 %v9893_v26  ;;  %10480 = vmatmul.mubr.f32.gmra.mrb[162].mxu1 %v10318_v36  ;;  %v10351_v26 = vld [vmem:[#allocation29 + $0x3b8] sm:$0xff]  ;;  %v9925_v36 = vld [vmem:[#allocation29 + $0x1b0] sm:$0xff] }
0x1dff   :  { %15464 = vmatpush1.bf16.msra.mxu0 %v18693_v17  ;;  %10059 = vmatprep.mubr.f32.mxu0 %v9896_v23  ;;  %v10325_v17 = vld [vmem:[#allocation29 + $0x2e8] sm:$0xff]  ;;  %v10350_v23 = vld [vmem:[#allocation29 + $0x3b0] sm:$0xff] }
0x1e00   :  { %10484 = vmatprep.mubr.f32.mxu1 %v10321_v21  ;;  %15465 = vmatprep.subr.bf16.mxu0 %v16413_v8  ;;  %v9928_v21 = vld [vmem:[#allocation29 + $0x1c8] sm:$0xff] }
0x1e02   :  { %10060 = vmatmul.mubr.f32.gmra.mrb[140].mxu0 %v9895_v45  ;;  %10485 = vmatmul.mubr.f32.gmra.mrb[164].mxu1 %v10320_v0  ;;  %v10353_v45 = vld [vmem:[#allocation29 + $0x3c8] sm:$0xff]  ;;  %v9927_v0 = vld [vmem:[#allocation29 + $0x1c0] sm:$0xff] }
0x1e03   :  { %15467 = vmatpush1.bf16.msra.mxu0 %v18701_v10  ;;  %10064 = vmatprep.mubr.f32.mxu0 %v9898_v24  ;;  %v10327_v10 = vld [vmem:[#allocation29 + $0x2f8] sm:$0xff]  ;;  %v10352_v24 = vld [vmem:[#allocation29 + $0x3c0] sm:$0xff] }
0x1e04   :  { %10489 = vmatprep.mubr.f32.mxu1 %v10323_v28  ;;  %15468 = vmatprep.subr.bf16.mxu0 %v16413_v8  ;;  %v9930_v28 = vld [vmem:[#allocation29 + $0x1d8] sm:$0xff] }
0x1e06   :  { %10065 = vmatmul.mubr.f32.gmra.mrb[142].mxu0 %v9897_v49  ;;  %10490 = vmatmul.mubr.f32.gmra.mrb[166].mxu1 %v10322_v18  ;;  %v10355_v49 = vld [vmem:[#allocation29 + $0x3d8] sm:$0xff]  ;;  %v9929_v18 = vld [vmem:[#allocation29 + $0x1d0] sm:$0xff] }
0x1e07   :  { %15470 = vmatpush1.bf16.msra.mxu0 %v18707_v60  ;;  %10069 = vmatprep.mubr.f32.mxu0 %v9900_v35  ;;  %v10329_v60 = vld [vmem:[#allocation29 + $0x308] sm:$0xff]  ;;  %v10354_v35 = vld [vmem:[#allocation29 + $0x3d0] sm:$0xff] }
0x1e08   :  { %10494 = vmatprep.mubr.f32.mxu1 %v10325_v17  ;;  %15471 = vmatprep.subr.bf16.mxu0 %v16413_v8  ;;  %v9932_v17 = vld [vmem:[#allocation29 + $0x1e8] sm:$0xff] }
0x1e0a   :  { %10070 = vmatmul.mubr.f32.gmra.mrb[144].mxu0 %v9899_v30  ;;  %10495 = vmatmul.mubr.f32.gmra.mrb[168].mxu1 %v10324_v54  ;;  %v10357_v30 = vld [vmem:[#allocation29 + $0x3e8] sm:$0xff]  ;;  %v9931_v54 = vld [vmem:[#allocation29 + $0x1e0] sm:$0xff] }
0x1e0b   :  { %15473 = vmatpush1.bf16.msra.mxu0 %v18713_v12  ;;  %10074 = vmatprep.mubr.f32.mxu0 %v9902_v19  ;;  %v9905_v12 = vld [vmem:[#allocation29 + $0x110] sm:$0xff]  ;;  %v10356_v19 = vld [vmem:[#allocation29 + $0x3e0] sm:$0xff] }
0x1e0c   :  { %10499 = vmatprep.mubr.f32.mxu1 %v10327_v10  ;;  %15474 = vmatprep.subr.bf16.mxu0 %v16413_v8  ;;  %v10333_v8 = vld [vmem:[#allocation29 + $0x328] sm:$0xff]  ;;  %v9934_v10 = vld [vmem:[#allocation29 + $0x1f8] sm:$0xff] }
0x1e0e   :  { %10075 = vmatmul.mubr.f32.gmra.mrb[146].mxu0 %v9901_v31  ;;  %10500 = vmatmul.mubr.f32.gmra.mrb[170].mxu1 %v10326_v38  ;;  %v10359_v31 = vld [vmem:[#allocation29 + $0x3f8] sm:$0xff]  ;;  %v9933_v38 = vld [vmem:[#allocation29 + $0x1f0] sm:$0xff] }
0x1e0f   :  { %15476 = vmatpush1.bf16.msra.mxu0 %v18719_v22  ;;  %10079 = vmatprep.mubr.f32.mxu0 %v9904_v6  ;;  %v10332_v22 = vld [vmem:[#allocation29 + $0x320] sm:$0xff]  ;;  %v10358_v6 = vld [vmem:[#allocation29 + $0x3f0] sm:$0xff] }
0x1e10   :  { %10504 = vmatprep.mubr.f32.mxu1 %v10329_v60  ;;  %v10755_v60 = vld [vmem:[#allocation29 + $0x408] sm:$0xff] }
0x1e12   :  { %10080 = vmatmul.mubr.f32.gmra.mrb[148].mxu0 %v9903_v4  ;;  %10505 = vmatmul.mubr.f32.gmra.mrb[172].mxu1 %v10328_v51  ;;  %v10754_v4 = vld [vmem:[#allocation29 + $0x400] sm:$0xff]  ;;  %v10757_v51 = vld [vmem:[#allocation29 + $0x418] sm:$0xff] }
0x1e13   :  { %10084 = vmatprep.mubr.f32.mxu0 %v9906_v55  ;;  %10509 = vmatprep.mubr.f32.mxu1 %v10331_v43  ;;  %v10756_v55 = vld [vmem:[#allocation29 + $0x410] sm:$0xff]  ;;  %v10759_v43 = vld [vmem:[#allocation29 + $0x428] sm:$0xff] }
0x1e16   :  { %10085 = vmatmul.mubr.f32.gmra.mrb[150].mxu0 %v9905_v12  ;;  %10510 = vmatmul.mubr.f32.gmra.mrb[174].mxu1 %v10330_v27  ;;  %v10758_v12 = vld [vmem:[#allocation29 + $0x420] sm:$0xff]  ;;  %v10761_v27 = vld [vmem:[#allocation29 + $0x438] sm:$0xff] }
0x1e17   :  { %10089 = vmatprep.mubr.f32.mxu0 %v9908_v14  ;;  %10514 = vmatprep.mubr.f32.mxu1 %v10333_v8  ;;  %v10760_v14 = vld [vmem:[#allocation29 + $0x430] sm:$0xff]  ;;  %v10763_v8 = vld [vmem:[#allocation29 + $0x448] sm:$0xff] }
0x1e1a   :  { %10090 = vmatmul.mubr.f32.gmra.mrb[152].mxu0 %v9907_v63  ;;  %10515 = vmatmul.mubr.f32.gmra.mrb[176].mxu1 %v10332_v22  ;;  %v10762_v63 = vld [vmem:[#allocation29 + $0x440] sm:$0xff]  ;;  %v10765_v22 = vld [vmem:[#allocation29 + $0x458] sm:$0xff] }
0x1e1b   :  { %10094 = vmatprep.mubr.f32.mxu0 %v9910_v58  ;;  %10519 = vmatprep.mubr.f32.mxu1 %v10335_v15  ;;  %v10764_v58 = vld [vmem:[#allocation29 + $0x450] sm:$0xff]  ;;  %v10767_v15 = vld [vmem:[#allocation29 + $0x468] sm:$0xff] }
0x1e1e   :  { %10095 = vmatmul.mubr.f32.gmra.mrb[154].mxu0 %v9909_v2  ;;  %10520 = vmatmul.mubr.f32.gmra.mrb[178].mxu1 %v10334_v40  ;;  %v10766_v2 = vld [vmem:[#allocation29 + $0x460] sm:$0xff]  ;;  %v10769_v40 = vld [vmem:[#allocation29 + $0x478] sm:$0xff] }
0x1e1f   :  { %10099 = vmatprep.mubr.f32.mxu0 %v9912_v41  ;;  %10524 = vmatprep.mubr.f32.mxu1 %v10337_v52  ;;  %v10768_v41 = vld [vmem:[#allocation29 + $0x470] sm:$0xff]  ;;  %v10771_v52 = vld [vmem:[#allocation29 + $0x488] sm:$0xff] }
0x1e22   :  { %10100 = vmatmul.mubr.f32.gmra.mrb[156].mxu0 %v9911_v44  ;;  %10525 = vmatmul.mubr.f32.gmra.mrb[180].mxu1 %v10336_v7  ;;  %v10770_v44 = vld [vmem:[#allocation29 + $0x480] sm:$0xff]  ;;  %v10773_v7 = vld [vmem:[#allocation29 + $0x498] sm:$0xff] }
0x1e23   :  { %10104 = vmatprep.mubr.f32.mxu0 %v9914_v56  ;;  %10529 = vmatprep.mubr.f32.mxu1 %v10339_v46  ;;  %v10772_v56 = vld [vmem:[#allocation29 + $0x490] sm:$0xff]  ;;  %v10775_v46 = vld [vmem:[#allocation29 + $0x4a8] sm:$0xff] }
0x1e26   :  { %10105 = vmatmul.mubr.f32.gmra.mrb[158].mxu0 %v9913_v48  ;;  %10530 = vmatmul.mubr.f32.gmra.mrb[182].mxu1 %v10338_v50  ;;  %v10774_v48 = vld [vmem:[#allocation29 + $0x4a0] sm:$0xff]  ;;  %v10777_v50 = vld [vmem:[#allocation29 + $0x4b8] sm:$0xff] }
0x1e27   :  { %10109 = vmatprep.mubr.f32.mxu0 %v9916_v1  ;;  %10534 = vmatprep.mubr.f32.mxu1 %v10341_v57  ;;  %v10776_v1 = vld [vmem:[#allocation29 + $0x4b0] sm:$0xff]  ;;  %v10779_v57 = vld [vmem:[#allocation29 + $0x4c8] sm:$0xff] }
0x1e2a   :  { %10110 = vmatmul.mubr.f32.gmra.mrb[160].mxu0 %v9915_v29  ;;  %10535 = vmatmul.mubr.f32.gmra.mrb[184].mxu1 %v10340_v5  ;;  %v10778_v29 = vld [vmem:[#allocation29 + $0x4c0] sm:$0xff]  ;;  %v10781_v5 = vld [vmem:[#allocation29 + $0x4d8] sm:$0xff] }
0x1e2b   :  { %10114 = vmatprep.mubr.f32.mxu0 %v9918_v9  ;;  %10539 = vmatprep.mubr.f32.mxu1 %v10343_v13  ;;  %v10780_v9 = vld [vmem:[#allocation29 + $0x4d0] sm:$0xff]  ;;  %v10783_v13 = vld [vmem:[#allocation29 + $0x4e8] sm:$0xff] }
0x1e2e   :  { %10115 = vmatmul.mubr.f32.gmra.mrb[162].mxu0 %v9917_v39  ;;  %10540 = vmatmul.mubr.f32.gmra.mrb[186].mxu1 %v10342_v62  ;;  %v10782_v39 = vld [vmem:[#allocation29 + $0x4e0] sm:$0xff]  ;;  %v10785_v62 = vld [vmem:[#allocation29 + $0x4f8] sm:$0xff] }
0x1e2f   :  { %10119 = vmatprep.mubr.f32.mxu0 %v9920_v3  ;;  %10544 = vmatprep.mubr.f32.mxu1 %v10345_v42  ;;  %v10784_v3 = vld [vmem:[#allocation29 + $0x4f0] sm:$0xff]  ;;  %v10787_v42 = vld [vmem:[#allocation29 + $0x508] sm:$0xff] }
0x1e32   :  { %10120 = vmatmul.mubr.f32.gmra.mrb[164].mxu0 %v9919_v20  ;;  %10545 = vmatmul.mubr.f32.gmra.mrb[188].mxu1 %v10344_v16  ;;  %v10786_v20 = vld [vmem:[#allocation29 + $0x500] sm:$0xff]  ;;  %v10789_v16 = vld [vmem:[#allocation29 + $0x518] sm:$0xff] }
0x1e33   :  { %10124 = vmatprep.mubr.f32.mxu0 %v9922_v53  ;;  %10549 = vmatprep.mubr.f32.mxu1 %v10347_v33  ;;  %v10788_v53 = vld [vmem:[#allocation29 + $0x510] sm:$0xff]  ;;  %v10791_v33 = vld [vmem:[#allocation29 + $0x528] sm:$0xff] }
0x1e36   :  { %10125 = vmatmul.mubr.f32.gmra.mrb[166].mxu0 %v9921_v34  ;;  %10550 = vmatmul.mubr.f32.gmra.mrb[190].mxu1 %v10346_v47  ;;  %v10790_v34 = vld [vmem:[#allocation29 + $0x520] sm:$0xff]  ;;  %v10793_v47 = vld [vmem:[#allocation29 + $0x538] sm:$0xff] }
0x1e37   :  { %10129 = vmatprep.mubr.f32.mxu0 %v9924_v37  ;;  %10554 = vmatprep.mubr.f32.mxu1 %v10349_v32  ;;  %v10792_v37 = vld [vmem:[#allocation29 + $0x530] sm:$0xff]  ;;  %v10795_v32 = vld [vmem:[#allocation29 + $0x548] sm:$0xff] }
0x1e3a   :  { %10130 = vmatmul.mubr.f32.gmra.mrb[168].mxu0 %v9923_v61  ;;  %10555 = vmatmul.mubr.f32.gmra.mrb[192].mxu1 %v10348_v25  ;;  %v10794_v61 = vld [vmem:[#allocation29 + $0x540] sm:$0xff]  ;;  %v10797_v25 = vld [vmem:[#allocation29 + $0x558] sm:$0xff] }
0x1e3b   :  { %10134 = vmatprep.mubr.f32.mxu0 %v9926_v11  ;;  %10559 = vmatprep.mubr.f32.mxu1 %v10351_v26  ;;  %v18755_v11 = vld [vmem:[#allocation20] ss:$0 sm:$0xff]  ;;  %v10796_v26 = vld [vmem:[#allocation29 + $0x550] sm:$0xff] }
0x1e3e   :  { %10135 = vmatmul.mubr.f32.gmra.mrb[170].mxu0 %v9925_v36  ;;  %10560 = vmatmul.mubr.f32.gmra.mrb[194].mxu1 %v10350_v23  ;;  %v18757_v36 = vld [vmem:[#allocation20 + $0x1] ss:$0 sm:$0xff] }
0x1e3f   :  { %10139 = vmatprep.mubr.f32.mxu0 %v9928_v21  ;;  %10564 = vmatprep.mubr.f32.mxu1 %v10353_v45  ;;  %v10799_v23 = vld [vmem:[#allocation29 + $0x568] sm:$0xff] }
0x1e42   :  { %10140 = vmatmul.mubr.f32.gmra.mrb[172].mxu0 %v9927_v0  ;;  %10565 = vmatmul.mubr.f32.gmra.mrb[196].mxu1 %v10352_v24 }
0x1e43   :  { %10144 = vmatprep.mubr.f32.mxu0 %v9930_v28  ;;  %10569 = vmatprep.mubr.f32.mxu1 %v10355_v49 }
0x1e46   :  { %10145 = vmatmul.mubr.f32.gmra.mrb[174].mxu0 %v9929_v18  ;;  %10570 = vmatmul.mubr.f32.gmra.mrb[198].mxu1 %v10354_v35  ;;  %v10798_v18 = vld [vmem:[#allocation29 + $0x560] sm:$0xff] }
0x1e47   :  { %10149 = vmatprep.mubr.f32.mxu0 %v9932_v17  ;;  %10574 = vmatprep.mubr.f32.mxu1 %v10357_v30  ;;  %v10801_v17 = vld [vmem:[#allocation29 + $0x578] sm:$0xff] }
0x1e4a   :  { %10150 = vmatmul.mubr.f32.gmra.mrb[176].mxu0 %v9931_v54  ;;  %10575 = vmatmul.mubr.f32.gmra.mrb[200].mxu1 %v10356_v19 }
0x1e4b   :  { %10154 = vmatprep.mubr.f32.mxu0 %v9934_v10  ;;  %10579 = vmatprep.mubr.f32.mxu1 %v10359_v31 }
0x1e4e   :  { %10155 = vmatmul.mubr.f32.gmra.mrb[178].mxu0 %v9933_v38  ;;  %10580 = vmatmul.mubr.f32.gmra.mrb[202].mxu1 %v10358_v6 }
0x1e4f   :  { %10882 = vmatprep.mubr.f32.mxu0 %v10755_v60  ;;  %v10800_v60 = vld [vmem:[#allocation29 + $0x570] sm:$0xff] }
0x1e52   :  { %10883 = vmatmul.mubr.f32.vlgmr.msra.gmra.mrb[180].mxu0 %v10754_v4 }
0x1e53   :  { %10887 = vmatprep.mubr.f32.mxu0 %v10757_v51  ;;  %v10803_v51 = vld [vmem:[#allocation29 + $0x588] sm:$0xff] }
0x1e56   :  { %10888 = vmatmul.mubr.f32.gmra.mrb[182].mxu0 %v10756_v55 }
0x1e57   :  { %10892 = vmatprep.mubr.f32.mxu0 %v10759_v43 }
0x1e5a   :  { %10893 = vmatmul.mubr.f32.gmra.mrb[184].mxu0 %v10758_v12 }
0x1e5b   :  { %10897 = vmatprep.mubr.f32.mxu0 %v10761_v27 }
0x1e5e   :  { %10898 = vmatmul.mubr.f32.gmra.mrb[186].mxu0 %v10760_v14 }
0x1e5f   :  { %10902 = vmatprep.mubr.f32.mxu0 %v10763_v8 }
0x1e62   :  { %10903 = vmatmul.mubr.f32.gmra.mrb[188].mxu0 %v10762_v63 }
0x1e63   :  { %10907 = vmatprep.mubr.f32.mxu0 %v10765_v22  ;;  %v10802_v22 = vld [vmem:[#allocation29 + $0x580] sm:$0xff] }
0x1e66   :  { %10908 = vmatmul.mubr.f32.gmra.mrb[190].mxu0 %v10764_v58 }
0x1e67   :  { %10912 = vmatprep.mubr.f32.mxu0 %v10767_v15  ;;  %v10805_v15 = vld [vmem:[#allocation29 + $0x598] sm:$0xff] }
0x1e6a   :  { %10913 = vmatmul.mubr.f32.gmra.mrb[192].mxu0 %v10766_v2 }
0x1e6b   :  { %10917 = vmatprep.mubr.f32.mxu0 %v10769_v40 }
0x1e6e   :  { %10918 = vmatmul.mubr.f32.gmra.mrb[194].mxu0 %v10768_v41 }
0x1e6f   :  { %10922 = vmatprep.mubr.f32.mxu0 %v10771_v52 }
0x1e72   :  { %10923 = vmatmul.mubr.f32.gmra.mrb[196].mxu0 %v10770_v44 }
0x1e73   :  { %10927 = vmatprep.mubr.f32.mxu0 %v10773_v7 }
0x1e76   :  { %10928 = vmatmul.mubr.f32.gmra.mrb[198].mxu0 %v10772_v56 }
0x1e77   :  { %10932 = vmatprep.mubr.f32.mxu0 %v10775_v46  ;;  %v10804_v46 = vld [vmem:[#allocation29 + $0x590] sm:$0xff] }
0x1e7a   :  { %10933 = vmatmul.mubr.f32.gmra.mrb[200].mxu0 %v10774_v48 }
0x1e7b   :  { %10937 = vmatprep.mubr.f32.mxu0 %v10777_v50  ;;  %v10807_v50 = vld [vmem:[#allocation29 + $0x5a8] sm:$0xff] }
0x1e7e   :  { %10938 = vmatmul.mubr.f32.gmra.mrb[202].mxu0 %v10776_v1 }
0x1e7f   :  { %10942 = vmatprep.mubr.f32.mxu0 %v10779_v57 }
0x1e82   :  { %10943 = vmatmul.mubr.f32.gmra.mrb[204].mxu0 %v10778_v29 }
0x1e83   :  { %10947 = vmatprep.mubr.f32.mxu0 %v10781_v5 }
0x1e86   :  { %10948 = vmatmul.mubr.f32.gmra.mrb[206].mxu0 %v10780_v9 }
0x1e87   :  { %10952 = vmatprep.mubr.f32.mxu0 %v10783_v13 }
0x1e8a   :  { %10953 = vmatmul.mubr.f32.gmra.mrb[208].mxu0 %v10782_v39 }
0x1e8b   :  { %10957 = vmatprep.mubr.f32.mxu0 %v10785_v62  ;;  %v10806_v62 = vld [vmem:[#allocation29 + $0x5a0] sm:$0xff] }
0x1e8e   :  { %10958 = vmatmul.mubr.f32.gmra.mrb[210].mxu0 %v10784_v3 }
0x1e8f   :  { %10962 = vmatprep.mubr.f32.mxu0 %v10787_v42  ;;  %v10809_v42 = vld [vmem:[#allocation29 + $0x5b8] sm:$0xff] }
0x1e92   :  { %10963 = vmatmul.mubr.f32.gmra.mrb[212].mxu0 %v10786_v20 }
0x1e93   :  { %10967 = vmatprep.mubr.f32.mxu0 %v10789_v16 }
0x1e96   :  { %10968 = vmatmul.mubr.f32.gmra.mrb[214].mxu0 %v10788_v53 }
0x1e97   :  { %10972 = vmatprep.mubr.f32.mxu0 %v10791_v33 }
0x1e9a   :  { %10973 = vmatmul.mubr.f32.gmra.mrb[216].mxu0 %v10790_v34 }
0x1e9b   :  { %10977 = vmatprep.mubr.f32.mxu0 %v10793_v47 }
0x1e9e   :  { %10978 = vmatmul.mubr.f32.gmra.mrb[218].mxu0 %v10792_v37 }
0x1e9f   :  { %10982 = vmatprep.mubr.f32.mxu0 %v10795_v32  ;;  %v10808_v32 = vld [vmem:[#allocation29 + $0x5b0] sm:$0xff] }
0x1ea2   :  { %10983 = vmatmul.mubr.f32.gmra.mrb[220].mxu0 %v10794_v61 }
0x1ea3   :  { %10987 = vmatprep.mubr.f32.mxu0 %v10797_v25  ;;  %v10811_v25 = vld [vmem:[#allocation29 + $0x5c8] sm:$0xff] }
0x1ea5   :  { %v10001_v21 = vpop.f32.mrb[116].mxu0  ;;  %v10426_v45 = vpop.f32.mrb[140].mxu1 }
0x1ea6   :  { %v10167_v0 = vmul.f32 %v18755_v11, %v10001_v21  ;;  %v10003_v24 = vpop.f32.mrb[117].mxu0  ;;  %10988 = vmatmul.mubr.f32.gmra.mrb[222].mxu0 %v10796_v26  ;;  %v10593_v28 = vmul.f32 %v18757_v36, %v10426_v45  ;;  %v10428_v49 = vpop.f32.mrb[141].mxu1 }
0x1ea7   :  { %10992 = vmatprep.mubr.f32.mxu0 %v10799_v23  ;;  %v10810_v49 = vld [vmem:[#allocation29 + $0x5c0] sm:$0xff] }
0x1ea8   :  { %v10199_v35 = vsel %vm1374_vm1, %v10167_v0, 0.0  ;;  %v10625_v38 = vsel %vm1374_vm1, %v10593_v28, 0.0 }
0x1ea9   :  { %10200 = vadd.xlane.f32.xlu0 %v10199_v35  ;;  %v10006_v30 = vpop.f32.mrb[118].mxu0  ;;  %v10431_v54 = vpop.f32.mrb[142].mxu1  ;;  %v10813_v35 = vld [vmem:[#allocation29 + $0x5d8] sm:$0xff] }
0x1eaa   :  { %v10168_v19 = vmul.f32 %v18755_v11, %v10006_v30  ;;  %v10008_v10 = vpop.f32.mrb[119].mxu0  ;;  %10993 = vmatmul.mubr.f32.gmra.mrb[224].mxu0 %v10798_v18  ;;  %v10594_v31 = vmul.f32 %v18757_v36, %v10431_v54  ;;  %v10433_v6 = vpop.f32.mrb[143].mxu1 }
0x1eab   :  { %10997 = vmatprep.mubr.f32.mxu0 %v10801_v17  ;;  %v10812_v6 = vld [vmem:[#allocation29 + $0x5d0] sm:$0xff] }
0x1eac   :  { %v10202_v4 = vsel %vm1374_vm1, %v10168_v19, 0.0  ;;  %v10628_v8 = vsel %vm1374_vm1, %v10594_v31, 0.0 }
0x1ead   :  { %10626 = vadd.xlane.f32.xlu0 %v10625_v38  ;;  %10203 = vadd.xlane.f32.xlu1 %v10202_v4  ;;  %v10011_v55 = vpop.f32.mrb[120].mxu0  ;;  %v10436_v43 = vpop.f32.mrb[144].mxu1  ;;  %v10815_v4 = vld [vmem:[#allocation29 + $0x5e8] sm:$0xff] }
0x1eae   :  { %v10169_v12 = vmul.f32 %v18755_v11, %v10011_v55  ;;  %v10013_v27 = vpop.f32.mrb[121].mxu0  ;;  %10998 = vmatmul.mubr.f32.gmra.mrb[226].mxu0 %v10800_v60  ;;  %v10595_v14 = vmul.f32 %v18757_v36, %v10436_v43  ;;  %v10438_v63 = vpop.f32.mrb[145].mxu1 }
0x1eaf   :  { %11002 = vmatprep.mubr.f32.mxu0 %v10803_v51  ;;  %v10814_v63 = vld [vmem:[#allocation29 + $0x5e0] sm:$0xff] }
0x1eb0   :  { %v10205_v58 = vsel %vm1374_vm1, %v10169_v12, 0.0  ;;  %v10631_v7 = vsel %vm1374_vm1, %v10595_v14, 0.0 }
0x1eb1   :  { %10629 = vadd.xlane.f32.xlu1 %v10628_v8  ;;  %10206 = vadd.xlane.f32.xlu0 %v10205_v58  ;;  %v10016_v2 = vpop.f32.mrb[122].mxu0  ;;  %v10441_v40 = vpop.f32.mrb[146].mxu1  ;;  %v10817_v58 = vld [vmem:[#allocation29 + $0x5f8] sm:$0xff] }
0x1eb2   :  { %v10170_v41 = vmul.f32 %v18755_v11, %v10016_v2  ;;  %v10018_v52 = vpop.f32.mrb[123].mxu0  ;;  %11003 = vmatmul.mubr.f32.gmra.mrb[228].mxu0 %v10802_v22  ;;  %v10596_v44 = vmul.f32 %v18757_v36, %v10441_v40  ;;  %v10443_v56 = vpop.f32.mrb[147].mxu1 }
0x1eb3   :  { %11007 = vmatprep.mubr.f32.mxu0 %v10805_v15  ;;  %v10816_v56 = vld [vmem:[#allocation29 + $0x5f0] sm:$0xff] }
0x1eb4   :  { %v10208_v48 = vsel %vm1374_vm1, %v10170_v41, 0.0  ;;  %v10634_v13 = vsel %vm1374_vm1, %v10596_v44, 0.0 }
0x1eb5   :  { %10632 = vadd.xlane.f32.xlu0 %v10631_v7  ;;  %10209 = vadd.xlane.f32.xlu1 %v10208_v48  ;;  %v10021_v1 = vpop.f32.mrb[124].mxu0  ;;  %v10446_v57 = vpop.f32.mrb[148].mxu1 }
0x1eb6   :  { %v10171_v29 = vmul.f32 %v18755_v11, %v10021_v1  ;;  %v10023_v5 = vpop.f32.mrb[125].mxu0  ;;  %11008 = vmatmul.mubr.f32.gmra.mrb[230].mxu0 %v10804_v46  ;;  %v10597_v9 = vmul.f32 %v18757_v36, %v10446_v57  ;;  %v10448_v39 = vpop.f32.mrb[149].mxu1 }
0x1eb7   :  { %11012 = vmatprep.mubr.f32.mxu0 %v10807_v50 }
0x1eb8   :  { %v10211_v3 = vsel %vm1374_vm1, %v10171_v29, 0.0  ;;  %v10637_v47 = vsel %vm1374_vm1, %v10597_v9, 0.0 }
0x1eb9   :  { %10635 = vadd.xlane.f32.xlu1 %v10634_v13  ;;  %10212 = vadd.xlane.f32.xlu0 %v10211_v3  ;;  %v10026_v20 = vpop.f32.mrb[126].mxu0  ;;  %v10451_v16 = vpop.f32.mrb[150].mxu1 }
0x1eba   :  { %v10172_v53 = vmul.f32 %v18755_v11, %v10026_v20  ;;  %v10028_v33 = vpop.f32.mrb[127].mxu0  ;;  %11013 = vmatmul.mubr.f32.gmra.mrb[232].mxu0 %v10806_v62  ;;  %v10598_v34 = vmul.f32 %v18757_v36, %v10451_v16  ;;  %v10453_v37 = vpop.f32.mrb[151].mxu1 }
0x1ebb   :  { %11017 = vmatprep.mubr.f32.mxu0 %v10809_v42 }
0x1ebc   :  { %v10214_v61 = vsel %vm1374_vm1, %v10172_v53, 0.0  ;;  %v10640_v24 = vsel %vm1374_vm1, %v10598_v34, 0.0 }
0x1ebd   :  { %10638 = vadd.xlane.f32.xlu0 %v10637_v47  ;;  %10215 = vadd.xlane.f32.xlu1 %v10214_v61  ;;  %v10031_v26 = vpop.f32.mrb[128].mxu0  ;;  %v10456_v23 = vpop.f32.mrb[152].mxu1 }
0x1ebe   :  { %v10173_v21 = vmul.f32 %v18755_v11, %v10031_v26  ;;  %v10033_v45 = vpop.f32.mrb[129].mxu0  ;;  %11018 = vmatmul.mubr.f32.gmra.mrb[234].mxu0 %v10808_v32  ;;  %v10599_v0 = vmul.f32 %v18757_v36, %v10456_v23  ;;  %v10458_v28 = vpop.f32.mrb[153].mxu1 }
0x1ebf   :  { %11022 = vmatprep.mubr.f32.mxu0 %v10811_v25 }
0x1ec0   :  { %v10217_v18 = vsel %vm1374_vm1, %v10173_v21, 0.0  ;;  %v10643_v31 = vsel %vm1374_vm1, %v10599_v0, 0.0 }
0x1ec1   :  { %10641 = vadd.xlane.f32.xlu1 %v10640_v24  ;;  %10218 = vadd.xlane.f32.xlu0 %v10217_v18  ;;  %v10036_v17 = vpop.f32.mrb[130].mxu0  ;;  %v10461_v30 = vpop.f32.mrb[154].mxu1 }
0x1ec2   :  { %v10174_v54 = vmul.f32 %v18755_v11, %v10036_v17  ;;  %v10038_v19 = vpop.f32.mrb[131].mxu0  ;;  %11023 = vmatmul.mubr.f32.gmra.mrb[236].mxu0 %v10810_v49  ;;  %v10600_v10 = vmul.f32 %v18757_v36, %v10461_v30  ;;  %v10463_v38 = vpop.f32.mrb[155].mxu1 }
0x1ec3   :  { %11027 = vmatprep.mubr.f32.mxu0 %v10813_v35 }
0x1ec4   :  { %v10220_v60 = vsel %vm1374_vm1, %v10174_v54, 0.0  ;;  %v10646_v14 = vsel %vm1374_vm1, %v10600_v10, 0.0 }
0x1ec5   :  { %10644 = vadd.xlane.f32.xlu0 %v10643_v31  ;;  %10221 = vadd.xlane.f32.xlu1 %v10220_v60  ;;  %v10041_v51 = vpop.f32.mrb[132].mxu0  ;;  %v10466_v55 = vpop.f32.mrb[156].mxu1 }
0x1ec6   :  { %v10175_v43 = vmul.f32 %v18755_v11, %v10041_v51  ;;  %v10043_v12 = vpop.f32.mrb[133].mxu0  ;;  %11028 = vmatmul.mubr.f32.gmra.mrb[238].mxu0 %v10812_v6  ;;  %v10601_v27 = vmul.f32 %v18757_v36, %v10466_v55  ;;  %v10468_v8 = vpop.f32.mrb[157].mxu1 }
0x1ec7   :  { %11032 = vmatprep.mubr.f32.mxu0 %v10815_v4 }
0x1ec8   :  { %v10223_v22 = vsel %vm1374_vm1, %v10175_v43, 0.0  ;;  %v10649_v44 = vsel %vm1374_vm1, %v10601_v27, 0.0 }
0x1ec9   :  { %10647 = vadd.xlane.f32.xlu1 %v10646_v14  ;;  %10224 = vadd.xlane.f32.xlu0 %v10223_v22  ;;  %v10046_v15 = vpop.f32.mrb[134].mxu0  ;;  %v10471_v2 = vpop.f32.mrb[158].mxu1 }
0x1eca   :  { %v10176_v40 = vmul.f32 %v18755_v11, %v10046_v15  ;;  %v10048_v41 = vpop.f32.mrb[135].mxu0  ;;  %11033 = vmatmul.mubr.f32.gmra.mrb[240].mxu0 %v10814_v63  ;;  %v10602_v52 = vmul.f32 %v18757_v36, %v10471_v2  ;;  %v10473_v7 = vpop.f32.mrb[159].mxu1 }
0x1ecb   :  { %11037 = vmatprep.mubr.f32.mxu0 %v10817_v58 }
0x1ecc   :  { %v10226_v46 = vsel %vm1374_vm1, %v10176_v40, 0.0  ;;  %v10652_v5 = vsel %vm1374_vm1, %v10602_v52, 0.0 }
0x1ecd   :  { %10650 = vadd.xlane.f32.xlu0 %v10649_v44  ;;  %10227 = vadd.xlane.f32.xlu1 %v10226_v46  ;;  %v10051_v48 = vpop.f32.mrb[136].mxu0  ;;  %v10476_v50 = vpop.f32.mrb[160].mxu1 }
0x1ece   :  { %v10177_v1 = vmul.f32 %v18755_v11, %v10051_v48  ;;  %v10053_v57 = vpop.f32.mrb[137].mxu0  ;;  %11038 = vmatmul.mubr.f32.gmra.mrb[242].mxu0 %v10816_v56  ;;  %v10603_v29 = vmul.f32 %v18757_v36, %v10476_v50  ;;  %v10478_v9 = vpop.f32.mrb[161].mxu1 }
0x1ed0   :  { %v10229_v13 = vsel %vm1374_vm1, %v10177_v1, 0.0  ;;  %v10655_v16 = vsel %vm1374_vm1, %v10603_v29, 0.0 }
0x1ed1   :  { %10653 = vadd.xlane.f32.xlu1 %v10652_v5  ;;  %10230 = vadd.xlane.f32.xlu0 %v10229_v13  ;;  %v10056_v39 = vpop.f32.mrb[138].mxu0  ;;  %v10481_v62 = vpop.f32.mrb[162].mxu1 }
0x1ed2   :  { %v10178_v3 = vmul.f32 %v18755_v11, %v10056_v39  ;;  %v10058_v42 = vpop.f32.mrb[139].mxu0  ;;  %v10604_v20 = vmul.f32 %v18757_v36, %v10481_v62  ;;  %v10483_v53 = vpop.f32.mrb[163].mxu1 }
0x1ed4   :  { %v10232_v33 = vsel %vm1374_vm1, %v10178_v3, 0.0  ;;  %v10658_v25 = vsel %vm1374_vm1, %v10604_v20, 0.0 }
0x1ed5   :  { %10656 = vadd.xlane.f32.xlu0 %v10655_v16  ;;  %10233 = vadd.xlane.f32.xlu1 %v10232_v33  ;;  %v10061_v34 = vpop.f32.mrb[140].mxu0  ;;  %v10486_v47 = vpop.f32.mrb[164].mxu1 }
0x1ed6   :  { %v10179_v37 = vmul.f32 %v18755_v11, %v10061_v34  ;;  %v10063_v32 = vpop.f32.mrb[141].mxu0  ;;  %v10605_v61 = vmul.f32 %v18757_v36, %v10486_v47  ;;  %v10488_v26 = vpop.f32.mrb[165].mxu1 }
0x1ed8   :  { %v10235_v23 = vsel %vm1374_vm1, %v10179_v37, 0.0  ;;  %v10661_v49 = vsel %vm1374_vm1, %v10605_v61, 0.0 }
0x1ed9   :  { %10659 = vadd.xlane.f32.xlu1 %v10658_v25  ;;  %10236 = vadd.xlane.f32.xlu0 %v10235_v23  ;;  %v10066_v21 = vpop.f32.mrb[142].mxu0  ;;  %v10491_v45 = vpop.f32.mrb[166].mxu1 }
0x1eda   :  { %v10180_v0 = vmul.f32 %v18755_v11, %v10066_v21  ;;  %v10068_v24 = vpop.f32.mrb[143].mxu0  ;;  %v10606_v28 = vmul.f32 %v18757_v36, %v10491_v45  ;;  %v10493_v18 = vpop.f32.mrb[167].mxu1 }
0x1edc   :  { %v10238_v35 = vsel %vm1374_vm1, %v10180_v0, 0.0  ;;  %v10664_v31 = vsel %vm1374_vm1, %v10606_v28, 0.0 }
0x1edd   :  { %10662 = vadd.xlane.f32.xlu0 %v10661_v49  ;;  %10239 = vadd.xlane.f32.xlu1 %v10238_v35  ;;  %v10071_v17 = vpop.f32.mrb[144].mxu0  ;;  %v10496_v30 = vpop.f32.mrb[168].mxu1 }
0x1ede   :  { %v10181_v54 = vmul.f32 %v18755_v11, %v10071_v17  ;;  %v10073_v19 = vpop.f32.mrb[145].mxu0  ;;  %v10607_v10 = vmul.f32 %v18757_v36, %v10496_v30  ;;  %v10498_v38 = vpop.f32.mrb[169].mxu1 }
0x1ee0   :  { %v10241_v6 = vsel %vm1374_vm1, %v10181_v54, 0.0  ;;  %v10667_v27 = vsel %vm1374_vm1, %v10607_v10, 0.0 }
0x1ee1   :  { %10665 = vadd.xlane.f32.xlu1 %v10664_v31  ;;  %10242 = vadd.xlane.f32.xlu0 %v10241_v6  ;;  %v10076_v60 = vpop.f32.mrb[146].mxu0  ;;  %v10501_v4 = vpop.f32.mrb[170].mxu1 }
0x1ee2   :  { %v10182_v51 = vmul.f32 %v18755_v11, %v10076_v60  ;;  %v10078_v55 = vpop.f32.mrb[147].mxu0  ;;  %v10608_v43 = vmul.f32 %v18757_v36, %v10501_v4  ;;  %v10503_v12 = vpop.f32.mrb[171].mxu1 }
0x1ee4   :  { %v10244_v14 = vsel %vm1374_vm1, %v10182_v51, 0.0  ;;  %v10670_v15 = vsel %vm1374_vm1, %v10608_v43, 0.0 }
0x1ee5   :  { %v10506_v8 = vpop.f32.mrb[172].mxu1  ;;  %10668 = vadd.xlane.f32.xlu0 %v10667_v27  ;;  %10245 = vadd.xlane.f32.xlu1 %v10244_v14  ;;  %v10081_v63 = vpop.f32.mrb[148].mxu0 }
0x1ee6   :  { %v10609_v22 = vmul.f32 %v18757_v36, %v10506_v8  ;;  %v10083_v58 = vpop.f32.mrb[149].mxu0  ;;  %v10508_v2 = vpop.f32.mrb[173].mxu1  ;;  %v10183_v40 = vmul.f32 %v18755_v11, %v10081_v63 }
0x1ee8   :  { %v10673_v41 = vsel %vm1374_vm1, %v10609_v22, 0.0  ;;  %v10247_v50 = vsel %vm1374_vm1, %v10183_v40, 0.0 }
0x1ee9   :  { %10674 = vadd.xlane.f32.xlu0 %v10673_v41  ;;  %10671 = vadd.xlane.f32.xlu1 %v10670_v15  ;;  %v10086_v52 = vpop.f32.mrb[150].mxu0  ;;  %v10511_v44 = vpop.f32.mrb[174].mxu1 }
0x1eea   :  { %v10184_v7 = vmul.f32 %v18755_v11, %v10086_v52  ;;  %v10088_v56 = vpop.f32.mrb[151].mxu0  ;;  %v10610_v46 = vmul.f32 %v18757_v36, %v10511_v44  ;;  %v10513_v48 = vpop.f32.mrb[175].mxu1 }
0x1eec   :  { %v10250_v1 = vsel %vm1374_vm1, %v10184_v7, 0.0  ;;  %v10676_v39 = vsel %vm1374_vm1, %v10610_v46, 0.0 }
0x1eed   :  { %10248 = vadd.xlane.f32.xlu1 %v10247_v50  ;;  %10251 = vadd.xlane.f32.xlu0 %v10250_v1  ;;  %v10091_v57 = vpop.f32.mrb[152].mxu0  ;;  %v10516_v29 = vpop.f32.mrb[176].mxu1 }
0x1eee   :  { %v10185_v5 = vmul.f32 %v18755_v11, %v10091_v57  ;;  %v10093_v9 = vpop.f32.mrb[153].mxu0  ;;  %v10611_v13 = vmul.f32 %v18757_v36, %v10516_v29  ;;  %v10518_v62 = vpop.f32.mrb[177].mxu1 }
0x1ef0   :  { %v10253_v3 = vsel %vm1374_vm1, %v10185_v5, 0.0  ;;  %v10679_v34 = vsel %vm1374_vm1, %v10611_v13, 0.0 }
0x1ef1   :  { %10677 = vadd.xlane.f32.xlu1 %v10676_v39  ;;  %10254 = vadd.xlane.f32.xlu0 %v10253_v3  ;;  %v10096_v42 = vpop.f32.mrb[154].mxu0  ;;  %v10521_v20 = vpop.f32.mrb[178].mxu1 }
0x1ef2   :  { %v10186_v16 = vmul.f32 %v18755_v11, %v10096_v42  ;;  %v10098_v53 = vpop.f32.mrb[155].mxu0  ;;  %v10612_v33 = vmul.f32 %v18757_v36, %v10521_v20  ;;  %v10523_v47 = vpop.f32.mrb[179].mxu1 }
0x1ef4   :  { %v10256_v37 = vsel %vm1374_vm1, %v10186_v16, 0.0  ;;  %v10682_v21 = vsel %vm1374_vm1, %v10612_v33, 0.0 }
0x1ef5   :  { %10680 = vadd.xlane.f32.xlu0 %v10679_v34  ;;  %10257 = vadd.xlane.f32.xlu1 %v10256_v37  ;;  %v10101_v32 = vpop.f32.mrb[156].mxu0  ;;  %v10526_v61 = vpop.f32.mrb[180].mxu1 }
0x1ef6   :  { %v10187_v25 = vmul.f32 %v18755_v11, %v10101_v32  ;;  %v10103_v26 = vpop.f32.mrb[157].mxu0  ;;  %v10613_v23 = vmul.f32 %v18757_v36, %v10526_v61  ;;  %v10528_v45 = vpop.f32.mrb[181].mxu1 }
0x1ef8   :  { %v10259_v0 = vsel %vm1374_vm1, %v10187_v25, 0.0  ;;  %v10685_v17 = vsel %vm1374_vm1, %v10613_v23, 0.0 }
0x1ef9   :  { %10683 = vadd.xlane.f32.xlu1 %v10682_v21  ;;  %10260 = vadd.xlane.f32.xlu0 %v10259_v0  ;;  %v10106_v24 = vpop.f32.mrb[158].mxu0  ;;  %v10531_v28 = vpop.f32.mrb[182].mxu1 }
0x1efa   :  { %v10188_v49 = vmul.f32 %v18755_v11, %v10106_v24  ;;  %v10108_v18 = vpop.f32.mrb[159].mxu0  ;;  %v10614_v35 = vmul.f32 %v18757_v36, %v10531_v28  ;;  %v10533_v30 = vpop.f32.mrb[183].mxu1 }
0x1efc   :  { %v10262_v54 = vsel %vm1374_vm1, %v10188_v49, 0.0  ;;  %v10688_v60 = vsel %vm1374_vm1, %v10614_v35, 0.0 }
0x1efd   :  { %10686 = vadd.xlane.f32.xlu0 %v10685_v17  ;;  %10263 = vadd.xlane.f32.xlu1 %v10262_v54  ;;  %v10111_v19 = vpop.f32.mrb[160].mxu0  ;;  %v10536_v10 = vpop.f32.mrb[184].mxu1 }
0x1efe   :  { %v10189_v31 = vmul.f32 %v18755_v11, %v10111_v19  ;;  %v10113_v38 = vpop.f32.mrb[161].mxu0  ;;  %v10615_v6 = vmul.f32 %v18757_v36, %v10536_v10  ;;  %v10538_v4 = vpop.f32.mrb[185].mxu1 }
0x1f00   :  { %v10265_v51 = vsel %vm1374_vm1, %v10189_v31, 0.0  ;;  %v10691_v8 = vsel %vm1374_vm1, %v10615_v6, 0.0 }
0x1f01   :  { %10689 = vadd.xlane.f32.xlu1 %v10688_v60  ;;  %10266 = vadd.xlane.f32.xlu0 %v10265_v51  ;;  %v10116_v55 = vpop.f32.mrb[162].mxu0  ;;  %v10541_v43 = vpop.f32.mrb[186].mxu1 }
0x1f02   :  { %v10190_v12 = vmul.f32 %v18755_v11, %v10116_v55  ;;  %v10118_v27 = vpop.f32.mrb[163].mxu0  ;;  %v10616_v14 = vmul.f32 %v18757_v36, %v10541_v43  ;;  %v10543_v63 = vpop.f32.mrb[187].mxu1 }
0x1f04   :  { %v10268_v22 = vsel %vm1374_vm1, %v10190_v12, 0.0  ;;  %v10694_v52 = vsel %vm1374_vm1, %v10616_v14, 0.0 }
0x1f05   :  { %10692 = vadd.xlane.f32.xlu0 %v10691_v8  ;;  %10269 = vadd.xlane.f32.xlu1 %v10268_v22  ;;  %v10121_v58 = vpop.f32.mrb[164].mxu0  ;;  %v10546_v15 = vpop.f32.mrb[188].mxu1 }
0x1f06   :  { %v10191_v2 = vmul.f32 %v18755_v11, %v10121_v58  ;;  %v10123_v40 = vpop.f32.mrb[165].mxu0  ;;  %v10617_v41 = vmul.f32 %v18757_v36, %v10546_v15  ;;  %v10548_v44 = vpop.f32.mrb[189].mxu1 }
0x1f08   :  { %v10271_v7 = vsel %vm1374_vm1, %v10191_v2, 0.0  ;;  %v10697_v57 = vsel %vm1374_vm1, %v10617_v41, 0.0  ;;  %v18885_v2 = vld [vmem:[#allocation20 + $0x2] ss:$0 sm:$0xff] }
0x1f09   :  { %10695 = vadd.xlane.f32.xlu1 %v10694_v52  ;;  %10272 = vadd.xlane.f32.xlu0 %v10271_v7  ;;  %v10126_v56 = vpop.f32.mrb[166].mxu0  ;;  %v10551_v46 = vpop.f32.mrb[190].mxu1 }
0x1f0a   :  { %v10192_v48 = vmul.f32 %v18755_v11, %v10126_v56  ;;  %v10128_v50 = vpop.f32.mrb[167].mxu0  ;;  %v10618_v1 = vmul.f32 %v18757_v36, %v10551_v46  ;;  %v10553_v29 = vpop.f32.mrb[191].mxu1 }
0x1f0c   :  { %v10274_v5 = vsel %vm1374_vm1, %v10192_v48, 0.0  ;;  %v10700_v42 = vsel %vm1374_vm1, %v10618_v1, 0.0 }
0x1f0d   :  { %10698 = vadd.xlane.f32.xlu0 %v10697_v57  ;;  %10275 = vadd.xlane.f32.xlu1 %v10274_v5  ;;  %v10131_v9 = vpop.f32.mrb[168].mxu0  ;;  %v10556_v13 = vpop.f32.mrb[192].mxu1 }
0x1f0e   :  { %v10193_v39 = vmul.f32 %v18755_v11, %v10131_v9  ;;  %v10133_v62 = vpop.f32.mrb[169].mxu0  ;;  %v10619_v3 = vmul.f32 %v18757_v36, %v10556_v13  ;;  %v10558_v20 = vpop.f32.mrb[193].mxu1 }
0x1f10   :  { %v10277_v16 = vsel %vm1374_vm1, %v10193_v39, 0.0  ;;  %v10703_v32 = vsel %vm1374_vm1, %v10619_v3, 0.0 }
0x1f11   :  { %10701 = vadd.xlane.f32.xlu1 %v10700_v42  ;;  %10278 = vadd.xlane.f32.xlu0 %v10277_v16  ;;  %v10136_v53 = vpop.f32.mrb[170].mxu0  ;;  %v10561_v33 = vpop.f32.mrb[194].mxu1 }
0x1f12   :  { %v10194_v34 = vmul.f32 %v18755_v11, %v10136_v53  ;;  %v10138_v47 = vpop.f32.mrb[171].mxu0  ;;  %v10620_v37 = vmul.f32 %v18757_v36, %v10561_v33  ;;  %v10563_v61 = vpop.f32.mrb[195].mxu1 }
0x1f14   :  { %v10280_v25 = vsel %vm1374_vm1, %v10194_v34, 0.0  ;;  %v10706_v24 = vsel %vm1374_vm1, %v10620_v37, 0.0 }
0x1f15   :  { %10704 = vadd.xlane.f32.xlu0 %v10703_v32  ;;  %10281 = vadd.xlane.f32.xlu1 %v10280_v25  ;;  %v10141_v26 = vpop.f32.mrb[172].mxu0  ;;  %v10566_v23 = vpop.f32.mrb[196].mxu1 }
0x1f16   :  { %v10195_v21 = vmul.f32 %v18755_v11, %v10141_v26  ;;  %v10143_v45 = vpop.f32.mrb[173].mxu0  ;;  %v10621_v0 = vmul.f32 %v18757_v36, %v10566_v23  ;;  %v10568_v28 = vpop.f32.mrb[197].mxu1 }
0x1f18   :  { %v10283_v49 = vsel %vm1374_vm1, %v10195_v21, 0.0  ;;  %v10709_v19 = vsel %vm1374_vm1, %v10621_v0, 0.0 }
0x1f19   :  { %10707 = vadd.xlane.f32.xlu1 %v10706_v24  ;;  %10284 = vadd.xlane.f32.xlu0 %v10283_v49  ;;  %v10146_v18 = vpop.f32.mrb[174].mxu0  ;;  %v10571_v35 = vpop.f32.mrb[198].mxu1 }
0x1f1a   :  { %v10196_v17 = vmul.f32 %v18755_v11, %v10146_v18  ;;  %v10148_v30 = vpop.f32.mrb[175].mxu0  ;;  %v10622_v54 = vmul.f32 %v18757_v36, %v10571_v35  ;;  %v10573_v10 = vpop.f32.mrb[199].mxu1 }
0x1f1c   :  { %v10286_v31 = vsel %vm1374_vm1, %v10196_v17, 0.0  ;;  %v10712_v55 = vsel %vm1374_vm1, %v10622_v54, 0.0 }
0x1f1d   :  { %10710 = vadd.xlane.f32.xlu0 %v10709_v19  ;;  %10287 = vadd.xlane.f32.xlu1 %v10286_v31  ;;  %v10151_v38 = vpop.f32.mrb[176].mxu0  ;;  %v10576_v6 = vpop.f32.mrb[200].mxu1 }
0x1f1e   :  { %v10197_v60 = vmul.f32 %v18755_v11, %v10151_v38  ;;  %v10153_v4 = vpop.f32.mrb[177].mxu0  ;;  %v10623_v51 = vmul.f32 %v18757_v36, %v10576_v6  ;;  %v10578_v43 = vpop.f32.mrb[201].mxu1 }
0x1f20   :  { %v10289_v12 = vsel %vm1374_vm1, %v10197_v60, 0.0  ;;  %v10715_v58 = vsel %vm1374_vm1, %v10623_v51, 0.0 }
0x1f21   :  { %10713 = vadd.xlane.f32.xlu1 %v10712_v55  ;;  %10290 = vadd.xlane.f32.xlu0 %v10289_v12  ;;  %v10156_v27 = vpop.f32.mrb[178].mxu0  ;;  %v10581_v14 = vpop.f32.mrb[202].mxu1 }
0x1f22   :  { %v10198_v8 = vmul.f32 %v18755_v11, %v10156_v27  ;;  %v10158_v63 = vpop.f32.mrb[179].mxu0  ;;  %v10624_v22 = vmul.f32 %v18757_v36, %v10581_v14  ;;  %v10583_v15 = vpop.f32.mrb[203].mxu1 }
0x1f24   :  { %v10292_v40 = vsel %vm1374_vm1, %v10198_v8, 0.0  ;;  %v10718_v7 = vsel %vm1374_vm1, %v10624_v22, 0.0 }
0x1f25   :  { %10716 = vadd.xlane.f32.xlu0 %v10715_v58  ;;  %10293 = vadd.xlane.f32.xlu1 %v10292_v40  ;;  %v10884_v41 = vpop.f32.mrb[180].mxu0 }
0x1f26   :  { %v11051_v52 = vmul.f32 %v18885_v2, %v10884_v41  ;;  %v10886_v44 = vpop.f32.mrb[181].mxu0 }
0x1f28   :  { %v11083_v11 = vsel %vm1374_vm1, %v11051_v52, 0.0 }
0x1f29   :  { %10719 = vadd.xlane.f32.xlu1 %v10718_v7  ;;  %11084 = vadd.xlane.f32.xlu0 %v11083_v11  ;;  %v10889_v36 = vpop.f32.mrb[182].mxu0 }
0x1f2a   :  { %v11052_v56 = vmul.f32 %v18885_v2, %v10889_v36  ;;  %v10891_v46 = vpop.f32.mrb[183].mxu0 }
0x1f2c   :  { %v11086_v48 = vsel %vm1374_vm1, %v11052_v56, 0.0 }
0x1f2d   :  { %11087 = vadd.xlane.f32.xlu1 %v11086_v48  ;;  %v10894_v50 = vpop.f32.mrb[184].mxu0 }
0x1f2e   :  { %v11053_v1 = vmul.f32 %v18885_v2, %v10894_v50  ;;  %v10896_v57 = vpop.f32.mrb[185].mxu0 }
0x1f30   :  { %v11089_v29 = vsel %vm1374_vm1, %v11053_v1, 0.0 }
0x1f31   :  { %11090 = vadd.xlane.f32.xlu0 %v11089_v29  ;;  %v10899_v5 = vpop.f32.mrb[186].mxu0 }
0x1f32   :  { %v11054_v9 = vmul.f32 %v18885_v2, %v10899_v5  ;;  %v10901_v13 = vpop.f32.mrb[187].mxu0 }
0x1f34   :  { %v11092_v39 = vsel %vm1374_vm1, %v11054_v9, 0.0 }
0x1f35   :  { %11093 = vadd.xlane.f32.xlu1 %v11092_v39  ;;  %v10904_v62 = vpop.f32.mrb[188].mxu0 }
0x1f36   :  { %v11055_v3 = vmul.f32 %v18885_v2, %v10904_v62  ;;  %v18898_v42 = vpop.xlane.xlu0 %10200  ;;  %v10906_v20 = vpop.f32.mrb[189].mxu0 }
0x1f38   :  { %v11095_v16 = vsel %vm1374_vm1, %v11055_v3, 0.0 }
0x1f39   :  { %11096 = vadd.xlane.f32.xlu0 %v11095_v16  ;;  %v10909_v53 = vpop.f32.mrb[190].mxu0 }
0x1f3a   :  { %v11056_v33 = vmul.f32 %v18885_v2, %v10909_v53  ;;  %v18902_v34 = vpop.xlane.xlu0 %10626  ;;  %v18904_v47 = vpop.xlane.xlu1 %10203 }
0x1f3b   :  { %v10911_v37 = vpop.f32.mrb[191].mxu0 }
0x1f3c   :  { %v11098_v32 = vsel %vm1374_vm1, %v11056_v33, 0.0 }
0x1f3d   :  { %11099 = vadd.xlane.f32.xlu1 %v11098_v32  ;;  %v10914_v61 = vpop.f32.mrb[192].mxu0 }
0x1f3e   :  { %v11057_v25 = vmul.f32 %v18885_v2, %v10914_v61  ;;  %v18908_v26 = vpop.xlane.xlu1 %10629  ;;  %v18910_v23 = vpop.xlane.xlu0 %10206 }
0x1f3f   :  { %v10916_v21 = vpop.f32.mrb[193].mxu0 }
0x1f40   :  { %v11101_v45 = vsel %vm1374_vm1, %v11057_v25, 0.0 }
0x1f41   :  { %11102 = vadd.xlane.f32.xlu0 %v11101_v45  ;;  %v10919_v0 = vpop.f32.mrb[194].mxu0 }
0x1f42   :  { %v11058_v24 = vmul.f32 %v18885_v2, %v10919_v0  ;;  %v18914_v28 = vpop.xlane.xlu0 %10632  ;;  %v18916_v49 = vpop.xlane.xlu1 %10209 }
0x1f43   :  { %v10921_v18 = vpop.f32.mrb[195].mxu0 }
0x1f44   :  { %v11104_v35 = vsel %vm1374_vm1, %v11058_v24, 0.0 }
0x1f45   :  { %11105 = vadd.xlane.f32.xlu1 %v11104_v35  ;;  %v10924_v17 = vpop.f32.mrb[196].mxu0 }
0x1f46   :  { %v11059_v30 = vmul.f32 %v18885_v2, %v10924_v17  ;;  %v18920_v54 = vpop.xlane.xlu1 %10635  ;;  %v18922_v19 = vpop.xlane.xlu0 %10212 }
0x1f47   :  { %v10926_v10 = vpop.f32.mrb[197].mxu0 }
0x1f48   :  { %v11107_v31 = vsel %vm1374_vm1, %v11059_v30, 0.0 }
0x1f49   :  { %11108 = vadd.xlane.f32.xlu0 %v11107_v31  ;;  %v10929_v38 = vpop.f32.mrb[198].mxu0 }
0x1f4a   :  { %v11060_v6 = vmul.f32 %v18885_v2, %v10929_v38  ;;  %v18926_v60 = vpop.xlane.xlu0 %10638  ;;  %v18928_v4 = vpop.xlane.xlu1 %10215 }
0x1f4b   :  { %v10931_v51 = vpop.f32.mrb[199].mxu0 }
0x1f4c   :  { %v11110_v55 = vsel %vm1374_vm1, %v11060_v6, 0.0 }
0x1f4d   :  { %11111 = vadd.xlane.f32.xlu1 %v11110_v55  ;;  %v10934_v43 = vpop.f32.mrb[200].mxu0 }
0x1f4e   :  { %v11061_v12 = vmul.f32 %v18885_v2, %v10934_v43  ;;  %v18932_v27 = vpop.xlane.xlu1 %10641  ;;  %v18934_v14 = vpop.xlane.xlu0 %10218 }
0x1f4f   :  { %v10936_v8 = vpop.f32.mrb[201].mxu0 }
0x1f50   :  { %v11113_v63 = vsel %vm1374_vm1, %v11061_v12, 0.0 }
0x1f51   :  { %11114 = vadd.xlane.f32.xlu0 %v11113_v63  ;;  %v10939_v22 = vpop.f32.mrb[202].mxu0 }
0x1f52   :  { %v11062_v58 = vmul.f32 %v18885_v2, %v10939_v22  ;;  %v18938_v15 = vpop.xlane.xlu0 %10644  ;;  %v18940_v40 = vpop.xlane.xlu1 %10221 }
0x1f53   :  { %v10941_v41 = vpop.f32.mrb[203].mxu0 }
0x1f54   :  { %v11116_v52 = vsel %vm1374_vm1, %v11062_v58, 0.0 }
0x1f55   :  { %11117 = vadd.xlane.f32.xlu1 %v11116_v52  ;;  %v10944_v44 = vpop.f32.mrb[204].mxu0 }
0x1f56   :  { %v11063_v7 = vmul.f32 %v18885_v2, %v10944_v44  ;;  %v18944_v11 = vpop.xlane.xlu1 %10647  ;;  %v18946_v36 = vpop.xlane.xlu0 %10224 }
0x1f57   :  { %v10946_v56 = vpop.f32.mrb[205].mxu0 }
0x1f58   :  { %v11119_v46 = vsel %vm1374_vm1, %v11063_v7, 0.0 }
0x1f59   :  { %11120 = vadd.xlane.f32.xlu0 %v11119_v46  ;;  %v10949_v48 = vpop.f32.mrb[206].mxu0 }
0x1f5a   :  { %v11064_v50 = vmul.f32 %v18885_v2, %v10949_v48  ;;  %v18950_v1 = vpop.xlane.xlu0 %10650  ;;  %v18952_v57 = vpop.xlane.xlu1 %10227 }
0x1f5b   :  { %v10951_v29 = vpop.f32.mrb[207].mxu0 }
0x1f5c   :  { %v11122_v5 = vsel %vm1374_vm1, %v11064_v50, 0.0 }
0x1f5d   :  { %11123 = vadd.xlane.f32.xlu1 %v11122_v5  ;;  %v10954_v9 = vpop.f32.mrb[208].mxu0 }
0x1f5e   :  { %v11065_v13 = vmul.f32 %v18885_v2, %v10954_v9  ;;  %v18956_v39 = vpop.xlane.xlu1 %10653  ;;  %v18958_v62 = vpop.xlane.xlu0 %10230 }
0x1f5f   :  { %v10956_v3 = vpop.f32.mrb[209].mxu0 }
0x1f60   :  { %v11125_v20 = vsel %vm1374_vm1, %v11065_v13, 0.0 }
0x1f61   :  { %11126 = vadd.xlane.f32.xlu0 %v11125_v20  ;;  %v10959_v16 = vpop.f32.mrb[210].mxu0 }
0x1f62   :  { %v11066_v53 = vmul.f32 %v18885_v2, %v10959_v16  ;;  %v18962_v33 = vpop.xlane.xlu0 %10656  ;;  %v18964_v37 = vpop.xlane.xlu1 %10233 }
0x1f63   :  { %v10961_v32 = vpop.f32.mrb[211].mxu0 }
0x1f64   :  { %v11128_v61 = vsel %vm1374_vm1, %v11066_v53, 0.0 }
0x1f65   :  { %11129 = vadd.xlane.f32.xlu1 %v11128_v61  ;;  %v10964_v25 = vpop.f32.mrb[212].mxu0 }
0x1f66   :  { %v11067_v21 = vmul.f32 %v18885_v2, %v10964_v25  ;;  %v18968_v45 = vpop.xlane.xlu1 %10659  ;;  %v18970_v0 = vpop.xlane.xlu0 %10236 }
0x1f67   :  { %v10966_v24 = vpop.f32.mrb[213].mxu0 }
0x1f68   :  { %v11131_v18 = vsel %vm1374_vm1, %v11067_v21, 0.0 }
0x1f69   :  { %11132 = vadd.xlane.f32.xlu0 %v11131_v18  ;;  %v10969_v35 = vpop.f32.mrb[214].mxu0 }
0x1f6a   :  { %v11068_v17 = vmul.f32 %v18885_v2, %v10969_v35  ;;  %v18974_v30 = vpop.xlane.xlu0 %10662  ;;  %v18976_v10 = vpop.xlane.xlu1 %10239 }
0x1f6b   :  { %v10971_v31 = vpop.f32.mrb[215].mxu0 }
0x1f6c   :  { %v11134_v38 = vsel %vm1374_vm1, %v11068_v17, 0.0 }
0x1f6d   :  { %11135 = vadd.xlane.f32.xlu1 %v11134_v38  ;;  %v10974_v6 = vpop.f32.mrb[216].mxu0 }
0x1f6e   :  { %v11069_v51 = vmul.f32 %v18885_v2, %v10974_v6  ;;  %v18980_v55 = vpop.xlane.xlu1 %10665  ;;  %v18982_v43 = vpop.xlane.xlu0 %10242 }
0x1f6f   :  { %v10976_v12 = vpop.f32.mrb[217].mxu0 }
0x1f70   :  { %v11137_v8 = vsel %vm1374_vm1, %v11069_v51, 0.0 }
0x1f71   :  { %11138 = vadd.xlane.f32.xlu0 %v11137_v8  ;;  %v10979_v63 = vpop.f32.mrb[218].mxu0 }
0x1f72   :  { %v11070_v22 = vmul.f32 %v18885_v2, %v10979_v63  ;;  %v18986_v58 = vpop.xlane.xlu0 %10668  ;;  %v18988_v41 = vpop.xlane.xlu1 %10245 }
0x1f73   :  { %v10981_v52 = vpop.f32.mrb[219].mxu0 }
0x1f74   :  { %v11140_v44 = vsel %vm1374_vm1, %v11070_v22, 0.0 }
0x1f75   :  { %11141 = vadd.xlane.f32.xlu1 %v11140_v44  ;;  %v10984_v7 = vpop.f32.mrb[220].mxu0 }
0x1f76   :  { %v11071_v56 = vmul.f32 %v18885_v2, %v10984_v7  ;;  %v10675_v46 = vpop.xlane.xlu0 %10674  ;;  %v18992_v48 = vpop.xlane.xlu1 %10671 }
0x1f77   :  { %v10986_v50 = vpop.f32.mrb[221].mxu0 }
0x1f78   :  { %v11143_v29 = vsel %vm1374_vm1, %v11071_v56, 0.0 }
0x1f79   :  { %11144 = vadd.xlane.f32.xlu0 %v11143_v29  ;;  %v10989_v5 = vpop.f32.mrb[222].mxu0 }
0x1f7a   :  { %v11072_v9 = vmul.f32 %v18885_v2, %v10989_v5  ;;  %v10249_v13 = vpop.xlane.xlu1 %10248  ;;  %v10252_v3 = vpop.xlane.xlu0 %10251 }
0x1f7b   :  { %v18996_v20 = vadd.f32 %v10675_v46, %v10249_v13  ;;  %v10991_v16 = vpop.f32.mrb[223].mxu0 }
0x1f7c   :  { %v11146_v53 = vsel %vm1374_vm1, %v11072_v9, 0.0 }
0x1f7d   :  { %11147 = vadd.xlane.f32.xlu1 %v11146_v53  ;;  %v10994_v32 = vpop.f32.mrb[224].mxu0 }
0x1f7e   :  { %v11073_v61 = vmul.f32 %v18885_v2, %v10994_v32  ;;  %v10678_v25 = vpop.xlane.xlu1 %10677  ;;  %v10255_v21 = vpop.xlane.xlu0 %10254 }
0x1f7f   :  { %v19000_v24 = vadd.f32 %v10678_v25, %v10252_v3  ;;  %v10996_v18 = vpop.f32.mrb[225].mxu0 }
0x1f80   :  { %v11149_v35 = vsel %vm1374_vm1, %v11073_v61, 0.0 }
0x1f81   :  { %11150 = vadd.xlane.f32.xlu0 %v11149_v35  ;;  %v10999_v17 = vpop.f32.mrb[226].mxu0 }
0x1f82   :  { %v11074_v31 = vmul.f32 %v18885_v2, %v10999_v17  ;;  %v10681_v38 = vpop.xlane.xlu0 %10680  ;;  %v10258_v6 = vpop.xlane.xlu1 %10257 }
0x1f83   :  { %v19004_v51 = vadd.f32 %v10681_v38, %v10255_v21  ;;  %v11001_v12 = vpop.f32.mrb[227].mxu0 }
0x1f84   :  { %v11152_v8 = vsel %vm1374_vm1, %v11074_v31, 0.0 }
0x1f85   :  { %11153 = vadd.xlane.f32.xlu1 %v11152_v8  ;;  %v11004_v63 = vpop.f32.mrb[228].mxu0 }
0x1f86   :  { %v11075_v22 = vmul.f32 %v18885_v2, %v11004_v63  ;;  %v10684_v52 = vpop.xlane.xlu1 %10683  ;;  %v10261_v44 = vpop.xlane.xlu0 %10260 }
0x1f87   :  { %v19008_v7 = vadd.f32 %v10684_v52, %v10258_v6  ;;  %v11006_v56 = vpop.f32.mrb[229].mxu0 }
0x1f88   :  { %v11155_v46 = vsel %vm1374_vm1, %v11075_v22, 0.0 }
0x1f89   :  { %11156 = vadd.xlane.f32.xlu0 %v11155_v46  ;;  %v11009_v50 = vpop.f32.mrb[230].mxu0 }
0x1f8a   :  { %v11076_v29 = vmul.f32 %v18885_v2, %v11009_v50  ;;  %v10687_v5 = vpop.xlane.xlu0 %10686  ;;  %v10264_v9 = vpop.xlane.xlu1 %10263 }
0x1f8b   :  { %v19012_v13 = vadd.f32 %v10687_v5, %v10261_v44  ;;  %v11011_v3 = vpop.f32.mrb[231].mxu0 }
0x1f8c   :  { %v11158_v16 = vsel %vm1374_vm1, %v11076_v29, 0.0 }
0x1f8d   :  { %11159 = vadd.xlane.f32.xlu1 %v11158_v16  ;;  %v11014_v53 = vpop.f32.mrb[232].mxu0 }
0x1f8e   :  { %v11077_v32 = vmul.f32 %v18885_v2, %v11014_v53  ;;  %v10690_v61 = vpop.xlane.xlu1 %10689  ;;  %v10267_v25 = vpop.xlane.xlu0 %10266 }
0x1f8f   :  { %v19016_v21 = vadd.f32 %v10690_v61, %v10264_v9  ;;  %v11016_v18 = vpop.f32.mrb[233].mxu0 }
0x1f90   :  { %v11161_v35 = vsel %vm1374_vm1, %v11077_v32, 0.0 }
0x1f91   :  { %11162 = vadd.xlane.f32.xlu0 %v11161_v35  ;;  %v11019_v17 = vpop.f32.mrb[234].mxu0 }
0x1f92   :  { %v11078_v31 = vmul.f32 %v18885_v2, %v11019_v17  ;;  %v10693_v38 = vpop.xlane.xlu0 %10692  ;;  %v10270_v6 = vpop.xlane.xlu1 %10269 }
0x1f93   :  { %v19020_v12 = vadd.f32 %v10693_v38, %v10267_v25  ;;  %v11021_v8 = vpop.f32.mrb[235].mxu0 }
0x1f94   :  { %v11164_v63 = vsel %vm1374_vm1, %v11078_v31, 0.0 }
0x1f95   :  { %11165 = vadd.xlane.f32.xlu1 %v11164_v63  ;;  %v11024_v22 = vpop.f32.mrb[236].mxu0 }
0x1f96   :  { %v11079_v52 = vmul.f32 %v18885_v2, %v11024_v22  ;;  %v10696_v44 = vpop.xlane.xlu1 %10695  ;;  %v10273_v56 = vpop.xlane.xlu0 %10272 }
0x1f97   :  { %v19024_v46 = vadd.f32 %v10696_v44, %v10270_v6  ;;  %v11026_v50 = vpop.f32.mrb[237].mxu0 }
0x1f98   :  { %v11167_v29 = vsel %vm1374_vm1, %v11079_v52, 0.0 }
0x1f99   :  { %11168 = vadd.xlane.f32.xlu0 %v11167_v29  ;;  %v11029_v5 = vpop.f32.mrb[238].mxu0 }
0x1f9a   :  { %v11080_v9 = vmul.f32 %v18885_v2, %v11029_v5  ;;  %v10699_v3 = vpop.xlane.xlu0 %10698  ;;  %v10276_v16 = vpop.xlane.xlu1 %10275 }
0x1f9b   :  { %v19028_v53 = vadd.f32 %v10699_v3, %v10273_v56  ;;  %v11031_v32 = vpop.f32.mrb[239].mxu0 }
0x1f9c   :  { %v11170_v61 = vsel %vm1374_vm1, %v11080_v9, 0.0 }
0x1f9d   :  { %11171 = vadd.xlane.f32.xlu1 %v11170_v61  ;;  %v11034_v25 = vpop.f32.mrb[240].mxu0 }
0x1f9e   :  { %v11081_v18 = vmul.f32 %v18885_v2, %v11034_v25  ;;  %v10702_v35 = vpop.xlane.xlu1 %10701  ;;  %v10279_v17 = vpop.xlane.xlu0 %10278 }
0x1f9f   :  { %v19032_v31 = vadd.f32 %v10702_v35, %v10276_v16  ;;  %v11036_v38 = vpop.f32.mrb[241].mxu0 }
0x1fa0   :  { %v11173_v6 = vsel %vm1374_vm1, %v11081_v18, 0.0  ;;  %v10721_v38 = vadd.f32 %v18902_v34, %v18898_v42 }
0x1fa1   :  { %11174 = vadd.xlane.f32.xlu0 %v11173_v6  ;;  %v11039_v8 = vpop.f32.mrb[242].mxu0 }
0x1fa2   :  { %v11082_v63 = vmul.f32 %v18885_v2, %v11039_v8  ;;  %v10705_v22 = vpop.xlane.xlu0 %10704  ;;  %v10282_v52 = vpop.xlane.xlu1 %10281  ;;  %v19049_v8 = vld [vmem:[#allocation2] ss:$0 sm:$0xff] }
0x1fa3   :  { %v19036_v44 = vadd.f32 %v10705_v22, %v10279_v17  ;;  %v11041_v56 = vpop.f32.mrb[243].mxu0 }
0x1fa4   :  { %v11176_v50 = vsel %vm1374_vm1, %v11082_v63, 0.0  ;;  %v10722_v56 = vadd.f32 %v18908_v26, %v18904_v47  ;;  %v10725_v26 = vadd.f32 %v18926_v60, %v18922_v19  ;;  %v10728_v60 = vadd.f32 %v18944_v11, %v18940_v40 }
0x1fa5   :  { %11177 = vadd.xlane.f32.xlu1 %v11176_v50  ;;  %v10731_v11 = vadd.f32 %v18962_v33, %v18958_v62  ;;  %v10734_v33 = vadd.f32 %v18980_v55, %v18976_v10 }
0x1fa6   :  { %v10708_v29 = vpop.xlane.xlu1 %10707  ;;  %v10285_v5 = vpop.xlane.xlu0 %10284 }
0x1fa7   :  { %v19039_v9 = vadd.f32 %v10708_v29, %v10282_v52 }
0x1faa   :  { %v10711_v3 = vpop.xlane.xlu0 %10710  ;;  %v10288_v16 = vpop.xlane.xlu1 %10287 }
0x1fab   :  { %v19041_v32 = vadd.f32 %v10711_v3, %v10285_v5  ;;  %v10723_v3 = vadd.f32 %v18914_v28, %v18910_v23  ;;  %v10726_v28 = vadd.f32 %v18932_v27, %v18928_v4  ;;  %v10729_v27 = vadd.f32 %v18950_v1, %v18946_v36 }
0x1fac   :  { %v10732_v1 = vadd.f32 %v18968_v45, %v18964_v37  ;;  %v10735_v45 = vadd.f32 %v18986_v58, %v18982_v43 }
0x1fae   :  { %v10714_v61 = vpop.xlane.xlu1 %10713  ;;  %v10291_v25 = vpop.xlane.xlu0 %10290 }
0x1faf   :  { %v19043_v18 = vadd.f32 %v10714_v61, %v10288_v16  ;;  %v10724_v61 = vadd.f32 %v18920_v54, %v18916_v49  ;;  %v10727_v54 = vadd.f32 %v18938_v15, %v18934_v14  ;;  %v10730_v15 = vadd.f32 %v18956_v39, %v18952_v57 }
0x1fb0   :  { %v10733_v39 = vadd.f32 %v18974_v30, %v18970_v0 }
0x1fb2   :  { %v10717_v2 = vpop.xlane.xlu0 %10716  ;;  %v10294_v35 = vpop.xlane.xlu1 %10293 }
0x1fb3   :  { %v19045_v17 = vadd.f32 %v10717_v2, %v10291_v25 }
0x1fb6   :  { %v10720_v6 = vpop.xlane.xlu1 %10719  ;;  %v11085_v63 = vpop.xlane.xlu0 %11084 }
0x1fb7   :  { %v19051_v22 = vadd.f32 %v10720_v6, %v10294_v35  ;;  %v11179_v52 = vadd.f32 %v11085_v63, %v10721_v38 }
0x1fb9   :  { %v11218_v50 = vadd.f32 %v19049_v8, %v11179_v52 }
0x1fba   :  { %v11088_v29 = vpop.xlane.xlu1 %11087 }
0x1fbb   :  { %v11180_v5 = vadd.f32 %v11088_v29, %v10722_v56  ;;  %11285 = vperm.xlu1 %15823, %v11218_v50  }
0x1fbd   :  { %v11219_v42 = vadd.f32 %v19049_v8, %v11180_v5 }
0x1fbe   :  { %v11091_v34 = vpop.xlane.xlu0 %11090 }
0x1fbf   :  { %v11181_v16 = vadd.f32 %v11091_v34, %v10723_v3  ;;  %11290 = vperm.xlu0 %15822, %v11219_v42  }
0x1fc1   :  { %v11220_v25 = vadd.f32 %v19049_v8, %v11181_v16 }
0x1fc2   :  { %v11094_v2 = vpop.xlane.xlu1 %11093 }
0x1fc3   :  { %v11182_v47 = vadd.f32 %v11094_v2, %v10724_v61  ;;  %11295 = vperm.xlu1 %15823, %v11220_v25  }
0x1fc5   :  { %v11221_v35 = vadd.f32 %v19049_v8, %v11182_v47 }
0x1fc6   :  { %v11097_v38 = vpop.xlane.xlu0 %11096 }
0x1fc7   :  { %v11183_v23 = vadd.f32 %v11097_v38, %v10725_v26  ;;  %11300 = vperm.xlu0 %15822, %v11221_v35  }
0x1fc9   :  { %v11222_v6 = vadd.f32 %v19049_v8, %v11183_v23 }
0x1fca   :  { %v11100_v63 = vpop.xlane.xlu1 %11099 }
0x1fcb   :  { %v11184_v49 = vadd.f32 %v11100_v63, %v10726_v28  ;;  %11305 = vperm.xlu1 %15823, %v11222_v6  }
0x1fcd   :  { %v11223_v52 = vadd.f32 %v19049_v8, %v11184_v49 }
0x1fce   :  { %v11103_v56 = vpop.xlane.xlu0 %11102 }
0x1fcf   :  { %v11185_v19 = vadd.f32 %v11103_v56, %v10727_v54  ;;  %11310 = vperm.xlu0 %15822, %v11223_v52  }
0x1fd1   :  { %v11224_v50 = vadd.f32 %v19049_v8, %v11185_v19 }
0x1fd2   :  { %v11106_v29 = vpop.xlane.xlu1 %11105 }
0x1fd3   :  { %v11186_v4 = vadd.f32 %v11106_v29, %v10728_v60  ;;  %11315 = vperm.xlu1 %15823, %v11224_v50  }
0x1fd5   :  { %v11225_v5 = vadd.f32 %v19049_v8, %v11186_v4 }
0x1fd6   :  { %v11109_v3 = vpop.xlane.xlu0 %11108 }
0x1fd7   :  { %v11187_v14 = vadd.f32 %v11109_v3, %v10729_v27  ;;  %11320 = vperm.xlu0 %15822, %v11225_v5  }
0x1fd9   :  { %v11226_v42 = vadd.f32 %v19049_v8, %v11187_v14 }
0x1fda   :  { %v11112_v34 = vpop.xlane.xlu1 %11111 }
0x1fdb   :  { %v11188_v40 = vadd.f32 %v11112_v34, %v10730_v15  ;;  %11325 = vperm.xlu1 %15823, %v11226_v42  }
0x1fdd   :  { %v11227_v16 = vadd.f32 %v19049_v8, %v11188_v40 }
0x1fde   :  { %v11115_v61 = vpop.xlane.xlu0 %11114 }
0x1fdf   :  { %v11189_v36 = vadd.f32 %v11115_v61, %v10731_v11  ;;  %11330 = vperm.xlu0 %15822, %v11227_v16  }
0x1fe1   :  { %v11228_v25 = vadd.f32 %v19049_v8, %v11189_v36 }
0x1fe2   :  { %v11118_v2 = vpop.xlane.xlu1 %11117 }
0x1fe3   :  { %v11190_v57 = vadd.f32 %v11118_v2, %v10732_v1  ;;  %11335 = vperm.xlu1 %15823, %v11228_v25  }
0x1fe5   :  { %v11229_v47 = vadd.f32 %v19049_v8, %v11190_v57 }
0x1fe6   :  { %v11121_v26 = vpop.xlane.xlu0 %11120 }
0x1fe7   :  { %v11191_v62 = vadd.f32 %v11121_v26, %v10733_v39  ;;  %11340 = vperm.xlu0 %15822, %v11229_v47  }
0x1fe9   :  { %v11230_v35 = vadd.f32 %v19049_v8, %v11191_v62 }
0x1fea   :  { %v11124_v38 = vpop.xlane.xlu1 %11123 }
0x1feb   :  { %v11192_v37 = vadd.f32 %v11124_v38, %v10734_v33  ;;  %11345 = vperm.xlu1 %15823, %v11230_v35   ;;  %v19140_v38 = vld [vmem:[%s19259_s29] sm:$0xff] }
0x1fed   :  { %v11231_v23 = vadd.f32 %v19049_v8, %v11192_v37 }
0x1fee   :  { %v11127_v28 = vpop.xlane.xlu0 %11126 }
0x1fef   :  { %v19095_v0 = vadd.f32 %v11127_v28, %v10735_v45  ;;  %11350 = vperm.xlu0 %15822, %v11231_v23  }
0x1ff2   :  { %v19097_v30 = vpop.xlane.xlu1 %11129 }
0x1ff6   :  { %v11133_v6 = vpop.xlane.xlu0 %11132 }
0x1ff7   :  { %v11195_v63 = vadd.f32 %v11133_v6, %v18996_v20 }
0x1ff9   :  { %v11234_v10 = vadd.f32 %v19049_v8, %v11195_v63 }
0x1ffa   :  { %v11136_v55 = vpop.xlane.xlu1 %11135 }
0x1ffb   :  { %v11196_v49 = vadd.f32 %v11136_v55, %v19000_v24  ;;  %11365 = vperm.xlu0 %15822, %v11234_v10  }
0x1ffd   :  { %v11235_v54 = vadd.f32 %v19049_v8, %v11196_v49  ;;  %v11252_v49 = vld [vmem:[%s16607_s19 + $0x8] sm:$0xff] }
0x1ffe   :  { %v11139_v43 = vpop.xlane.xlu0 %11138 }
0x1fff   :  { %v11197_v58 = vadd.f32 %v11139_v43, %v19004_v51  ;;  %11370 = vperm.xlu1 %15823, %v11235_v54   ;;  %v11267_v54 = vld [vmem:[%s16607_s19 + $0x80] sm:$0xff] }
0x2001   :  { %v11236_v52 = vadd.f32 %v19049_v8, %v11197_v58  ;;  %v11268_v58 = vld [vmem:[%s16607_s19 + $0x88] sm:$0xff] }
0x2002   :  { %v11142_v56 = vpop.xlane.xlu1 %11141 }
0x2003   :  { %v11198_v19 = vadd.f32 %v11142_v56, %v19008_v7  ;;  %11375 = vperm.xlu1 %15823, %v11236_v52   ;;  %v11251_v52 = vld [vmem:[%s16607_s19] sm:$0xff] }
0x2005   :  { %v11237_v20 = vadd.f32 %v19049_v8, %v11198_v19 }
0x2006   :  { %v11145_v60 = vpop.xlane.xlu0 %11144 }
0x2007   :  { %v11199_v50 = vadd.f32 %v11145_v60, %v19012_v13  ;;  %11380 = vperm.xlu0 %15822, %v11237_v20  }
0x2009   :  { %v11238_v24 = vadd.f32 %v19049_v8, %v11199_v50 }
0x200a   :  { %v11148_v29 = vpop.xlane.xlu1 %11147 }
0x200b   :  { %v11200_v4 = vadd.f32 %v11148_v29, %v19016_v21  ;;  %11385 = vperm.xlu1 %15823, %v11238_v24  }
0x200d   :  { %v11239_v51 = vadd.f32 %v19049_v8, %v11200_v4  ;;  %v11254_v4 = vld [vmem:[%s16607_s19 + $0x18] sm:$0xff] }
0x200e   :  { %v11151_v27 = vpop.xlane.xlu0 %11150 }
0x200f   :  { %v11201_v5 = vadd.f32 %v11151_v27, %v19020_v12  ;;  %11390 = vperm.xlu0 %15822, %v11239_v51   ;;  %v11269_v51 = vld [vmem:[%s16607_s19 + $0x90] sm:$0xff] }
0x2011   :  { %v11240_v7 = vadd.f32 %v19049_v8, %v11201_v5  ;;  %v11270_v5 = vld [vmem:[%s16607_s19 + $0x98] sm:$0xff] }
0x2012   :  { %v11154_v3 = vpop.xlane.xlu1 %11153 }
0x2013   :  { %v11202_v14 = vadd.f32 %v11154_v3, %v19024_v46  ;;  %11395 = vperm.xlu1 %15823, %v11240_v7   ;;  %v11253_v7 = vld [vmem:[%s16607_s19 + $0x10] sm:$0xff] }
0x2015   :  { %v11241_v13 = vadd.f32 %v19049_v8, %v11202_v14 }
0x2016   :  { %v11157_v15 = vpop.xlane.xlu0 %11156 }
0x2017   :  { %v11203_v42 = vadd.f32 %v11157_v15, %v19028_v53  ;;  %11400 = vperm.xlu0 %15822, %v11241_v13  }
0x2019   :  { %v11242_v21 = vadd.f32 %v19049_v8, %v11203_v42 }
0x201a   :  { %v11160_v34 = vpop.xlane.xlu1 %11159 }
0x201b   :  { %v11204_v40 = vadd.f32 %v11160_v34, %v19032_v31  ;;  %11405 = vperm.xlu1 %15823, %v11242_v21  }
0x201d   :  { %v11243_v12 = vadd.f32 %v19049_v8, %v11204_v40  ;;  %v11256_v40 = vld [vmem:[%s16607_s19 + $0x28] sm:$0xff] }
0x201e   :  { %v11163_v11 = vpop.xlane.xlu0 %11162 }
0x201f   :  { %v11205_v16 = vadd.f32 %v11163_v11, %v19036_v44  ;;  %11410 = vperm.xlu0 %15822, %v11243_v12   ;;  %v11271_v12 = vld [vmem:[%s16607_s19 + $0xa0] sm:$0xff] }
0x2021   :  { %v11244_v46 = vadd.f32 %v19049_v8, %v11205_v16  ;;  %v11272_v16 = vld [vmem:[%s16607_s19 + $0xa8] sm:$0xff] }
0x2022   :  { %v11166_v61 = vpop.xlane.xlu1 %11165 }
0x2023   :  { %v11206_v36 = vadd.f32 %v11166_v61, %v19039_v9  ;;  %11415 = vperm.xlu1 %15823, %v11244_v46   ;;  %v11255_v46 = vld [vmem:[%s16607_s19 + $0x20] sm:$0xff] }
0x2025   :  { %v11245_v53 = vadd.f32 %v19049_v8, %v11206_v36 }
0x2026   :  { %v11169_v1 = vpop.xlane.xlu0 %11168 }
0x2027   :  { %v11207_v25 = vadd.f32 %v11169_v1, %v19041_v32  ;;  %11420 = vperm.xlu0 %15822, %v11245_v53   ;;  %v10736_v32 = vadd.f32 %v18992_v48, %v18988_v41  ;;  %v11476_v41 = vcombine.high %v19140_v38, %v19140_v38 }
0x2029   :  { %v11246_v31 = vadd.f32 %v19049_v8, %v11207_v25  ;;  %v11194_v33 = vadd.f32 %v19097_v30, %v10736_v32  ;;  %11542 = vmatprep.mubr.f32.mxu1 %v11476_v41  ;;  %v11260_v41 = vld [vmem:[%s16607_s19 + $0x48] sm:$0xff] }
0x202a   :  { %v11172_v2 = vpop.xlane.xlu1 %11171 }
0x202b   :  { %v11208_v57 = vadd.f32 %v11172_v2, %v19043_v18  ;;  %11425 = vperm.xlu1 %15823, %v11246_v31   ;;  %v11232_v18 = vadd.f32 %v19049_v8, %v19095_v0 }
0x202d   :  { %v11247_v44 = vadd.f32 %v19049_v8, %v11208_v57  ;;  %v11258_v57 = vld [vmem:[%s16607_s19 + $0x38] sm:$0xff] }
0x202e   :  { %v11175_v39 = vpop.xlane.xlu0 %11174 }
0x202f   :  { %v11209_v47 = vadd.f32 %v11175_v39, %v19045_v17  ;;  %11430 = vperm.xlu0 %15822, %v11247_v44   ;;  %v11233_v17 = vadd.f32 %v19049_v8, %v11194_v33  ;;  %v11273_v44 = vld [vmem:[%s16607_s19 + $0xb0] sm:$0xff] }
0x2031   :  { %v11248_v9 = vadd.f32 %v19049_v8, %v11209_v47  ;;  %v11274_v47 = vld [vmem:[%s16607_s19 + $0xb8] sm:$0xff] }
0x2032   :  { %v11178_v26 = vpop.xlane.xlu1 %11177 }
0x2033   :  { %v11210_v62 = vadd.f32 %v11178_v26, %v19051_v22  ;;  %11435 = vperm.xlu1 %15823, %v11248_v9   ;;  %v11257_v9 = vld [vmem:[%s16607_s19 + $0x30] sm:$0xff] }
0x2035   :  { %v11249_v35 = vadd.f32 %v19049_v8, %v11210_v62 }
0x2037   :  { %11355 = vperm.xlu1 %15823, %v11232_v18   ;;  %11440 = vperm.xlu0 %15822, %v11249_v35  }
0x203a   :  { %v11286_v22 = vpop.permute.xlu1 %11285 }
0x203b   :  { %4546 = vrot.lane.b32.xlu1 %v17648_v59, %s16417_s10  ;;  %11360 = vperm.xlu0 %15822, %v11233_v17   ;;  %v11443_v50 = vmul.f32 %v11286_v22, %v11251_v52  ;;  %v11277_v52 = vld [vmem:[%s16607_s19 + $0xd0] sm:$0xff] }
0x203e   :  { %v11291_v48 = vpop.permute.xlu0 %11290 }
0x203f   :  { %v11444_v56 = vmul.f32 %v11291_v48, %v11252_v49  ;;  %v11275_v48 = vld [vmem:[%s16607_s19 + $0xc0] sm:$0xff] }
0x2041   :  { %v15479_v29 = vpack.c.bf16 %v11444_v56, %v11443_v50 }
0x2042   :  { %v11296_v45 = vpop.permute.xlu1 %11295 }
0x2043   :  { %v11445_v42 = vmul.f32 %v11296_v45, %v11253_v7  ;;  %v11259_v45 = vld [vmem:[%s16607_s19 + $0x40] sm:$0xff]  ;;  %v11280_v7 = vld [vmem:[%s16607_s19 + $0xe8] sm:$0xff] }
0x2046   :  { %v11301_v37 = vpop.permute.xlu0 %11300 }
0x2047   :  { %v11446_v3 = vmul.f32 %v11301_v37, %v11254_v4  ;;  %v11276_v37 = vld [vmem:[%s16607_s19 + $0xc8] sm:$0xff] }
0x2049   :  { %v15483_v34 = vpack.c.bf16 %v11446_v3, %v11445_v42  ;;  %v11263_v3 = vld [vmem:[%s16607_s19 + $0x60] sm:$0xff] }
0x204a   :  { %v11306_v8 = vpop.permute.xlu1 %11305 }
0x204b   :  { %v11447_v25 = vmul.f32 %v11306_v8, %v11255_v46 }
0x204e   :  { %v11311_v23 = vpop.permute.xlu0 %11310 }
0x204f   :  { %v11448_v61 = vmul.f32 %v11311_v23, %v11256_v40  ;;  %v11281_v40 = vld [vmem:[%s16607_s19 + $0xf0] sm:$0xff] }
0x2051   :  { %v15487_v2 = vpack.c.bf16 %v11448_v61, %v11447_v25 }
0x2052   :  { %v11316_v0 = vpop.permute.xlu1 %11315 }
0x2053   :  { %v11449_v33 = vmul.f32 %v11316_v0, %v11257_v9 }
0x2056   :  { %v11321_v28 = vpop.permute.xlu0 %11320 }
0x2057   :  { %v11450_v26 = vmul.f32 %v11321_v28, %v11258_v57 }
0x2059   :  { %v15491_v17 = vpack.c.bf16 %v11450_v26, %v11449_v33 }
0x205a   :  { %v19146_v30 = vpop.permute.xlu1 %11325 }
0x205b   :  { %v11451_v0 = vmul.f32 %v19146_v30, %v11259_v45 }
0x205e   :  { %v19144_v59 = vpop.permute.xlu0 %11330 }
0x205f   :  { %v11452_v23 = vmul.f32 %v19144_v59, %v11260_v41 }
0x2062   :  { %v19150_v63 = vpop.permute.xlu1 %11335 }
0x2066   :  { %v19148_v6 = vpop.permute.xlu0 %11340 }
0x206a   :  { %v19154_v55 = vpop.permute.xlu1 %11345 }
0x206e   :  { %v19152_v10 = vpop.permute.xlu0 %11350 }
0x207a   :  { %v11366_v43 = vpop.permute.xlu0 %11365 }
0x207b   :  { %v11459_v20 = vmul.f32 %v11366_v43, %v11267_v54  ;;  %v15495_v43 = vpack.c.bf16 %v11452_v23, %v11451_v0 }
0x207e   :  { %v11371_v19 = vpop.permute.xlu1 %11370 }
0x207f   :  { %v11460_v60 = vmul.f32 %v11371_v19, %v11268_v58  ;;  %v11262_v58 = vld [vmem:[%s16607_s19 + $0x58] sm:$0xff] }
0x2080   :  { %v11278_v19 = vld [vmem:[%s16607_s19 + $0xd8] sm:$0xff]  ;;  %v11454_v59 = vmul.f32 %v19148_v6, %v11262_v58 }
0x2081   :  { %v15477_v24 = vpack.c.bf16 %v11460_v60, %v11459_v20  ;;  %v11261_v20 = vld [vmem:[%s16607_s19 + $0x50] sm:$0xff] }
0x2082   :  { %v11376_v27 = vpop.permute.xlu1 %11375  ;;  %v11453_v30 = vmul.f32 %v19150_v63, %v11261_v20  ;;  %v11455_v63 = vmul.f32 %v19154_v55, %v11263_v3 }
0x2083   :  { %15478 = vmatprep.subr.bf16.mxu1 %v15477_v24  ;;  %v11461_v13 = vmul.f32 %v11376_v27, %v11269_v51  ;;  %v11264_v51 = vld [vmem:[%s16607_s19 + $0x68] sm:$0xff]  ;;  %v11279_v27 = vld [vmem:[%s16607_s19 + $0xe0] sm:$0xff] }
0x2084   :  { %15480 = vmatpush3.bf16.msra.mxu1 %v15479_v29  ;;  %v15499_v4 = vpack.c.bf16 %v11454_v59, %v11453_v30 }
0x2086   :  { %v11381_v14 = vpop.permute.xlu0 %11380 }
0x2087   :  { %v11462_v15 = vmul.f32 %v11381_v14, %v11270_v5  ;;  %v11456_v14 = vmul.f32 %v19152_v10, %v11264_v51  ;;  %v11266_v10 = vld [vmem:[%s16607_s19 + $0x78] sm:$0xff] }
0x2089   :  { %v15481_v21 = vpack.c.bf16 %v11462_v15, %v11461_v13 }
0x208a   :  { %v11386_v11 = vpop.permute.xlu1 %11385 }
0x208b   :  { %15482 = vmatprep.subr.bf16.mxu1 %v15481_v21  ;;  %v11463_v53 = vmul.f32 %v11386_v11, %v11271_v12  ;;  %v15503_v21 = vpack.c.bf16 %v11456_v14, %v11455_v63  ;;  %v11282_v12 = vld [vmem:[%s16607_s19 + $0xf8] sm:$0xff] }
0x208c   :  { %15484 = vmatpush3.bf16.msra.mxu1 %v15483_v34 }
0x208e   :  { %v11391_v36 = vpop.permute.xlu0 %11390 }
0x208f   :  { %v11464_v1 = vmul.f32 %v11391_v36, %v11272_v16  ;;  %v11265_v36 = vld [vmem:[%s16607_s19 + $0x70] sm:$0xff] }
0x2091   :  { %v15485_v31 = vpack.c.bf16 %v11464_v1, %v11463_v53 }
0x2092   :  { %v11396_v39 = vpop.permute.xlu1 %11395 }
0x2093   :  { %15486 = vmatprep.subr.bf16.mxu1 %v15485_v31  ;;  %v11465_v62 = vmul.f32 %v11396_v39, %v11273_v44 }
0x2094   :  { %15488 = vmatpush3.bf16.msra.mxu1 %v15487_v2 }
0x2096   :  { %v11401_v32 = vpop.permute.xlu0 %11400 }
0x2097   :  { %v11466_v18 = vmul.f32 %v11401_v32, %v11274_v47 }
0x2099   :  { %v15489_v35 = vpack.c.bf16 %v11466_v18, %v11465_v62 }
0x209a   :  { %v11406_v22 = vpop.permute.xlu1 %11405 }
0x209b   :  { %15490 = vmatprep.subr.bf16.mxu1 %v15489_v35  ;;  %v11467_v28 = vmul.f32 %v11406_v22, %v11275_v48 }
0x209c   :  { %15492 = vmatpush3.bf16.msra.mxu1 %v15491_v17 }
0x209e   :  { %v11411_v8 = vpop.permute.xlu0 %11410 }
0x209f   :  { %v11468_v49 = vmul.f32 %v11411_v8, %v11276_v37 }
0x20a1   :  { %v15493_v54 = vpack.c.bf16 %v11468_v49, %v11467_v28 }
0x20a2   :  { %v11416_v56 = vpop.permute.xlu1 %11415 }
0x20a3   :  { %15494 = vmatprep.subr.bf16.mxu1 %v15493_v54  ;;  %v11469_v50 = vmul.f32 %v11416_v56, %v11277_v52 }
0x20a4   :  { %15496 = vmatpush3.bf16.msra.mxu1 %v15495_v43 }
0x20a6   :  { %v11421_v60 = vpop.permute.xlu0 %11420 }
0x20a7   :  { %v11470_v24 = vmul.f32 %v11421_v60, %v11278_v19 }
0x20a9   :  { %v15497_v29 = vpack.c.bf16 %v11470_v24, %v11469_v50 }
0x20aa   :  { %v11426_v5 = vpop.permute.xlu1 %11425 }
0x20ab   :  { %15498 = vmatprep.subr.bf16.mxu1 %v15497_v29  ;;  %v11471_v13 = vmul.f32 %v11426_v5, %v11279_v27 }
0x20ac   :  { %15500 = vmatpush3.bf16.msra.mxu1 %v15499_v4 }
0x20ae   :  { %v11431_v6 = vpop.permute.xlu0 %11430 }
0x20af   :  { %v11472_v15 = vmul.f32 %v11431_v6, %v11280_v7 }
0x20b1   :  { %v15501_v42 = vpack.c.bf16 %v11472_v15, %v11471_v13 }
0x20b2   :  { %v11436_v34 = vpop.permute.xlu1 %11435 }
0x20b3   :  { %15502 = vmatprep.subr.bf16.mxu1 %v15501_v42  ;;  %v11473_v46 = vmul.f32 %v11436_v34, %v11281_v40 }
0x20b4   :  { %15504 = vmatpush3.bf16.msra.mxu1 %v15503_v21 }
0x20b6   :  { %v11441_v11 = vpop.permute.xlu0 %11440  ;;  %v11356_v16 = vpop.permute.xlu1 %11355 }
0x20b7   :  { %v11474_v61 = vmul.f32 %v11441_v11, %v11282_v12  ;;  %v11457_v31 = vmul.f32 %v11356_v16, %v11265_v36 }
0x20b9   :  { %v15505_v53 = vpack.c.bf16 %v11474_v61, %v11473_v46 }
0x20ba   :  { %v11361_v1 = vpop.permute.xlu0 %11360  ;;  %v4547_v25 = vpop.permute.xlu1 %4546 }
0x20bb   :  { %v11458_v2 = vmul.f32 %v11361_v1, %v11266_v10  ;;  %4549 = vst.msk [vmem:[#allocation36] sm:$0xf] %vm4543_vm8, %v4547_v25  ;;  %15506 = vmatprep.subr.bf16.mxu1 %v15505_v53 }
0x20bd   :  { %v15507_v55 = vpack.c.bf16 %v11458_v2, %v11457_v31 }
0x20bf   :  { %15508 = vmatpush3.bf16.msra.mxu1 %v15507_v55 }
0x20c2   :  { %11543 = vmatmul.mubr.f32.vlgmr.msra.gmra.mrb[204].mxu1 %v19140_v38 }
0x20c3   :  { %16268 = shalt.err (!%p16265_p2)
}
0x20c4   :  { %s16269_s19 = scalar_lea.hbm %s16617_s16, 64 }
0x20c5   :  { %p16270_p3 = scmp.ne.s32.totalorder %s16617_s16, %s16269_s19  ;;  %p16273_p4 = scmp.lt.u32.totalorder %s16269_s19, %s16617_s16 }
0x20c7   :  { %p16275_p5 = pnand %p16273_p4, %p16270_p3 }
0x20c9   :  { %16278 = shalt.err (!%p16275_p5)
}
0x20ca   :  { %11569 = dma.vmem_to_hbm [thread:$0]  %s11567_s17, 64, %s16617_s16, [#allocation35]  }
0x20cb   :  { %s16419_s24 = smov [#allocation36]  }
0x20cc   :  { %s11576_s20 = sshll.u32 %s16419_s24, 4  ;;  %s11577_s20 = int_to_ptr.vmem [resolvable:$true] %s11576_s20 }
0x20cd   :  { %s16279_s15 = scalar_lea.vmem %s11577_s20, 64  ;;  %p16284_p7 = scmp.lt.s32.totalorder %s11577_s20, %s11577_s20 }
0x20ce   :  { %p16280_p6 = scmp.ne.s32.totalorder %s11577_s20, %s16279_s15  ;;  %p16285_p8 = scmp.lt.s32.totalorder %s16279_s15, %s16279_s15 }
0x20d0   :  { %p16286_p9 = por %p16285_p8, %p16284_p7 }
0x20d2   :  { %p16287_p10 = pnand %p16286_p9, %p16280_p6 }
0x20d4   :  { %16290 = shalt.err (!%p16287_p10)
}
0x20d5   :  { %s16291_s5 = scalar_lea.hbm %s16622_s22, 64 }
0x20d6   :  { %p16292_p11 = scmp.ne.s32.totalorder %s16622_s22, %s16291_s5  ;;  %p16295_p12 = scmp.lt.u32.totalorder %s16291_s5, %s16622_s22 }
0x20d8   :  { %p16297_p13 = pnand %p16295_p12, %p16292_p11 }
0x20da   :  { %16300 = shalt.err (!%p16297_p13)
}
0x20db   :  { %11579 = dma.vmem_to_hbm [thread:$0]  %s11577_s20, 64, %s16622_s22, [#allocation35]   ;;  %vm11548_vm1 = vcmask 486400  }
0x20dc   :  { %s16420_s16 = smov [#allocation33]  }
0x20dd   :  { %s11556_s18 = sshll.u32 %s16420_s16, 4  ;;  %s11557_s18 = int_to_ptr.vmem [resolvable:$true] %s11556_s18 }
0x20de   :  { %s16301_s23 = scalar_lea.vmem %s11557_s18, 64  ;;  %p16306_p1 = scmp.lt.s32.totalorder %s11557_s18, %s11557_s18 }
0x20df   :  { %p16302_p0 = scmp.ne.s32.totalorder %s11557_s18, %s16301_s23  ;;  %p16307_p2 = scmp.lt.s32.totalorder %s16301_s23, %s16301_s23 }
0x20e1   :  { %p16308_p3 = por %p16307_p2, %p16306_p1 }
0x20e3   :  { %p16309_p4 = pnand %p16308_p3, %p16302_p0 }
0x2195   :  { %v12865_v38 = vpop.f32.mrb[204].mxu1 }
0x2196   :  { %v12866_v57 = vpop.f32.mrb[205].mxu1 }
0x2197   :  { %v12867_v44 = vadd.f32 %v12866_v57, %v12865_v38 }
0x2199   :  { %11549 = vst.msk [vmem:[#allocation33] sm:$0xf] %vm11548_vm1, %v12867_v44 }
0x219a   :  { %16312 = shalt.err (!%p16309_p4)
}
0x219b   :  { %s16313_s12 = scalar_lea.hbm %s16612_s14, 64 }
0x219c   :  { %p16314_p5 = scmp.ne.s32.totalorder %s16612_s14, %s16313_s12  ;;  %p16317_p6 = scmp.lt.u32.totalorder %s16313_s12, %s16612_s14 }
0x219e   :  { %p16319_p7 = pnand %p16317_p6, %p16314_p5 }
0x21a0   :  { %16322 = shalt.err (!%p16319_p7)
}
0x21a1   :  { %11559 = dma.vmem_to_hbm [thread:$0]  %s11557_s18, 64, %s16612_s14, [#allocation5]  }
0x21a2   :  { %16343 = dma.done.wait [#allocation5], 64  }
0x21a3   :  { %16344 = vsyncadd [#allocation5], 4294967232 }
0x21a4   :  { %16345 = dma.done.wait [#allocation35], 128  }
0x21a5   :  { %16346 = vsyncadd [#allocation35], 4294967168 }
0x21a6   :  { %11589 = vsyncpa [#allocation4], 1 }
0x21a7   :  { %11590 = vsyncpa [#allocation7], 1 }
0x21a8   :  { %11591 = vsyncpa [#allocation10], 1 }
0x21a9   :  { %11592 = vsyncpa [#allocation13], 1 }
0x21aa   :  { %11593 = vsyncpa [#allocation16], 1 }
0x21ab   :  { %11594 = vsyncpa [#allocation19], 1 }
0x21ac   :  { %11595 = vsyncpa [#allocation22], 1 }
0x21ad   :  { %11596 = vsyncpa [#allocation25], 1 }
0x21ae   :  { %11597 = vsyncpa [#allocation28], 1 }
0x21af   :  { %11598 = vsyncpa [#allocation31], 1 }
0x21b0   :  { %11599 = vsyncpa [#allocation5], 1 }
0x21b1   :  { %11600 = vsyncpa [#allocation35], 1 }

</bundles_post_ra>
